<compile_context>
chip_gen: v6e
topology: v6e:2x2x1
jax: 0.10.0
libtpu: 0.0.40
codegen_flags: <defaults>
</compile_context>

<pallas_src>
import math

import jax
import jax.numpy as jnp
from jax.experimental import pallas as pl
from jax.experimental.pallas import tpu as pltpu

# ----------------------------- config (small, consistent with the module) ------------------
VOCAB = 32
D_MODEL = 64
NHEAD = 4
D_HEAD = D_MODEL // NHEAD
N_ENC = 2
N_DEC = 2
FF = 128
SPK_DIM = 64
MEL_DIM = 16
MAX_SEQ_LEN = 64

BATCH = 2
TEXT_LEN = 8
MEL_LEN = 8

NEG_INF = -1e9
LN_EPS = 1e-5

# Packing assumptions (checked here so the packed-weight layout stays valid if config changes).
assert FF == 2 * D_MODEL          # cross-attn K|V weight [D, 2D] shares the [D, FF] pack
assert SPK_DIM == D_MODEL         # speaker projection shares the [D, D] pack
assert MEL_DIM <= D_MODEL         # prenet-1 weight is row-padded into the [D, D] pack
assert MEL_DIM + 1 <= D_MODEL     # fused mel|stop head is column-padded into the [D, D] pack

# ----------------------------- packed f32 bias / LayerNorm blob layout ---------------------
BW = 256  # blob lane width (>= widest packed vector: 3*D_MODEL = 192)


def _blob_layout():
    rows = {}
    r = 0

    def add(name, width):
        nonlocal r
        rows[name] = (r, width)
        r += 1

    add("spk_b", D_MODEL)
    add("pre_b1", D_MODEL)
    add("pre_b2", D_MODEL)
    add("head_b", MEL_DIM + 1)
    for l in range(N_ENC):
        add(f"enc{l}_bqkv", 3 * D_MODEL)
        add(f"enc{l}_bo", D_MODEL)
        add(f"enc{l}_b1", FF)
        add(f"enc{l}_b2", D_MODEL)
        add(f"enc{l}_ln1g", D_MODEL); add(f"enc{l}_ln1b", D_MODEL)
        add(f"enc{l}_ln2g", D_MODEL); add(f"enc{l}_ln2b", D_MODEL)
    for l in range(N_DEC):
        add(f"dec{l}_bqkv", 3 * D_MODEL)
        add(f"dec{l}_bos", D_MODEL)
        add(f"dec{l}_bqx", D_MODEL)
        add(f"dec{l}_bkvx", 2 * D_MODEL)
        add(f"dec{l}_box", D_MODEL)
        add(f"dec{l}_b1", FF)
        add(f"dec{l}_b2", D_MODEL)
        add(f"dec{l}_ln1g", D_MODEL); add(f"dec{l}_ln1b", D_MODEL)
        add(f"dec{l}_ln2g", D_MODEL); add(f"dec{l}_ln2b", D_MODEL)
        add(f"dec{l}_ln3g", D_MODEL); add(f"dec{l}_ln3b", D_MODEL)
    return rows, r


BLOB_ROWS, BLOB_NROWS = _blob_layout()

# ----------------------------- stacked bf16 weight-pack indices ----------------------------
# w_dd  : [N_DD, D, D]
DD_SPK, DD_PRE1, DD_PRE2, DD_HEAD = 0, 1, 2, 3
DD_ENC_WO = 4
DD_DEC_WOS = DD_ENC_WO + N_ENC
DD_DEC_WQX = DD_DEC_WOS + N_DEC
DD_DEC_WOX = DD_DEC_WQX + N_DEC
N_DD = DD_DEC_WOX + N_DEC
# w_qkv : [N_ENC + N_DEC, D, 3D]   (encoder layers first)
# w_dff : [N_DFF, D, FF]
DFF_ENC_W1 = 0
DFF_DEC_W1 = N_ENC
DFF_DEC_WKVX = N_ENC + N_DEC
N_DFF = N_ENC + 2 * N_DEC
# w_ffd : [N_ENC + N_DEC, FF, D]   (encoder layers first)


# ----------------------------- in-kernel helpers (traced inline) ---------------------------
def _bf16(x):
    return x.astype(jnp.bfloat16)


def _matmul(x, w, b):
    """bf16 MXU matmul with f32 accumulation; w is already bf16, b is f32 [1, N]."""
    return jnp.dot(_bf16(x), w, preferred_element_type=jnp.float32) + b


def _layernorm(x, g, b):
    mean = jnp.mean(x, axis=-1, keepdims=True)
    var = jnp.mean(jnp.square(x - mean), axis=-1, keepdims=True)
    return (x - mean) * jax.lax.rsqrt(var + LN_EPS) * g + b


def _softmax(s):
    m = jnp.max(s, axis=-1, keepdims=True)
    p = jnp.exp(s - m)
    return p * pl.reciprocal(jnp.sum(p, axis=-1, keepdims=True), approx=True)


def _lane_heads(x3, base):
    """Gather NHEAD lane slices starting at `base` from x3 [B, T, W] into a head-major
    batch [NHEAD*B, T, D_HEAD] (outer-dim concat; batch index = h*B + b)."""
    return jnp.concatenate(
        [x3[:, :, base + h * D_HEAD: base + (h + 1) * D_HEAD] for h in range(NHEAD)],
        axis=0)


def _merge_heads(o3, B, Tq):
    """[NHEAD*B, Tq, D_HEAD] -> [B*Tq, D_MODEL] (heads back into lane order h*D_HEAD..)."""
    return jnp.concatenate(
        [o3[h * B:(h + 1) * B] for h in range(NHEAD)], axis=-1).reshape(B * Tq, D_MODEL)


def _attend(qh, kh, vh, bias, B, Tq, Tk):
    """Head-batched attention. qh/kh/vh: [NHEAD*B, T*, D_HEAD] f32.
    bias broadcastable to [NHEAD, B, Tq, Tk]. Single einsum pair / bias add / softmax."""
    s = jnp.einsum("bqd,bkd->bqk",
                   _bf16(qh * (1.0 / math.sqrt(D_HEAD))), _bf16(kh),
                   preferred_element_type=jnp.float32)
    s = (s.reshape(NHEAD, B, Tq, Tk) + bias).reshape(NHEAD * B, Tq, Tk)
    p = _softmax(s)
    return jnp.einsum("bqk,bkd->bqd", _bf16(p), _bf16(vh),
                      preferred_element_type=jnp.float32)


def _self_attention(x2, wqkv, bqkv, wo, bo, bias, B, T):
    # Fused Q|K|V projection. (The 64/128 lane splits below are mid-vreg; accepted as
    # low-priority per review — heads are 16-lane slices regardless.)
    qkv3 = _matmul(x2, wqkv, bqkv).reshape(B, T, 3 * D_MODEL)
    q = _lane_heads(qkv3, 0)
    k = _lane_heads(qkv3, D_MODEL)
    v = _lane_heads(qkv3, 2 * D_MODEL)
    o = _attend(q, k, v, bias, B, T, T)
    return _matmul(_merge_heads(o, B, T), wo, bo)


# ----------------------------- the fused TTS kernel ----------------------------------------
def _tts_kernel(ids_ref, spk_ref, mel_ref, tab_ref, blob_ref,
                w_qkv_ref, w_dd_ref, w_dff_ref, w_ffd_ref, out_ref):
    B, T = ids_ref.shape
    _, Tm, mel_dim = mel_ref.shape
    D = D_MODEL

    blob = blob_ref[...]

    def bias(name):
        r, w = BLOB_ROWS[name]
        return blob[r:r + 1, :w]            # f32 [1, w]

    ids = ids_ref[...]                      # [B, T] int32

    # ---------- embedding (one-hot matmul: exact f32 row select) + PE + speaker ------------
    onehot = (jax.lax.broadcasted_iota(jnp.int32, (B, T, VOCAB), 2)
              == ids[:, :, None]).astype(jnp.float32)
    emb = tab_ref[0:VOCAB, :]                                   # [VOCAB, D]
    x = jnp.dot(onehot.reshape(B * T, VOCAB), emb,
                preferred_element_type=jnp.float32)             # [B*T, D]
    pe_enc = tab_ref[VOCAB:VOCAB + T, :]                        # [T, D]
    spk = _matmul(spk_ref[...], w_dd_ref[DD_SPK], bias("spk_b"))  # [B, D]
    x2 = (x.reshape(B, T, D) + pe_enc[None, :, :] + spk[:, None, :]).reshape(B * T, D)

    # key-padding additive bias built in-kernel; broadcastable to [NHEAD, B, Tq, T]
    kp = jnp.where(ids == 0, jnp.float32(NEG_INF), jnp.float32(0.0))   # [B, T]
    kp_bias = kp[None, :, None, :]                                     # [1, B, 1, T]

    # ---------- encoder (post-norm, ReLU FFN) ------------------------------------------------
    for l in range(N_ENC):
        a = _self_attention(x2, w_qkv_ref[l], bias(f"enc{l}_bqkv"),
                            w_dd_ref[DD_ENC_WO + l], bias(f"enc{l}_bo"), kp_bias, B, T)
        x2 = _layernorm(x2 + a, bias(f"enc{l}_ln1g"), bias(f"enc{l}_ln1b"))
        f = jnp.maximum(_matmul(x2, w_dff_ref[DFF_ENC_W1 + l], bias(f"enc{l}_b1")), 0.0)
        f = _matmul(f, w_ffd_ref[l], bias(f"enc{l}_b2"))
        x2 = _layernorm(x2 + f, bias(f"enc{l}_ln2g"), bias(f"enc{l}_ln2b"))

    mem2 = x2   # encoder memory never leaves the kernel (lives in VMEM / vregs)

    # ---------- decoder input: teacher-forced right shift (shift-matrix matmul) + prenet ----
    mel_flat = mel_ref[...].reshape(B * Tm, mel_dim)
    r_i = jax.lax.broadcasted_iota(jnp.int32, (B * Tm, B * Tm), 0)
    c_i = jax.lax.broadcasted_iota(jnp.int32, (B * Tm, B * Tm), 1)
    t_of_r = jax.lax.broadcasted_iota(jnp.int32, (B, Tm, B * Tm), 1).reshape(B * Tm, B * Tm)
    shift = jnp.where((c_i + 1 == r_i) & (t_of_r > 0), 1.0, 0.0)       # row t <- row t-1, row 0 <- 0
    dec_in = jnp.dot(shift, mel_flat, preferred_element_type=jnp.float32)  # [B*Tm, mel]

    # mel prenet (Linear+ReLU x2; dropout = identity in eval) + positional encoding
    d2 = jnp.maximum(_matmul(dec_in, w_dd_ref[DD_PRE1][:mel_dim, :], bias("pre_b1")), 0.0)
    d2 = jnp.maximum(_matmul(d2, w_dd_ref[DD_PRE2], bias("pre_b2")), 0.0)
    pe_dec = tab_ref[VOCAB:VOCAB + Tm, :]
    d2 = (d2.reshape(B, Tm, D) + pe_dec[None, :, :]).reshape(B * Tm, D)

    # causal (look-ahead) mask built in-kernel
    rows = jax.lax.broadcasted_iota(jnp.int32, (Tm, Tm), 0)
    cols = jax.lax.broadcasted_iota(jnp.int32, (Tm, Tm), 1)
    causal_bias = jnp.where(cols > rows, jnp.float32(NEG_INF),
                            jnp.float32(0.0))[None, None]              # [1, 1, Tm, Tm]

    # ---------- decoder (self-attn, cross-attn, FFN; post-norm) ------------------------------
    for l in range(N_DEC):
        a = _self_attention(d2, w_qkv_ref[N_ENC + l], bias(f"dec{l}_bqkv"),
                            w_dd_ref[DD_DEC_WOS + l], bias(f"dec{l}_bos"),
                            causal_bias, B, Tm)
        d2 = _layernorm(d2 + a, bias(f"dec{l}_ln1g"), bias(f"dec{l}_ln1b"))

        # cross-attention: fused K|V projection of the resident encoder memory
        kv3 = _matmul(mem2, w_dff_ref[DFF_DEC_WKVX + l],
                      bias(f"dec{l}_bkvx")).reshape(B, T, 2 * D)
        mk = _lane_heads(kv3, 0)
        mv = _lane_heads(kv3, D)
        q2 = _matmul(d2, w_dd_ref[DD_DEC_WQX + l], bias(f"dec{l}_bqx"))
        qh = _lane_heads(q2.reshape(B, Tm, D), 0)
        o = _attend(qh, mk, mv, kp_bias, B, Tm, T)
        a = _matmul(_merge_heads(o, B, Tm), w_dd_ref[DD_DEC_WOX + l], bias(f"dec{l}_box"))
        d2 = _layernorm(d2 + a, bias(f"dec{l}_ln2g"), bias(f"dec{l}_ln2b"))

        f = jnp.maximum(_matmul(d2, w_dff_ref[DFF_DEC_W1 + l], bias(f"dec{l}_b1")), 0.0)
        f = _matmul(f, w_ffd_ref[N_ENC + l], bias(f"dec{l}_b2"))
        d2 = _layernorm(d2 + f, bias(f"dec{l}_ln3g"), bias(f"dec{l}_ln3b"))

    # ---------- fused mel|stop output head (column-padded weight, single store) --------------
    h = jnp.dot(_bf16(d2), w_dd_ref[DD_HEAD], preferred_element_type=jnp.float32)  # [B*Tm, D]
    out_ref[...] = h[:, :MEL_DIM + 1] + bias("head_b")


# ----------------------------- forward (one pallas_call, no grid) --------------------------
@jax.jit
def transformer_tts_forward(params, text_ids, speaker_embedding, mel_targets):
    """
    Equivalent of TransformerTTS.forward(text_ids, speaker_embedding, mel_targets,
    teacher_forcing_ratio=1.0) in eval mode.
    Returns (mel_outputs [B, mel_len, mel_dim], stop_preds [B, mel_len]).
    """
    B, T = text_ids.shape
    _, Tm, mel_dim = mel_targets.shape
    vspec = pl.BlockSpec(memory_space=pltpu.MemorySpace.VMEM)

    out = pl.pallas_call(
        _tts_kernel,
        out_shape=jax.ShapeDtypeStruct((B * Tm, MEL_DIM + 1), jnp.float32),
        in_specs=[vspec] * 9,
        out_specs=vspec,
    )(text_ids, speaker_embedding, mel_targets,
      params["tab"], params["blob"],
      params["w_qkv"], params["w_dd"], params["w_dff"], params["w_ffd"])

    mel_outputs = out[:, :mel_dim].reshape(B, Tm, mel_dim)
    stop_preds = out[:, mel_dim].reshape(B, Tm)
    return mel_outputs, stop_preds


# ----------------------------- parameter init (packed blobs / stacked bf16 weights) --------
def make_positional_encoding(max_len, d_model):
    pos = jnp.arange(max_len, dtype=jnp.float32)[:, None]
    div = jnp.exp(
        jnp.arange(0, d_model, 2, dtype=jnp.float32) * (-math.log(10000.0) / d_model))
    pe = jnp.zeros((max_len, d_model), jnp.float32)
    pe = pe.at[:, 0::2].set(jnp.sin(pos * div))
    pe = pe.at[:, 1::2].set(jnp.cos(pos * div))
    return pe


def init_params(key):
    keys = iter(jax.random.split(key, 64))
    D = D_MODEL

    def xav(fi, fo):
        lim = math.sqrt(6.0 / (fi + fo))
        return jax.random.uniform(next(keys), (fi, fo), jnp.float32, -lim, lim)

    def bf(x):
        return x.astype(jnp.bfloat16)

    # embedding table + positional encoding packed row-wise into one f32 table
    tab = jnp.concatenate([xav(VOCAB, D), make_positional_encoding(MAX_SEQ_LEN, D)], axis=0)

    # f32 bias / LayerNorm blob (biases zero; LN gammas = 1)
    blob = jnp.zeros((BLOB_NROWS, BW), jnp.float32)
    gamma_rows = []
    for l in range(N_ENC):
        gamma_rows += [f"enc{l}_ln1g", f"enc{l}_ln2g"]
    for l in range(N_DEC):
        gamma_rows += [f"dec{l}_ln1g", f"dec{l}_ln2g", f"dec{l}_ln3g"]
    for name in gamma_rows:
        r, w = BLOB_ROWS[name]
        blob = blob.at[r, :w].set(1.0)

    # stacked bf16 weight packs
    w_qkv = bf(jnp.stack([jnp.concatenate([xav(D, D) for _ in range(3)], axis=1)
                          for _ in range(N_ENC + N_DEC)]))                       # [4, D, 3D]

    pre_w1 = jnp.zeros((D, D), jnp.float32).at[:MEL_DIM, :].set(xav(MEL_DIM, D))  # row-padded
    head_w = jnp.zeros((D, D), jnp.float32).at[:, :MEL_DIM + 1].set(
        jnp.concatenate([xav(D, MEL_DIM), xav(D, 1)], axis=1))                    # col-padded
    w_dd = bf(jnp.stack(
        [xav(SPK_DIM, D), pre_w1, xav(D, D), head_w]
        + [xav(D, D) for _ in range(N_ENC)]        # encoder attn out-proj
        + [xav(D, D) for _ in range(N_DEC)]        # decoder self-attn out-proj
        + [xav(D, D) for _ in range(N_DEC)]        # decoder cross-attn q-proj
        + [xav(D, D) for _ in range(N_DEC)]))      # decoder cross-attn out-proj  [12, D, D]

    w_dff = bf(jnp.stack(
        [xav(D, FF) for _ in range(N_ENC)]         # encoder FFN w1
        + [xav(D, FF) for _ in range(N_DEC)]       # decoder FFN w1
        + [jnp.concatenate([xav(D, D), xav(D, D)], axis=1)
           for _ in range(N_DEC)]))                # decoder cross-attn K|V proj  [6, D, FF]

    w_ffd = bf(jnp.stack([xav(FF, D) for _ in range(N_ENC + N_DEC)]))             # [4, FF, D]

    return dict(tab=tab, blob=blob, w_qkv=w_qkv, w_dd=w_dd, w_dff=w_dff, w_ffd=w_ffd)


# TODO(synk): TransformerTTS.inference()'s data-dependent early-stop loop
# (torch.sigmoid(stop_pred).item() > 0.5 -> break) is host-side control flow and is not
# implemented here; only the teacher-forced forward() path is provided.

if __name__ == "__main__":
    key = jax.random.PRNGKey(0)
    k_param, k_text, k_spk, k_mel = jax.random.split(key, 4)

    params = init_params(k_param)

    text_ids = jax.random.randint(k_text, (BATCH, TEXT_LEN), 1, VOCAB, dtype=jnp.int32)
    text_ids = text_ids.at[:, -1].set(0)  # add padding to exercise the key-padding mask
    speaker_embedding = jax.random.normal(k_spk, (BATCH, SPK_DIM), jnp.float32)
    mel_targets = jax.random.normal(k_mel, (BATCH, MEL_LEN, MEL_DIM), jnp.float32)

    mel_outputs, stop_preds = transformer_tts_forward(
        params, text_ids, speaker_embedding, mel_targets)
    jax.block_until_ready((mel_outputs, stop_preds))

    assert mel_outputs.shape == (BATCH, MEL_LEN, MEL_DIM)
    assert stop_preds.shape == (BATCH, MEL_LEN)
    assert bool(jnp.all(jnp.isfinite(mel_outputs))) and bool(jnp.all(jnp.isfinite(stop_preds)))
    print("KERNEL_OK")
</pallas_src>

<mosaic_0001>
module attributes {stable_mosaic.version = 11 : i64} {
  func.func @_tts_kernel(%arg0: memref<2x8xi32, #tpu.memory_space<vmem>>, %arg1: memref<2x64xf32, #tpu.memory_space<vmem>>, %arg2: memref<2x8x16xf32, #tpu.memory_space<vmem>>, %arg3: memref<96x64xf32, #tpu.memory_space<vmem>>, %arg4: memref<46x256xf32, #tpu.memory_space<vmem>>, %arg5: memref<4x64x192xbf16, #tpu.memory_space<vmem>>, %arg6: memref<12x64x64xbf16, #tpu.memory_space<vmem>>, %arg7: memref<6x64x128xbf16, #tpu.memory_space<vmem>>, %arg8: memref<4x128x64xbf16, #tpu.memory_space<vmem>>, %arg9: memref<16x17xf32, #tpu.memory_space<vmem>>) attributes {dimension_semantics = [], scalar_prefetch = 0 : i64, scratch_operands = 0 : i64, tpu.core_type = #tpu.core_type<tc>} {
    %c0 = arith.constant 0 : index
    %c0_0 = arith.constant 0 : index
    %0 = vector.load %arg4[%c0, %c0_0] : memref<46x256xf32, #tpu.memory_space<vmem>>, vector<46x256xf32>
    %c0_1 = arith.constant 0 : index
    %c0_2 = arith.constant 0 : index
    %1 = vector.load %arg0[%c0_1, %c0_2] : memref<2x8xi32, #tpu.memory_space<vmem>>, vector<2x8xi32>
    %2 = tpu.iota {dimensions = array<i32: 2>} : vector<2x8x32xi32>
    %3 = vector.shape_cast %1 : vector<2x8xi32> to vector<2x8x1xi32>
    %4 = vector.broadcast %3 : vector<2x8x1xi32> to vector<2x8x32xi32>
    %5 = arith.cmpi eq, %2, %4 : vector<2x8x32xi32>
    %6 = arith.extui %5 : vector<2x8x32xi1> to vector<2x8x32xi32>
    %7 = arith.sitofp %6 : vector<2x8x32xi32> to vector<2x8x32xf32>
    %c0_3 = arith.constant 0 : index
    %c0_4 = arith.constant 0 : index
    %8 = vector.load %arg3[%c0_3, %c0_4] : memref<96x64xf32, #tpu.memory_space<vmem>>, vector<32x64xf32>
    %9 = vector.shape_cast %7 : vector<2x8x32xf32> to vector<16x32xf32>
    %cst = arith.constant dense<0.000000e+00> : vector<16x64xf32>
    %10 = tpu.matmul %9, %8, %cst {dimension_numbers = #tpu.dot_dimension_numbers<[1], [0], [0], [1], [0, 0, 1, 1], [], []>} : vector<16x32xf32>, vector<32x64xf32>, vector<16x64xf32> -> vector<16x64xf32>
    %c32 = arith.constant 32 : index
    %c0_5 = arith.constant 0 : index
    %11 = vector.load %arg3[%c32, %c0_5] : memref<96x64xf32, #tpu.memory_space<vmem>>, vector<8x64xf32>
    %c0_6 = arith.constant 0 : index
    %c0_7 = arith.constant 0 : index
    %12 = vector.load %arg1[%c0_6, %c0_7] : memref<2x64xf32, #tpu.memory_space<vmem>>, vector<2x64xf32>
    %c0_8 = arith.constant 0 : index
    %c0_9 = arith.constant 0 : index
    %c0_10 = arith.constant 0 : index
    %13 = vector.load %arg6[%c0_8, %c0_9, %c0_10] : memref<12x64x64xbf16, #tpu.memory_space<vmem>>, vector<1x64x64xbf16>
    %14 = vector.shape_cast %13 : vector<1x64x64xbf16> to vector<64x64xbf16>
    %15 = vector.extract_strided_slice %0 {offsets = [0, 0], sizes = [1, 64], strides = [1, 1]} : vector<46x256xf32> to vector<1x64xf32>
    %16 = arith.truncf %12 : vector<2x64xf32> to vector<2x64xbf16>
    %cst_11 = arith.constant dense<0.000000e+00> : vector<2x64xf32>
    %17 = tpu.matmul %16, %14, %cst_11 {dimension_numbers = #tpu.dot_dimension_numbers<[1], [0], [0], [1], [0, 0, 1, 1], [], []>} : vector<2x64xbf16>, vector<64x64xbf16>, vector<2x64xf32> -> vector<2x64xf32>
    %18 = vector.broadcast %15 : vector<1x64xf32> to vector<2x64xf32>
    %19 = arith.addf %17, %18 : vector<2x64xf32>
    %20 = vector.shape_cast %10 : vector<16x64xf32> to vector<2x8x64xf32>
    %21 = vector.shape_cast %11 : vector<8x64xf32> to vector<1x8x64xf32>
    %22 = vector.broadcast %21 : vector<1x8x64xf32> to vector<2x8x64xf32>
    %23 = arith.addf %20, %22 : vector<2x8x64xf32>
    %24 = vector.shape_cast %19 : vector<2x64xf32> to vector<2x1x64xf32>
    %25 = vector.broadcast %24 : vector<2x1x64xf32> to vector<2x8x64xf32>
    %26 = arith.addf %23, %25 : vector<2x8x64xf32>
    %27 = vector.shape_cast %26 : vector<2x8x64xf32> to vector<16x64xf32>
    %c0_i32 = arith.constant 0 : i32
    %28 = vector.broadcast %c0_i32 : i32 to vector<2x8xi32>
    %29 = arith.cmpi eq, %1, %28 : vector<2x8xi32>
    %cst_12 = arith.constant -1.000000e+09 : f32
    %cst_13 = arith.constant 0.000000e+00 : f32
    %30 = vector.broadcast %cst_12 : f32 to vector<2x8xf32>
    %31 = vector.broadcast %cst_13 : f32 to vector<2x8xf32>
    %32 = arith.select %29, %30, %31 : vector<2x8xi1>, vector<2x8xf32>
    %33 = vector.shape_cast %32 : vector<2x8xf32> to vector<1x2x1x8xf32>
    %c0_14 = arith.constant 0 : index
    %c0_15 = arith.constant 0 : index
    %c0_16 = arith.constant 0 : index
    %34 = vector.load %arg5[%c0_14, %c0_15, %c0_16] : memref<4x64x192xbf16, #tpu.memory_space<vmem>>, vector<1x64x192xbf16>
    %35 = vector.shape_cast %34 : vector<1x64x192xbf16> to vector<64x192xbf16>
    %36 = vector.extract_strided_slice %0 {offsets = [4, 0], sizes = [1, 192], strides = [1, 1]} : vector<46x256xf32> to vector<1x192xf32>
    %c4 = arith.constant 4 : index
    %c0_17 = arith.constant 0 : index
    %c0_18 = arith.constant 0 : index
    %37 = vector.load %arg6[%c4, %c0_17, %c0_18] : memref<12x64x64xbf16, #tpu.memory_space<vmem>>, vector<1x64x64xbf16>
    %38 = vector.shape_cast %37 : vector<1x64x64xbf16> to vector<64x64xbf16>
    %39 = vector.extract_strided_slice %0 {offsets = [5, 0], sizes = [1, 64], strides = [1, 1]} : vector<46x256xf32> to vector<1x64xf32>
    %40 = arith.truncf %27 : vector<16x64xf32> to vector<16x64xbf16>
    %cst_19 = arith.constant dense<0.000000e+00> : vector<16x192xf32>
    %41 = tpu.matmul %40, %35, %cst_19 {dimension_numbers = #tpu.dot_dimension_numbers<[1], [0], [0], [1], [0, 0, 1, 1], [], []>} : vector<16x64xbf16>, vector<64x192xbf16>, vector<16x192xf32> -> vector<16x192xf32>
    %42 = vector.broadcast %36 : vector<1x192xf32> to vector<16x192xf32>
    %43 = arith.addf %41, %42 : vector<16x192xf32>
    %44 = vector.shape_cast %43 : vector<16x192xf32> to vector<2x8x192xf32>
    %45 = vector.extract_strided_slice %44 {offsets = [0, 0, 0], sizes = [2, 8, 16], strides = [1, 1, 1]} : vector<2x8x192xf32> to vector<2x8x16xf32>
    %46 = vector.extract_strided_slice %44 {offsets = [0, 0, 16], sizes = [2, 8, 16], strides = [1, 1, 1]} : vector<2x8x192xf32> to vector<2x8x16xf32>
    %47 = vector.extract_strided_slice %44 {offsets = [0, 0, 32], sizes = [2, 8, 16], strides = [1, 1, 1]} : vector<2x8x192xf32> to vector<2x8x16xf32>
    %48 = vector.extract_strided_slice %44 {offsets = [0, 0, 48], sizes = [2, 8, 16], strides = [1, 1, 1]} : vector<2x8x192xf32> to vector<2x8x16xf32>
    %49 = tpu.concatenate %45, %46, %47, %48 in 0 : vector<2x8x16xf32>, vector<2x8x16xf32>, vector<2x8x16xf32>, vector<2x8x16xf32> -> vector<8x8x16xf32>
    %50 = vector.extract_strided_slice %44 {offsets = [0, 0, 64], sizes = [2, 8, 16], strides = [1, 1, 1]} : vector<2x8x192xf32> to vector<2x8x16xf32>
    %51 = vector.extract_strided_slice %44 {offsets = [0, 0, 80], sizes = [2, 8, 16], strides = [1, 1, 1]} : vector<2x8x192xf32> to vector<2x8x16xf32>
    %52 = vector.extract_strided_slice %44 {offsets = [0, 0, 96], sizes = [2, 8, 16], strides = [1, 1, 1]} : vector<2x8x192xf32> to vector<2x8x16xf32>
    %53 = vector.extract_strided_slice %44 {offsets = [0, 0, 112], sizes = [2, 8, 16], strides = [1, 1, 1]} : vector<2x8x192xf32> to vector<2x8x16xf32>
    %54 = tpu.concatenate %50, %51, %52, %53 in 0 : vector<2x8x16xf32>, vector<2x8x16xf32>, vector<2x8x16xf32>, vector<2x8x16xf32> -> vector<8x8x16xf32>
    %55 = vector.extract_strided_slice %44 {offsets = [0, 0, 128], sizes = [2, 8, 16], strides = [1, 1, 1]} : vector<2x8x192xf32> to vector<2x8x16xf32>
    %56 = vector.extract_strided_slice %44 {offsets = [0, 0, 144], sizes = [2, 8, 16], strides = [1, 1, 1]} : vector<2x8x192xf32> to vector<2x8x16xf32>
    %57 = vector.extract_strided_slice %44 {offsets = [0, 0, 160], sizes = [2, 8, 16], strides = [1, 1, 1]} : vector<2x8x192xf32> to vector<2x8x16xf32>
    %58 = vector.extract_strided_slice %44 {offsets = [0, 0, 176], sizes = [2, 8, 16], strides = [1, 1, 1]} : vector<2x8x192xf32> to vector<2x8x16xf32>
    %59 = tpu.concatenate %55, %56, %57, %58 in 0 : vector<2x8x16xf32>, vector<2x8x16xf32>, vector<2x8x16xf32>, vector<2x8x16xf32> -> vector<8x8x16xf32>
    %cst_20 = arith.constant 2.500000e-01 : f32
    %60 = vector.broadcast %cst_20 : f32 to vector<8x8x16xf32>
    %61 = arith.mulf %49, %60 : vector<8x8x16xf32>
    %62 = arith.truncf %61 : vector<8x8x16xf32> to vector<8x8x16xbf16>
    %63 = arith.truncf %54 : vector<8x8x16xf32> to vector<8x8x16xbf16>
    "tpu.trace_start"() <{level = 10 : i32, message = "bqd,bkd->bqk"}> : () -> ()
    %cst_21 = arith.constant dense<0.000000e+00> : vector<8x8x8xf32>
    %64 = tpu.matmul %62, %63, %cst_21 {dimension_numbers = #tpu.dot_dimension_numbers<[2], [2], [1], [1], [0, 0, 0, 1, 1, 1], [0], [0]>} : vector<8x8x16xbf16>, vector<8x8x16xbf16>, vector<8x8x8xf32> -> vector<8x8x8xf32>
    "tpu.trace_stop"() : () -> ()
    %65 = vector.shape_cast %64 : vector<8x8x8xf32> to vector<4x2x8x8xf32>
    %66 = vector.broadcast %33 : vector<1x2x1x8xf32> to vector<4x2x8x8xf32>
    %67 = arith.addf %65, %66 : vector<4x2x8x8xf32>
    %68 = vector.shape_cast %67 : vector<4x2x8x8xf32> to vector<8x8x8xf32>
    %cst_22 = arith.constant dense<0xFF800000> : vector<8x8xf32>
    %69 = vector.multi_reduction <maximumf>, %68, %cst_22 [2] : vector<8x8x8xf32> to vector<8x8xf32>
    %70 = vector.shape_cast %69 : vector<8x8xf32> to vector<8x8x1xf32>
    %71 = vector.broadcast %70 : vector<8x8x1xf32> to vector<8x8x8xf32>
    %72 = arith.subf %68, %71 : vector<8x8x8xf32>
    %73 = math.exp %72 : vector<8x8x8xf32>
    %cst_23 = arith.constant dense<0.000000e+00> : vector<8x8xf32>
    %74 = vector.multi_reduction <add>, %73, %cst_23 [2] : vector<8x8x8xf32> to vector<8x8xf32>
    %75 = vector.shape_cast %74 : vector<8x8xf32> to vector<8x8x1xf32>
    %76 = tpu.reciprocal %75 {approx = true} : vector<8x8x1xf32> -> vector<8x8x1xf32>
    %77 = vector.broadcast %76 : vector<8x8x1xf32> to vector<8x8x8xf32>
    %78 = arith.mulf %73, %77 : vector<8x8x8xf32>
    %79 = arith.truncf %78 : vector<8x8x8xf32> to vector<8x8x8xbf16>
    %80 = arith.truncf %59 : vector<8x8x16xf32> to vector<8x8x16xbf16>
    "tpu.trace_start"() <{level = 10 : i32, message = "bqk,bkd->bqd"}> : () -> ()
    %cst_24 = arith.constant dense<0.000000e+00> : vector<8x8x16xf32>
    %81 = tpu.matmul %79, %80, %cst_24 {dimension_numbers = #tpu.dot_dimension_numbers<[2], [1], [1], [2], [0, 0, 0, 1, 1, 2], [0], [0]>} : vector<8x8x8xbf16>, vector<8x8x16xbf16>, vector<8x8x16xf32> -> vector<8x8x16xf32>
    "tpu.trace_stop"() : () -> ()
    %82 = vector.extract_strided_slice %81 {offsets = [0, 0, 0], sizes = [2, 8, 16], strides = [1, 1, 1]} : vector<8x8x16xf32> to vector<2x8x16xf32>
    %83 = vector.extract_strided_slice %81 {offsets = [2, 0, 0], sizes = [2, 8, 16], strides = [1, 1, 1]} : vector<8x8x16xf32> to vector<2x8x16xf32>
    %84 = vector.extract_strided_slice %81 {offsets = [4, 0, 0], sizes = [2, 8, 16], strides = [1, 1, 1]} : vector<8x8x16xf32> to vector<2x8x16xf32>
    %85 = vector.extract_strided_slice %81 {offsets = [6, 0, 0], sizes = [2, 8, 16], strides = [1, 1, 1]} : vector<8x8x16xf32> to vector<2x8x16xf32>
    %86 = tpu.concatenate %82, %83, %84, %85 in 2 : vector<2x8x16xf32>, vector<2x8x16xf32>, vector<2x8x16xf32>, vector<2x8x16xf32> -> vector<2x8x64xf32>
    %87 = vector.shape_cast %86 : vector<2x8x64xf32> to vector<16x64xf32>
    %88 = arith.truncf %87 : vector<16x64xf32> to vector<16x64xbf16>
    %cst_25 = arith.constant dense<0.000000e+00> : vector<16x64xf32>
    %89 = tpu.matmul %88, %38, %cst_25 {dimension_numbers = #tpu.dot_dimension_numbers<[1], [0], [0], [1], [0, 0, 1, 1], [], []>} : vector<16x64xbf16>, vector<64x64xbf16>, vector<16x64xf32> -> vector<16x64xf32>
    %90 = vector.broadcast %39 : vector<1x64xf32> to vector<16x64xf32>
    %91 = arith.addf %89, %90 : vector<16x64xf32>
    %92 = arith.addf %27, %91 : vector<16x64xf32>
    %93 = vector.extract_strided_slice %0 {offsets = [8, 0], sizes = [1, 64], strides = [1, 1]} : vector<46x256xf32> to vector<1x64xf32>
    %94 = vector.extract_strided_slice %0 {offsets = [9, 0], sizes = [1, 64], strides = [1, 1]} : vector<46x256xf32> to vector<1x64xf32>
    %cst_26 = arith.constant dense<0.000000e+00> : vector<16xf32>
    %95 = vector.multi_reduction <add>, %92, %cst_26 [1] : vector<16x64xf32> to vector<16xf32>
    %96 = vector.shape_cast %95 : vector<16xf32> to vector<16x1xf32>
    %cst_27 = arith.constant 6.400000e+01 : f32
    %97 = vector.broadcast %cst_27 : f32 to vector<16x1xf32>
    %98 = arith.divf %96, %97 : vector<16x1xf32>
    %99 = vector.broadcast %98 : vector<16x1xf32> to vector<16x64xf32>
    %100 = arith.subf %92, %99 : vector<16x64xf32>
    %101 = arith.mulf %100, %100 : vector<16x64xf32>
    %cst_28 = arith.constant dense<0.000000e+00> : vector<16xf32>
    %102 = vector.multi_reduction <add>, %101, %cst_28 [1] : vector<16x64xf32> to vector<16xf32>
    %103 = vector.shape_cast %102 : vector<16xf32> to vector<16x1xf32>
    %cst_29 = arith.constant 6.400000e+01 : f32
    %104 = vector.broadcast %cst_29 : f32 to vector<16x1xf32>
    %105 = arith.divf %103, %104 : vector<16x1xf32>
    %106 = vector.broadcast %98 : vector<16x1xf32> to vector<16x64xf32>
    %107 = arith.subf %92, %106 : vector<16x64xf32>
    %cst_30 = arith.constant 9.99999974E-6 : f32
    %108 = vector.broadcast %cst_30 : f32 to vector<16x1xf32>
    %109 = arith.addf %105, %108 : vector<16x1xf32>
    %110 = math.rsqrt %109 : vector<16x1xf32>
    %111 = vector.broadcast %110 : vector<16x1xf32> to vector<16x64xf32>
    %112 = arith.mulf %107, %111 : vector<16x64xf32>
    %113 = vector.broadcast %93 : vector<1x64xf32> to vector<16x64xf32>
    %114 = arith.mulf %112, %113 : vector<16x64xf32>
    %115 = vector.broadcast %94 : vector<1x64xf32> to vector<16x64xf32>
    %116 = arith.addf %114, %115 : vector<16x64xf32>
    %c0_31 = arith.constant 0 : index
    %c0_32 = arith.constant 0 : index
    %c0_33 = arith.constant 0 : index
    %117 = vector.load %arg7[%c0_31, %c0_32, %c0_33] : memref<6x64x128xbf16, #tpu.memory_space<vmem>>, vector<1x64x128xbf16>
    %118 = vector.shape_cast %117 : vector<1x64x128xbf16> to vector<64x128xbf16>
    %119 = vector.extract_strided_slice %0 {offsets = [6, 0], sizes = [1, 128], strides = [1, 1]} : vector<46x256xf32> to vector<1x128xf32>
    %120 = arith.truncf %116 : vector<16x64xf32> to vector<16x64xbf16>
    %cst_34 = arith.constant dense<0.000000e+00> : vector<16x128xf32>
    %121 = tpu.matmul %120, %118, %cst_34 {dimension_numbers = #tpu.dot_dimension_numbers<[1], [0], [0], [1], [0, 0, 1, 1], [], []>} : vector<16x64xbf16>, vector<64x128xbf16>, vector<16x128xf32> -> vector<16x128xf32>
    %122 = vector.broadcast %119 : vector<1x128xf32> to vector<16x128xf32>
    %123 = arith.addf %121, %122 : vector<16x128xf32>
    %cst_35 = arith.constant 0.000000e+00 : f32
    %124 = vector.broadcast %cst_35 : f32 to vector<16x128xf32>
    %125 = arith.maximumf %123, %124 : vector<16x128xf32>
    %c0_36 = arith.constant 0 : index
    %c0_37 = arith.constant 0 : index
    %c0_38 = arith.constant 0 : index
    %126 = vector.load %arg8[%c0_36, %c0_37, %c0_38] : memref<4x128x64xbf16, #tpu.memory_space<vmem>>, vector<1x128x64xbf16>
    %127 = vector.shape_cast %126 : vector<1x128x64xbf16> to vector<128x64xbf16>
    %128 = vector.extract_strided_slice %0 {offsets = [7, 0], sizes = [1, 64], strides = [1, 1]} : vector<46x256xf32> to vector<1x64xf32>
    %129 = arith.truncf %125 : vector<16x128xf32> to vector<16x128xbf16>
    %cst_39 = arith.constant dense<0.000000e+00> : vector<16x64xf32>
    %130 = tpu.matmul %129, %127, %cst_39 {dimension_numbers = #tpu.dot_dimension_numbers<[1], [0], [0], [1], [0, 0, 1, 1], [], []>} : vector<16x128xbf16>, vector<128x64xbf16>, vector<16x64xf32> -> vector<16x64xf32>
    %131 = vector.broadcast %128 : vector<1x64xf32> to vector<16x64xf32>
    %132 = arith.addf %130, %131 : vector<16x64xf32>
    %133 = arith.addf %116, %132 : vector<16x64xf32>
    %134 = vector.extract_strided_slice %0 {offsets = [10, 0], sizes = [1, 64], strides = [1, 1]} : vector<46x256xf32> to vector<1x64xf32>
    %135 = vector.extract_strided_slice %0 {offsets = [11, 0], sizes = [1, 64], strides = [1, 1]} : vector<46x256xf32> to vector<1x64xf32>
    %cst_40 = arith.constant dense<0.000000e+00> : vector<16xf32>
    %136 = vector.multi_reduction <add>, %133, %cst_40 [1] : vector<16x64xf32> to vector<16xf32>
    %137 = vector.shape_cast %136 : vector<16xf32> to vector<16x1xf32>
    %cst_41 = arith.constant 6.400000e+01 : f32
    %138 = vector.broadcast %cst_41 : f32 to vector<16x1xf32>
    %139 = arith.divf %137, %138 : vector<16x1xf32>
    %140 = vector.broadcast %139 : vector<16x1xf32> to vector<16x64xf32>
    %141 = arith.subf %133, %140 : vector<16x64xf32>
    %142 = arith.mulf %141, %141 : vector<16x64xf32>
    %cst_42 = arith.constant dense<0.000000e+00> : vector<16xf32>
    %143 = vector.multi_reduction <add>, %142, %cst_42 [1] : vector<16x64xf32> to vector<16xf32>
    %144 = vector.shape_cast %143 : vector<16xf32> to vector<16x1xf32>
    %cst_43 = arith.constant 6.400000e+01 : f32
    %145 = vector.broadcast %cst_43 : f32 to vector<16x1xf32>
    %146 = arith.divf %144, %145 : vector<16x1xf32>
    %147 = vector.broadcast %139 : vector<16x1xf32> to vector<16x64xf32>
    %148 = arith.subf %133, %147 : vector<16x64xf32>
    %cst_44 = arith.constant 9.99999974E-6 : f32
    %149 = vector.broadcast %cst_44 : f32 to vector<16x1xf32>
    %150 = arith.addf %146, %149 : vector<16x1xf32>
    %151 = math.rsqrt %150 : vector<16x1xf32>
    %152 = vector.broadcast %151 : vector<16x1xf32> to vector<16x64xf32>
    %153 = arith.mulf %148, %152 : vector<16x64xf32>
    %154 = vector.broadcast %134 : vector<1x64xf32> to vector<16x64xf32>
    %155 = arith.mulf %153, %154 : vector<16x64xf32>
    %156 = vector.broadcast %135 : vector<1x64xf32> to vector<16x64xf32>
    %157 = arith.addf %155, %156 : vector<16x64xf32>
    %c1 = arith.constant 1 : index
    %c0_45 = arith.constant 0 : index
    %c0_46 = arith.constant 0 : index
    %158 = vector.load %arg5[%c1, %c0_45, %c0_46] : memref<4x64x192xbf16, #tpu.memory_space<vmem>>, vector<1x64x192xbf16>
    %159 = vector.shape_cast %158 : vector<1x64x192xbf16> to vector<64x192xbf16>
    %160 = vector.extract_strided_slice %0 {offsets = [12, 0], sizes = [1, 192], strides = [1, 1]} : vector<46x256xf32> to vector<1x192xf32>
    %c5 = arith.constant 5 : index
    %c0_47 = arith.constant 0 : index
    %c0_48 = arith.constant 0 : index
    %161 = vector.load %arg6[%c5, %c0_47, %c0_48] : memref<12x64x64xbf16, #tpu.memory_space<vmem>>, vector<1x64x64xbf16>
    %162 = vector.shape_cast %161 : vector<1x64x64xbf16> to vector<64x64xbf16>
    %163 = vector.extract_strided_slice %0 {offsets = [13, 0], sizes = [1, 64], strides = [1, 1]} : vector<46x256xf32> to vector<1x64xf32>
    %164 = arith.truncf %157 : vector<16x64xf32> to vector<16x64xbf16>
    %cst_49 = arith.constant dense<0.000000e+00> : vector<16x192xf32>
    %165 = tpu.matmul %164, %159, %cst_49 {dimension_numbers = #tpu.dot_dimension_numbers<[1], [0], [0], [1], [0, 0, 1, 1], [], []>} : vector<16x64xbf16>, vector<64x192xbf16>, vector<16x192xf32> -> vector<16x192xf32>
    %166 = vector.broadcast %160 : vector<1x192xf32> to vector<16x192xf32>
    %167 = arith.addf %165, %166 : vector<16x192xf32>
    %168 = vector.shape_cast %167 : vector<16x192xf32> to vector<2x8x192xf32>
    %169 = vector.extract_strided_slice %168 {offsets = [0, 0, 0], sizes = [2, 8, 16], strides = [1, 1, 1]} : vector<2x8x192xf32> to vector<2x8x16xf32>
    %170 = vector.extract_strided_slice %168 {offsets = [0, 0, 16], sizes = [2, 8, 16], strides = [1, 1, 1]} : vector<2x8x192xf32> to vector<2x8x16xf32>
    %171 = vector.extract_strided_slice %168 {offsets = [0, 0, 32], sizes = [2, 8, 16], strides = [1, 1, 1]} : vector<2x8x192xf32> to vector<2x8x16xf32>
    %172 = vector.extract_strided_slice %168 {offsets = [0, 0, 48], sizes = [2, 8, 16], strides = [1, 1, 1]} : vector<2x8x192xf32> to vector<2x8x16xf32>
    %173 = tpu.concatenate %169, %170, %171, %172 in 0 : vector<2x8x16xf32>, vector<2x8x16xf32>, vector<2x8x16xf32>, vector<2x8x16xf32> -> vector<8x8x16xf32>
    %174 = vector.extract_strided_slice %168 {offsets = [0, 0, 64], sizes = [2, 8, 16], strides = [1, 1, 1]} : vector<2x8x192xf32> to vector<2x8x16xf32>
    %175 = vector.extract_strided_slice %168 {offsets = [0, 0, 80], sizes = [2, 8, 16], strides = [1, 1, 1]} : vector<2x8x192xf32> to vector<2x8x16xf32>
    %176 = vector.extract_strided_slice %168 {offsets = [0, 0, 96], sizes = [2, 8, 16], strides = [1, 1, 1]} : vector<2x8x192xf32> to vector<2x8x16xf32>
    %177 = vector.extract_strided_slice %168 {offsets = [0, 0, 112], sizes = [2, 8, 16], strides = [1, 1, 1]} : vector<2x8x192xf32> to vector<2x8x16xf32>
    %178 = tpu.concatenate %174, %175, %176, %177 in 0 : vector<2x8x16xf32>, vector<2x8x16xf32>, vector<2x8x16xf32>, vector<2x8x16xf32> -> vector<8x8x16xf32>
    %179 = vector.extract_strided_slice %168 {offsets = [0, 0, 128], sizes = [2, 8, 16], strides = [1, 1, 1]} : vector<2x8x192xf32> to vector<2x8x16xf32>
    %180 = vector.extract_strided_slice %168 {offsets = [0, 0, 144], sizes = [2, 8, 16], strides = [1, 1, 1]} : vector<2x8x192xf32> to vector<2x8x16xf32>
    %181 = vector.extract_strided_slice %168 {offsets = [0, 0, 160], sizes = [2, 8, 16], strides = [1, 1, 1]} : vector<2x8x192xf32> to vector<2x8x16xf32>
    %182 = vector.extract_strided_slice %168 {offsets = [0, 0, 176], sizes = [2, 8, 16], strides = [1, 1, 1]} : vector<2x8x192xf32> to vector<2x8x16xf32>
    %183 = tpu.concatenate %179, %180, %181, %182 in 0 : vector<2x8x16xf32>, vector<2x8x16xf32>, vector<2x8x16xf32>, vector<2x8x16xf32> -> vector<8x8x16xf32>
    %cst_50 = arith.constant 2.500000e-01 : f32
    %184 = vector.broadcast %cst_50 : f32 to vector<8x8x16xf32>
    %185 = arith.mulf %173, %184 : vector<8x8x16xf32>
    %186 = arith.truncf %185 : vector<8x8x16xf32> to vector<8x8x16xbf16>
    %187 = arith.truncf %178 : vector<8x8x16xf32> to vector<8x8x16xbf16>
    "tpu.trace_start"() <{level = 10 : i32, message = "bqd,bkd->bqk"}> : () -> ()
    %cst_51 = arith.constant dense<0.000000e+00> : vector<8x8x8xf32>
    %188 = tpu.matmul %186, %187, %cst_51 {dimension_numbers = #tpu.dot_dimension_numbers<[2], [2], [1], [1], [0, 0, 0, 1, 1, 1], [0], [0]>} : vector<8x8x16xbf16>, vector<8x8x16xbf16>, vector<8x8x8xf32> -> vector<8x8x8xf32>
    "tpu.trace_stop"() : () -> ()
    %189 = vector.shape_cast %188 : vector<8x8x8xf32> to vector<4x2x8x8xf32>
    %190 = vector.broadcast %33 : vector<1x2x1x8xf32> to vector<4x2x8x8xf32>
    %191 = arith.addf %189, %190 : vector<4x2x8x8xf32>
    %192 = vector.shape_cast %191 : vector<4x2x8x8xf32> to vector<8x8x8xf32>
    %cst_52 = arith.constant dense<0xFF800000> : vector<8x8xf32>
    %193 = vector.multi_reduction <maximumf>, %192, %cst_52 [2] : vector<8x8x8xf32> to vector<8x8xf32>
    %194 = vector.shape_cast %193 : vector<8x8xf32> to vector<8x8x1xf32>
    %195 = vector.broadcast %194 : vector<8x8x1xf32> to vector<8x8x8xf32>
    %196 = arith.subf %192, %195 : vector<8x8x8xf32>
    %197 = math.exp %196 : vector<8x8x8xf32>
    %cst_53 = arith.constant dense<0.000000e+00> : vector<8x8xf32>
    %198 = vector.multi_reduction <add>, %197, %cst_53 [2] : vector<8x8x8xf32> to vector<8x8xf32>
    %199 = vector.shape_cast %198 : vector<8x8xf32> to vector<8x8x1xf32>
    %200 = tpu.reciprocal %199 {approx = true} : vector<8x8x1xf32> -> vector<8x8x1xf32>
    %201 = vector.broadcast %200 : vector<8x8x1xf32> to vector<8x8x8xf32>
    %202 = arith.mulf %197, %201 : vector<8x8x8xf32>
    %203 = arith.truncf %202 : vector<8x8x8xf32> to vector<8x8x8xbf16>
    %204 = arith.truncf %183 : vector<8x8x16xf32> to vector<8x8x16xbf16>
    "tpu.trace_start"() <{level = 10 : i32, message = "bqk,bkd->bqd"}> : () -> ()
    %cst_54 = arith.constant dense<0.000000e+00> : vector<8x8x16xf32>
    %205 = tpu.matmul %203, %204, %cst_54 {dimension_numbers = #tpu.dot_dimension_numbers<[2], [1], [1], [2], [0, 0, 0, 1, 1, 2], [0], [0]>} : vector<8x8x8xbf16>, vector<8x8x16xbf16>, vector<8x8x16xf32> -> vector<8x8x16xf32>
    "tpu.trace_stop"() : () -> ()
    %206 = vector.extract_strided_slice %205 {offsets = [0, 0, 0], sizes = [2, 8, 16], strides = [1, 1, 1]} : vector<8x8x16xf32> to vector<2x8x16xf32>
    %207 = vector.extract_strided_slice %205 {offsets = [2, 0, 0], sizes = [2, 8, 16], strides = [1, 1, 1]} : vector<8x8x16xf32> to vector<2x8x16xf32>
    %208 = vector.extract_strided_slice %205 {offsets = [4, 0, 0], sizes = [2, 8, 16], strides = [1, 1, 1]} : vector<8x8x16xf32> to vector<2x8x16xf32>
    %209 = vector.extract_strided_slice %205 {offsets = [6, 0, 0], sizes = [2, 8, 16], strides = [1, 1, 1]} : vector<8x8x16xf32> to vector<2x8x16xf32>
    %210 = tpu.concatenate %206, %207, %208, %209 in 2 : vector<2x8x16xf32>, vector<2x8x16xf32>, vector<2x8x16xf32>, vector<2x8x16xf32> -> vector<2x8x64xf32>
    %211 = vector.shape_cast %210 : vector<2x8x64xf32> to vector<16x64xf32>
    %212 = arith.truncf %211 : vector<16x64xf32> to vector<16x64xbf16>
    %cst_55 = arith.constant dense<0.000000e+00> : vector<16x64xf32>
    %213 = tpu.matmul %212, %162, %cst_55 {dimension_numbers = #tpu.dot_dimension_numbers<[1], [0], [0], [1], [0, 0, 1, 1], [], []>} : vector<16x64xbf16>, vector<64x64xbf16>, vector<16x64xf32> -> vector<16x64xf32>
    %214 = vector.broadcast %163 : vector<1x64xf32> to vector<16x64xf32>
    %215 = arith.addf %213, %214 : vector<16x64xf32>
    %216 = arith.addf %157, %215 : vector<16x64xf32>
    %217 = vector.extract_strided_slice %0 {offsets = [16, 0], sizes = [1, 64], strides = [1, 1]} : vector<46x256xf32> to vector<1x64xf32>
    %218 = vector.extract_strided_slice %0 {offsets = [17, 0], sizes = [1, 64], strides = [1, 1]} : vector<46x256xf32> to vector<1x64xf32>
    %cst_56 = arith.constant dense<0.000000e+00> : vector<16xf32>
    %219 = vector.multi_reduction <add>, %216, %cst_56 [1] : vector<16x64xf32> to vector<16xf32>
    %220 = vector.shape_cast %219 : vector<16xf32> to vector<16x1xf32>
    %cst_57 = arith.constant 6.400000e+01 : f32
    %221 = vector.broadcast %cst_57 : f32 to vector<16x1xf32>
    %222 = arith.divf %220, %221 : vector<16x1xf32>
    %223 = vector.broadcast %222 : vector<16x1xf32> to vector<16x64xf32>
    %224 = arith.subf %216, %223 : vector<16x64xf32>
    %225 = arith.mulf %224, %224 : vector<16x64xf32>
    %cst_58 = arith.constant dense<0.000000e+00> : vector<16xf32>
    %226 = vector.multi_reduction <add>, %225, %cst_58 [1] : vector<16x64xf32> to vector<16xf32>
    %227 = vector.shape_cast %226 : vector<16xf32> to vector<16x1xf32>
    %cst_59 = arith.constant 6.400000e+01 : f32
    %228 = vector.broadcast %cst_59 : f32 to vector<16x1xf32>
    %229 = arith.divf %227, %228 : vector<16x1xf32>
    %230 = vector.broadcast %222 : vector<16x1xf32> to vector<16x64xf32>
    %231 = arith.subf %216, %230 : vector<16x64xf32>
    %cst_60 = arith.constant 9.99999974E-6 : f32
    %232 = vector.broadcast %cst_60 : f32 to vector<16x1xf32>
    %233 = arith.addf %229, %232 : vector<16x1xf32>
    %234 = math.rsqrt %233 : vector<16x1xf32>
    %235 = vector.broadcast %234 : vector<16x1xf32> to vector<16x64xf32>
    %236 = arith.mulf %231, %235 : vector<16x64xf32>
    %237 = vector.broadcast %217 : vector<1x64xf32> to vector<16x64xf32>
    %238 = arith.mulf %236, %237 : vector<16x64xf32>
    %239 = vector.broadcast %218 : vector<1x64xf32> to vector<16x64xf32>
    %240 = arith.addf %238, %239 : vector<16x64xf32>
    %c1_61 = arith.constant 1 : index
    %c0_62 = arith.constant 0 : index
    %c0_63 = arith.constant 0 : index
    %241 = vector.load %arg7[%c1_61, %c0_62, %c0_63] : memref<6x64x128xbf16, #tpu.memory_space<vmem>>, vector<1x64x128xbf16>
    %242 = vector.shape_cast %241 : vector<1x64x128xbf16> to vector<64x128xbf16>
    %243 = vector.extract_strided_slice %0 {offsets = [14, 0], sizes = [1, 128], strides = [1, 1]} : vector<46x256xf32> to vector<1x128xf32>
    %244 = arith.truncf %240 : vector<16x64xf32> to vector<16x64xbf16>
    %cst_64 = arith.constant dense<0.000000e+00> : vector<16x128xf32>
    %245 = tpu.matmul %244, %242, %cst_64 {dimension_numbers = #tpu.dot_dimension_numbers<[1], [0], [0], [1], [0, 0, 1, 1], [], []>} : vector<16x64xbf16>, vector<64x128xbf16>, vector<16x128xf32> -> vector<16x128xf32>
    %246 = vector.broadcast %243 : vector<1x128xf32> to vector<16x128xf32>
    %247 = arith.addf %245, %246 : vector<16x128xf32>
    %cst_65 = arith.constant 0.000000e+00 : f32
    %248 = vector.broadcast %cst_65 : f32 to vector<16x128xf32>
    %249 = arith.maximumf %247, %248 : vector<16x128xf32>
    %c1_66 = arith.constant 1 : index
    %c0_67 = arith.constant 0 : index
    %c0_68 = arith.constant 0 : index
    %250 = vector.load %arg8[%c1_66, %c0_67, %c0_68] : memref<4x128x64xbf16, #tpu.memory_space<vmem>>, vector<1x128x64xbf16>
    %251 = vector.shape_cast %250 : vector<1x128x64xbf16> to vector<128x64xbf16>
    %252 = vector.extract_strided_slice %0 {offsets = [15, 0], sizes = [1, 64], strides = [1, 1]} : vector<46x256xf32> to vector<1x64xf32>
    %253 = arith.truncf %249 : vector<16x128xf32> to vector<16x128xbf16>
    %cst_69 = arith.constant dense<0.000000e+00> : vector<16x64xf32>
    %254 = tpu.matmul %253, %251, %cst_69 {dimension_numbers = #tpu.dot_dimension_numbers<[1], [0], [0], [1], [0, 0, 1, 1], [], []>} : vector<16x128xbf16>, vector<128x64xbf16>, vector<16x64xf32> -> vector<16x64xf32>
    %255 = vector.broadcast %252 : vector<1x64xf32> to vector<16x64xf32>
    %256 = arith.addf %254, %255 : vector<16x64xf32>
    %257 = arith.addf %240, %256 : vector<16x64xf32>
    %258 = vector.extract_strided_slice %0 {offsets = [18, 0], sizes = [1, 64], strides = [1, 1]} : vector<46x256xf32> to vector<1x64xf32>
    %259 = vector.extract_strided_slice %0 {offsets = [19, 0], sizes = [1, 64], strides = [1, 1]} : vector<46x256xf32> to vector<1x64xf32>
    %cst_70 = arith.constant dense<0.000000e+00> : vector<16xf32>
    %260 = vector.multi_reduction <add>, %257, %cst_70 [1] : vector<16x64xf32> to vector<16xf32>
    %261 = vector.shape_cast %260 : vector<16xf32> to vector<16x1xf32>
    %cst_71 = arith.constant 6.400000e+01 : f32
    %262 = vector.broadcast %cst_71 : f32 to vector<16x1xf32>
    %263 = arith.divf %261, %262 : vector<16x1xf32>
    %264 = vector.broadcast %263 : vector<16x1xf32> to vector<16x64xf32>
    %265 = arith.subf %257, %264 : vector<16x64xf32>
    %266 = arith.mulf %265, %265 : vector<16x64xf32>
    %cst_72 = arith.constant dense<0.000000e+00> : vector<16xf32>
    %267 = vector.multi_reduction <add>, %266, %cst_72 [1] : vector<16x64xf32> to vector<16xf32>
    %268 = vector.shape_cast %267 : vector<16xf32> to vector<16x1xf32>
    %cst_73 = arith.constant 6.400000e+01 : f32
    %269 = vector.broadcast %cst_73 : f32 to vector<16x1xf32>
    %270 = arith.divf %268, %269 : vector<16x1xf32>
    %271 = vector.broadcast %263 : vector<16x1xf32> to vector<16x64xf32>
    %272 = arith.subf %257, %271 : vector<16x64xf32>
    %cst_74 = arith.constant 9.99999974E-6 : f32
    %273 = vector.broadcast %cst_74 : f32 to vector<16x1xf32>
    %274 = arith.addf %270, %273 : vector<16x1xf32>
    %275 = math.rsqrt %274 : vector<16x1xf32>
    %276 = vector.broadcast %275 : vector<16x1xf32> to vector<16x64xf32>
    %277 = arith.mulf %272, %276 : vector<16x64xf32>
    %278 = vector.broadcast %258 : vector<1x64xf32> to vector<16x64xf32>
    %279 = arith.mulf %277, %278 : vector<16x64xf32>
    %280 = vector.broadcast %259 : vector<1x64xf32> to vector<16x64xf32>
    %281 = arith.addf %279, %280 : vector<16x64xf32>
    %c0_75 = arith.constant 0 : index
    %c0_76 = arith.constant 0 : index
    %c0_77 = arith.constant 0 : index
    %282 = vector.load %arg2[%c0_75, %c0_76, %c0_77] : memref<2x8x16xf32, #tpu.memory_space<vmem>>, vector<2x8x16xf32>
    %283 = vector.shape_cast %282 : vector<2x8x16xf32> to vector<16x16xf32>
    %284 = tpu.iota {dimensions = array<i32: 0>} : vector<16x16xi32>
    %285 = tpu.iota {dimensions = array<i32: 1>} : vector<16x16xi32>
    %286 = tpu.iota {dimensions = array<i32: 1>} : vector<2x8x16xi32>
    %287 = vector.shape_cast %286 : vector<2x8x16xi32> to vector<16x16xi32>
    %c1_i32 = arith.constant 1 : i32
    %288 = vector.broadcast %c1_i32 : i32 to vector<16x16xi32>
    %289 = arith.addi %285, %288 : vector<16x16xi32>
    %290 = arith.cmpi eq, %289, %284 : vector<16x16xi32>
    %c0_i32_78 = arith.constant 0 : i32
    %291 = vector.broadcast %c0_i32_78 : i32 to vector<16x16xi32>
    %292 = arith.cmpi sgt, %287, %291 : vector<16x16xi32>
    %293 = arith.andi %290, %292 : vector<16x16xi1>
    %cst_79 = arith.constant 1.000000e+00 : f32
    %cst_80 = arith.constant 0.000000e+00 : f32
    %294 = vector.broadcast %cst_79 : f32 to vector<16x16xf32>
    %295 = vector.broadcast %cst_80 : f32 to vector<16x16xf32>
    %296 = arith.select %293, %294, %295 : vector<16x16xi1>, vector<16x16xf32>
    %cst_81 = arith.constant dense<0.000000e+00> : vector<16x16xf32>
    %297 = tpu.matmul %296, %283, %cst_81 {dimension_numbers = #tpu.dot_dimension_numbers<[1], [0], [0], [1], [0, 0, 1, 1], [], []>} : vector<16x16xf32>, vector<16x16xf32>, vector<16x16xf32> -> vector<16x16xf32>
    %c1_82 = arith.constant 1 : index
    %c0_83 = arith.constant 0 : index
    %c0_84 = arith.constant 0 : index
    %298 = vector.load %arg6[%c1_82, %c0_83, %c0_84] : memref<12x64x64xbf16, #tpu.memory_space<vmem>>, vector<1x64x64xbf16>
    %299 = vector.shape_cast %298 : vector<1x64x64xbf16> to vector<64x64xbf16>
    %300 = vector.extract_strided_slice %299 {offsets = [0, 0], sizes = [16, 64], strides = [1, 1]} : vector<64x64xbf16> to vector<16x64xbf16>
    %301 = vector.extract_strided_slice %0 {offsets = [1, 0], sizes = [1, 64], strides = [1, 1]} : vector<46x256xf32> to vector<1x64xf32>
    %302 = arith.truncf %297 : vector<16x16xf32> to vector<16x16xbf16>
    %cst_85 = arith.constant dense<0.000000e+00> : vector<16x64xf32>
    %303 = tpu.matmul %302, %300, %cst_85 {dimension_numbers = #tpu.dot_dimension_numbers<[1], [0], [0], [1], [0, 0, 1, 1], [], []>} : vector<16x16xbf16>, vector<16x64xbf16>, vector<16x64xf32> -> vector<16x64xf32>
    %304 = vector.broadcast %301 : vector<1x64xf32> to vector<16x64xf32>
    %305 = arith.addf %303, %304 : vector<16x64xf32>
    %cst_86 = arith.constant 0.000000e+00 : f32
    %306 = vector.broadcast %cst_86 : f32 to vector<16x64xf32>
    %307 = arith.maximumf %305, %306 : vector<16x64xf32>
    %c2 = arith.constant 2 : index
    %c0_87 = arith.constant 0 : index
    %c0_88 = arith.constant 0 : index
    %308 = vector.load %arg6[%c2, %c0_87, %c0_88] : memref<12x64x64xbf16, #tpu.memory_space<vmem>>, vector<1x64x64xbf16>
    %309 = vector.shape_cast %308 : vector<1x64x64xbf16> to vector<64x64xbf16>
    %310 = vector.extract_strided_slice %0 {offsets = [2, 0], sizes = [1, 64], strides = [1, 1]} : vector<46x256xf32> to vector<1x64xf32>
    %311 = arith.truncf %307 : vector<16x64xf32> to vector<16x64xbf16>
    %cst_89 = arith.constant dense<0.000000e+00> : vector<16x64xf32>
    %312 = tpu.matmul %311, %309, %cst_89 {dimension_numbers = #tpu.dot_dimension_numbers<[1], [0], [0], [1], [0, 0, 1, 1], [], []>} : vector<16x64xbf16>, vector<64x64xbf16>, vector<16x64xf32> -> vector<16x64xf32>
    %313 = vector.broadcast %310 : vector<1x64xf32> to vector<16x64xf32>
    %314 = arith.addf %312, %313 : vector<16x64xf32>
    %cst_90 = arith.constant 0.000000e+00 : f32
    %315 = vector.broadcast %cst_90 : f32 to vector<16x64xf32>
    %316 = arith.maximumf %314, %315 : vector<16x64xf32>
    %c32_91 = arith.constant 32 : index
    %c0_92 = arith.constant 0 : index
    %317 = vector.load %arg3[%c32_91, %c0_92] : memref<96x64xf32, #tpu.memory_space<vmem>>, vector<8x64xf32>
    %318 = vector.shape_cast %316 : vector<16x64xf32> to vector<2x8x64xf32>
    %319 = vector.shape_cast %317 : vector<8x64xf32> to vector<1x8x64xf32>
    %320 = vector.broadcast %319 : vector<1x8x64xf32> to vector<2x8x64xf32>
    %321 = arith.addf %318, %320 : vector<2x8x64xf32>
    %322 = vector.shape_cast %321 : vector<2x8x64xf32> to vector<16x64xf32>
    %323 = tpu.iota {dimensions = array<i32: 0>} : vector<8x8xi32>
    %324 = tpu.iota {dimensions = array<i32: 1>} : vector<8x8xi32>
    %325 = arith.cmpi sgt, %324, %323 : vector<8x8xi32>
    %cst_93 = arith.constant -1.000000e+09 : f32
    %cst_94 = arith.constant 0.000000e+00 : f32
    %326 = vector.broadcast %cst_93 : f32 to vector<8x8xf32>
    %327 = vector.broadcast %cst_94 : f32 to vector<8x8xf32>
    %328 = arith.select %325, %326, %327 : vector<8x8xi1>, vector<8x8xf32>
    %329 = vector.shape_cast %328 : vector<8x8xf32> to vector<1x1x8x8xf32>
    %c2_95 = arith.constant 2 : index
    %c0_96 = arith.constant 0 : index
    %c0_97 = arith.constant 0 : index
    %330 = vector.load %arg5[%c2_95, %c0_96, %c0_97] : memref<4x64x192xbf16, #tpu.memory_space<vmem>>, vector<1x64x192xbf16>
    %331 = vector.shape_cast %330 : vector<1x64x192xbf16> to vector<64x192xbf16>
    %332 = vector.extract_strided_slice %0 {offsets = [20, 0], sizes = [1, 192], strides = [1, 1]} : vector<46x256xf32> to vector<1x192xf32>
    %c6 = arith.constant 6 : index
    %c0_98 = arith.constant 0 : index
    %c0_99 = arith.constant 0 : index
    %333 = vector.load %arg6[%c6, %c0_98, %c0_99] : memref<12x64x64xbf16, #tpu.memory_space<vmem>>, vector<1x64x64xbf16>
    %334 = vector.shape_cast %333 : vector<1x64x64xbf16> to vector<64x64xbf16>
    %335 = vector.extract_strided_slice %0 {offsets = [21, 0], sizes = [1, 64], strides = [1, 1]} : vector<46x256xf32> to vector<1x64xf32>
    %336 = arith.truncf %322 : vector<16x64xf32> to vector<16x64xbf16>
    %cst_100 = arith.constant dense<0.000000e+00> : vector<16x192xf32>
    %337 = tpu.matmul %336, %331, %cst_100 {dimension_numbers = #tpu.dot_dimension_numbers<[1], [0], [0], [1], [0, 0, 1, 1], [], []>} : vector<16x64xbf16>, vector<64x192xbf16>, vector<16x192xf32> -> vector<16x192xf32>
    %338 = vector.broadcast %332 : vector<1x192xf32> to vector<16x192xf32>
    %339 = arith.addf %337, %338 : vector<16x192xf32>
    %340 = vector.shape_cast %339 : vector<16x192xf32> to vector<2x8x192xf32>
    %341 = vector.extract_strided_slice %340 {offsets = [0, 0, 0], sizes = [2, 8, 16], strides = [1, 1, 1]} : vector<2x8x192xf32> to vector<2x8x16xf32>
    %342 = vector.extract_strided_slice %340 {offsets = [0, 0, 16], sizes = [2, 8, 16], strides = [1, 1, 1]} : vector<2x8x192xf32> to vector<2x8x16xf32>
    %343 = vector.extract_strided_slice %340 {offsets = [0, 0, 32], sizes = [2, 8, 16], strides = [1, 1, 1]} : vector<2x8x192xf32> to vector<2x8x16xf32>
    %344 = vector.extract_strided_slice %340 {offsets = [0, 0, 48], sizes = [2, 8, 16], strides = [1, 1, 1]} : vector<2x8x192xf32> to vector<2x8x16xf32>
    %345 = tpu.concatenate %341, %342, %343, %344 in 0 : vector<2x8x16xf32>, vector<2x8x16xf32>, vector<2x8x16xf32>, vector<2x8x16xf32> -> vector<8x8x16xf32>
    %346 = vector.extract_strided_slice %340 {offsets = [0, 0, 64], sizes = [2, 8, 16], strides = [1, 1, 1]} : vector<2x8x192xf32> to vector<2x8x16xf32>
    %347 = vector.extract_strided_slice %340 {offsets = [0, 0, 80], sizes = [2, 8, 16], strides = [1, 1, 1]} : vector<2x8x192xf32> to vector<2x8x16xf32>
    %348 = vector.extract_strided_slice %340 {offsets = [0, 0, 96], sizes = [2, 8, 16], strides = [1, 1, 1]} : vector<2x8x192xf32> to vector<2x8x16xf32>
    %349 = vector.extract_strided_slice %340 {offsets = [0, 0, 112], sizes = [2, 8, 16], strides = [1, 1, 1]} : vector<2x8x192xf32> to vector<2x8x16xf32>
    %350 = tpu.concatenate %346, %347, %348, %349 in 0 : vector<2x8x16xf32>, vector<2x8x16xf32>, vector<2x8x16xf32>, vector<2x8x16xf32> -> vector<8x8x16xf32>
    %351 = vector.extract_strided_slice %340 {offsets = [0, 0, 128], sizes = [2, 8, 16], strides = [1, 1, 1]} : vector<2x8x192xf32> to vector<2x8x16xf32>
    %352 = vector.extract_strided_slice %340 {offsets = [0, 0, 144], sizes = [2, 8, 16], strides = [1, 1, 1]} : vector<2x8x192xf32> to vector<2x8x16xf32>
    %353 = vector.extract_strided_slice %340 {offsets = [0, 0, 160], sizes = [2, 8, 16], strides = [1, 1, 1]} : vector<2x8x192xf32> to vector<2x8x16xf32>
    %354 = vector.extract_strided_slice %340 {offsets = [0, 0, 176], sizes = [2, 8, 16], strides = [1, 1, 1]} : vector<2x8x192xf32> to vector<2x8x16xf32>
    %355 = tpu.concatenate %351, %352, %353, %354 in 0 : vector<2x8x16xf32>, vector<2x8x16xf32>, vector<2x8x16xf32>, vector<2x8x16xf32> -> vector<8x8x16xf32>
    %cst_101 = arith.constant 2.500000e-01 : f32
    %356 = vector.broadcast %cst_101 : f32 to vector<8x8x16xf32>
    %357 = arith.mulf %345, %356 : vector<8x8x16xf32>
    %358 = arith.truncf %357 : vector<8x8x16xf32> to vector<8x8x16xbf16>
    %359 = arith.truncf %350 : vector<8x8x16xf32> to vector<8x8x16xbf16>
    "tpu.trace_start"() <{level = 10 : i32, message = "bqd,bkd->bqk"}> : () -> ()
    %cst_102 = arith.constant dense<0.000000e+00> : vector<8x8x8xf32>
    %360 = tpu.matmul %358, %359, %cst_102 {dimension_numbers = #tpu.dot_dimension_numbers<[2], [2], [1], [1], [0, 0, 0, 1, 1, 1], [0], [0]>} : vector<8x8x16xbf16>, vector<8x8x16xbf16>, vector<8x8x8xf32> -> vector<8x8x8xf32>
    "tpu.trace_stop"() : () -> ()
    %361 = vector.shape_cast %360 : vector<8x8x8xf32> to vector<4x2x8x8xf32>
    %362 = vector.broadcast %329 : vector<1x1x8x8xf32> to vector<4x2x8x8xf32>
    %363 = arith.addf %361, %362 : vector<4x2x8x8xf32>
    %364 = vector.shape_cast %363 : vector<4x2x8x8xf32> to vector<8x8x8xf32>
    %cst_103 = arith.constant dense<0xFF800000> : vector<8x8xf32>
    %365 = vector.multi_reduction <maximumf>, %364, %cst_103 [2] : vector<8x8x8xf32> to vector<8x8xf32>
    %366 = vector.shape_cast %365 : vector<8x8xf32> to vector<8x8x1xf32>
    %367 = vector.broadcast %366 : vector<8x8x1xf32> to vector<8x8x8xf32>
    %368 = arith.subf %364, %367 : vector<8x8x8xf32>
    %369 = math.exp %368 : vector<8x8x8xf32>
    %cst_104 = arith.constant dense<0.000000e+00> : vector<8x8xf32>
    %370 = vector.multi_reduction <add>, %369, %cst_104 [2] : vector<8x8x8xf32> to vector<8x8xf32>
    %371 = vector.shape_cast %370 : vector<8x8xf32> to vector<8x8x1xf32>
    %372 = tpu.reciprocal %371 {approx = true} : vector<8x8x1xf32> -> vector<8x8x1xf32>
    %373 = vector.broadcast %372 : vector<8x8x1xf32> to vector<8x8x8xf32>
    %374 = arith.mulf %369, %373 : vector<8x8x8xf32>
    %375 = arith.truncf %374 : vector<8x8x8xf32> to vector<8x8x8xbf16>
    %376 = arith.truncf %355 : vector<8x8x16xf32> to vector<8x8x16xbf16>
    "tpu.trace_start"() <{level = 10 : i32, message = "bqk,bkd->bqd"}> : () -> ()
    %cst_105 = arith.constant dense<0.000000e+00> : vector<8x8x16xf32>
    %377 = tpu.matmul %375, %376, %cst_105 {dimension_numbers = #tpu.dot_dimension_numbers<[2], [1], [1], [2], [0, 0, 0, 1, 1, 2], [0], [0]>} : vector<8x8x8xbf16>, vector<8x8x16xbf16>, vector<8x8x16xf32> -> vector<8x8x16xf32>
    "tpu.trace_stop"() : () -> ()
    %378 = vector.extract_strided_slice %377 {offsets = [0, 0, 0], sizes = [2, 8, 16], strides = [1, 1, 1]} : vector<8x8x16xf32> to vector<2x8x16xf32>
    %379 = vector.extract_strided_slice %377 {offsets = [2, 0, 0], sizes = [2, 8, 16], strides = [1, 1, 1]} : vector<8x8x16xf32> to vector<2x8x16xf32>
    %380 = vector.extract_strided_slice %377 {offsets = [4, 0, 0], sizes = [2, 8, 16], strides = [1, 1, 1]} : vector<8x8x16xf32> to vector<2x8x16xf32>
    %381 = vector.extract_strided_slice %377 {offsets = [6, 0, 0], sizes = [2, 8, 16], strides = [1, 1, 1]} : vector<8x8x16xf32> to vector<2x8x16xf32>
    %382 = tpu.concatenate %378, %379, %380, %381 in 2 : vector<2x8x16xf32>, vector<2x8x16xf32>, vector<2x8x16xf32>, vector<2x8x16xf32> -> vector<2x8x64xf32>
    %383 = vector.shape_cast %382 : vector<2x8x64xf32> to vector<16x64xf32>
    %384 = arith.truncf %383 : vector<16x64xf32> to vector<16x64xbf16>
    %cst_106 = arith.constant dense<0.000000e+00> : vector<16x64xf32>
    %385 = tpu.matmul %384, %334, %cst_106 {dimension_numbers = #tpu.dot_dimension_numbers<[1], [0], [0], [1], [0, 0, 1, 1], [], []>} : vector<16x64xbf16>, vector<64x64xbf16>, vector<16x64xf32> -> vector<16x64xf32>
    %386 = vector.broadcast %335 : vector<1x64xf32> to vector<16x64xf32>
    %387 = arith.addf %385, %386 : vector<16x64xf32>
    %388 = arith.addf %322, %387 : vector<16x64xf32>
    %389 = vector.extract_strided_slice %0 {offsets = [27, 0], sizes = [1, 64], strides = [1, 1]} : vector<46x256xf32> to vector<1x64xf32>
    %390 = vector.extract_strided_slice %0 {offsets = [28, 0], sizes = [1, 64], strides = [1, 1]} : vector<46x256xf32> to vector<1x64xf32>
    %cst_107 = arith.constant dense<0.000000e+00> : vector<16xf32>
    %391 = vector.multi_reduction <add>, %388, %cst_107 [1] : vector<16x64xf32> to vector<16xf32>
    %392 = vector.shape_cast %391 : vector<16xf32> to vector<16x1xf32>
    %cst_108 = arith.constant 6.400000e+01 : f32
    %393 = vector.broadcast %cst_108 : f32 to vector<16x1xf32>
    %394 = arith.divf %392, %393 : vector<16x1xf32>
    %395 = vector.broadcast %394 : vector<16x1xf32> to vector<16x64xf32>
    %396 = arith.subf %388, %395 : vector<16x64xf32>
    %397 = arith.mulf %396, %396 : vector<16x64xf32>
    %cst_109 = arith.constant dense<0.000000e+00> : vector<16xf32>
    %398 = vector.multi_reduction <add>, %397, %cst_109 [1] : vector<16x64xf32> to vector<16xf32>
    %399 = vector.shape_cast %398 : vector<16xf32> to vector<16x1xf32>
    %cst_110 = arith.constant 6.400000e+01 : f32
    %400 = vector.broadcast %cst_110 : f32 to vector<16x1xf32>
    %401 = arith.divf %399, %400 : vector<16x1xf32>
    %402 = vector.broadcast %394 : vector<16x1xf32> to vector<16x64xf32>
    %403 = arith.subf %388, %402 : vector<16x64xf32>
    %cst_111 = arith.constant 9.99999974E-6 : f32
    %404 = vector.broadcast %cst_111 : f32 to vector<16x1xf32>
    %405 = arith.addf %401, %404 : vector<16x1xf32>
    %406 = math.rsqrt %405 : vector<16x1xf32>
    %407 = vector.broadcast %406 : vector<16x1xf32> to vector<16x64xf32>
    %408 = arith.mulf %403, %407 : vector<16x64xf32>
    %409 = vector.broadcast %389 : vector<1x64xf32> to vector<16x64xf32>
    %410 = arith.mulf %408, %409 : vector<16x64xf32>
    %411 = vector.broadcast %390 : vector<1x64xf32> to vector<16x64xf32>
    %412 = arith.addf %410, %411 : vector<16x64xf32>
    %c4_112 = arith.constant 4 : index
    %c0_113 = arith.constant 0 : index
    %c0_114 = arith.constant 0 : index
    %413 = vector.load %arg7[%c4_112, %c0_113, %c0_114] : memref<6x64x128xbf16, #tpu.memory_space<vmem>>, vector<1x64x128xbf16>
    %414 = vector.shape_cast %413 : vector<1x64x128xbf16> to vector<64x128xbf16>
    %415 = vector.extract_strided_slice %0 {offsets = [23, 0], sizes = [1, 128], strides = [1, 1]} : vector<46x256xf32> to vector<1x128xf32>
    %416 = arith.truncf %281 : vector<16x64xf32> to vector<16x64xbf16>
    %cst_115 = arith.constant dense<0.000000e+00> : vector<16x128xf32>
    %417 = tpu.matmul %416, %414, %cst_115 {dimension_numbers = #tpu.dot_dimension_numbers<[1], [0], [0], [1], [0, 0, 1, 1], [], []>} : vector<16x64xbf16>, vector<64x128xbf16>, vector<16x128xf32> -> vector<16x128xf32>
    %418 = vector.broadcast %415 : vector<1x128xf32> to vector<16x128xf32>
    %419 = arith.addf %417, %418 : vector<16x128xf32>
    %420 = vector.shape_cast %419 : vector<16x128xf32> to vector<2x8x128xf32>
    %421 = vector.extract_strided_slice %420 {offsets = [0, 0, 0], sizes = [2, 8, 16], strides = [1, 1, 1]} : vector<2x8x128xf32> to vector<2x8x16xf32>
    %422 = vector.extract_strided_slice %420 {offsets = [0, 0, 16], sizes = [2, 8, 16], strides = [1, 1, 1]} : vector<2x8x128xf32> to vector<2x8x16xf32>
    %423 = vector.extract_strided_slice %420 {offsets = [0, 0, 32], sizes = [2, 8, 16], strides = [1, 1, 1]} : vector<2x8x128xf32> to vector<2x8x16xf32>
    %424 = vector.extract_strided_slice %420 {offsets = [0, 0, 48], sizes = [2, 8, 16], strides = [1, 1, 1]} : vector<2x8x128xf32> to vector<2x8x16xf32>
    %425 = tpu.concatenate %421, %422, %423, %424 in 0 : vector<2x8x16xf32>, vector<2x8x16xf32>, vector<2x8x16xf32>, vector<2x8x16xf32> -> vector<8x8x16xf32>
    %426 = vector.extract_strided_slice %420 {offsets = [0, 0, 64], sizes = [2, 8, 16], strides = [1, 1, 1]} : vector<2x8x128xf32> to vector<2x8x16xf32>
    %427 = vector.extract_strided_slice %420 {offsets = [0, 0, 80], sizes = [2, 8, 16], strides = [1, 1, 1]} : vector<2x8x128xf32> to vector<2x8x16xf32>
    %428 = vector.extract_strided_slice %420 {offsets = [0, 0, 96], sizes = [2, 8, 16], strides = [1, 1, 1]} : vector<2x8x128xf32> to vector<2x8x16xf32>
    %429 = vector.extract_strided_slice %420 {offsets = [0, 0, 112], sizes = [2, 8, 16], strides = [1, 1, 1]} : vector<2x8x128xf32> to vector<2x8x16xf32>
    %430 = tpu.concatenate %426, %427, %428, %429 in 0 : vector<2x8x16xf32>, vector<2x8x16xf32>, vector<2x8x16xf32>, vector<2x8x16xf32> -> vector<8x8x16xf32>
    %c8 = arith.constant 8 : index
    %c0_116 = arith.constant 0 : index
    %c0_117 = arith.constant 0 : index
    %431 = vector.load %arg6[%c8, %c0_116, %c0_117] : memref<12x64x64xbf16, #tpu.memory_space<vmem>>, vector<1x64x64xbf16>
    %432 = vector.shape_cast %431 : vector<1x64x64xbf16> to vector<64x64xbf16>
    %433 = vector.extract_strided_slice %0 {offsets = [22, 0], sizes = [1, 64], strides = [1, 1]} : vector<46x256xf32> to vector<1x64xf32>
    %434 = arith.truncf %412 : vector<16x64xf32> to vector<16x64xbf16>
    %cst_118 = arith.constant dense<0.000000e+00> : vector<16x64xf32>
    %435 = tpu.matmul %434, %432, %cst_118 {dimension_numbers = #tpu.dot_dimension_numbers<[1], [0], [0], [1], [0, 0, 1, 1], [], []>} : vector<16x64xbf16>, vector<64x64xbf16>, vector<16x64xf32> -> vector<16x64xf32>
    %436 = vector.broadcast %433 : vector<1x64xf32> to vector<16x64xf32>
    %437 = arith.addf %435, %436 : vector<16x64xf32>
    %438 = vector.shape_cast %437 : vector<16x64xf32> to vector<2x8x64xf32>
    %439 = vector.extract_strided_slice %438 {offsets = [0, 0, 0], sizes = [2, 8, 16], strides = [1, 1, 1]} : vector<2x8x64xf32> to vector<2x8x16xf32>
    %440 = vector.extract_strided_slice %438 {offsets = [0, 0, 16], sizes = [2, 8, 16], strides = [1, 1, 1]} : vector<2x8x64xf32> to vector<2x8x16xf32>
    %441 = vector.extract_strided_slice %438 {offsets = [0, 0, 32], sizes = [2, 8, 16], strides = [1, 1, 1]} : vector<2x8x64xf32> to vector<2x8x16xf32>
    %442 = vector.extract_strided_slice %438 {offsets = [0, 0, 48], sizes = [2, 8, 16], strides = [1, 1, 1]} : vector<2x8x64xf32> to vector<2x8x16xf32>
    %443 = tpu.concatenate %439, %440, %441, %442 in 0 : vector<2x8x16xf32>, vector<2x8x16xf32>, vector<2x8x16xf32>, vector<2x8x16xf32> -> vector<8x8x16xf32>
    %cst_119 = arith.constant 2.500000e-01 : f32
    %444 = vector.broadcast %cst_119 : f32 to vector<8x8x16xf32>
    %445 = arith.mulf %443, %444 : vector<8x8x16xf32>
    %446 = arith.truncf %445 : vector<8x8x16xf32> to vector<8x8x16xbf16>
    %447 = arith.truncf %425 : vector<8x8x16xf32> to vector<8x8x16xbf16>
    "tpu.trace_start"() <{level = 10 : i32, message = "bqd,bkd->bqk"}> : () -> ()
    %cst_120 = arith.constant dense<0.000000e+00> : vector<8x8x8xf32>
    %448 = tpu.matmul %446, %447, %cst_120 {dimension_numbers = #tpu.dot_dimension_numbers<[2], [2], [1], [1], [0, 0, 0, 1, 1, 1], [0], [0]>} : vector<8x8x16xbf16>, vector<8x8x16xbf16>, vector<8x8x8xf32> -> vector<8x8x8xf32>
    "tpu.trace_stop"() : () -> ()
    %449 = vector.shape_cast %448 : vector<8x8x8xf32> to vector<4x2x8x8xf32>
    %450 = vector.broadcast %33 : vector<1x2x1x8xf32> to vector<4x2x8x8xf32>
    %451 = arith.addf %449, %450 : vector<4x2x8x8xf32>
    %452 = vector.shape_cast %451 : vector<4x2x8x8xf32> to vector<8x8x8xf32>
    %cst_121 = arith.constant dense<0xFF800000> : vector<8x8xf32>
    %453 = vector.multi_reduction <maximumf>, %452, %cst_121 [2] : vector<8x8x8xf32> to vector<8x8xf32>
    %454 = vector.shape_cast %453 : vector<8x8xf32> to vector<8x8x1xf32>
    %455 = vector.broadcast %454 : vector<8x8x1xf32> to vector<8x8x8xf32>
    %456 = arith.subf %452, %455 : vector<8x8x8xf32>
    %457 = math.exp %456 : vector<8x8x8xf32>
    %cst_122 = arith.constant dense<0.000000e+00> : vector<8x8xf32>
    %458 = vector.multi_reduction <add>, %457, %cst_122 [2] : vector<8x8x8xf32> to vector<8x8xf32>
    %459 = vector.shape_cast %458 : vector<8x8xf32> to vector<8x8x1xf32>
    %460 = tpu.reciprocal %459 {approx = true} : vector<8x8x1xf32> -> vector<8x8x1xf32>
    %461 = vector.broadcast %460 : vector<8x8x1xf32> to vector<8x8x8xf32>
    %462 = arith.mulf %457, %461 : vector<8x8x8xf32>
    %463 = arith.truncf %462 : vector<8x8x8xf32> to vector<8x8x8xbf16>
    %464 = arith.truncf %430 : vector<8x8x16xf32> to vector<8x8x16xbf16>
    "tpu.trace_start"() <{level = 10 : i32, message = "bqk,bkd->bqd"}> : () -> ()
    %cst_123 = arith.constant dense<0.000000e+00> : vector<8x8x16xf32>
    %465 = tpu.matmul %463, %464, %cst_123 {dimension_numbers = #tpu.dot_dimension_numbers<[2], [1], [1], [2], [0, 0, 0, 1, 1, 2], [0], [0]>} : vector<8x8x8xbf16>, vector<8x8x16xbf16>, vector<8x8x16xf32> -> vector<8x8x16xf32>
    "tpu.trace_stop"() : () -> ()
    %466 = vector.extract_strided_slice %465 {offsets = [0, 0, 0], sizes = [2, 8, 16], strides = [1, 1, 1]} : vector<8x8x16xf32> to vector<2x8x16xf32>
    %467 = vector.extract_strided_slice %465 {offsets = [2, 0, 0], sizes = [2, 8, 16], strides = [1, 1, 1]} : vector<8x8x16xf32> to vector<2x8x16xf32>
    %468 = vector.extract_strided_slice %465 {offsets = [4, 0, 0], sizes = [2, 8, 16], strides = [1, 1, 1]} : vector<8x8x16xf32> to vector<2x8x16xf32>
    %469 = vector.extract_strided_slice %465 {offsets = [6, 0, 0], sizes = [2, 8, 16], strides = [1, 1, 1]} : vector<8x8x16xf32> to vector<2x8x16xf32>
    %470 = tpu.concatenate %466, %467, %468, %469 in 2 : vector<2x8x16xf32>, vector<2x8x16xf32>, vector<2x8x16xf32>, vector<2x8x16xf32> -> vector<2x8x64xf32>
    %471 = vector.shape_cast %470 : vector<2x8x64xf32> to vector<16x64xf32>
    %c10 = arith.constant 10 : index
    %c0_124 = arith.constant 0 : index
    %c0_125 = arith.constant 0 : index
    %472 = vector.load %arg6[%c10, %c0_124, %c0_125] : memref<12x64x64xbf16, #tpu.memory_space<vmem>>, vector<1x64x64xbf16>
    %473 = vector.shape_cast %472 : vector<1x64x64xbf16> to vector<64x64xbf16>
    %474 = vector.extract_strided_slice %0 {offsets = [24, 0], sizes = [1, 64], strides = [1, 1]} : vector<46x256xf32> to vector<1x64xf32>
    %475 = arith.truncf %471 : vector<16x64xf32> to vector<16x64xbf16>
    %cst_126 = arith.constant dense<0.000000e+00> : vector<16x64xf32>
    %476 = tpu.matmul %475, %473, %cst_126 {dimension_numbers = #tpu.dot_dimension_numbers<[1], [0], [0], [1], [0, 0, 1, 1], [], []>} : vector<16x64xbf16>, vector<64x64xbf16>, vector<16x64xf32> -> vector<16x64xf32>
    %477 = vector.broadcast %474 : vector<1x64xf32> to vector<16x64xf32>
    %478 = arith.addf %476, %477 : vector<16x64xf32>
    %479 = arith.addf %412, %478 : vector<16x64xf32>
    %480 = vector.extract_strided_slice %0 {offsets = [29, 0], sizes = [1, 64], strides = [1, 1]} : vector<46x256xf32> to vector<1x64xf32>
    %481 = vector.extract_strided_slice %0 {offsets = [30, 0], sizes = [1, 64], strides = [1, 1]} : vector<46x256xf32> to vector<1x64xf32>
    %cst_127 = arith.constant dense<0.000000e+00> : vector<16xf32>
    %482 = vector.multi_reduction <add>, %479, %cst_127 [1] : vector<16x64xf32> to vector<16xf32>
    %483 = vector.shape_cast %482 : vector<16xf32> to vector<16x1xf32>
    %cst_128 = arith.constant 6.400000e+01 : f32
    %484 = vector.broadcast %cst_128 : f32 to vector<16x1xf32>
    %485 = arith.divf %483, %484 : vector<16x1xf32>
    %486 = vector.broadcast %485 : vector<16x1xf32> to vector<16x64xf32>
    %487 = arith.subf %479, %486 : vector<16x64xf32>
    %488 = arith.mulf %487, %487 : vector<16x64xf32>
    %cst_129 = arith.constant dense<0.000000e+00> : vector<16xf32>
    %489 = vector.multi_reduction <add>, %488, %cst_129 [1] : vector<16x64xf32> to vector<16xf32>
    %490 = vector.shape_cast %489 : vector<16xf32> to vector<16x1xf32>
    %cst_130 = arith.constant 6.400000e+01 : f32
    %491 = vector.broadcast %cst_130 : f32 to vector<16x1xf32>
    %492 = arith.divf %490, %491 : vector<16x1xf32>
    %493 = vector.broadcast %485 : vector<16x1xf32> to vector<16x64xf32>
    %494 = arith.subf %479, %493 : vector<16x64xf32>
    %cst_131 = arith.constant 9.99999974E-6 : f32
    %495 = vector.broadcast %cst_131 : f32 to vector<16x1xf32>
    %496 = arith.addf %492, %495 : vector<16x1xf32>
    %497 = math.rsqrt %496 : vector<16x1xf32>
    %498 = vector.broadcast %497 : vector<16x1xf32> to vector<16x64xf32>
    %499 = arith.mulf %494, %498 : vector<16x64xf32>
    %500 = vector.broadcast %480 : vector<1x64xf32> to vector<16x64xf32>
    %501 = arith.mulf %499, %500 : vector<16x64xf32>
    %502 = vector.broadcast %481 : vector<1x64xf32> to vector<16x64xf32>
    %503 = arith.addf %501, %502 : vector<16x64xf32>
    %c2_132 = arith.constant 2 : index
    %c0_133 = arith.constant 0 : index
    %c0_134 = arith.constant 0 : index
    %504 = vector.load %arg7[%c2_132, %c0_133, %c0_134] : memref<6x64x128xbf16, #tpu.memory_space<vmem>>, vector<1x64x128xbf16>
    %505 = vector.shape_cast %504 : vector<1x64x128xbf16> to vector<64x128xbf16>
    %506 = vector.extract_strided_slice %0 {offsets = [25, 0], sizes = [1, 128], strides = [1, 1]} : vector<46x256xf32> to vector<1x128xf32>
    %507 = arith.truncf %503 : vector<16x64xf32> to vector<16x64xbf16>
    %cst_135 = arith.constant dense<0.000000e+00> : vector<16x128xf32>
    %508 = tpu.matmul %507, %505, %cst_135 {dimension_numbers = #tpu.dot_dimension_numbers<[1], [0], [0], [1], [0, 0, 1, 1], [], []>} : vector<16x64xbf16>, vector<64x128xbf16>, vector<16x128xf32> -> vector<16x128xf32>
    %509 = vector.broadcast %506 : vector<1x128xf32> to vector<16x128xf32>
    %510 = arith.addf %508, %509 : vector<16x128xf32>
    %cst_136 = arith.constant 0.000000e+00 : f32
    %511 = vector.broadcast %cst_136 : f32 to vector<16x128xf32>
    %512 = arith.maximumf %510, %511 : vector<16x128xf32>
    %c2_137 = arith.constant 2 : index
    %c0_138 = arith.constant 0 : index
    %c0_139 = arith.constant 0 : index
    %513 = vector.load %arg8[%c2_137, %c0_138, %c0_139] : memref<4x128x64xbf16, #tpu.memory_space<vmem>>, vector<1x128x64xbf16>
    %514 = vector.shape_cast %513 : vector<1x128x64xbf16> to vector<128x64xbf16>
    %515 = vector.extract_strided_slice %0 {offsets = [26, 0], sizes = [1, 64], strides = [1, 1]} : vector<46x256xf32> to vector<1x64xf32>
    %516 = arith.truncf %512 : vector<16x128xf32> to vector<16x128xbf16>
    %cst_140 = arith.constant dense<0.000000e+00> : vector<16x64xf32>
    %517 = tpu.matmul %516, %514, %cst_140 {dimension_numbers = #tpu.dot_dimension_numbers<[1], [0], [0], [1], [0, 0, 1, 1], [], []>} : vector<16x128xbf16>, vector<128x64xbf16>, vector<16x64xf32> -> vector<16x64xf32>
    %518 = vector.broadcast %515 : vector<1x64xf32> to vector<16x64xf32>
    %519 = arith.addf %517, %518 : vector<16x64xf32>
    %520 = arith.addf %503, %519 : vector<16x64xf32>
    %521 = vector.extract_strided_slice %0 {offsets = [31, 0], sizes = [1, 64], strides = [1, 1]} : vector<46x256xf32> to vector<1x64xf32>
    %522 = vector.extract_strided_slice %0 {offsets = [32, 0], sizes = [1, 64], strides = [1, 1]} : vector<46x256xf32> to vector<1x64xf32>
    %cst_141 = arith.constant dense<0.000000e+00> : vector<16xf32>
    %523 = vector.multi_reduction <add>, %520, %cst_141 [1] : vector<16x64xf32> to vector<16xf32>
    %524 = vector.shape_cast %523 : vector<16xf32> to vector<16x1xf32>
    %cst_142 = arith.constant 6.400000e+01 : f32
    %525 = vector.broadcast %cst_142 : f32 to vector<16x1xf32>
    %526 = arith.divf %524, %525 : vector<16x1xf32>
    %527 = vector.broadcast %526 : vector<16x1xf32> to vector<16x64xf32>
    %528 = arith.subf %520, %527 : vector<16x64xf32>
    %529 = arith.mulf %528, %528 : vector<16x64xf32>
    %cst_143 = arith.constant dense<0.000000e+00> : vector<16xf32>
    %530 = vector.multi_reduction <add>, %529, %cst_143 [1] : vector<16x64xf32> to vector<16xf32>
    %531 = vector.shape_cast %530 : vector<16xf32> to vector<16x1xf32>
    %cst_144 = arith.constant 6.400000e+01 : f32
    %532 = vector.broadcast %cst_144 : f32 to vector<16x1xf32>
    %533 = arith.divf %531, %532 : vector<16x1xf32>
    %534 = vector.broadcast %526 : vector<16x1xf32> to vector<16x64xf32>
    %535 = arith.subf %520, %534 : vector<16x64xf32>
    %cst_145 = arith.constant 9.99999974E-6 : f32
    %536 = vector.broadcast %cst_145 : f32 to vector<16x1xf32>
    %537 = arith.addf %533, %536 : vector<16x1xf32>
    %538 = math.rsqrt %537 : vector<16x1xf32>
    %539 = vector.broadcast %538 : vector<16x1xf32> to vector<16x64xf32>
    %540 = arith.mulf %535, %539 : vector<16x64xf32>
    %541 = vector.broadcast %521 : vector<1x64xf32> to vector<16x64xf32>
    %542 = arith.mulf %540, %541 : vector<16x64xf32>
    %543 = vector.broadcast %522 : vector<1x64xf32> to vector<16x64xf32>
    %544 = arith.addf %542, %543 : vector<16x64xf32>
    %c3 = arith.constant 3 : index
    %c0_146 = arith.constant 0 : index
    %c0_147 = arith.constant 0 : index
    %545 = vector.load %arg5[%c3, %c0_146, %c0_147] : memref<4x64x192xbf16, #tpu.memory_space<vmem>>, vector<1x64x192xbf16>
    %546 = vector.shape_cast %545 : vector<1x64x192xbf16> to vector<64x192xbf16>
    %547 = vector.extract_strided_slice %0 {offsets = [33, 0], sizes = [1, 192], strides = [1, 1]} : vector<46x256xf32> to vector<1x192xf32>
    %c7 = arith.constant 7 : index
    %c0_148 = arith.constant 0 : index
    %c0_149 = arith.constant 0 : index
    %548 = vector.load %arg6[%c7, %c0_148, %c0_149] : memref<12x64x64xbf16, #tpu.memory_space<vmem>>, vector<1x64x64xbf16>
    %549 = vector.shape_cast %548 : vector<1x64x64xbf16> to vector<64x64xbf16>
    %550 = vector.extract_strided_slice %0 {offsets = [34, 0], sizes = [1, 64], strides = [1, 1]} : vector<46x256xf32> to vector<1x64xf32>
    %551 = arith.truncf %544 : vector<16x64xf32> to vector<16x64xbf16>
    %cst_150 = arith.constant dense<0.000000e+00> : vector<16x192xf32>
    %552 = tpu.matmul %551, %546, %cst_150 {dimension_numbers = #tpu.dot_dimension_numbers<[1], [0], [0], [1], [0, 0, 1, 1], [], []>} : vector<16x64xbf16>, vector<64x192xbf16>, vector<16x192xf32> -> vector<16x192xf32>
    %553 = vector.broadcast %547 : vector<1x192xf32> to vector<16x192xf32>
    %554 = arith.addf %552, %553 : vector<16x192xf32>
    %555 = vector.shape_cast %554 : vector<16x192xf32> to vector<2x8x192xf32>
    %556 = vector.extract_strided_slice %555 {offsets = [0, 0, 0], sizes = [2, 8, 16], strides = [1, 1, 1]} : vector<2x8x192xf32> to vector<2x8x16xf32>
    %557 = vector.extract_strided_slice %555 {offsets = [0, 0, 16], sizes = [2, 8, 16], strides = [1, 1, 1]} : vector<2x8x192xf32> to vector<2x8x16xf32>
    %558 = vector.extract_strided_slice %555 {offsets = [0, 0, 32], sizes = [2, 8, 16], strides = [1, 1, 1]} : vector<2x8x192xf32> to vector<2x8x16xf32>
    %559 = vector.extract_strided_slice %555 {offsets = [0, 0, 48], sizes = [2, 8, 16], strides = [1, 1, 1]} : vector<2x8x192xf32> to vector<2x8x16xf32>
    %560 = tpu.concatenate %556, %557, %558, %559 in 0 : vector<2x8x16xf32>, vector<2x8x16xf32>, vector<2x8x16xf32>, vector<2x8x16xf32> -> vector<8x8x16xf32>
    %561 = vector.extract_strided_slice %555 {offsets = [0, 0, 64], sizes = [2, 8, 16], strides = [1, 1, 1]} : vector<2x8x192xf32> to vector<2x8x16xf32>
    %562 = vector.extract_strided_slice %555 {offsets = [0, 0, 80], sizes = [2, 8, 16], strides = [1, 1, 1]} : vector<2x8x192xf32> to vector<2x8x16xf32>
    %563 = vector.extract_strided_slice %555 {offsets = [0, 0, 96], sizes = [2, 8, 16], strides = [1, 1, 1]} : vector<2x8x192xf32> to vector<2x8x16xf32>
    %564 = vector.extract_strided_slice %555 {offsets = [0, 0, 112], sizes = [2, 8, 16], strides = [1, 1, 1]} : vector<2x8x192xf32> to vector<2x8x16xf32>
    %565 = tpu.concatenate %561, %562, %563, %564 in 0 : vector<2x8x16xf32>, vector<2x8x16xf32>, vector<2x8x16xf32>, vector<2x8x16xf32> -> vector<8x8x16xf32>
    %566 = vector.extract_strided_slice %555 {offsets = [0, 0, 128], sizes = [2, 8, 16], strides = [1, 1, 1]} : vector<2x8x192xf32> to vector<2x8x16xf32>
    %567 = vector.extract_strided_slice %555 {offsets = [0, 0, 144], sizes = [2, 8, 16], strides = [1, 1, 1]} : vector<2x8x192xf32> to vector<2x8x16xf32>
    %568 = vector.extract_strided_slice %555 {offsets = [0, 0, 160], sizes = [2, 8, 16], strides = [1, 1, 1]} : vector<2x8x192xf32> to vector<2x8x16xf32>
    %569 = vector.extract_strided_slice %555 {offsets = [0, 0, 176], sizes = [2, 8, 16], strides = [1, 1, 1]} : vector<2x8x192xf32> to vector<2x8x16xf32>
    %570 = tpu.concatenate %566, %567, %568, %569 in 0 : vector<2x8x16xf32>, vector<2x8x16xf32>, vector<2x8x16xf32>, vector<2x8x16xf32> -> vector<8x8x16xf32>
    %cst_151 = arith.constant 2.500000e-01 : f32
    %571 = vector.broadcast %cst_151 : f32 to vector<8x8x16xf32>
    %572 = arith.mulf %560, %571 : vector<8x8x16xf32>
    %573 = arith.truncf %572 : vector<8x8x16xf32> to vector<8x8x16xbf16>
    %574 = arith.truncf %565 : vector<8x8x16xf32> to vector<8x8x16xbf16>
    "tpu.trace_start"() <{level = 10 : i32, message = "bqd,bkd->bqk"}> : () -> ()
    %cst_152 = arith.constant dense<0.000000e+00> : vector<8x8x8xf32>
    %575 = tpu.matmul %573, %574, %cst_152 {dimension_numbers = #tpu.dot_dimension_numbers<[2], [2], [1], [1], [0, 0, 0, 1, 1, 1], [0], [0]>} : vector<8x8x16xbf16>, vector<8x8x16xbf16>, vector<8x8x8xf32> -> vector<8x8x8xf32>
    "tpu.trace_stop"() : () -> ()
    %576 = vector.shape_cast %575 : vector<8x8x8xf32> to vector<4x2x8x8xf32>
    %577 = vector.broadcast %329 : vector<1x1x8x8xf32> to vector<4x2x8x8xf32>
    %578 = arith.addf %576, %577 : vector<4x2x8x8xf32>
    %579 = vector.shape_cast %578 : vector<4x2x8x8xf32> to vector<8x8x8xf32>
    %cst_153 = arith.constant dense<0xFF800000> : vector<8x8xf32>
    %580 = vector.multi_reduction <maximumf>, %579, %cst_153 [2] : vector<8x8x8xf32> to vector<8x8xf32>
    %581 = vector.shape_cast %580 : vector<8x8xf32> to vector<8x8x1xf32>
    %582 = vector.broadcast %581 : vector<8x8x1xf32> to vector<8x8x8xf32>
    %583 = arith.subf %579, %582 : vector<8x8x8xf32>
    %584 = math.exp %583 : vector<8x8x8xf32>
    %cst_154 = arith.constant dense<0.000000e+00> : vector<8x8xf32>
    %585 = vector.multi_reduction <add>, %584, %cst_154 [2] : vector<8x8x8xf32> to vector<8x8xf32>
    %586 = vector.shape_cast %585 : vector<8x8xf32> to vector<8x8x1xf32>
    %587 = tpu.reciprocal %586 {approx = true} : vector<8x8x1xf32> -> vector<8x8x1xf32>
    %588 = vector.broadcast %587 : vector<8x8x1xf32> to vector<8x8x8xf32>
    %589 = arith.mulf %584, %588 : vector<8x8x8xf32>
    %590 = arith.truncf %589 : vector<8x8x8xf32> to vector<8x8x8xbf16>
    %591 = arith.truncf %570 : vector<8x8x16xf32> to vector<8x8x16xbf16>
    "tpu.trace_start"() <{level = 10 : i32, message = "bqk,bkd->bqd"}> : () -> ()
    %cst_155 = arith.constant dense<0.000000e+00> : vector<8x8x16xf32>
    %592 = tpu.matmul %590, %591, %cst_155 {dimension_numbers = #tpu.dot_dimension_numbers<[2], [1], [1], [2], [0, 0, 0, 1, 1, 2], [0], [0]>} : vector<8x8x8xbf16>, vector<8x8x16xbf16>, vector<8x8x16xf32> -> vector<8x8x16xf32>
    "tpu.trace_stop"() : () -> ()
    %593 = vector.extract_strided_slice %592 {offsets = [0, 0, 0], sizes = [2, 8, 16], strides = [1, 1, 1]} : vector<8x8x16xf32> to vector<2x8x16xf32>
    %594 = vector.extract_strided_slice %592 {offsets = [2, 0, 0], sizes = [2, 8, 16], strides = [1, 1, 1]} : vector<8x8x16xf32> to vector<2x8x16xf32>
    %595 = vector.extract_strided_slice %592 {offsets = [4, 0, 0], sizes = [2, 8, 16], strides = [1, 1, 1]} : vector<8x8x16xf32> to vector<2x8x16xf32>
    %596 = vector.extract_strided_slice %592 {offsets = [6, 0, 0], sizes = [2, 8, 16], strides = [1, 1, 1]} : vector<8x8x16xf32> to vector<2x8x16xf32>
    %597 = tpu.concatenate %593, %594, %595, %596 in 2 : vector<2x8x16xf32>, vector<2x8x16xf32>, vector<2x8x16xf32>, vector<2x8x16xf32> -> vector<2x8x64xf32>
    %598 = vector.shape_cast %597 : vector<2x8x64xf32> to vector<16x64xf32>
    %599 = arith.truncf %598 : vector<16x64xf32> to vector<16x64xbf16>
    %cst_156 = arith.constant dense<0.000000e+00> : vector<16x64xf32>
    %600 = tpu.matmul %599, %549, %cst_156 {dimension_numbers = #tpu.dot_dimension_numbers<[1], [0], [0], [1], [0, 0, 1, 1], [], []>} : vector<16x64xbf16>, vector<64x64xbf16>, vector<16x64xf32> -> vector<16x64xf32>
    %601 = vector.broadcast %550 : vector<1x64xf32> to vector<16x64xf32>
    %602 = arith.addf %600, %601 : vector<16x64xf32>
    %603 = arith.addf %544, %602 : vector<16x64xf32>
    %604 = vector.extract_strided_slice %0 {offsets = [40, 0], sizes = [1, 64], strides = [1, 1]} : vector<46x256xf32> to vector<1x64xf32>
    %605 = vector.extract_strided_slice %0 {offsets = [41, 0], sizes = [1, 64], strides = [1, 1]} : vector<46x256xf32> to vector<1x64xf32>
    %cst_157 = arith.constant dense<0.000000e+00> : vector<16xf32>
    %606 = vector.multi_reduction <add>, %603, %cst_157 [1] : vector<16x64xf32> to vector<16xf32>
    %607 = vector.shape_cast %606 : vector<16xf32> to vector<16x1xf32>
    %cst_158 = arith.constant 6.400000e+01 : f32
    %608 = vector.broadcast %cst_158 : f32 to vector<16x1xf32>
    %609 = arith.divf %607, %608 : vector<16x1xf32>
    %610 = vector.broadcast %609 : vector<16x1xf32> to vector<16x64xf32>
    %611 = arith.subf %603, %610 : vector<16x64xf32>
    %612 = arith.mulf %611, %611 : vector<16x64xf32>
    %cst_159 = arith.constant dense<0.000000e+00> : vector<16xf32>
    %613 = vector.multi_reduction <add>, %612, %cst_159 [1] : vector<16x64xf32> to vector<16xf32>
    %614 = vector.shape_cast %613 : vector<16xf32> to vector<16x1xf32>
    %cst_160 = arith.constant 6.400000e+01 : f32
    %615 = vector.broadcast %cst_160 : f32 to vector<16x1xf32>
    %616 = arith.divf %614, %615 : vector<16x1xf32>
    %617 = vector.broadcast %609 : vector<16x1xf32> to vector<16x64xf32>
    %618 = arith.subf %603, %617 : vector<16x64xf32>
    %cst_161 = arith.constant 9.99999974E-6 : f32
    %619 = vector.broadcast %cst_161 : f32 to vector<16x1xf32>
    %620 = arith.addf %616, %619 : vector<16x1xf32>
    %621 = math.rsqrt %620 : vector<16x1xf32>
    %622 = vector.broadcast %621 : vector<16x1xf32> to vector<16x64xf32>
    %623 = arith.mulf %618, %622 : vector<16x64xf32>
    %624 = vector.broadcast %604 : vector<1x64xf32> to vector<16x64xf32>
    %625 = arith.mulf %623, %624 : vector<16x64xf32>
    %626 = vector.broadcast %605 : vector<1x64xf32> to vector<16x64xf32>
    %627 = arith.addf %625, %626 : vector<16x64xf32>
    %c5_162 = arith.constant 5 : index
    %c0_163 = arith.constant 0 : index
    %c0_164 = arith.constant 0 : index
    %628 = vector.load %arg7[%c5_162, %c0_163, %c0_164] : memref<6x64x128xbf16, #tpu.memory_space<vmem>>, vector<1x64x128xbf16>
    %629 = vector.shape_cast %628 : vector<1x64x128xbf16> to vector<64x128xbf16>
    %630 = vector.extract_strided_slice %0 {offsets = [36, 0], sizes = [1, 128], strides = [1, 1]} : vector<46x256xf32> to vector<1x128xf32>
    %631 = arith.truncf %281 : vector<16x64xf32> to vector<16x64xbf16>
    %cst_165 = arith.constant dense<0.000000e+00> : vector<16x128xf32>
    %632 = tpu.matmul %631, %629, %cst_165 {dimension_numbers = #tpu.dot_dimension_numbers<[1], [0], [0], [1], [0, 0, 1, 1], [], []>} : vector<16x64xbf16>, vector<64x128xbf16>, vector<16x128xf32> -> vector<16x128xf32>
    %633 = vector.broadcast %630 : vector<1x128xf32> to vector<16x128xf32>
    %634 = arith.addf %632, %633 : vector<16x128xf32>
    %635 = vector.shape_cast %634 : vector<16x128xf32> to vector<2x8x128xf32>
    %636 = vector.extract_strided_slice %635 {offsets = [0, 0, 0], sizes = [2, 8, 16], strides = [1, 1, 1]} : vector<2x8x128xf32> to vector<2x8x16xf32>
    %637 = vector.extract_strided_slice %635 {offsets = [0, 0, 16], sizes = [2, 8, 16], strides = [1, 1, 1]} : vector<2x8x128xf32> to vector<2x8x16xf32>
    %638 = vector.extract_strided_slice %635 {offsets = [0, 0, 32], sizes = [2, 8, 16], strides = [1, 1, 1]} : vector<2x8x128xf32> to vector<2x8x16xf32>
    %639 = vector.extract_strided_slice %635 {offsets = [0, 0, 48], sizes = [2, 8, 16], strides = [1, 1, 1]} : vector<2x8x128xf32> to vector<2x8x16xf32>
    %640 = tpu.concatenate %636, %637, %638, %639 in 0 : vector<2x8x16xf32>, vector<2x8x16xf32>, vector<2x8x16xf32>, vector<2x8x16xf32> -> vector<8x8x16xf32>
    %641 = vector.extract_strided_slice %635 {offsets = [0, 0, 64], sizes = [2, 8, 16], strides = [1, 1, 1]} : vector<2x8x128xf32> to vector<2x8x16xf32>
    %642 = vector.extract_strided_slice %635 {offsets = [0, 0, 80], sizes = [2, 8, 16], strides = [1, 1, 1]} : vector<2x8x128xf32> to vector<2x8x16xf32>
    %643 = vector.extract_strided_slice %635 {offsets = [0, 0, 96], sizes = [2, 8, 16], strides = [1, 1, 1]} : vector<2x8x128xf32> to vector<2x8x16xf32>
    %644 = vector.extract_strided_slice %635 {offsets = [0, 0, 112], sizes = [2, 8, 16], strides = [1, 1, 1]} : vector<2x8x128xf32> to vector<2x8x16xf32>
    %645 = tpu.concatenate %641, %642, %643, %644 in 0 : vector<2x8x16xf32>, vector<2x8x16xf32>, vector<2x8x16xf32>, vector<2x8x16xf32> -> vector<8x8x16xf32>
    %c9 = arith.constant 9 : index
    %c0_166 = arith.constant 0 : index
    %c0_167 = arith.constant 0 : index
    %646 = vector.load %arg6[%c9, %c0_166, %c0_167] : memref<12x64x64xbf16, #tpu.memory_space<vmem>>, vector<1x64x64xbf16>
    %647 = vector.shape_cast %646 : vector<1x64x64xbf16> to vector<64x64xbf16>
    %648 = vector.extract_strided_slice %0 {offsets = [35, 0], sizes = [1, 64], strides = [1, 1]} : vector<46x256xf32> to vector<1x64xf32>
    %649 = arith.truncf %627 : vector<16x64xf32> to vector<16x64xbf16>
    %cst_168 = arith.constant dense<0.000000e+00> : vector<16x64xf32>
    %650 = tpu.matmul %649, %647, %cst_168 {dimension_numbers = #tpu.dot_dimension_numbers<[1], [0], [0], [1], [0, 0, 1, 1], [], []>} : vector<16x64xbf16>, vector<64x64xbf16>, vector<16x64xf32> -> vector<16x64xf32>
    %651 = vector.broadcast %648 : vector<1x64xf32> to vector<16x64xf32>
    %652 = arith.addf %650, %651 : vector<16x64xf32>
    %653 = vector.shape_cast %652 : vector<16x64xf32> to vector<2x8x64xf32>
    %654 = vector.extract_strided_slice %653 {offsets = [0, 0, 0], sizes = [2, 8, 16], strides = [1, 1, 1]} : vector<2x8x64xf32> to vector<2x8x16xf32>
    %655 = vector.extract_strided_slice %653 {offsets = [0, 0, 16], sizes = [2, 8, 16], strides = [1, 1, 1]} : vector<2x8x64xf32> to vector<2x8x16xf32>
    %656 = vector.extract_strided_slice %653 {offsets = [0, 0, 32], sizes = [2, 8, 16], strides = [1, 1, 1]} : vector<2x8x64xf32> to vector<2x8x16xf32>
    %657 = vector.extract_strided_slice %653 {offsets = [0, 0, 48], sizes = [2, 8, 16], strides = [1, 1, 1]} : vector<2x8x64xf32> to vector<2x8x16xf32>
    %658 = tpu.concatenate %654, %655, %656, %657 in 0 : vector<2x8x16xf32>, vector<2x8x16xf32>, vector<2x8x16xf32>, vector<2x8x16xf32> -> vector<8x8x16xf32>
    %cst_169 = arith.constant 2.500000e-01 : f32
    %659 = vector.broadcast %cst_169 : f32 to vector<8x8x16xf32>
    %660 = arith.mulf %658, %659 : vector<8x8x16xf32>
    %661 = arith.truncf %660 : vector<8x8x16xf32> to vector<8x8x16xbf16>
    %662 = arith.truncf %640 : vector<8x8x16xf32> to vector<8x8x16xbf16>
    "tpu.trace_start"() <{level = 10 : i32, message = "bqd,bkd->bqk"}> : () -> ()
    %cst_170 = arith.constant dense<0.000000e+00> : vector<8x8x8xf32>
    %663 = tpu.matmul %661, %662, %cst_170 {dimension_numbers = #tpu.dot_dimension_numbers<[2], [2], [1], [1], [0, 0, 0, 1, 1, 1], [0], [0]>} : vector<8x8x16xbf16>, vector<8x8x16xbf16>, vector<8x8x8xf32> -> vector<8x8x8xf32>
    "tpu.trace_stop"() : () -> ()
    %664 = vector.shape_cast %663 : vector<8x8x8xf32> to vector<4x2x8x8xf32>
    %665 = vector.broadcast %33 : vector<1x2x1x8xf32> to vector<4x2x8x8xf32>
    %666 = arith.addf %664, %665 : vector<4x2x8x8xf32>
    %667 = vector.shape_cast %666 : vector<4x2x8x8xf32> to vector<8x8x8xf32>
    %cst_171 = arith.constant dense<0xFF800000> : vector<8x8xf32>
    %668 = vector.multi_reduction <maximumf>, %667, %cst_171 [2] : vector<8x8x8xf32> to vector<8x8xf32>
    %669 = vector.shape_cast %668 : vector<8x8xf32> to vector<8x8x1xf32>
    %670 = vector.broadcast %669 : vector<8x8x1xf32> to vector<8x8x8xf32>
    %671 = arith.subf %667, %670 : vector<8x8x8xf32>
    %672 = math.exp %671 : vector<8x8x8xf32>
    %cst_172 = arith.constant dense<0.000000e+00> : vector<8x8xf32>
    %673 = vector.multi_reduction <add>, %672, %cst_172 [2] : vector<8x8x8xf32> to vector<8x8xf32>
    %674 = vector.shape_cast %673 : vector<8x8xf32> to vector<8x8x1xf32>
    %675 = tpu.reciprocal %674 {approx = true} : vector<8x8x1xf32> -> vector<8x8x1xf32>
    %676 = vector.broadcast %675 : vector<8x8x1xf32> to vector<8x8x8xf32>
    %677 = arith.mulf %672, %676 : vector<8x8x8xf32>
    %678 = arith.truncf %677 : vector<8x8x8xf32> to vector<8x8x8xbf16>
    %679 = arith.truncf %645 : vector<8x8x16xf32> to vector<8x8x16xbf16>
    "tpu.trace_start"() <{level = 10 : i32, message = "bqk,bkd->bqd"}> : () -> ()
    %cst_173 = arith.constant dense<0.000000e+00> : vector<8x8x16xf32>
    %680 = tpu.matmul %678, %679, %cst_173 {dimension_numbers = #tpu.dot_dimension_numbers<[2], [1], [1], [2], [0, 0, 0, 1, 1, 2], [0], [0]>} : vector<8x8x8xbf16>, vector<8x8x16xbf16>, vector<8x8x16xf32> -> vector<8x8x16xf32>
    "tpu.trace_stop"() : () -> ()
    %681 = vector.extract_strided_slice %680 {offsets = [0, 0, 0], sizes = [2, 8, 16], strides = [1, 1, 1]} : vector<8x8x16xf32> to vector<2x8x16xf32>
    %682 = vector.extract_strided_slice %680 {offsets = [2, 0, 0], sizes = [2, 8, 16], strides = [1, 1, 1]} : vector<8x8x16xf32> to vector<2x8x16xf32>
    %683 = vector.extract_strided_slice %680 {offsets = [4, 0, 0], sizes = [2, 8, 16], strides = [1, 1, 1]} : vector<8x8x16xf32> to vector<2x8x16xf32>
    %684 = vector.extract_strided_slice %680 {offsets = [6, 0, 0], sizes = [2, 8, 16], strides = [1, 1, 1]} : vector<8x8x16xf32> to vector<2x8x16xf32>
    %685 = tpu.concatenate %681, %682, %683, %684 in 2 : vector<2x8x16xf32>, vector<2x8x16xf32>, vector<2x8x16xf32>, vector<2x8x16xf32> -> vector<2x8x64xf32>
    %686 = vector.shape_cast %685 : vector<2x8x64xf32> to vector<16x64xf32>
    %c11 = arith.constant 11 : index
    %c0_174 = arith.constant 0 : index
    %c0_175 = arith.constant 0 : index
    %687 = vector.load %arg6[%c11, %c0_174, %c0_175] : memref<12x64x64xbf16, #tpu.memory_space<vmem>>, vector<1x64x64xbf16>
    %688 = vector.shape_cast %687 : vector<1x64x64xbf16> to vector<64x64xbf16>
    %689 = vector.extract_strided_slice %0 {offsets = [37, 0], sizes = [1, 64], strides = [1, 1]} : vector<46x256xf32> to vector<1x64xf32>
    %690 = arith.truncf %686 : vector<16x64xf32> to vector<16x64xbf16>
    %cst_176 = arith.constant dense<0.000000e+00> : vector<16x64xf32>
    %691 = tpu.matmul %690, %688, %cst_176 {dimension_numbers = #tpu.dot_dimension_numbers<[1], [0], [0], [1], [0, 0, 1, 1], [], []>} : vector<16x64xbf16>, vector<64x64xbf16>, vector<16x64xf32> -> vector<16x64xf32>
    %692 = vector.broadcast %689 : vector<1x64xf32> to vector<16x64xf32>
    %693 = arith.addf %691, %692 : vector<16x64xf32>
    %694 = arith.addf %627, %693 : vector<16x64xf32>
    %695 = vector.extract_strided_slice %0 {offsets = [42, 0], sizes = [1, 64], strides = [1, 1]} : vector<46x256xf32> to vector<1x64xf32>
    %696 = vector.extract_strided_slice %0 {offsets = [43, 0], sizes = [1, 64], strides = [1, 1]} : vector<46x256xf32> to vector<1x64xf32>
    %cst_177 = arith.constant dense<0.000000e+00> : vector<16xf32>
    %697 = vector.multi_reduction <add>, %694, %cst_177 [1] : vector<16x64xf32> to vector<16xf32>
    %698 = vector.shape_cast %697 : vector<16xf32> to vector<16x1xf32>
    %cst_178 = arith.constant 6.400000e+01 : f32
    %699 = vector.broadcast %cst_178 : f32 to vector<16x1xf32>
    %700 = arith.divf %698, %699 : vector<16x1xf32>
    %701 = vector.broadcast %700 : vector<16x1xf32> to vector<16x64xf32>
    %702 = arith.subf %694, %701 : vector<16x64xf32>
    %703 = arith.mulf %702, %702 : vector<16x64xf32>
    %cst_179 = arith.constant dense<0.000000e+00> : vector<16xf32>
    %704 = vector.multi_reduction <add>, %703, %cst_179 [1] : vector<16x64xf32> to vector<16xf32>
    %705 = vector.shape_cast %704 : vector<16xf32> to vector<16x1xf32>
    %cst_180 = arith.constant 6.400000e+01 : f32
    %706 = vector.broadcast %cst_180 : f32 to vector<16x1xf32>
    %707 = arith.divf %705, %706 : vector<16x1xf32>
    %708 = vector.broadcast %700 : vector<16x1xf32> to vector<16x64xf32>
    %709 = arith.subf %694, %708 : vector<16x64xf32>
    %cst_181 = arith.constant 9.99999974E-6 : f32
    %710 = vector.broadcast %cst_181 : f32 to vector<16x1xf32>
    %711 = arith.addf %707, %710 : vector<16x1xf32>
    %712 = math.rsqrt %711 : vector<16x1xf32>
    %713 = vector.broadcast %712 : vector<16x1xf32> to vector<16x64xf32>
    %714 = arith.mulf %709, %713 : vector<16x64xf32>
    %715 = vector.broadcast %695 : vector<1x64xf32> to vector<16x64xf32>
    %716 = arith.mulf %714, %715 : vector<16x64xf32>
    %717 = vector.broadcast %696 : vector<1x64xf32> to vector<16x64xf32>
    %718 = arith.addf %716, %717 : vector<16x64xf32>
    %c3_182 = arith.constant 3 : index
    %c0_183 = arith.constant 0 : index
    %c0_184 = arith.constant 0 : index
    %719 = vector.load %arg7[%c3_182, %c0_183, %c0_184] : memref<6x64x128xbf16, #tpu.memory_space<vmem>>, vector<1x64x128xbf16>
    %720 = vector.shape_cast %719 : vector<1x64x128xbf16> to vector<64x128xbf16>
    %721 = vector.extract_strided_slice %0 {offsets = [38, 0], sizes = [1, 128], strides = [1, 1]} : vector<46x256xf32> to vector<1x128xf32>
    %722 = arith.truncf %718 : vector<16x64xf32> to vector<16x64xbf16>
    %cst_185 = arith.constant dense<0.000000e+00> : vector<16x128xf32>
    %723 = tpu.matmul %722, %720, %cst_185 {dimension_numbers = #tpu.dot_dimension_numbers<[1], [0], [0], [1], [0, 0, 1, 1], [], []>} : vector<16x64xbf16>, vector<64x128xbf16>, vector<16x128xf32> -> vector<16x128xf32>
    %724 = vector.broadcast %721 : vector<1x128xf32> to vector<16x128xf32>
    %725 = arith.addf %723, %724 : vector<16x128xf32>
    %cst_186 = arith.constant 0.000000e+00 : f32
    %726 = vector.broadcast %cst_186 : f32 to vector<16x128xf32>
    %727 = arith.maximumf %725, %726 : vector<16x128xf32>
    %c3_187 = arith.constant 3 : index
    %c0_188 = arith.constant 0 : index
    %c0_189 = arith.constant 0 : index
    %728 = vector.load %arg8[%c3_187, %c0_188, %c0_189] : memref<4x128x64xbf16, #tpu.memory_space<vmem>>, vector<1x128x64xbf16>
    %729 = vector.shape_cast %728 : vector<1x128x64xbf16> to vector<128x64xbf16>
    %730 = vector.extract_strided_slice %0 {offsets = [39, 0], sizes = [1, 64], strides = [1, 1]} : vector<46x256xf32> to vector<1x64xf32>
    %731 = arith.truncf %727 : vector<16x128xf32> to vector<16x128xbf16>
    %cst_190 = arith.constant dense<0.000000e+00> : vector<16x64xf32>
    %732 = tpu.matmul %731, %729, %cst_190 {dimension_numbers = #tpu.dot_dimension_numbers<[1], [0], [0], [1], [0, 0, 1, 1], [], []>} : vector<16x128xbf16>, vector<128x64xbf16>, vector<16x64xf32> -> vector<16x64xf32>
    %733 = vector.broadcast %730 : vector<1x64xf32> to vector<16x64xf32>
    %734 = arith.addf %732, %733 : vector<16x64xf32>
    %735 = arith.addf %718, %734 : vector<16x64xf32>
    %736 = vector.extract_strided_slice %0 {offsets = [44, 0], sizes = [1, 64], strides = [1, 1]} : vector<46x256xf32> to vector<1x64xf32>
    %737 = vector.extract_strided_slice %0 {offsets = [45, 0], sizes = [1, 64], strides = [1, 1]} : vector<46x256xf32> to vector<1x64xf32>
    %cst_191 = arith.constant dense<0.000000e+00> : vector<16xf32>
    %738 = vector.multi_reduction <add>, %735, %cst_191 [1] : vector<16x64xf32> to vector<16xf32>
    %739 = vector.shape_cast %738 : vector<16xf32> to vector<16x1xf32>
    %cst_192 = arith.constant 6.400000e+01 : f32
    %740 = vector.broadcast %cst_192 : f32 to vector<16x1xf32>
    %741 = arith.divf %739, %740 : vector<16x1xf32>
    %742 = vector.broadcast %741 : vector<16x1xf32> to vector<16x64xf32>
    %743 = arith.subf %735, %742 : vector<16x64xf32>
    %744 = arith.mulf %743, %743 : vector<16x64xf32>
    %cst_193 = arith.constant dense<0.000000e+00> : vector<16xf32>
    %745 = vector.multi_reduction <add>, %744, %cst_193 [1] : vector<16x64xf32> to vector<16xf32>
    %746 = vector.shape_cast %745 : vector<16xf32> to vector<16x1xf32>
    %cst_194 = arith.constant 6.400000e+01 : f32
    %747 = vector.broadcast %cst_194 : f32 to vector<16x1xf32>
    %748 = arith.divf %746, %747 : vector<16x1xf32>
    %749 = vector.broadcast %741 : vector<16x1xf32> to vector<16x64xf32>
    %750 = arith.subf %735, %749 : vector<16x64xf32>
    %cst_195 = arith.constant 9.99999974E-6 : f32
    %751 = vector.broadcast %cst_195 : f32 to vector<16x1xf32>
    %752 = arith.addf %748, %751 : vector<16x1xf32>
    %753 = math.rsqrt %752 : vector<16x1xf32>
    %754 = vector.broadcast %753 : vector<16x1xf32> to vector<16x64xf32>
    %755 = arith.mulf %750, %754 : vector<16x64xf32>
    %756 = vector.broadcast %736 : vector<1x64xf32> to vector<16x64xf32>
    %757 = arith.mulf %755, %756 : vector<16x64xf32>
    %758 = vector.broadcast %737 : vector<1x64xf32> to vector<16x64xf32>
    %759 = arith.addf %757, %758 : vector<16x64xf32>
    %760 = arith.truncf %759 : vector<16x64xf32> to vector<16x64xbf16>
    %c3_196 = arith.constant 3 : index
    %c0_197 = arith.constant 0 : index
    %c0_198 = arith.constant 0 : index
    %761 = vector.load %arg6[%c3_196, %c0_197, %c0_198] : memref<12x64x64xbf16, #tpu.memory_space<vmem>>, vector<1x64x64xbf16>
    %762 = vector.shape_cast %761 : vector<1x64x64xbf16> to vector<64x64xbf16>
    %cst_199 = arith.constant dense<0.000000e+00> : vector<16x64xf32>
    %763 = tpu.matmul %760, %762, %cst_199 {dimension_numbers = #tpu.dot_dimension_numbers<[1], [0], [0], [1], [0, 0, 1, 1], [], []>} : vector<16x64xbf16>, vector<64x64xbf16>, vector<16x64xf32> -> vector<16x64xf32>
    %764 = vector.extract_strided_slice %763 {offsets = [0, 0], sizes = [16, 17], strides = [1, 1]} : vector<16x64xf32> to vector<16x17xf32>
    %765 = vector.extract_strided_slice %0 {offsets = [3, 0], sizes = [1, 17], strides = [1, 1]} : vector<46x256xf32> to vector<1x17xf32>
    %766 = vector.broadcast %765 : vector<1x17xf32> to vector<16x17xf32>
    %767 = arith.addf %764, %766 : vector<16x17xf32>
    %c0_200 = arith.constant 0 : index
    %c0_201 = arith.constant 0 : index
    %768 = vector.load %arg9[%c0_200, %c0_201] : memref<16x17xf32, #tpu.memory_space<vmem>>, vector<16x17xf32>
    tpu.vector_store %arg9[%c0_200, %c0_201], %767 {strides = array<i32>} : memref<16x17xf32, #tpu.memory_space<vmem>>, vector<16x17xf32>,
    return
  }
}

</mosaic_0001>

<bundles_post_ra>
// kernel: squeeze.1
= control target key start
LH: loop header
LB: loop body
LE: loop exit
PB: predicated region body
PF: predicated region fallthrough
CT: control target
= control target key end

     0   :  { %s77_s0 = inlined_call_operand.vmem [shape: f32[16], index: 0, kind: input, shape index: {}]   ;;  %s78_s1 = inlined_call_operand.hbm [shape: f32[2,8], index: 1, kind: output, shape index: {}]  }
   0x1   :  { %v6_v0 = vld [vmem:[%s77_s0] sm:$0x1] }
   0x2   :  { %2 = vsyncpa [#allocation1], 0  ;;  %7 = vst [vmem:[#allocation3] sm:$0x1] %v6_v0  ;;  %vm9_vm0 = vcmask 64512   ;;  %s59_s0 = smov 120  }
   0x3   :  { %s60_s8 = smov [#allocation0]  }
   0x4   :  { %s29_s9 = sshll.u32 %s60_s8, 4  ;;  %s30_s9 = int_to_ptr.vmem [resolvable:$true] %s29_s9 }
   0x5   :  { %s37_s10 = scalar_lea.vmem %s30_s9, 32  ;;  %p42_p1 = scmp.lt.s32.totalorder %s30_s9, %s30_s9 }
   0x6   :  { %p38_p0 = scmp.ne.s32.totalorder %s30_s9, %s37_s10  ;;  %p43_p2 = scmp.lt.s32.totalorder %s37_s10, %s37_s10 }
   0x8   :  { %p44_p3 = por %p43_p2, %p42_p1 }
   0x9   :  { %v11_v1 = vld [vmem:[#allocation3] sm:$0x1]  }
   0xa   :  { %v8_v2 = vld [vmem:[#allocation3] sm:$0x1]   ;;  %12 = vrot.lane.b32.xlu0 %v11_v1, %s59_s0  ;;  %p45_p4 = pnand %p44_p3, %p38_p0 }
   0xb   :  { %10 = vst.msk [vmem:[#allocation2] sm:$0x1] %vm9_vm0, %v8_v2  }
  0x7c   :  { %v13_v3 = vpop.permute.xlu0 %12  }
  0x7d   :  { %16 = vst.msk [vmem:[#allocation2 + $0x1] sm:$0x1] %vm9_vm0, %v13_v3  }
  0x84   :  { %v21_v4 = vld [vmem:[#allocation2] sm:$0x3] }
  0x85   :  { %24 = vst [vmem:[#allocation0] sm:$0x3] %v21_v4 }
  0x86   :  { %48 = shalt.err (!%p45_p4)
}
  0x87   :  { %32 = dma.vmem_to_hbm [thread:$0]  %s30_s9, 32, %s78_s1, [#allocation1]  }
  0x88   :  { %57 = dma.done.wait [#allocation1], 32  }
  0x89   :  { %58 = vsyncadd [#allocation1], 4294967264 }
  0x8a   :  { %34 = vsyncpa [#allocation1], 1 }

// kernel: transformer_tts_forward.1
= control target key start
LH: loop header
LB: loop body
LE: loop exit
PB: predicated region body
PF: predicated region fallthrough
CT: control target
= control target key end

     0   :  { %14 = vsyncpa [#allocation3], 0  ;;  %s12995_s0 = inlined_call_operand.vmem [shape: s32[2,8], index: 0, kind: input, shape index: {}]   ;;  %s12996_s1 = inlined_call_operand.vmem [shape: f32[2,64], index: 1, kind: input, shape index: {}]   ;;  %s12997_s2 = inlined_call_operand.vmem [shape: f32[2,8,16], index: 2, kind: input, shape index: {}]   ;;  %s12998_s3 = inlined_call_operand.vmem [shape: f32[96,64], index: 3, kind: input, shape index: {}]   ;;  %s12999_s4 = inlined_call_operand.hbm [shape: f32[46,256], index: 4, kind: input, shape index: {}]   ;;  %s13000_s5 = inlined_call_operand.hbm [shape: bf16[4,64,192], index: 5, kind: input, shape index: {}]   ;;  %s13001_s6 = inlined_call_operand.vmem [shape: bf16[12,64,64], index: 6, kind: input, shape index: {}]   ;;  %s13002_s7 = inlined_call_operand.hbm [shape: bf16[6,64,128], index: 7, kind: input, shape index: {}]   ;;  %s13003_s8 = inlined_call_operand.vmem [shape: bf16[4,128,64], index: 8, kind: input, shape index: {}]   ;;  %s13004_s9 = inlined_call_operand.vmem [shape: f32[16,17], index: 9, kind: output, shape index: {}]  }
   0x1   :  { %15 = vsyncpa [#allocation5], 0  ;;  %s11125_s30 = smov [#allocation4]  }
   0x2   :  { %s41_s10 = sshll.u32 %s11125_s30, 4  ;;  %s42_s10 = int_to_ptr.vmem [resolvable:$true] %s41_s10 }
   0x3   :  { %s11069_s11 = scalar_lea.vmem %s42_s10, 4096  ;;  %p11074_p1 = scmp.lt.s32.totalorder %s42_s10, %s42_s10 }
   0x4   :  { %p11070_p0 = scmp.ne.s32.totalorder %s42_s10, %s11069_s11  ;;  %p11075_p2 = scmp.lt.s32.totalorder %s11069_s11, %s11069_s11 }
   0x6   :  { %p11076_p3 = por %p11075_p2, %p11074_p1 }
   0x8   :  { %p11077_p4 = pnand %p11076_p3, %p11070_p0 }
   0xa   :  { %11080 = shalt.err (!%p11077_p4)
}
   0xb   :  { %s11126_s12 = smov 128   ;;  %s11127_s13 = smov 8  }
   0xc   :  { %47 = dma.hbm_to_vmem [thread:$0]  %s13000_s5, 4096, %s42_s10, [#allocation5], %s11126_s12, %s11126_s12, %s11127_s13  }
   0xd   :  { %s11128_s16 = smov [#allocation2]  }
   0xe   :  { %s29_s17 = sshll.u32 %s11128_s16, 4  ;;  %s30_s17 = int_to_ptr.vmem [resolvable:$true] %s29_s17 }
   0xf   :  { %s11089_s18 = scalar_lea.vmem %s30_s17, 1536  ;;  %p11094_p6 = scmp.lt.s32.totalorder %s30_s17, %s30_s17 }
  0x10   :  { %p11090_p5 = scmp.ne.s32.totalorder %s30_s17, %s11089_s18  ;;  %p11095_p7 = scmp.lt.s32.totalorder %s11089_s18, %s11089_s18 }
  0x12   :  { %p11096_p8 = por %p11095_p7, %p11094_p6 }
  0x14   :  { %p11097_p9 = pnand %p11096_p8, %p11090_p5 }
  0x16   :  { %11100 = shalt.err (!%p11097_p9)
}
  0x17   :  { %s11129_s19 = smov 256   ;;  %s11130_s20 = smov 16  }
  0x18   :  { %35 = dma.hbm_to_vmem [thread:$0]  %s12999_s4, 1536, %s30_s17, [#allocation3], %s11129_s19, %s11129_s19, %s11130_s20  }
  0x19   :  { %s11131_s23 = smov [#allocation6]  }
  0x1a   :  { %s55_s24 = sshll.u32 %s11131_s23, 4  ;;  %s56_s24 = int_to_ptr.vmem [resolvable:$true] %s55_s24 }
  0x1b   :  { %s11109_s5 = scalar_lea.vmem %s56_s24, 3072  ;;  %p11114_p11 = scmp.lt.s32.totalorder %s56_s24, %s56_s24 }
  0x1c   :  { %p11110_p10 = scmp.ne.s32.totalorder %s56_s24, %s11109_s5  ;;  %p11115_p12 = scmp.lt.s32.totalorder %s11109_s5, %s11109_s5 }
  0x1e   :  { %p11116_p13 = por %p11115_p12, %p11114_p11 }
  0x20   :  { %p11117_p0 = pnand %p11116_p13, %p11110_p10 }
  0x22   :  { %11120 = shalt.err (!%p11117_p0)
}
  0x23   :  { %s11132_s25 = smov 64   ;;  %s11133_s26 = smov 4  }
  0x24   :  { %61 = dma.hbm_to_vmem [thread:$0]  %s13002_s7, 3072, %s56_s24, [#allocation5], %s11132_s25, %s11132_s25, %s11133_s26  }
  0x25   :  { %11121 = dma.done.wait [#allocation3], 1536  }
  0x26   :  { %11122 = vsyncadd [#allocation3], 4294965760 }
  0x27   :  { %11123 = dma.done.wait [#allocation5], 7168  }
  0x28   :  { %11124 = vsyncadd [#allocation5], 4294960128  ;;  %v85_v0 = vlaneseq  ;;  %v11134_v1 = vmov 0.0   ;;  %vm11135_vm0 = vmmov 0   ;;  %v11219_v5 = vld [vmem:[%s12995_s0] sm:$0x3] }
  0x29   :  { %9601 = vmatprep.subr.bf16.mxu1 %v11134_v1  ;;  %9609 = vmatprep.mubr.msk.bf16.mxu1 %vm11135_vm0, %v11134_v1  ;;  %v10672_v7 = vld [vmem:[%s13001_s6 + $0x18] sm:$0xff]   ;;  %v10673_v9 = vld [vmem:[%s13001_s6 + $0x10] sm:$0xff]   ;;  %v10674_v11 = vld [vmem:[%s13001_s6 + $0x8] sm:$0xff]   ;;  %vm232_vm1 = vcmask 523264   ;;  %vm111_vm2 = vcmask 261120   ;;  %v11136_v31 = vmov 0  }
  0x2a   :  { %v11208_v2 = vshrl.u32 %v85_v0, 7  ;;  %9602 = vmatpush3.bf16.msra.mxu1 %v10672_v7  ;;  %v110_v10 = vld [vmem:[%s12998_s3 + $0x18] sm:$0xff]  ;;  %v109_v12 = vld [vmem:[%s12998_s3 + $0x10] sm:$0xff]  ;;  %v108_v13 = vld [vmem:[%s12998_s3 + $0x8] sm:$0xff]  ;;  %v11259_v19 = vand.u32 127, %v85_v0  ;;  %s11138_s27 = smov 96  }
  0x2b   :  { %9603 = vmatprep.subr.bf16.mxu1 %v11134_v1  ;;  %9590 = vmatprep.subr.mxu0 %v110_v10  ;;  %v107_v14 = vld [vmem:[%s12998_s3] sm:$0xff]  ;;  %v10678_v18 = vld [vmem:[#allocation4 + $0x34] ss:$8 sps:$4 sm:$0xff]   ;;  %v10676_v23 = vld [vmem:[#allocation4 + $0x30] ss:$8 sps:$4 sm:$0xff]   ;;  %s11139_s28 = smov 112  }
  0x2c   :  { %v11211_v3 = vsub.s32 0, %v11208_v2  ;;  %v11214_v4 = vsub.s32 1, %v11208_v2  ;;  %9591 = vmatpush3.msra.mxu0 %v110_v10  ;;  %v10675_v15 = vld [vmem:[%s13001_s6] sm:$0xff]   ;;  %v10684_v27 = vld [vmem:[#allocation4 + $0x14] ss:$8 sps:$4 sm:$0xff]   ;;  %v11294_v57 = vsub.s32 4, %v11208_v2  ;;  %vm3445_vm15 = vcmp.gt.s32.totalorder %v11259_v19, %v11208_v2 }
  0x2d   :  { %9592 = vmatprep.subr.mxu0 %v109_v12  ;;  %v194_v16 = vld [vmem:[%s12996_s1] sm:$0x3]  ;;  %v10681_v24 = vld [vmem:[#allocation4 + $0x24] ss:$8 sps:$4 sm:$0xff]   ;;  %v10682_v28 = vld [vmem:[#allocation4 + $0x10] ss:$8 sps:$4 sm:$0xff]  }
  0x2e   :  { %v90_v6 = vrot.slane %v11219_v5, %v11211_v3  ;;  %v97_v8 = vrot.slane %v11219_v5, %v11214_v4  ;;  %9604 = vmatpush3.bf16.msra.mxu1 %v10673_v9  ;;  %9593 = vmatpush3.msra.mxu0 %v109_v12  ;;  %v203_v17 = vpack.c.bf16 %v194_v16, %v194_v16  ;;  %v10679_v26 = vld [vmem:[#allocation4 + $0x20] ss:$8 sps:$4 sm:$0xff]   ;;  %v10687_v29 = vld [vmem:[#allocation4 + $0x4] ss:$8 sps:$4 sm:$0xff]   ;;  %v11137_v36 = vmov 1966171168  }
  0x2f   :  { %9605 = vmatprep.subr.bf16.mxu1 %v11134_v1  ;;  %9594 = vmatprep.subr.mxu0 %v108_v13  ;;  %v10685_v30 = vld [vmem:[#allocation4] ss:$8 sps:$4 sm:$0xff]   ;;  %v280_v37 = vunpack.c.l.s4 %v11137_v36  ;;  %s11140_s4 = smov 80   ;;  %vm517_vm5 = vcmask 130048   ;;  %vm1033_vm6 = vcmask 1043456   ;;  %vm313_vm7 = vcmp.eq.s32.totalorder %v11219_v5, 0 }
  0x30   :  { %92 = vbcast.lane.b32.xlu0 %v90_v6, 256  ;;  %9595 = vmatpush3.msra.mxu0 %v108_v13  ;;  %v11269_v38 = vld [vmem:[#allocation2] sm:$0xff]  ;;  %v75_v60 = vld [vmem:[#allocation2 + $0x8] sm:$0xff]  ;;  %vm925_vm8 = vcmask 64512   ;;  %s11141_s14 = smov 32   ;;  %s11142_s15 = smov 48  }
  0x31   :  { %9596 = vmatprep.subr.mxu0 %v107_v14  ;;  %v281_v39 = vunpack.c.0.s8 %v280_v37  ;;  %v207_v40 = vrot.slane %v11269_v38, %v11211_v3  ;;  %v193_v46 = vld [vmem:[%s12998_s3 + $0x20] sm:$0xff]  ;;  %v359_v58 = vrot.slane %v11269_v38, %v11294_v57  ;;  %v363_v63 = vrot.slane %v75_v60, %v11294_v57 }
  0x32   :  { %9606 = vmatpush3.bf16.msra.mxu1 %v10674_v11  ;;  %9597 = vmatpush3.msra.mxu0 %v107_v14  ;;  %vm1427_vm9 = vcmask 392192   ;;  %vm3212_vm11 = vcmp.gt.s32.totalorder %v11208_v2, 0 }
  0x33   :  { %9607 = vmatprep.subr.bf16.mxu1 %v11134_v1  ;;  %415 = vmatprep.subr.bf16.mxu0 %v10678_v18  ;;  %v11274_v41 = vsub.s32 %v281_v39, %v11208_v2 }
  0x34   :  { %99 = vbcast.lane.b32.xlu0 %v97_v8, 256 }
  0x36   :  { %9608 = vmatpush3.bf16.msra.mxu1 %v10675_v15 }
  0x37   :  { %9625 = vmatprep.subr.bf16.mxu1 %v11134_v1 }
  0x39   :  { %9610 = vmatmul.mubr.msk.bf16.vlgmr.msra.gmra.mxu1 %vm232_vm1, %v203_v17 }
  0x3a   :  { %9627 = vmatprep.mubr.msk.bf16.mxu1 %vm11135_vm0, %v11134_v1 }
  0xa2   :  { %v93_v20 = vpop.permute.xlu0 %92 }
  0xa3   :  { %vm101_vm3 = vcmp.eq.s32.totalorder %v11259_v19, %v93_v20 }
  0xa4   :  { %v8878_v21 = vsel %vm101_vm3, 1.0, %v11134_v1 }
  0xa5   :  { %9598 = vmatprep.mubr.msk.f32.mxu0 %vm111_vm2, %v8878_v21 }
  0xa6   :  { %v100_v22 = vpop.permute.xlu0 %99 }
  0xa7   :  { %vm102_vm4 = vcmp.eq.s32.totalorder %v11259_v19, %v100_v22 }
  0xa8   :  { %v8879_v25 = vsel %vm102_vm4, 1.0, %v11134_v1 }
  0xa9   :  { %9599 = vmatmul.mubr.msk.f32.vlgmr.msra.gmra.mxu0 %vm111_vm2, %v8879_v25 }
  0xaa   :  { %416 = vmatpush1.bf16.msra.mxu0 %v10676_v23  ;;  %439 = vmatprep.mubr.bf16.mxu0 %v11136_v31 }
  0xab   :  { %417 = vmatprep.subr.bf16.mxu0 %v10681_v24 }
  0xae   :  { %418 = vmatpush1.bf16.msra.mxu0 %v10679_v26 }
  0xaf   :  { %419 = vmatprep.subr.bf16.mxu0 %v10684_v27 }
  0xb2   :  { %420 = vmatpush1.bf16.msra.mxu0 %v10682_v28 }
  0xb3   :  { %421 = vmatprep.subr.bf16.mxu0 %v10687_v29 }
  0xb6   :  { %422 = vmatpush1.bf16.msra.mxu0 %v10685_v30 }
  0xb7   :  { %9613 = vmatprep.subr.bf16.mxu0 %v11134_v1 }
  0xf9   :  { %v270_v32 = vpop.f32.mrf.mxu1 }
  0xfa   :  { %v271_v42 = vadd.f32 %v270_v32, %v207_v40 }
  0xfb   :  { %v9611_v33 = vpop.f32.mrf.mxu1 }
  0xfc   :  { %v285_v43 = vrot.slane %v271_v42, %v11274_v41 }
  0xfd   :  { %v273_v34 = vpop.f32.mrf.mxu1 }
  0xfe   :  { %v286_v44 = vcombine.high %v285_v43, %v285_v43  ;;  %v293_v47 = vrot.slane %v285_v43, %v11274_v41 }
  0xff   :  { %v9612_v35 = vpop.f32.mrf.mxu1 }
 0x100   :  { %v300_v45 = vrot.slane %v286_v44, %v11274_v41  ;;  %v304_v53 = vrot.slane %v293_v47, %v11211_v3 }
 0x102   :  { %v308_v50 = vrot.slane %v300_v45, %v11211_v3 }
 0x169   :  { %v9600_v48 = vpop.f32.mrf.mxu0 }
 0x16a   :  { %v277_v49 = vadd.f32 %v9600_v48, %v193_v46 }
 0x16b   :  { %v184_v51 = vpop.f32.mrf.mxu0 }
 0x16c   :  { %v276_v52 = vadd.f32 %v193_v46, %v184_v51  ;;  %v11284_v54 = vadd.f32 %v308_v50, %v277_v49 }
 0x16e   :  { %v11286_v55 = vadd.f32 %v304_v53, %v276_v52 }
 0x170   :  { %v355_v56 = vpack.c.bf16 %v11284_v54, %v11286_v55 }
 0x172   :  { %8903 = vmatmul.mubr.msk.bf16.vlgmr.msra.gmra.mxu0 %vm232_vm1, %v355_v56 }
 0x173   :  { %9615 = vmatprep.mubr.msk.bf16.mxu0 %vm11135_vm0, %v11134_v1 }
 0x232   :  { %v441_v59 = vpop.f32.mrf.mxu0 }
 0x233   :  { %v442_v61 = vadd.f32 %v441_v59, %v359_v58 }
 0x234   :  { %v443_v62 = vpop.f32.mrf.mxu0 }
 0x235   :  { %458 = vrot.lane.b32.xlu0 %v442_v61, %s11138_s27  ;;  %452 = vrot.lane.b32.xlu1 %v442_v61, %s11139_s28  ;;  %v11301_v8 = vadd.f32 %v443_v62, %v363_v63  ;;  %v506_v10 = vpack.c.bf16 %v442_v61, %v442_v61  ;;  %v490_v26 = vmul.f32 0.25, %v442_v61 }
 0x236   :  { %v445_v0 = vpop.f32.mrf.mxu0 }
 0x237   :  { %v446_v6 = vadd.f32 %v445_v0, %v359_v58  ;;  %v498_v29 = vpack.c.bf16 %v490_v26, %v490_v26 }
 0x238   :  { %v447_v7 = vpop.f32.mrf.mxu0 }
 0x239   :  { %v11303_v9 = vadd.f32 %v447_v7, %v363_v63  ;;  %464 = vrot.lane.b32.xlu0 %v442_v61, %s11140_s4  ;;  %454 = vrot.lane.b32.xlu1 %v446_v6, %s11139_s28  ;;  %v507_v12 = vpack.c.bf16 %v446_v6, %v446_v6  ;;  %v491_v33 = vmul.f32 0.25, %v446_v6  ;;  %v1022_v61 = vpack.c.bf16 %v11301_v8, %v11301_v8 }
 0x23b   :  { %v11309_v11 = vpack.i.bf16 %v11303_v9, %v11301_v8  ;;  %v499_v34 = vpack.c.bf16 %v491_v33, %v491_v33  ;;  %v1035_v0 = vsel %vm1033_vm6, %v1022_v61, 0 }
 0x23d   :  { %460 = vrot.lane.b32.xlu1 %v446_v6, %s11138_s27  ;;  %515 = vrot.lane.b32.xlu0 %v506_v10, %s11132_s25 }
 0x241   :  { %466 = vrot.lane.b32.xlu1 %v446_v6, %s11140_s4  ;;  %v1023_v6 = vpack.c.bf16 %v11303_v9, %v11303_v9  ;;  %v314_v9 = vsel %vm313_vm7, -1e+09, %v11134_v1 }
 0x242   :  { %v322_v10 = vrot.slane %v314_v9, %v11274_v41 }
 0x243   :  { %v1081_v8 = vsel %vm1033_vm6, %v1023_v6, 0 }
 0x245   :  { %565 = vrot.lane.b32.xlu1 %v507_v12, %s11132_s25  ;;  %v330_v12 = vrot.slane %v322_v10, %v11274_v41 }
 0x2a7   :  { %v459_v13 = vpop.permute.xlu0 %458  ;;  %v453_v14 = vpop.permute.xlu1 %452 }
 0x2a8   :  { %v508_v15 = vpack.c.bf16 %v453_v14, %v453_v14  ;;  %v510_v20 = vpack.c.bf16 %v459_v13, %v459_v13  ;;  %v492_v37 = vmul.f32 0.25, %v453_v14  ;;  %v494_v47 = vmul.f32 0.25, %v459_v13 }
 0x2a9   :  { %v323_v13 = vcombine.high %v322_v10, %v322_v10  ;;  %v11379_v14 = vrot.slane %v330_v12, %v11211_v3 }
 0x2aa   :  { %614 = vrot.lane.b32.xlu0 %v508_v15, %s11132_s25  ;;  %v500_v43 = vpack.c.bf16 %v492_v37, %v492_v37  ;;  %v502_v51 = vpack.c.bf16 %v494_v47, %v494_v47 }
 0x2ab   :  { %v11316_v16 = vpop.permute.xlu0 %464  ;;  %v455_v17 = vpop.permute.xlu1 %454 }
 0x2ac   :  { %v509_v18 = vpack.c.bf16 %v455_v17, %v455_v17  ;;  %v512_v25 = vpack.c.bf16 %v11316_v16, %v11316_v16  ;;  %v493_v44 = vmul.f32 0.25, %v455_v17  ;;  %v496_v58 = vmul.f32 0.25, %v11316_v16 }
 0x2ad   :  { %v337_v16 = vrot.slane %v323_v13, %v11274_v41 }
 0x2ae   :  { %663 = vrot.lane.b32.xlu1 %v509_v18, %s11132_s25  ;;  %712 = vrot.lane.b32.xlu0 %v510_v20, %s11132_s25  ;;  %v501_v48 = vpack.c.bf16 %v493_v44, %v493_v44  ;;  %v504_v62 = vpack.c.bf16 %v496_v58, %v496_v58 }
 0x2af   :  { %v461_v21 = vpop.permute.xlu1 %460  ;;  %v516_v22 = vpop.permute.xlu0 %515 }
 0x2b0   :  { %v522_v23 = vsel %vm517_vm5, %v516_v22, 0  ;;  %v511_v24 = vpack.c.bf16 %v461_v21, %v461_v21  ;;  %v495_v52 = vmul.f32 0.25, %v461_v21  ;;  %v11388_v21 = vrot.slane %v337_v16, %v11211_v3 }
 0x2b1   :  { %9614 = vmatpush3.bf16.xpose.msra.mxu0 %v522_v23 }
 0x2b2   :  { %761 = vrot.lane.b32.xlu1 %v511_v24, %s11132_s25  ;;  %810 = vrot.lane.b32.xlu0 %v512_v25, %s11132_s25  ;;  %v503_v59 = vpack.c.bf16 %v495_v52, %v495_v52 }
 0x2b3   :  { %v467_v27 = vpop.permute.xlu1 %466  ;;  %9619 = vmatprep.subr.bf16.mxu0 %v11134_v1 }
 0x2b4   :  { %v513_v28 = vpack.c.bf16 %v467_v27, %v467_v27  ;;  %v497_v63 = vmul.f32 0.25, %v467_v27 }
 0x2b6   :  { %859 = vrot.lane.b32.xlu1 %v513_v28, %s11132_s25  ;;  %v505_v7 = vpack.c.bf16 %v497_v63, %v497_v63 }
 0x2b7   :  { %v566_v30 = vpop.permute.xlu1 %565 }
 0x2b8   :  { %v571_v32 = vsel %vm517_vm5, %v566_v30, 0  ;;  %9616 = vmatmul.mubr.msk.bf16.vlgmr.msra.gmra.mxu0 %vm517_vm5, %v498_v29 }
 0x2b9   :  { %9620 = vmatpush3.bf16.xpose.msra.mxu0 %v571_v32  ;;  %9621 = vmatprep.mubr.msk.bf16.mxu0 %vm11135_vm0, %v11134_v1 }
 0x2ba   :  { %9631 = vmatprep.subr.bf16.mxu0 %v11134_v1 }
 0x2c0   :  { %9622 = vmatmul.mubr.msk.bf16.vlgmr.msra.gmra.mxu0 %vm517_vm5, %v499_v34 }
 0x2c1   :  { %9633 = vmatprep.mubr.msk.bf16.mxu0 %vm11135_vm0, %v11134_v1 }
 0x31c   :  { %v615_v35 = vpop.permute.xlu0 %614 }
 0x31d   :  { %v620_v36 = vsel %vm517_vm5, %v615_v35, 0 }
 0x31e   :  { %9626 = vmatpush3.bf16.xpose.msra.mxu1 %v620_v36 }
 0x31f   :  { %9637 = vmatprep.subr.bf16.mxu1 %v11134_v1 }
 0x320   :  { %v664_v39 = vpop.permute.xlu1 %663  ;;  %v713_v42 = vpop.permute.xlu0 %712 }
 0x321   :  { %v669_v40 = vsel %vm517_vm5, %v664_v39, 0  ;;  %v718_v45 = vsel %vm517_vm5, %v713_v42, 0 }
 0x322   :  { %9632 = vmatpush3.bf16.xpose.msra.mxu0 %v669_v40 }
 0x323   :  { %9643 = vmatprep.subr.bf16.mxu0 %v11134_v1 }
 0x324   :  { %v762_v46 = vpop.permute.xlu1 %761  ;;  %v811_v50 = vpop.permute.xlu0 %810 }
 0x325   :  { %9628 = vmatmul.mubr.msk.bf16.vlgmr.msra.gmra.mxu1 %vm517_vm5, %v500_v43  ;;  %v767_v49 = vsel %vm517_vm5, %v762_v46, 0  ;;  %v816_v53 = vsel %vm517_vm5, %v811_v50, 0 }
 0x326   :  { %9638 = vmatpush3.bf16.xpose.msra.mxu1 %v718_v45  ;;  %9639 = vmatprep.mubr.msk.bf16.mxu1 %vm11135_vm0, %v11134_v1 }
 0x327   :  { %9649 = vmatprep.subr.bf16.mxu1 %v11134_v1 }
 0x328   :  { %v860_v56 = vpop.permute.xlu1 %859 }
 0x329   :  { %9634 = vmatmul.mubr.msk.bf16.vlgmr.msra.gmra.mxu0 %vm517_vm5, %v501_v48  ;;  %v865_v60 = vsel %vm517_vm5, %v860_v56, 0 }
 0x32a   :  { %9644 = vmatpush3.bf16.xpose.msra.mxu0 %v767_v49  ;;  %9645 = vmatprep.mubr.msk.bf16.mxu0 %vm11135_vm0, %v11134_v1 }
 0x32b   :  { %9655 = vmatprep.subr.bf16.mxu0 %v11134_v1 }
 0x32d   :  { %9640 = vmatmul.mubr.msk.bf16.vlgmr.msra.gmra.mxu1 %vm517_vm5, %v502_v51 }
 0x32e   :  { %9650 = vmatpush3.bf16.xpose.msra.mxu1 %v816_v53  ;;  %9651 = vmatprep.mubr.msk.bf16.mxu1 %vm11135_vm0, %v11134_v1 }
 0x32f   :  { %9661 = vmatprep.subr.bf16.mxu1 %v11134_v1 }
 0x331   :  { %9646 = vmatmul.mubr.msk.bf16.vlgmr.msra.gmra.mxu0 %vm517_vm5, %v503_v59 }
 0x332   :  { %9656 = vmatpush3.bf16.xpose.msra.mxu0 %v865_v60  ;;  %9657 = vmatprep.mubr.msk.bf16.mxu0 %vm11135_vm0, %v11134_v1 }
 0x333   :  { %9667 = vmatprep.subr.bf16.mxu0 %v11134_v1 }
 0x335   :  { %9652 = vmatmul.mubr.msk.bf16.vlgmr.msra.gmra.mxu1 %vm517_vm5, %v504_v62 }
 0x336   :  { %9662 = vmatpush3.bf16.msra.mxu1 %v1035_v0  ;;  %9663 = vmatprep.mubr.msk.bf16.mxu1 %vm11135_vm0, %v11134_v1 }
 0x337   :  { %9673 = vmatprep.subr.bf16.mxu1 %v11134_v1 }
 0x339   :  { %9658 = vmatmul.mubr.msk.bf16.vlgmr.msra.gmra.mxu0 %vm517_vm5, %v505_v7 }
 0x33a   :  { %9668 = vmatpush3.bf16.msra.mxu0 %v1081_v8  ;;  %9669 = vmatprep.mubr.msk.bf16.mxu0 %vm11135_vm0, %v11134_v1 }
 0x33b   :  { %9679 = vmatprep.subr.bf16.mxu0 %v11134_v1 }
 0x378   :  { %v558_v15 = vpop.f32.mrf.mxu0 }
 0x379   :  { %v11383_v17 = vadd.f32 %v11379_v14, %v558_v15 }
 0x37a   :  { %v9617_v18 = vpop.f32.mrf.mxu0 }
 0x37b   :  { %v926_v5 = vsel %vm925_vm8, %v11383_v17, -inf }
 0x37c   :  { %927 = vmax.xlane.f32.xlu0 %v926_v5  ;;  %v561_v20 = vpop.f32.mrf.mxu0 }
 0x37e   :  { %v9618_v22 = vpop.f32.mrf.mxu0 }
 0x380   :  { %v607_v23 = vpop.f32.mrf.mxu0 }
 0x381   :  { %v918_v24 = vadd.f32 %v11388_v21, %v607_v23 }
 0x382   :  { %v9623_v25 = vpop.f32.mrf.mxu0 }
 0x383   :  { %v929_v26 = vsel %vm925_vm8, %v918_v24, -inf }
 0x384   :  { %930 = vmax.xlane.f32.xlu1 %v929_v26  ;;  %v610_v41 = vpop.f32.mrf.mxu0 }
 0x386   :  { %v9624_v27 = vpop.f32.mrf.mxu0 }
 0x3e5   :  { %v656_v28 = vpop.f32.mrf.mxu1 }
 0x3e6   :  { %v919_v29 = vadd.f32 %v11379_v14, %v656_v28 }
 0x3e7   :  { %v9629_v30 = vpop.f32.mrf.mxu1 }
 0x3e8   :  { %v932_v32 = vsel %vm925_vm8, %v919_v29, -inf }
 0x3e9   :  { %v659_v33 = vpop.f32.mrf.mxu1  ;;  %933 = vmax.xlane.f32.xlu0 %v932_v32  ;;  %v705_v34 = vpop.f32.mrf.mxu0 }
 0x3ea   :  { %v920_v35 = vadd.f32 %v11388_v21, %v705_v34 }
 0x3eb   :  { %v9630_v36 = vpop.f32.mrf.mxu1  ;;  %v9635_v37 = vpop.f32.mrf.mxu0 }
 0x3ec   :  { %v935_v39 = vsel %vm925_vm8, %v920_v35, -inf }
 0x3ed   :  { %v754_v40 = vpop.f32.mrf.mxu1  ;;  %936 = vmax.xlane.f32.xlu0 %v935_v39  ;;  %v708_v42 = vpop.f32.mrf.mxu0 }
 0x3ee   :  { %v921_v43 = vadd.f32 %v11379_v14, %v754_v40 }
 0x3ef   :  { %v9636_v44 = vpop.f32.mrf.mxu0  ;;  %v9641_v45 = vpop.f32.mrf.mxu1 }
 0x3f0   :  { %v938_v46 = vsel %vm925_vm8, %v921_v43, -inf }
 0x3f1   :  { %v757_v47 = vpop.f32.mrf.mxu1  ;;  %939 = vmax.xlane.f32.xlu1 %v938_v46  ;;  %v803_v48 = vpop.f32.mrf.mxu0 }
 0x3f2   :  { %v922_v49 = vadd.f32 %v11388_v21, %v803_v48 }
 0x3f3   :  { %v9642_v50 = vpop.f32.mrf.mxu1  ;;  %v9647_v51 = vpop.f32.mrf.mxu0 }
 0x3f4   :  { %v941_v52 = vsel %vm925_vm8, %v922_v49, -inf }
 0x3f5   :  { %v852_v53 = vpop.f32.mrf.mxu1  ;;  %942 = vmax.xlane.f32.xlu0 %v941_v52  ;;  %v806_v56 = vpop.f32.mrf.mxu0 }
 0x3f6   :  { %v923_v58 = vadd.f32 %v11379_v14, %v852_v53 }
 0x3f7   :  { %v9648_v59 = vpop.f32.mrf.mxu0  ;;  %v9653_v60 = vpop.f32.mrf.mxu1 }
 0x3f8   :  { %v944_v61 = vsel %vm925_vm8, %v923_v58, -inf }
 0x3f9   :  { %v855_v62 = vpop.f32.mrf.mxu1  ;;  %945 = vmax.xlane.f32.xlu1 %v944_v61  ;;  %v901_v63 = vpop.f32.mrf.mxu0 }
 0x3fa   :  { %v924_v0 = vadd.f32 %v11388_v21, %v901_v63 }
 0x3fb   :  { %v9654_v6 = vpop.f32.mrf.mxu1  ;;  %v9659_v7 = vpop.f32.mrf.mxu0 }
 0x3fc   :  { %v947_v8 = vsel %vm925_vm8, %v924_v0, -inf }
 0x3fd   :  { %948 = vmax.xlane.f32.xlu0 %v947_v8  ;;  %v904_v9 = vpop.f32.mrf.mxu0 }
 0x3ff   :  { %v9660_v10 = vpop.f32.mrf.mxu0 }
 0x405   :  { %v928_v16 = vpop.xlane.xlu0 %927 }
 0x406   :  { %v950_v18 = vsub.f32 %v11383_v17, %v928_v16 }
 0x408   :  { %v958_v5 = vmul.f32 1.442695, %v950_v18 }
 0x40a   :  { %10493 = vrot.lane.b32.xlu1 %v11309_v11, %s11139_s28 }
 0x40d   :  { %v931_v12 = vpop.xlane.xlu1 %930 }
 0x40e   :  { %v951_v13 = vsub.f32 %v918_v24, %v931_v12 }
 0x410   :  { %v960_v15 = vmul.f32 1.442695, %v951_v13 }
 0x412   :  { %10821 = vpow2.f32 %v960_v15 }
 0x413   :  { %10823 = vpow2.f32 %v958_v5 }
 0x41f   :  { %v10822_v20 = vpop.eup %10821 }
 0x420   :  { %v977_v22 = vsel %vm925_vm8, %v10822_v20, 0.0  ;;  %v11408_v23 = vpop.eup %10823 }
 0x421   :  { %978 = vadd.xlane.f32.xlu0 %v977_v22  ;;  %v974_v25 = vsel %vm925_vm8, %v11408_v23, 0.0 }
 0x42e   :  { %975 = vadd.xlane.f32.xlu1 %v974_v25 }
 0x472   :  { %v934_v26 = vpop.xlane.xlu0 %933 }
 0x473   :  { %v952_v41 = vsub.f32 %v919_v29, %v934_v26 }
 0x475   :  { %v962_v24 = vmul.f32 1.442695, %v952_v41 }
 0x476   :  { %v937_v27 = vpop.xlane.xlu0 %936 }
 0x477   :  { %10825 = vpow2.f32 %v962_v24  ;;  %v953_v28 = vsub.f32 %v920_v35, %v937_v27 }
 0x479   :  { %v964_v30 = vmul.f32 1.442695, %v953_v28 }
 0x47a   :  { %v940_v17 = vpop.xlane.xlu1 %939 }
 0x47b   :  { %10827 = vpow2.f32 %v964_v30  ;;  %v954_v32 = vsub.f32 %v921_v43, %v940_v17 }
 0x47d   :  { %v966_v33 = vmul.f32 1.442695, %v954_v32 }
 0x47e   :  { %v943_v34 = vpop.xlane.xlu0 %942 }
 0x47f   :  { %10829 = vpow2.f32 %v966_v33  ;;  %v955_v36 = vsub.f32 %v922_v49, %v943_v34 }
 0x481   :  { %v968_v37 = vmul.f32 1.442695, %v955_v36 }
 0x482   :  { %v946_v39 = vpop.xlane.xlu1 %945 }
 0x483   :  { %10831 = vpow2.f32 %v968_v37  ;;  %v956_v40 = vsub.f32 %v923_v58, %v946_v39 }
 0x484   :  { %v10826_v42 = vpop.eup %10825 }
 0x485   :  { %v970_v44 = vmul.f32 1.442695, %v956_v40  ;;  %v980_v29 = vsel %vm925_vm8, %v10826_v42, 0.0 }
 0x486   :  { %981 = vadd.xlane.f32.xlu1 %v980_v29  ;;  %v949_v45 = vpop.xlane.xlu0 %948  ;;  %v10494_v60 = vpop.permute.xlu1 %10493 }
 0x487   :  { %10833 = vpow2.f32 %v970_v44  ;;  %v957_v35 = vsub.f32 %v924_v0, %v949_v45  ;;  %v10496_v61 = vunpack.i.h.bf16 %v10494_v60  ;;  %v10495_v9 = vunpack.i.l.bf16 %v10494_v60 }
 0x488   :  { %v10828_v46 = vpop.eup %10827 }
 0x489   :  { %v972_v47 = vmul.f32 1.442695, %v957_v35  ;;  %v983_v43 = vsel %vm925_vm8, %v10828_v46, 0.0  ;;  %v1025_v0 = vpack.c.bf16 %v10496_v61, %v10496_v61  ;;  %v1024_v10 = vpack.c.bf16 %v10495_v9, %v10495_v9  ;;  %v10688_v9 = vld [vmem:[%s13001_s6 + $0x98] sm:$0xff]  }
 0x48a   :  { %984 = vadd.xlane.f32.xlu0 %v983_v43 }
 0x48b   :  { %10835 = vpow2.f32 %v972_v47  ;;  %v1173_v8 = vsel %vm1033_vm6, %v1025_v0, 0  ;;  %v1127_v15 = vsel %vm1033_vm6, %v1024_v10, 0 }
 0x48c   :  { %v11414_v48 = vpop.eup %10829 }
 0x48d   :  { %v986_v49 = vsel %vm925_vm8, %v11414_v48, 0.0 }
 0x48e   :  { %987 = vadd.xlane.f32.xlu1 %v986_v49 }
 0x490   :  { %v11418_v50 = vpop.eup %10831 }
 0x491   :  { %v989_v51 = vsel %vm925_vm8, %v11418_v50, 0.0 }
 0x492   :  { %990 = vadd.xlane.f32.xlu0 %v989_v51 }
 0x494   :  { %v11422_v52 = vpop.eup %10833 }
 0x495   :  { %v992_v53 = vsel %vm925_vm8, %v11422_v52, 0.0 }
 0x496   :  { %993 = vadd.xlane.f32.xlu1 %v992_v53 }
 0x498   :  { %v11426_v56 = vpop.eup %10835 }
 0x499   :  { %v995_v58 = vsel %vm925_vm8, %v11426_v56, 0.0 }
 0x49a   :  { %996 = vadd.xlane.f32.xlu0 %v995_v58 }
 0x4a7   :  { %10503 = vrot.lane.b32.xlu1 %v11309_v11, %s11140_s4 }
 0x4aa   :  { %v979_v59 = vpop.xlane.xlu0 %978 }
 0x4ab   :  { %10837 = vrcp.f32 %v979_v59 }
 0x4b0   :  { %10498 = vrot.lane.b32.xlu0 %v11309_v11, %s11138_s27 }
 0x4b7   :  { %v976_v62 = vpop.xlane.xlu1 %975 }
 0x4b8   :  { %v10838_v63 = vpop.eup %10837  ;;  %10839 = vrcp.f32 %v976_v62 }
 0x4b9   :  { %v1007_v6 = vmul.f32 %v10838_v63, %v10822_v20 }
 0x4bb   :  { %v1015_v7 = vpack.c.bf16 %v1007_v6, %v1007_v6 }
 0x4bd   :  { %9670 = vmatmul.mubr.msk.bf16.vlgmr.msra.gmra.mxu0 %vm925_vm8, %v1015_v7 }
 0x4be   :  { %9680 = vmatpush3.bf16.msra.mxu0 %v1173_v8  ;;  %9681 = vmatprep.mubr.msk.bf16.mxu0 %vm11135_vm0, %v11134_v1 }
 0x4bf   :  { %9691 = vmatprep.subr.bf16.mxu0 %v11134_v1 }
 0x4c5   :  { %v10840_v11 = vpop.eup %10839 }
 0x4c6   :  { %v1006_v12 = vmul.f32 %v10840_v11, %v11408_v23 }
 0x4c8   :  { %v1014_v13 = vpack.c.bf16 %v1006_v12, %v1006_v12 }
 0x4ca   :  { %9664 = vmatmul.mubr.msk.bf16.vlgmr.msra.gmra.mxu1 %vm925_vm8, %v1014_v13 }
 0x4cb   :  { %9674 = vmatpush3.bf16.msra.mxu1 %v1127_v15  ;;  %9675 = vmatprep.mubr.msk.bf16.mxu1 %vm11135_vm0, %v11134_v1 }
 0x4cc   :  { %9685 = vmatprep.subr.bf16.mxu1 %v11134_v1 }
 0x50f   :  { %v982_v16 = vpop.xlane.xlu1 %981 }
 0x510   :  { %10841 = vrcp.f32 %v982_v16  ;;  %v10689_v16 = vld [vmem:[%s13001_s6 + $0x90] sm:$0xff]  }
 0x513   :  { %v985_v18 = vpop.xlane.xlu0 %984 }
 0x514   :  { %10843 = vrcp.f32 %v985_v18 }
 0x517   :  { %v988_v5 = vpop.xlane.xlu1 %987 }
 0x518   :  { %10845 = vrcp.f32 %v988_v5 }
 0x51b   :  { %v991_v20 = vpop.xlane.xlu0 %990 }
 0x51c   :  { %10847 = vrcp.f32 %v991_v20  ;;  %v10690_v20 = vld [vmem:[%s13001_s6 + $0x88] sm:$0xff]  }
 0x51d   :  { %v10842_v22 = vpop.eup %10841 }
 0x51e   :  { %v1008_v23 = vmul.f32 %v10842_v22, %v10826_v42 }
 0x51f   :  { %v994_v25 = vpop.xlane.xlu1 %993 }
 0x520   :  { %v1016_v26 = vpack.c.bf16 %v1008_v23, %v1008_v23  ;;  %10849 = vrcp.f32 %v994_v25  ;;  %v10691_v25 = vld [vmem:[%s13001_s6 + $0x80] sm:$0xff]  }
 0x521   :  { %v10844_v41 = vpop.eup %10843 }
 0x522   :  { %9676 = vmatmul.mubr.msk.bf16.vlgmr.msra.gmra.mxu1 %vm925_vm8, %v1016_v26  ;;  %v1009_v24 = vmul.f32 %v10844_v41, %v10828_v46 }
 0x523   :  { %v997_v27 = vpop.xlane.xlu0 %996  ;;  %9687 = vmatprep.mubr.msk.bf16.mxu1 %vm11135_vm0, %v11134_v1  ;;  %v10504_v30 = vpop.permute.xlu1 %10503 }
 0x524   :  { %10851 = vrcp.f32 %v997_v27  ;;  %v1017_v28 = vpack.c.bf16 %v1009_v24, %v1009_v24  ;;  %v10506_v33 = vunpack.i.h.bf16 %v10504_v30  ;;  %v10505_v34 = vunpack.i.l.bf16 %v10504_v30 }
 0x525   :  { %v10846_v17 = vpop.eup %10845 }
 0x526   :  { %9682 = vmatmul.mubr.msk.bf16.vlgmr.msra.gmra.mxu0 %vm925_vm8, %v1017_v28  ;;  %v1010_v44 = vmul.f32 %v10846_v17, %v11414_v48  ;;  %v1029_v45 = vpack.c.bf16 %v10506_v33, %v10506_v33  ;;  %v1028_v35 = vpack.c.bf16 %v10505_v34, %v10505_v34 }
 0x527   :  { %v10499_v32 = vpop.permute.xlu0 %10498  ;;  %9693 = vmatprep.mubr.msk.bf16.mxu0 %vm11135_vm0, %v11134_v1 }
 0x528   :  { %v10501_v36 = vunpack.i.h.bf16 %v10499_v32  ;;  %v10500_v37 = vunpack.i.l.bf16 %v10499_v32  ;;  %v1018_v43 = vpack.c.bf16 %v1010_v44, %v1010_v44  ;;  %v1311_v48 = vsel %vm1033_vm6, %v1028_v35, 0 }
 0x529   :  { %v10848_v39 = vpop.eup %10847 }
 0x52a   :  { %v1027_v40 = vpack.c.bf16 %v10501_v36, %v10501_v36  ;;  %v1026_v42 = vpack.c.bf16 %v10500_v37, %v10500_v37  ;;  %v1011_v29 = vmul.f32 %v10848_v39, %v11418_v50  ;;  %v1357_v50 = vsel %vm1033_vm6, %v1029_v45, 0 }
 0x52c   :  { %v1219_v46 = vsel %vm1033_vm6, %v1026_v42, 0  ;;  %v1265_v47 = vsel %vm1033_vm6, %v1027_v40, 0  ;;  %v1019_v49 = vpack.c.bf16 %v1011_v29, %v1011_v29 }
 0x52d   :  { %9686 = vmatpush3.bf16.msra.mxu1 %v1219_v46  ;;  %9692 = vmatpush3.bf16.msra.mxu0 %v1265_v47  ;;  %v10850_v51 = vpop.eup %10849 }
 0x52e   :  { %9697 = vmatprep.subr.bf16.mxu1 %v11134_v1  ;;  %9703 = vmatprep.subr.bf16.mxu0 %v11134_v1  ;;  %v1012_v58 = vmul.f32 %v10850_v51, %v11422_v52 }
 0x530   :  { %9688 = vmatmul.mubr.msk.bf16.vlgmr.msra.gmra.mxu1 %vm925_vm8, %v1018_v43  ;;  %9694 = vmatmul.mubr.msk.bf16.vlgmr.msra.gmra.mxu0 %vm925_vm8, %v1019_v49  ;;  %v1020_v60 = vpack.c.bf16 %v1012_v58, %v1012_v58 }
 0x531   :  { %v10852_v53 = vpop.eup %10851  ;;  %9698 = vmatpush3.bf16.msra.mxu1 %v1311_v48  ;;  %9704 = vmatpush3.bf16.msra.mxu0 %v1357_v50 }
 0x532   :  { %9699 = vmatprep.mubr.msk.bf16.mxu1 %vm11135_vm0, %v11134_v1  ;;  %9705 = vmatprep.mubr.msk.bf16.mxu0 %vm11135_vm0, %v11134_v1  ;;  %v1013_v59 = vmul.f32 %v10852_v53, %v11426_v56 }
 0x533   :  { %9709 = vmatprep.subr.bf16.mxu1 %v11134_v1  ;;  %9721 = vmatprep.subr.bf16.mxu0 %v11134_v1 }
 0x534   :  { %v1021_v61 = vpack.c.bf16 %v1013_v59, %v1013_v59 }
 0x538   :  { %9700 = vmatmul.mubr.msk.bf16.vlgmr.msra.gmra.mxu1 %vm925_vm8, %v1020_v60  ;;  %9706 = vmatmul.mubr.msk.bf16.vlgmr.msra.gmra.mxu0 %vm925_vm8, %v1021_v61 }
 0x539   :  { %9717 = vmatprep.mubr.msk.bf16.mxu1 %vm11135_vm0, %v11134_v1  ;;  %9729 = vmatprep.mubr.msk.bf16.mxu0 %vm11135_vm0, %v11134_v1 }
 0x53a   :  { %9710 = vmatpush3.bf16.msra.mxu1 %v10688_v9 }
 0x53b   :  { %9711 = vmatprep.subr.bf16.mxu1 %v11134_v1 }
 0x53e   :  { %9712 = vmatpush3.bf16.msra.mxu1 %v10689_v16 }
 0x53f   :  { %9713 = vmatprep.subr.bf16.mxu1 %v11134_v1 }
 0x542   :  { %9714 = vmatpush3.bf16.msra.mxu1 %v10690_v20 }
 0x543   :  { %9715 = vmatprep.subr.bf16.mxu1 %v11134_v1 }
 0x546   :  { %9716 = vmatpush3.bf16.msra.mxu1 %v10691_v25 }
 0x547   :  { %9733 = vmatprep.subr.bf16.mxu1 %v11134_v1 }
 0x57d   :  { %v1117_v62 = vpop.f32.mrf.mxu0 }
 0x57f   :  { %v9671_v52 = vpop.f32.mrf.mxu0 }
 0x581   :  { %v1120_v63 = vpop.f32.mrf.mxu0 }
 0x583   :  { %v9672_v56 = vpop.f32.mrf.mxu0 }
 0x58a   :  { %v1071_v0 = vpop.f32.mrf.mxu1 }
 0x58c   :  { %v9665_v6 = vpop.f32.mrf.mxu1 }
 0x58e   :  { %v1074_v7 = vpop.f32.mrf.mxu1 }
 0x590   :  { %v9666_v8 = vpop.f32.mrf.mxu1 }
 0x5e2   :  { %v1163_v11 = vpop.f32.mrf.mxu1 }
 0x5e4   :  { %v9677_v10 = vpop.f32.mrf.mxu1 }
 0x5e6   :  { %v1166_v12 = vpop.f32.mrf.mxu1  ;;  %v1209_v13 = vpop.f32.mrf.mxu0 }
 0x5e7   :  { %v10507_v15 = vpack.i.bf16 %v1209_v13, %v1163_v11 }
 0x5e8   :  { %v9678_v18 = vpop.f32.mrf.mxu1  ;;  %v9683_v5 = vpop.f32.mrf.mxu0 }
 0x5e9   :  { %10508 = vrot.lane.b32.xlu1 %v10507_v15, %s11130_s20 }
 0x5ea   :  { %v1212_v22 = vpop.f32.mrf.mxu0 }
 0x5ec   :  { %v9684_v23 = vpop.f32.mrf.mxu0 }
 0x5f0   :  { %v1255_v26 = vpop.f32.mrf.mxu1  ;;  %v1301_v41 = vpop.f32.mrf.mxu0 }
 0x5f1   :  { %v10512_v24 = vpack.i.bf16 %v1301_v41, %v1255_v26 }
 0x5f2   :  { %v9689_v27 = vpop.f32.mrf.mxu1  ;;  %v9695_v28 = vpop.f32.mrf.mxu0 }
 0x5f3   :  { %10513 = vrot.lane.b32.xlu0 %v10512_v24, %s11141_s14  ;;  %v10692_v27 = vld [vmem:[#allocation6 + $0x18] sm:$0xff]   ;;  %v10694_v28 = vld [vmem:[#allocation6 + $0x8] sm:$0xff]  }
 0x5f4   :  { %v1258_v30 = vpop.f32.mrf.mxu1  ;;  %v1304_v17 = vpop.f32.mrf.mxu0  ;;  %9722 = vmatpush3.bf16.msra.mxu0 %v10692_v27 }
 0x5f5   :  { %9723 = vmatprep.subr.bf16.mxu0 %v11134_v1  ;;  %v10695_v30 = vld [vmem:[#allocation6] sm:$0xff]   ;;  %v10696_v17 = vld [vmem:[%s13003_s8 + $0x38] sm:$0xff]  }
 0x5f6   :  { %v9690_v32 = vpop.f32.mrf.mxu1  ;;  %v9696_v33 = vpop.f32.mrf.mxu0 }
 0x5f7   :  { %v10697_v32 = vld [vmem:[%s13003_s8 + $0x30] sm:$0xff]   ;;  %v10698_v33 = vld [vmem:[%s13003_s8 + $0x28] sm:$0xff]  }
 0x5f8   :  { %v1347_v34 = vpop.f32.mrf.mxu1  ;;  %v1393_v36 = vpop.f32.mrf.mxu0 }
 0x5f9   :  { %v10517_v37 = vpack.i.bf16 %v1393_v36, %v1347_v34  ;;  %v10699_v34 = vld [vmem:[%s13003_s8 + $0x20] sm:$0xff]   ;;  %v10700_v36 = vld [vmem:[%s13003_s8 + $0x18] sm:$0xff]  }
 0x5fa   :  { %v9701_v39 = vpop.f32.mrf.mxu1  ;;  %v9707_v40 = vpop.f32.mrf.mxu0 }
 0x5fb   :  { %10518 = vrot.lane.b32.xlu1 %v10517_v37, %s11142_s15 }
 0x5fc   :  { %v1350_v42 = vpop.f32.mrf.mxu1  ;;  %v1396_v44 = vpop.f32.mrf.mxu0 }
 0x5fe   :  { %v9702_v29 = vpop.f32.mrf.mxu1  ;;  %v9708_v45 = vpop.f32.mrf.mxu0 }
 0x5ff   :  { %v11537_v45 = vld [vmem:[#allocation2 + $0x10] sm:$0xff] }
 0x65b   :  { %v10509_v35 = vpop.permute.xlu1 %10508 }
 0x65c   :  { %v10511_v47 = vunpack.i.h.bf16 %v10509_v35  ;;  %v10510_v43 = vunpack.i.l.bf16 %v10509_v35 }
 0x65e   :  { %v1424_v50 = vsel %vm517_vm5, %v1117_v62, %v10511_v47  ;;  %v1423_v53 = vsel %vm517_vm5, %v1071_v0, %v10510_v43  ;;  %v11504_v62 = vsub.s32 5, %v11208_v2  ;;  %v1535_v47 = vrot.slane %v11537_v45, %v11211_v3 }
 0x660   :  { %v1434_v0 = vrot.slane %v11269_v38, %v11504_v62 }
 0x665   :  { %v10514_v46 = vpop.permute.xlu0 %10513 }
 0x666   :  { %v10516_v49 = vunpack.i.h.bf16 %v10514_v46  ;;  %v10515_v51 = vunpack.i.l.bf16 %v10514_v46 }
 0x668   :  { %v1426_v60 = vsel %vm111_vm2, %v1424_v50, %v10516_v49  ;;  %v1425_v61 = vsel %vm111_vm2, %v1423_v53, %v10515_v51 }
 0x66d   :  { %v10519_v48 = vpop.permute.xlu1 %10518 }
 0x66e   :  { %v10521_v58 = vunpack.i.h.bf16 %v10519_v48  ;;  %v10520_v59 = vunpack.i.l.bf16 %v10519_v48  ;;  %v1541_v48 = vrot.slane %v11537_v45, %v11214_v4 }
 0x670   :  { %v1429_v52 = vsel %vm1427_vm9, %v1426_v60, %v10521_v58  ;;  %v1428_v63 = vsel %vm1427_vm9, %v1425_v61, %v10520_v59  ;;  %v10701_v60 = vld [vmem:[%s13003_s8 + $0x10] sm:$0xff]   ;;  %v10702_v61 = vld [vmem:[%s13003_s8 + $0x8] sm:$0xff]  }
 0x671   :  { %v1430_v56 = vpack.c.bf16 %v1429_v52, %v1428_v63  ;;  %v10703_v52 = vld [vmem:[%s13003_s8] sm:$0xff]   ;;  %v11558_v63 = vsub.s32 6, %v11208_v2 }
 0x673   :  { %9718 = vmatmul.mubr.msk.bf16.vlgmr.msra.gmra.mxu1 %vm232_vm1, %v1430_v56  ;;  %v1556_v56 = vrot.slane %v11269_v38, %v11558_v63 }
 0x674   :  { %9749 = vmatprep.mubr.msk.bf16.mxu1 %vm11135_vm0, %v11134_v1  ;;  %9734 = vmatpush3.bf16.msra.mxu1 %v10696_v17 }
 0x675   :  { %9735 = vmatprep.subr.bf16.mxu1 %v11134_v1 }
 0x678   :  { %9736 = vmatpush3.bf16.msra.mxu1 %v10697_v32 }
 0x679   :  { %9737 = vmatprep.subr.bf16.mxu1 %v11134_v1 }
 0x67c   :  { %9738 = vmatpush3.bf16.msra.mxu1 %v10698_v33 }
 0x67d   :  { %9739 = vmatprep.subr.bf16.mxu1 %v11134_v1 }
 0x680   :  { %9740 = vmatpush3.bf16.msra.mxu1 %v10699_v34 }
 0x681   :  { %9741 = vmatprep.subr.bf16.mxu1 %v11134_v1 }
 0x684   :  { %9742 = vmatpush3.bf16.msra.mxu1 %v10700_v36 }
 0x685   :  { %9743 = vmatprep.subr.bf16.mxu1 %v11134_v1 }
 0x688   :  { %9744 = vmatpush3.bf16.msra.mxu1 %v10701_v60 }
 0x689   :  { %9745 = vmatprep.subr.bf16.mxu1 %v11134_v1 }
 0x68c   :  { %9746 = vmatpush3.bf16.msra.mxu1 %v10702_v61 }
 0x68d   :  { %9747 = vmatprep.subr.bf16.mxu1 %v11134_v1 }
 0x690   :  { %9748 = vmatpush3.bf16.msra.mxu1 %v10703_v52  ;;  %v11579_v52 = vsub.s32 3, %v11208_v2 }
 0x691   :  { %9765 = vmatprep.subr.bf16.mxu1 %v11134_v1 }
 0x733   :  { %v1496_v6 = vpop.f32.mrf.mxu1 }
 0x734   :  { %v1497_v7 = vadd.f32 %v1496_v6, %v1434_v0 }
 0x735   :  { %v9719_v8 = vpop.f32.mrf.mxu1 }
 0x736   :  { %v1503_v9 = vadd.f32 %v1497_v7, %v11286_v55 }
 0x737   :  { %v1499_v11 = vpop.f32.mrf.mxu1 }
 0x738   :  { %v1500_v10 = vadd.f32 %v1499_v11, %v1434_v0  ;;  %v1505_v12 = vsel %vm232_vm1, %v1503_v9, 0.0 }
 0x739   :  { %1506 = vadd.xlane.f32.xlu0 %v1505_v12  ;;  %v9720_v13 = vpop.f32.mrf.mxu1 }
 0x73a   :  { %v1504_v15 = vadd.f32 %v1500_v10, %v11284_v54  ;;  %v10693_v54 = vld [vmem:[#allocation6 + $0x10] sm:$0xff]  }
 0x73b   :  { %9724 = vmatpush3.bf16.msra.mxu0 %v10693_v54 }
 0x73c   :  { %v1508_v16 = vsel %vm232_vm1, %v1504_v15, 0.0  ;;  %9725 = vmatprep.subr.bf16.mxu0 %v11134_v1 }
 0x73d   :  { %1509 = vadd.xlane.f32.xlu1 %v1508_v16  ;;  %v11053_v16 = vld [vmem:[#allocation2] sm:$0xff] }
 0x73f   :  { %9726 = vmatpush3.bf16.msra.mxu0 %v10694_v28 }
 0x740   :  { %9727 = vmatprep.subr.bf16.mxu0 %v11134_v1 }
 0x743   :  { %9728 = vmatpush3.bf16.msra.mxu0 %v10695_v30 }
 0x7c2   :  { %v1507_v18 = vpop.xlane.xlu0 %1506 }
 0x7c3   :  { %v1512_v5 = vmul.f32 0.015625, %v1507_v18 }
 0x7c5   :  { %v1514_v20 = vsub.f32 %v1503_v9, %v1512_v5 }
 0x7c6   :  { %v1510_v22 = vpop.xlane.xlu1 %1509 }
 0x7c7   :  { %v1513_v23 = vmul.f32 0.015625, %v1510_v22  ;;  %v1516_v25 = vmul.f32 %v1514_v20, %v1514_v20 }
 0x7c9   :  { %v1515_v26 = vsub.f32 %v1504_v15, %v1513_v23  ;;  %v1518_v55 = vsel %vm232_vm1, %v1516_v25, 0.0  ;;  %v11565_v15 = vsub.s32 7, %v11208_v2 }
 0x7ca   :  { %1519 = vadd.xlane.f32.xlu0 %v1518_v55 }
 0x7cb   :  { %v1517_v41 = vmul.f32 %v1515_v26, %v1515_v26  ;;  %v1647_v18 = vrot.slane %v11053_v16, %v11565_v15  ;;  %v77_v16 = vld [vmem:[#allocation2 + $0x18] sm:$0xff] }
 0x7cd   :  { %v1521_v24 = vsel %vm232_vm1, %v1517_v41, 0.0 }
 0x7ce   :  { %1522 = vadd.xlane.f32.xlu0 %v1521_v24 }
 0x853   :  { %v1520_v37 = vpop.xlane.xlu0 %1519 }
 0x854   :  { %v1524_v39 = vmul.f32 0.015625, %v1520_v37 }
 0x856   :  { %v1526_v40 = vadd.f32 1e-05, %v1524_v39  ;;  %v10706_v39 = vld [vmem:[#allocation4 + $0x74] ss:$8 sps:$4 sm:$0xff]  }
 0x857   :  { %v1523_v42 = vpop.xlane.xlu0 %1522  ;;  %1855 = vmatprep.subr.bf16.mxu0 %v10706_v39 }
 0x858   :  { %10853 = vrsqrt.f32 %v1526_v40  ;;  %v1525_v44 = vmul.f32 0.015625, %v1523_v42  ;;  %v10704_v40 = vld [vmem:[#allocation4 + $0x70] ss:$8 sps:$4 sm:$0xff]   ;;  %v10709_v42 = vld [vmem:[#allocation4 + $0x64] ss:$8 sps:$4 sm:$0xff]  }
 0x85a   :  { %v1527_v29 = vadd.f32 1e-05, %v1525_v44  ;;  %v10707_v44 = vld [vmem:[#allocation4 + $0x60] ss:$8 sps:$4 sm:$0xff]  }
 0x85c   :  { %10855 = vrsqrt.f32 %v1527_v29  ;;  %v10712_v29 = vld [vmem:[#allocation4 + $0x54] ss:$8 sps:$4 sm:$0xff]  }
 0x865   :  { %v10854_v35 = vpop.eup %10853 }
 0x866   :  { %v1530_v46 = vmul.f32 %v10854_v35, %v1514_v20  ;;  %v10710_v35 = vld [vmem:[#allocation4 + $0x50] ss:$8 sps:$4 sm:$0xff]  }
 0x868   :  { %v1536_v51 = vmul.f32 %v1535_v47, %v1530_v46  ;;  %v10715_v46 = vld [vmem:[#allocation4 + $0x44] ss:$8 sps:$4 sm:$0xff]  }
 0x869   :  { %v10856_v43 = vpop.eup %10855 }
 0x86a   :  { %v1531_v49 = vmul.f32 %v10856_v43, %v1515_v26  ;;  %v1542_v53 = vadd.f32 %v1541_v48, %v1536_v51 }
 0x86c   :  { %v1537_v50 = vmul.f32 %v1535_v47, %v1531_v49  ;;  %v10713_v47 = vld [vmem:[#allocation4 + $0x40] ss:$8 sps:$4 sm:$0xff]  }
 0x86e   :  { %v1543_v58 = vadd.f32 %v1541_v48, %v1537_v50 }
 0x870   :  { %v1552_v59 = vpack.c.bf16 %v1543_v58, %v1542_v53 }
 0x872   :  { %9730 = vmatmul.mubr.msk.bf16.vlgmr.msra.gmra.mxu0 %vm232_vm1, %v1552_v59 }
 0x873   :  { %1879 = vmatprep.mubr.bf16.mxu0 %v11136_v31  ;;  %1856 = vmatpush1.bf16.msra.mxu0 %v10704_v40 }
 0x874   :  { %1857 = vmatprep.subr.bf16.mxu0 %v10709_v42 }
 0x877   :  { %1858 = vmatpush1.bf16.msra.mxu0 %v10707_v44 }
 0x878   :  { %1859 = vmatprep.subr.bf16.mxu0 %v10712_v29 }
 0x87b   :  { %1860 = vmatpush1.bf16.msra.mxu0 %v10710_v35 }
 0x87c   :  { %1861 = vmatprep.subr.bf16.mxu0 %v10715_v46 }
 0x87f   :  { %1862 = vmatpush1.bf16.msra.mxu0 %v10713_v47 }
 0x880   :  { %9753 = vmatprep.subr.bf16.mxu0 %v11134_v1 }
 0x932   :  { %v1618_v0 = vpop.f32.mrf.mxu0 }
 0x933   :  { %v1619_v7 = vadd.f32 %v1618_v0, %v1556_v56 }
 0x934   :  { %v9731_v6 = vpop.f32.mrf.mxu0 }
 0x935   :  { %v1625_v10 = vmax.f32 %v1619_v7, 0.0  ;;  %v1774_v7 = vrot.slane %v11537_v45, %v11579_v52 }
 0x936   :  { %v1621_v8 = vpop.f32.mrf.mxu0 }
 0x937   :  { %v1622_v9 = vadd.f32 %v1621_v8, %v1556_v56 }
 0x938   :  { %v9732_v11 = vpop.f32.mrf.mxu0 }
 0x939   :  { %v1626_v12 = vmax.f32 %v1622_v9, 0.0 }
 0x93b   :  { %v1643_v13 = vpack.c.bf16 %v1626_v12, %v1625_v10  ;;  %v1799_v12 = vrot.slane %v11537_v45, %v11294_v57 }
 0x93d   :  { %9750 = vmatmul.mubr.bf16.vlgmr.msra.gmra.mxu1 %v1643_v13 }
 0x93e   :  { %9767 = vmatprep.mubr.msk.bf16.mxu1 %vm11135_vm0, %v11134_v1 }
 0x9fd   :  { %v1730_v38 = vpop.f32.mrf.mxu1 }
 0x9fe   :  { %v1731_v5 = vadd.f32 %v1730_v38, %v1647_v18 }
 0x9ff   :  { %v9751_v20 = vpop.f32.mrf.mxu1 }
 0xa00   :  { %v1737_v22 = vadd.f32 %v1731_v5, %v1542_v53  ;;  %v1803_v5 = vrot.slane %v77_v16, %v11294_v57 }
 0xa01   :  { %v1733_v23 = vpop.f32.mrf.mxu1 }
 0xa02   :  { %v1734_v25 = vadd.f32 %v1733_v23, %v1647_v18  ;;  %v1739_v26 = vsel %vm232_vm1, %v1737_v22, 0.0 }
 0xa03   :  { %1740 = vadd.xlane.f32.xlu1 %v1739_v26  ;;  %v9752_v55 = vpop.f32.mrf.mxu1 }
 0xa04   :  { %v1738_v41 = vadd.f32 %v1734_v25, %v1543_v58  ;;  %v11574_v58 = vsub.s32 2, %v11208_v2 }
 0xa06   :  { %v1742_v24 = vsel %vm232_vm1, %v1738_v41, 0.0  ;;  %v1768_v61 = vrot.slane %v11537_v45, %v11574_v58 }
 0xa07   :  { %1743 = vadd.xlane.f32.xlu0 %v1742_v24 }
 0xa8c   :  { %v1741_v27 = vpop.xlane.xlu1 %1740 }
 0xa8d   :  { %v1745_v54 = vmul.f32 0.015625, %v1741_v27 }
 0xa8f   :  { %v1747_v28 = vsub.f32 %v1737_v22, %v1745_v54 }
 0xa90   :  { %v1744_v30 = vpop.xlane.xlu0 %1743 }
 0xa91   :  { %v1746_v17 = vmul.f32 0.015625, %v1744_v30  ;;  %v1749_v32 = vmul.f32 %v1747_v28, %v1747_v28 }
 0xa93   :  { %v1748_v33 = vsub.f32 %v1738_v41, %v1746_v17  ;;  %v1751_v34 = vsel %vm232_vm1, %v1749_v32, 0.0 }
 0xa94   :  { %1752 = vadd.xlane.f32.xlu1 %v1751_v34 }
 0xa95   :  { %v1750_v36 = vmul.f32 %v1748_v33, %v1748_v33 }
 0xa97   :  { %v1754_v37 = vsel %vm232_vm1, %v1750_v36, 0.0 }
 0xa98   :  { %1755 = vadd.xlane.f32.xlu0 %v1754_v37 }
 0xb1d   :  { %v1753_v43 = vpop.xlane.xlu1 %1752 }
 0xb1e   :  { %v1757_v49 = vmul.f32 0.015625, %v1753_v43 }
 0xb20   :  { %v1759_v51 = vadd.f32 1e-05, %v1757_v49 }
 0xb21   :  { %v1756_v48 = vpop.xlane.xlu0 %1755 }
 0xb22   :  { %10857 = vrsqrt.f32 %v1759_v51  ;;  %v1758_v50 = vmul.f32 0.015625, %v1756_v48 }
 0xb24   :  { %v1760_v53 = vadd.f32 1e-05, %v1758_v50 }
 0xb26   :  { %10859 = vrsqrt.f32 %v1760_v53 }
 0xb2f   :  { %v10858_v59 = vpop.eup %10857 }
 0xb30   :  { %v1763_v60 = vmul.f32 %v10858_v59, %v1747_v28 }
 0xb32   :  { %v1769_v6 = vmul.f32 %v1768_v61, %v1763_v60 }
 0xb33   :  { %v10860_v56 = vpop.eup %10859 }
 0xb34   :  { %v1764_v0 = vmul.f32 %v10860_v56, %v1748_v33  ;;  %v11583_v9 = vadd.f32 %v1774_v7, %v1769_v6 }
 0xb36   :  { %v1770_v8 = vmul.f32 %v1768_v61, %v1764_v0 }
 0xb38   :  { %v11585_v11 = vadd.f32 %v1774_v7, %v1770_v8 }
 0xb3a   :  { %v1795_v10 = vpack.c.bf16 %v11585_v11, %v11583_v9 }
 0xb3c   :  { %8954 = vmatmul.mubr.msk.bf16.vlgmr.msra.gmra.mxu0 %vm232_vm1, %v1795_v10 }
 0xb3d   :  { %9755 = vmatprep.mubr.msk.bf16.mxu0 %vm11135_vm0, %v11134_v1 }
 0xbfc   :  { %v1881_v13 = vpop.f32.mrf.mxu0 }
 0xbfd   :  { %v1882_v18 = vadd.f32 %v1881_v13, %v1799_v12 }
 0xbfe   :  { %v1883_v38 = vpop.f32.mrf.mxu0 }
 0xbff   :  { %1892 = vrot.lane.b32.xlu1 %v1882_v18, %s11139_s28  ;;  %v11596_v25 = vadd.f32 %v1883_v38, %v1803_v5  ;;  %v1946_v41 = vpack.c.bf16 %v1882_v18, %v1882_v18  ;;  %v1930_v29 = vmul.f32 0.25, %v1882_v18 }
 0xc00   :  { %v1885_v20 = vpop.f32.mrf.mxu0 }
 0xc01   :  { %v1886_v22 = vadd.f32 %v1885_v20, %v1799_v12  ;;  %v1938_v46 = vpack.c.bf16 %v1930_v29, %v1930_v29 }
 0xc02   :  { %v1887_v23 = vpop.f32.mrf.mxu0 }
 0xc03   :  { %v11598_v26 = vadd.f32 %v1887_v23, %v1803_v5  ;;  %1894 = vrot.lane.b32.xlu0 %v1886_v22, %s11139_s28  ;;  %1898 = vrot.lane.b32.xlu1 %v1882_v18, %s11138_s27  ;;  %v1947_v24 = vpack.c.bf16 %v1886_v22, %v1886_v22  ;;  %v1931_v43 = vmul.f32 0.25, %v1886_v22  ;;  %v2450_v23 = vpack.c.bf16 %v11596_v25, %v11596_v25 }
 0xc05   :  { %v11604_v55 = vpack.i.bf16 %v11598_v26, %v11596_v25  ;;  %v1939_v49 = vpack.c.bf16 %v1931_v43, %v1931_v43 }
 0xc07   :  { %1904 = vrot.lane.b32.xlu0 %v1882_v18, %s11140_s4  ;;  %1900 = vrot.lane.b32.xlu1 %v1886_v22, %s11138_s27 }
 0xc0b   :  { %1906 = vrot.lane.b32.xlu1 %v1886_v22, %s11140_s4  ;;  %1955 = vrot.lane.b32.xlu0 %v1946_v41, %s11132_s25 }
 0xc0f   :  { %2004 = vrot.lane.b32.xlu1 %v1947_v24, %s11132_s25 }
 0xc71   :  { %v1893_v27 = vpop.permute.xlu1 %1892 }
 0xc72   :  { %v1948_v54 = vpack.c.bf16 %v1893_v27, %v1893_v27  ;;  %v1932_v50 = vmul.f32 0.25, %v1893_v27  ;;  %v2462_v27 = vsel %vm1033_vm6, %v2450_v23, 0 }
 0xc74   :  { %2053 = vrot.lane.b32.xlu0 %v1948_v54, %s11132_s25  ;;  %v1940_v61 = vpack.c.bf16 %v1932_v50, %v1932_v50  ;;  %v2451_v54 = vpack.c.bf16 %v11598_v26, %v11598_v26 }
 0xc75   :  { %v1895_v28 = vpop.permute.xlu0 %1894  ;;  %v1899_v30 = vpop.permute.xlu1 %1898 }
 0xc76   :  { %v1949_v17 = vpack.c.bf16 %v1895_v28, %v1895_v28  ;;  %v1950_v32 = vpack.c.bf16 %v1899_v30, %v1899_v30  ;;  %v1933_v56 = vmul.f32 0.25, %v1895_v28  ;;  %v1934_v8 = vmul.f32 0.25, %v1899_v30 }
 0xc77   :  { %v2508_v28 = vsel %vm1033_vm6, %v2451_v54, 0 }
 0xc78   :  { %2102 = vrot.lane.b32.xlu1 %v1949_v17, %s11132_s25  ;;  %2151 = vrot.lane.b32.xlu0 %v1950_v32, %s11132_s25  ;;  %v1941_v7 = vpack.c.bf16 %v1933_v56, %v1933_v56  ;;  %v1942_v13 = vpack.c.bf16 %v1934_v8, %v1934_v8 }
 0xc79   :  { %v1905_v33 = vpop.permute.xlu0 %1904  ;;  %v1901_v34 = vpop.permute.xlu1 %1900 }
 0xc7a   :  { %v1951_v36 = vpack.c.bf16 %v1901_v34, %v1901_v34  ;;  %v1952_v37 = vpack.c.bf16 %v1905_v33, %v1905_v33  ;;  %v1935_v16 = vmul.f32 0.25, %v1901_v34  ;;  %v1936_v5 = vmul.f32 0.25, %v1905_v33 }
 0xc7c   :  { %2200 = vrot.lane.b32.xlu1 %v1951_v36, %s11132_s25  ;;  %2249 = vrot.lane.b32.xlu0 %v1952_v37, %s11132_s25  ;;  %v1943_v20 = vpack.c.bf16 %v1935_v16, %v1935_v16  ;;  %v1944_v41 = vpack.c.bf16 %v1936_v5, %v1936_v5 }
 0xc7d   :  { %v1907_v39 = vpop.permute.xlu1 %1906  ;;  %v1956_v40 = vpop.permute.xlu0 %1955 }
 0xc7e   :  { %v1961_v42 = vsel %vm517_vm5, %v1956_v40, 0  ;;  %v1953_v44 = vpack.c.bf16 %v1907_v39, %v1907_v39  ;;  %v1937_v24 = vmul.f32 0.25, %v1907_v39 }
 0xc7f   :  { %9754 = vmatpush3.bf16.xpose.msra.mxu0 %v1961_v42 }
 0xc80   :  { %2298 = vrot.lane.b32.xlu1 %v1953_v44, %s11132_s25  ;;  %9759 = vmatprep.subr.bf16.mxu0 %v11134_v1  ;;  %v1945_v25 = vpack.c.bf16 %v1937_v24, %v1937_v24 }
 0xc81   :  { %v2005_v35 = vpop.permute.xlu1 %2004 }
 0xc82   :  { %v2010_v47 = vsel %vm517_vm5, %v2005_v35, 0 }
 0xc86   :  { %9756 = vmatmul.mubr.msk.bf16.vlgmr.msra.gmra.mxu0 %vm517_vm5, %v1938_v46 }
 0xc87   :  { %9760 = vmatpush3.bf16.xpose.msra.mxu0 %v2010_v47  ;;  %9761 = vmatprep.mubr.msk.bf16.mxu0 %vm11135_vm0, %v11134_v1 }
 0xc88   :  { %9771 = vmatprep.subr.bf16.mxu0 %v11134_v1 }
 0xc8e   :  { %9762 = vmatmul.mubr.msk.bf16.vlgmr.msra.gmra.mxu0 %vm517_vm5, %v1939_v49 }
 0xc8f   :  { %9773 = vmatprep.mubr.msk.bf16.mxu0 %vm11135_vm0, %v11134_v1 }
 0xce6   :  { %v2054_v51 = vpop.permute.xlu0 %2053 }
 0xce7   :  { %v2059_v48 = vsel %vm517_vm5, %v2054_v51, 0 }
 0xce8   :  { %9766 = vmatpush3.bf16.xpose.msra.mxu1 %v2059_v48 }
 0xce9   :  { %9777 = vmatprep.subr.bf16.mxu1 %v11134_v1 }
 0xcea   :  { %v2103_v53 = vpop.permute.xlu1 %2102  ;;  %v2152_v60 = vpop.permute.xlu0 %2151 }
 0xceb   :  { %v2108_v59 = vsel %vm517_vm5, %v2103_v53, 0  ;;  %v2157_v0 = vsel %vm517_vm5, %v2152_v60, 0 }
 0xcec   :  { %9772 = vmatpush3.bf16.xpose.msra.mxu0 %v2108_v59 }
 0xced   :  { %9783 = vmatprep.subr.bf16.mxu0 %v11134_v1 }
 0xcee   :  { %v2201_v6 = vpop.permute.xlu1 %2200  ;;  %v2250_v12 = vpop.permute.xlu0 %2249 }
 0xcef   :  { %9768 = vmatmul.mubr.msk.bf16.vlgmr.msra.gmra.mxu1 %vm517_vm5, %v1940_v61  ;;  %v2206_v10 = vsel %vm517_vm5, %v2201_v6, 0  ;;  %v2255_v18 = vsel %vm517_vm5, %v2250_v12, 0 }
 0xcf0   :  { %9778 = vmatpush3.bf16.xpose.msra.mxu1 %v2157_v0  ;;  %9779 = vmatprep.mubr.msk.bf16.mxu1 %vm11135_vm0, %v11134_v1 }
 0xcf1   :  { %9789 = vmatprep.subr.bf16.mxu1 %v11134_v1 }
 0xcf2   :  { %v2299_v38 = vpop.permute.xlu1 %2298 }
 0xcf3   :  { %9774 = vmatmul.mubr.msk.bf16.vlgmr.msra.gmra.mxu0 %vm517_vm5, %v1941_v7  ;;  %v2304_v22 = vsel %vm517_vm5, %v2299_v38, 0 }
 0xcf4   :  { %9784 = vmatpush3.bf16.xpose.msra.mxu0 %v2206_v10  ;;  %9785 = vmatprep.mubr.msk.bf16.mxu0 %vm11135_vm0, %v11134_v1 }
 0xcf5   :  { %9795 = vmatprep.subr.bf16.mxu0 %v11134_v1 }
 0xcf7   :  { %9780 = vmatmul.mubr.msk.bf16.vlgmr.msra.gmra.mxu1 %vm517_vm5, %v1942_v13 }
 0xcf8   :  { %9790 = vmatpush3.bf16.xpose.msra.mxu1 %v2255_v18  ;;  %9791 = vmatprep.mubr.msk.bf16.mxu1 %vm11135_vm0, %v11134_v1 }
 0xcf9   :  { %9801 = vmatprep.subr.bf16.mxu1 %v11134_v1 }
 0xcfb   :  { %9786 = vmatmul.mubr.msk.bf16.vlgmr.msra.gmra.mxu0 %vm517_vm5, %v1943_v20 }
 0xcfc   :  { %9796 = vmatpush3.bf16.xpose.msra.mxu0 %v2304_v22  ;;  %9797 = vmatprep.mubr.msk.bf16.mxu0 %vm11135_vm0, %v11134_v1 }
 0xcfd   :  { %9807 = vmatprep.subr.bf16.mxu0 %v11134_v1 }
 0xcff   :  { %9792 = vmatmul.mubr.msk.bf16.vlgmr.msra.gmra.mxu1 %vm517_vm5, %v1944_v41 }
 0xd00   :  { %9802 = vmatpush3.bf16.msra.mxu1 %v2462_v27  ;;  %9803 = vmatprep.mubr.msk.bf16.mxu1 %vm11135_vm0, %v11134_v1 }
 0xd01   :  { %9813 = vmatprep.subr.bf16.mxu1 %v11134_v1 }
 0xd03   :  { %9798 = vmatmul.mubr.msk.bf16.vlgmr.msra.gmra.mxu0 %vm517_vm5, %v1945_v25 }
 0xd04   :  { %9808 = vmatpush3.bf16.msra.mxu0 %v2508_v28  ;;  %9809 = vmatprep.mubr.msk.bf16.mxu0 %vm11135_vm0, %v11134_v1 }
 0xd05   :  { %9819 = vmatprep.subr.bf16.mxu0 %v11134_v1 }
 0xd46   :  { %v1997_v30 = vpop.f32.mrf.mxu0 }
 0xd47   :  { %v2346_v26 = vadd.f32 %v1997_v30, %v11379_v14 }
 0xd48   :  { %v9757_v17 = vpop.f32.mrf.mxu0 }
 0xd49   :  { %v2354_v32 = vsel %vm925_vm8, %v2346_v26, -inf }
 0xd4a   :  { %2355 = vmax.xlane.f32.xlu0 %v2354_v32  ;;  %v2000_v33 = vpop.f32.mrf.mxu0 }
 0xd4c   :  { %v9758_v34 = vpop.f32.mrf.mxu0 }
 0xd4e   :  { %v2046_v36 = vpop.f32.mrf.mxu0 }
 0xd4f   :  { %v2347_v37 = vadd.f32 %v2046_v36, %v11388_v21 }
 0xd50   :  { %v9763_v39 = vpop.f32.mrf.mxu0 }
 0xd51   :  { %v2357_v40 = vsel %vm925_vm8, %v2347_v37, -inf }
 0xd52   :  { %2358 = vmax.xlane.f32.xlu1 %v2357_v40  ;;  %v2049_v42 = vpop.f32.mrf.mxu0 }
 0xd54   :  { %v9764_v44 = vpop.f32.mrf.mxu0 }
 0xdaf   :  { %v2095_v29 = vpop.f32.mrf.mxu1 }
 0xdb0   :  { %v2348_v35 = vadd.f32 %v2095_v29, %v11379_v14 }
 0xdb1   :  { %v9769_v46 = vpop.f32.mrf.mxu1 }
 0xdb2   :  { %v2360_v47 = vsel %vm925_vm8, %v2348_v35, -inf }
 0xdb3   :  { %v2098_v43 = vpop.f32.mrf.mxu1  ;;  %2361 = vmax.xlane.f32.xlu0 %v2360_v47  ;;  %v2144_v49 = vpop.f32.mrf.mxu0 }
 0xdb4   :  { %v2349_v51 = vadd.f32 %v2144_v49, %v11388_v21 }
 0xdb5   :  { %v9770_v48 = vpop.f32.mrf.mxu1  ;;  %v9775_v50 = vpop.f32.mrf.mxu0 }
 0xdb6   :  { %v2363_v53 = vsel %vm925_vm8, %v2349_v51, -inf }
 0xdb7   :  { %v2193_v59 = vpop.f32.mrf.mxu1  ;;  %2364 = vmax.xlane.f32.xlu0 %v2363_v53  ;;  %v2147_v60 = vpop.f32.mrf.mxu0 }
 0xdb8   :  { %v2350_v61 = vadd.f32 %v2193_v59, %v11379_v14 }
 0xdb9   :  { %v9776_v56 = vpop.f32.mrf.mxu0  ;;  %v9781_v0 = vpop.f32.mrf.mxu1 }
 0xdba   :  { %v2366_v6 = vsel %vm925_vm8, %v2350_v61, -inf }
 0xdbb   :  { %v2196_v7 = vpop.f32.mrf.mxu1  ;;  %2367 = vmax.xlane.f32.xlu1 %v2366_v6  ;;  %v2242_v8 = vpop.f32.mrf.mxu0 }
 0xdbc   :  { %v2351_v10 = vadd.f32 %v2242_v8, %v11388_v21 }
 0xdbd   :  { %v9782_v12 = vpop.f32.mrf.mxu1  ;;  %v9787_v13 = vpop.f32.mrf.mxu0 }
 0xdbe   :  { %v2369_v16 = vsel %vm925_vm8, %v2351_v10, -inf }
 0xdbf   :  { %v2291_v18 = vpop.f32.mrf.mxu1  ;;  %2370 = vmax.xlane.f32.xlu0 %v2369_v16  ;;  %v2245_v38 = vpop.f32.mrf.mxu0 }
 0xdc0   :  { %v2352_v5 = vadd.f32 %v2291_v18, %v11379_v14 }
 0xdc1   :  { %v9788_v20 = vpop.f32.mrf.mxu0  ;;  %v9793_v22 = vpop.f32.mrf.mxu1 }
 0xdc2   :  { %v2372_v23 = vsel %vm925_vm8, %v2352_v5, -inf }
 0xdc3   :  { %v2294_v41 = vpop.f32.mrf.mxu1  ;;  %2373 = vmax.xlane.f32.xlu1 %v2372_v23  ;;  %v2340_v24 = vpop.f32.mrf.mxu0 }
 0xdc4   :  { %v2353_v27 = vadd.f32 %v2340_v24, %v11388_v21 }
 0xdc5   :  { %v9794_v54 = vpop.f32.mrf.mxu1  ;;  %v9799_v25 = vpop.f32.mrf.mxu0 }
 0xdc6   :  { %v2375_v28 = vsel %vm925_vm8, %v2353_v27, -inf }
 0xdc7   :  { %2376 = vmax.xlane.f32.xlu0 %v2375_v28  ;;  %v2343_v30 = vpop.f32.mrf.mxu0 }
 0xdc9   :  { %v9800_v17 = vpop.f32.mrf.mxu0 }
 0xdd3   :  { %v2356_v33 = vpop.xlane.xlu0 %2355 }
 0xdd4   :  { %10523 = vrot.lane.b32.xlu1 %v11604_v55, %s11139_s28  ;;  %v2378_v39 = vsub.f32 %v2346_v26, %v2356_v33 }
 0xdd6   :  { %v2386_v40 = vmul.f32 1.442695, %v2378_v39 }
 0xddb   :  { %v2359_v32 = vpop.xlane.xlu1 %2358 }
 0xddc   :  { %v2379_v34 = vsub.f32 %v2347_v37, %v2359_v32 }
 0xdde   :  { %v2388_v36 = vmul.f32 1.442695, %v2379_v34 }
 0xde0   :  { %10861 = vpow2.f32 %v2388_v36 }
 0xde1   :  { %10863 = vpow2.f32 %v2386_v40 }
 0xded   :  { %v10862_v42 = vpop.eup %10861 }
 0xdee   :  { %v2405_v44 = vsel %vm925_vm8, %v10862_v42, 0.0  ;;  %v11684_v29 = vpop.eup %10863 }
 0xdef   :  { %2406 = vadd.xlane.f32.xlu0 %v2405_v44  ;;  %v2402_v46 = vsel %vm925_vm8, %v11684_v29, 0.0 }
 0xdf8   :  { %2403 = vadd.xlane.f32.xlu1 %v2402_v46 }
 0xe3c   :  { %v2362_v47 = vpop.xlane.xlu0 %2361 }
 0xe3d   :  { %v2380_v43 = vsub.f32 %v2348_v35, %v2362_v47 }
 0xe3f   :  { %v2390_v49 = vmul.f32 1.442695, %v2380_v43 }
 0xe40   :  { %v2365_v48 = vpop.xlane.xlu0 %2364 }
 0xe41   :  { %10865 = vpow2.f32 %v2390_v49  ;;  %v2381_v37 = vsub.f32 %v2349_v51, %v2365_v48 }
 0xe43   :  { %v2392_v26 = vmul.f32 1.442695, %v2381_v37 }
 0xe44   :  { %v2368_v50 = vpop.xlane.xlu1 %2367 }
 0xe45   :  { %10867 = vpow2.f32 %v2392_v26  ;;  %v2382_v53 = vsub.f32 %v2350_v61, %v2368_v50 }
 0xe47   :  { %v2394_v59 = vmul.f32 1.442695, %v2382_v53 }
 0xe48   :  { %v2371_v60 = vpop.xlane.xlu0 %2370 }
 0xe49   :  { %10869 = vpow2.f32 %v2394_v59  ;;  %v2383_v56 = vsub.f32 %v2351_v10, %v2371_v60 }
 0xe4b   :  { %v2396_v0 = vmul.f32 1.442695, %v2383_v56 }
 0xe4c   :  { %v2374_v6 = vpop.xlane.xlu1 %2373 }
 0xe4d   :  { %10871 = vpow2.f32 %v2396_v0  ;;  %v2384_v7 = vsub.f32 %v2352_v5, %v2374_v6 }
 0xe4e   :  { %v10866_v8 = vpop.eup %10865 }
 0xe4f   :  { %v2398_v12 = vmul.f32 1.442695, %v2384_v7  ;;  %v2408_v35 = vsel %vm925_vm8, %v10866_v8, 0.0 }
 0xe50   :  { %2409 = vadd.xlane.f32.xlu1 %v2408_v35  ;;  %v2377_v13 = vpop.xlane.xlu0 %2376  ;;  %v10524_v54 = vpop.permute.xlu1 %10523 }
 0xe51   :  { %10873 = vpow2.f32 %v2398_v12  ;;  %v2385_v51 = vsub.f32 %v2353_v27, %v2377_v13  ;;  %v10526_v28 = vunpack.i.h.bf16 %v10524_v54  ;;  %v10525_v36 = vunpack.i.l.bf16 %v10524_v54 }
 0xe52   :  { %v10868_v16 = vpop.eup %10867 }
 0xe53   :  { %v2400_v18 = vmul.f32 1.442695, %v2385_v51  ;;  %v2411_v61 = vsel %vm925_vm8, %v10868_v16, 0.0  ;;  %v2453_v17 = vpack.c.bf16 %v10526_v28, %v10526_v28  ;;  %v2452_v39 = vpack.c.bf16 %v10525_v36, %v10525_v36 }
 0xe54   :  { %2412 = vadd.xlane.f32.xlu0 %v2411_v61 }
 0xe55   :  { %10875 = vpow2.f32 %v2400_v18  ;;  %v2600_v34 = vsel %vm1033_vm6, %v2453_v17, 0 }
 0xe56   :  { %v11690_v38 = vpop.eup %10869 }
 0xe57   :  { %v2414_v10 = vsel %vm925_vm8, %v11690_v38, 0.0 }
 0xe58   :  { %2415 = vadd.xlane.f32.xlu1 %v2414_v10 }
 0xe5a   :  { %v11694_v5 = vpop.eup %10871 }
 0xe5b   :  { %v2417_v20 = vsel %vm925_vm8, %v11694_v5, 0.0 }
 0xe5c   :  { %2418 = vadd.xlane.f32.xlu0 %v2417_v20 }
 0xe5e   :  { %v11698_v22 = vpop.eup %10873 }
 0xe5f   :  { %v2420_v23 = vsel %vm925_vm8, %v11698_v22, 0.0 }
 0xe60   :  { %2421 = vadd.xlane.f32.xlu1 %v2420_v23 }
 0xe62   :  { %v11702_v41 = vpop.eup %10875 }
 0xe63   :  { %v2423_v24 = vsel %vm925_vm8, %v11702_v41, 0.0 }
 0xe64   :  { %2424 = vadd.xlane.f32.xlu0 %v2423_v24 }
 0xe71   :  { %10533 = vrot.lane.b32.xlu1 %v11604_v55, %s11140_s4 }
 0xe78   :  { %v2407_v27 = vpop.xlane.xlu0 %2406 }
 0xe79   :  { %10877 = vrcp.f32 %v2407_v27 }
 0xe7a   :  { %10528 = vrot.lane.b32.xlu0 %v11604_v55, %s11138_s27 }
 0xe81   :  { %v2404_v25 = vpop.xlane.xlu1 %2403 }
 0xe82   :  { %10879 = vrcp.f32 %v2404_v25 }
 0xe86   :  { %v10878_v30 = vpop.eup %10877 }
 0xe87   :  { %v2435_v32 = vmul.f32 %v10878_v30, %v10862_v42  ;;  %v2554_v42 = vsel %vm1033_vm6, %v2452_v39, 0 }
 0xe89   :  { %v2443_v33 = vpack.c.bf16 %v2435_v32, %v2435_v32 }
 0xe8b   :  { %9810 = vmatmul.mubr.msk.bf16.vlgmr.msra.gmra.mxu0 %vm925_vm8, %v2443_v33 }
 0xe8c   :  { %9820 = vmatpush3.bf16.msra.mxu0 %v2600_v34  ;;  %9821 = vmatprep.mubr.msk.bf16.mxu0 %vm11135_vm0, %v11134_v1 }
 0xe8d   :  { %9831 = vmatprep.subr.bf16.mxu0 %v11134_v1 }
 0xe8f   :  { %v10880_v55 = vpop.eup %10879 }
 0xe90   :  { %v2434_v40 = vmul.f32 %v10880_v55, %v11684_v29 }
 0xe92   :  { %v2442_v44 = vpack.c.bf16 %v2434_v40, %v2434_v40 }
 0xe94   :  { %9804 = vmatmul.mubr.msk.bf16.vlgmr.msra.gmra.mxu1 %vm925_vm8, %v2442_v44 }
 0xe95   :  { %9814 = vmatpush3.bf16.msra.mxu1 %v2554_v42  ;;  %9815 = vmatprep.mubr.msk.bf16.mxu1 %vm11135_vm0, %v11134_v1  ;;  %v10716_v42 = vld [vmem:[%s13001_s6 + $0xb8] sm:$0xff]  }
 0xe96   :  { %9825 = vmatprep.subr.bf16.mxu1 %v11134_v1 }
 0xed9   :  { %v2410_v46 = vpop.xlane.xlu1 %2409 }
 0xeda   :  { %10881 = vrcp.f32 %v2410_v46 }
 0xedd   :  { %v2413_v47 = vpop.xlane.xlu0 %2412 }
 0xede   :  { %10883 = vrcp.f32 %v2413_v47 }
 0xee1   :  { %v2416_v43 = vpop.xlane.xlu1 %2415 }
 0xee2   :  { %10885 = vrcp.f32 %v2416_v43 }
 0xee5   :  { %v2419_v49 = vpop.xlane.xlu0 %2418 }
 0xee6   :  { %10887 = vrcp.f32 %v2419_v49 }
 0xee7   :  { %v10882_v29 = vpop.eup %10881 }
 0xee8   :  { %v2436_v48 = vmul.f32 %v10882_v29, %v10866_v8 }
 0xee9   :  { %v2422_v37 = vpop.xlane.xlu1 %2421 }
 0xeea   :  { %v2444_v26 = vpack.c.bf16 %v2436_v48, %v2436_v48  ;;  %10889 = vrcp.f32 %v2422_v37  ;;  %v10717_v48 = vld [vmem:[%s13001_s6 + $0xb0] sm:$0xff]  }
 0xeeb   :  { %v10884_v50 = vpop.eup %10883 }
 0xeec   :  { %9816 = vmatmul.mubr.msk.bf16.vlgmr.msra.gmra.mxu1 %vm925_vm8, %v2444_v26  ;;  %v2437_v53 = vmul.f32 %v10884_v50, %v10868_v16  ;;  %v10718_v50 = vld [vmem:[%s13001_s6 + $0xa8] sm:$0xff]  }
 0xeed   :  { %v2425_v59 = vpop.xlane.xlu0 %2424  ;;  %9827 = vmatprep.mubr.msk.bf16.mxu1 %vm11135_vm0, %v11134_v1  ;;  %v10534_v56 = vpop.permute.xlu1 %10533 }
 0xeee   :  { %10891 = vrcp.f32 %v2425_v59  ;;  %v2445_v60 = vpack.c.bf16 %v2437_v53, %v2437_v53  ;;  %v10536_v7 = vunpack.i.h.bf16 %v10534_v56  ;;  %v10535_v8 = vunpack.i.l.bf16 %v10534_v56 }
 0xeef   :  { %v10886_v0 = vpop.eup %10885 }
 0xef0   :  { %9822 = vmatmul.mubr.msk.bf16.vlgmr.msra.gmra.mxu0 %vm925_vm8, %v2445_v60  ;;  %v2438_v18 = vmul.f32 %v10886_v0, %v11690_v38  ;;  %v2457_v10 = vpack.c.bf16 %v10536_v7, %v10536_v7  ;;  %v2456_v20 = vpack.c.bf16 %v10535_v8, %v10535_v8  ;;  %v10719_v60 = vld [vmem:[%s13001_s6 + $0xa0] sm:$0xff]  }
 0xef1   :  { %v10529_v6 = vpop.permute.xlu0 %10528  ;;  %9833 = vmatprep.mubr.msk.bf16.mxu0 %vm11135_vm0, %v11134_v1 }
 0xef2   :  { %v10531_v12 = vunpack.i.h.bf16 %v10529_v6  ;;  %v10530_v35 = vunpack.i.l.bf16 %v10529_v6  ;;  %v2446_v27 = vpack.c.bf16 %v2438_v18, %v2438_v18  ;;  %v2738_v38 = vsel %vm1033_vm6, %v2456_v20, 0 }
 0xef3   :  { %v10888_v13 = vpop.eup %10887 }
 0xef4   :  { %v2455_v51 = vpack.c.bf16 %v10531_v12, %v10531_v12  ;;  %v2454_v16 = vpack.c.bf16 %v10530_v35, %v10530_v35  ;;  %v2439_v61 = vmul.f32 %v10888_v13, %v11694_v5  ;;  %v2784_v5 = vsel %vm1033_vm6, %v2457_v10, 0 }
 0xef6   :  { %v2646_v23 = vsel %vm1033_vm6, %v2454_v16, 0  ;;  %v2692_v24 = vsel %vm1033_vm6, %v2455_v51, 0  ;;  %v2447_v54 = vpack.c.bf16 %v2439_v61, %v2439_v61 }
 0xef7   :  { %9826 = vmatpush3.bf16.msra.mxu1 %v2646_v23  ;;  %9832 = vmatpush3.bf16.msra.mxu0 %v2692_v24  ;;  %v10890_v25 = vpop.eup %10889 }
 0xef8   :  { %9837 = vmatprep.subr.bf16.mxu1 %v11134_v1  ;;  %9843 = vmatprep.subr.bf16.mxu0 %v11134_v1  ;;  %v2440_v30 = vmul.f32 %v10890_v25, %v11698_v22 }
 0xefa   :  { %9828 = vmatmul.mubr.msk.bf16.vlgmr.msra.gmra.mxu1 %vm925_vm8, %v2446_v27  ;;  %9834 = vmatmul.mubr.msk.bf16.vlgmr.msra.gmra.mxu0 %vm925_vm8, %v2447_v54  ;;  %v2448_v32 = vpack.c.bf16 %v2440_v30, %v2440_v30 }
 0xefb   :  { %v10892_v28 = vpop.eup %10891  ;;  %9838 = vmatpush3.bf16.msra.mxu1 %v2738_v38  ;;  %9844 = vmatpush3.bf16.msra.mxu0 %v2784_v5 }
 0xefc   :  { %9839 = vmatprep.mubr.msk.bf16.mxu1 %vm11135_vm0, %v11134_v1  ;;  %9845 = vmatprep.mubr.msk.bf16.mxu0 %vm11135_vm0, %v11134_v1  ;;  %v2441_v17 = vmul.f32 %v10892_v28, %v11702_v41 }
 0xefd   :  { %9849 = vmatprep.subr.bf16.mxu1 %v11134_v1  ;;  %9861 = vmatprep.subr.bf16.mxu0 %v11134_v1 }
 0xefe   :  { %v2449_v33 = vpack.c.bf16 %v2441_v17, %v2441_v17 }
 0xf02   :  { %9840 = vmatmul.mubr.msk.bf16.vlgmr.msra.gmra.mxu1 %vm925_vm8, %v2448_v32  ;;  %9846 = vmatmul.mubr.msk.bf16.vlgmr.msra.gmra.mxu0 %vm925_vm8, %v2449_v33 }
 0xf03   :  { %9857 = vmatprep.mubr.msk.bf16.mxu1 %vm11135_vm0, %v11134_v1  ;;  %9869 = vmatprep.mubr.msk.bf16.mxu0 %vm11135_vm0, %v11134_v1 }
 0xf04   :  { %9850 = vmatpush3.bf16.msra.mxu1 %v10716_v42 }
 0xf05   :  { %9851 = vmatprep.subr.bf16.mxu1 %v11134_v1 }
 0xf08   :  { %9852 = vmatpush3.bf16.msra.mxu1 %v10717_v48 }
 0xf09   :  { %9853 = vmatprep.subr.bf16.mxu1 %v11134_v1 }
 0xf0c   :  { %9854 = vmatpush3.bf16.msra.mxu1 %v10718_v50 }
 0xf0d   :  { %9855 = vmatprep.subr.bf16.mxu1 %v11134_v1 }
 0xf10   :  { %9856 = vmatpush3.bf16.msra.mxu1 %v10719_v60 }
 0xf11   :  { %9873 = vmatprep.subr.bf16.mxu1 %v11134_v1 }
 0xf4b   :  { %v2544_v34 = vpop.f32.mrf.mxu0 }
 0xf4d   :  { %v9811_v22 = vpop.f32.mrf.mxu0 }
 0xf4f   :  { %v2547_v36 = vpop.f32.mrf.mxu0 }
 0xf51   :  { %v9812_v41 = vpop.f32.mrf.mxu0 }
 0xf54   :  { %v2498_v55 = vpop.f32.mrf.mxu1 }
 0xf56   :  { %v9805_v39 = vpop.f32.mrf.mxu1 }
 0xf58   :  { %v2501_v40 = vpop.f32.mrf.mxu1 }
 0xf5a   :  { %v9806_v44 = vpop.f32.mrf.mxu1 }
 0xfac   :  { %v2590_v46 = vpop.f32.mrf.mxu1 }
 0xfae   :  { %v9817_v47 = vpop.f32.mrf.mxu1 }
 0xfb0   :  { %v2593_v43 = vpop.f32.mrf.mxu1  ;;  %v2636_v49 = vpop.f32.mrf.mxu0 }
 0xfb1   :  { %v10537_v29 = vpack.i.bf16 %v2636_v49, %v2590_v46 }
 0xfb2   :  { %v9818_v37 = vpop.f32.mrf.mxu1  ;;  %v9823_v26 = vpop.f32.mrf.mxu0 }
 0xfb3   :  { %10538 = vrot.lane.b32.xlu1 %v10537_v29, %s11130_s20 }
 0xfb4   :  { %v2639_v53 = vpop.f32.mrf.mxu0 }
 0xfb6   :  { %v9824_v59 = vpop.f32.mrf.mxu0 }
 0xfba   :  { %v2682_v56 = vpop.f32.mrf.mxu1  ;;  %v2728_v0 = vpop.f32.mrf.mxu0 }
 0xfbb   :  { %v10542_v6 = vpack.i.bf16 %v2728_v0, %v2682_v56 }
 0xfbc   :  { %v9829_v7 = vpop.f32.mrf.mxu1  ;;  %v9835_v8 = vpop.f32.mrf.mxu0 }
 0xfbd   :  { %10543 = vrot.lane.b32.xlu0 %v10542_v6, %s11141_s14 }
 0xfbe   :  { %v2685_v12 = vpop.f32.mrf.mxu1  ;;  %v2731_v35 = vpop.f32.mrf.mxu0 }
 0xfbf   :  { %v10720_v35 = vld [vmem:[#allocation6 + $0x38] sm:$0xff]  }
 0xfc0   :  { %v9830_v13 = vpop.f32.mrf.mxu1  ;;  %v9836_v51 = vpop.f32.mrf.mxu0  ;;  %9862 = vmatpush3.bf16.msra.mxu0 %v10720_v35  ;;  %v10733_v35 = vld [vmem:[%s13001_s6 + $0x58] sm:$0xff]  }
 0xfc1   :  { %9863 = vmatprep.subr.bf16.mxu0 %v11134_v1  ;;  %v10722_v13 = vld [vmem:[#allocation6 + $0x28] sm:$0xff]   ;;  %v10723_v51 = vld [vmem:[#allocation6 + $0x20] sm:$0xff]  }
 0xfc2   :  { %v2774_v16 = vpop.f32.mrf.mxu1  ;;  %v2820_v18 = vpop.f32.mrf.mxu0 }
 0xfc3   :  { %v10547_v61 = vpack.i.bf16 %v2820_v18, %v2774_v16  ;;  %v3205_v16 = vld [vmem:[%s12997_s2 + $0x8] sm:$0xff]  ;;  %v10724_v18 = vld [vmem:[%s13003_s8 + $0x78] sm:$0xff]  }
 0xfc4   :  { %v9841_v10 = vpop.f32.mrf.mxu1  ;;  %v9847_v20 = vpop.f32.mrf.mxu0 }
 0xfc5   :  { %10548 = vrot.lane.b32.xlu1 %v10547_v61, %s11142_s15  ;;  %v10725_v61 = vld [vmem:[%s13003_s8 + $0x70] sm:$0xff]   ;;  %v10726_v10 = vld [vmem:[%s13003_s8 + $0x68] sm:$0xff]   ;;  %v10727_v20 = vld [vmem:[%s13003_s8 + $0x60] sm:$0xff]  }
 0xfc6   :  { %v2777_v23 = vpop.f32.mrf.mxu1  ;;  %v2823_v24 = vpop.f32.mrf.mxu0 }
 0xfc7   :  { %v10728_v23 = vld [vmem:[%s13003_s8 + $0x58] sm:$0xff]  }
 0xfc8   :  { %v9842_v27 = vpop.f32.mrf.mxu1  ;;  %v9848_v54 = vpop.f32.mrf.mxu0 }
0x1025   :  { %v10539_v25 = vpop.permute.xlu1 %10538 }
0x1026   :  { %v10541_v5 = vunpack.i.h.bf16 %v10539_v25  ;;  %v10540_v28 = vunpack.i.l.bf16 %v10539_v25 }
0x1028   :  { %v2851_v33 = vsel %vm517_vm5, %v2544_v34, %v10541_v5  ;;  %v2850_v22 = vsel %vm517_vm5, %v2498_v55, %v10540_v28  ;;  %v2860_v34 = vrot.slane %v11537_v45, %v11504_v62  ;;  %v11813_v28 = vld [vmem:[#allocation2 + $0x20] sm:$0xff] }
0x102f   :  { %v10544_v38 = vpop.permute.xlu0 %10543 }
0x1030   :  { %v10546_v30 = vunpack.i.h.bf16 %v10544_v38  ;;  %v10545_v17 = vunpack.i.l.bf16 %v10544_v38 }
0x1032   :  { %v2853_v39 = vsel %vm111_vm2, %v2851_v33, %v10546_v30  ;;  %v2852_v40 = vsel %vm111_vm2, %v2850_v22, %v10545_v17  ;;  %v3209_v33 = vadd.s32 1, %v11259_v19 }
0x1034   :  { %vm3210_vm10 = vcmp.eq.s32.totalorder %v3209_v33, %v11208_v2 }
0x1035   :  { %vm3213_vm12 = vmand %vm3210_vm10, %vm3212_vm11 }
0x1037   :  { %v10549_v32 = vpop.permute.xlu1 %10548 }
0x1038   :  { %v10551_v36 = vunpack.i.h.bf16 %v10549_v32  ;;  %v10550_v41 = vunpack.i.l.bf16 %v10549_v32  ;;  %v2960_v32 = vrot.slane %v11813_v28, %v11211_v3 }
0x103a   :  { %v2855_v44 = vsel %vm1427_vm9, %v2853_v39, %v10551_v36  ;;  %v2854_v42 = vsel %vm1427_vm9, %v2852_v40, %v10550_v41  ;;  %v2966_v36 = vrot.slane %v11813_v28, %v11214_v4 }
0x103b   :  { %v2856_v46 = vpack.c.bf16 %v2855_v44, %v2854_v42  ;;  %v3208_v44 = vadd.s32 8, %v11208_v2 }
0x103d   :  { %9858 = vmatmul.mubr.msk.bf16.vlgmr.msra.gmra.mxu1 %vm232_vm1, %v2856_v46  ;;  %vm3211_vm13 = vcmp.eq.s32.totalorder %v3209_v33, %v3208_v44  ;;  %v10743_v44 = vld [vmem:[#allocation4 + $0x90] ss:$8 sps:$4 sm:$0xff]  }
0x103e   :  { %9889 = vmatprep.mubr.msk.bf16.mxu1 %vm11135_vm0, %v11134_v1  ;;  %9874 = vmatpush3.bf16.msra.mxu1 %v10724_v18  ;;  %vm3214_vm14 = vmand %vm3211_vm13, %vm3212_vm11  ;;  %v10737_v18 = vld [vmem:[#allocation4 + $0xb0] ss:$8 sps:$4 sm:$0xff]  }
0x103f   :  { %9875 = vmatprep.subr.bf16.mxu1 %v11134_v1 }
0x1042   :  { %9876 = vmatpush3.bf16.msra.mxu1 %v10725_v61  ;;  %v10739_v61 = vld [vmem:[#allocation4 + $0xb4] ss:$8 sps:$4 sm:$0xff]  }
0x1043   :  { %9877 = vmatprep.subr.bf16.mxu1 %v11134_v1 }
0x1046   :  { %9878 = vmatpush3.bf16.msra.mxu1 %v10726_v10 }
0x1047   :  { %9879 = vmatprep.subr.bf16.mxu1 %v11134_v1 }
0x104a   :  { %9880 = vmatpush3.bf16.msra.mxu1 %v10727_v20  ;;  %v11055_v20 = vld [vmem:[#allocation2] sm:$0xff] }
0x104b   :  { %9881 = vmatprep.subr.bf16.mxu1 %v11134_v1 }
0x104e   :  { %9882 = vmatpush3.bf16.msra.mxu1 %v10728_v23  ;;  %v3305_v23 = vrot.slane %v11055_v20, %v11214_v4 }
0x104f   :  { %9883 = vmatprep.subr.bf16.mxu1 %v11134_v1 }
0x10fd   :  { %v2922_v55 = vpop.f32.mrf.mxu1 }
0x10fe   :  { %v2923_v47 = vadd.f32 %v2922_v55, %v2860_v34  ;;  %v3215_v55 = vsel %vm3213_vm12, 1.0, %v11134_v1 }
0x10ff   :  { %v9859_v43 = vpop.f32.mrf.mxu1 }
0x1100   :  { %v2929_v49 = vadd.f32 %v2923_v47, %v11583_v9  ;;  %v3204_v47 = vld [vmem:[%s12997_s2] sm:$0xff]  ;;  %v3216_v43 = vsel %vm3214_vm14, 1.0, %v11134_v1 }
0x1101   :  { %v2925_v29 = vpop.f32.mrf.mxu1 }
0x1102   :  { %v2926_v48 = vadd.f32 %v2925_v29, %v2860_v34  ;;  %v2931_v37 = vsel %vm232_vm1, %v2929_v49, 0.0  ;;  %v10730_v29 = vld [vmem:[%s13003_s8 + $0x48] sm:$0xff]  }
0x1103   :  { %2932 = vadd.xlane.f32.xlu0 %v2931_v37  ;;  %v9860_v26 = vpop.f32.mrf.mxu1  ;;  %v10732_v37 = vld [vmem:[%s13001_s6 + $0x20] sm:$0xff]  }
0x1104   :  { %v2930_v50 = vadd.f32 %v2926_v48, %v11585_v11  ;;  %v10721_v11 = vld [vmem:[#allocation6 + $0x30] sm:$0xff]   ;;  %v10731_v48 = vld [vmem:[%s13003_s8 + $0x40] sm:$0xff]  }
0x1105   :  { %9864 = vmatpush3.bf16.msra.mxu0 %v10721_v11  ;;  %v11855_v26 = vld [vmem:[#allocation2 + $0x10] sm:$0xff] }
0x1106   :  { %v2934_v53 = vsel %vm232_vm1, %v2930_v50, 0.0  ;;  %9865 = vmatprep.subr.bf16.mxu0 %v11134_v1 }
0x1107   :  { %2935 = vadd.xlane.f32.xlu1 %v2934_v53 }
0x1109   :  { %9866 = vmatpush3.bf16.msra.mxu0 %v10722_v13  ;;  %v10734_v13 = vld [vmem:[%s13001_s6 + $0x50] sm:$0xff]  }
0x110a   :  { %9867 = vmatprep.subr.bf16.mxu0 %v11134_v1 }
0x110d   :  { %9868 = vmatpush3.bf16.msra.mxu0 %v10723_v51  ;;  %v10735_v51 = vld [vmem:[%s13001_s6 + $0x48] sm:$0xff]  }
0x110e   :  { %9893 = vmatprep.subr.mxu0 %v3205_v16 }
0x118c   :  { %v2933_v59 = vpop.xlane.xlu0 %2932 }
0x118d   :  { %v2937_v60 = vmul.f32 0.015625, %v2933_v59 }
0x118f   :  { %v2939_v56 = vsub.f32 %v2929_v49, %v2937_v60  ;;  %v10729_v49 = vld [vmem:[%s13003_s8 + $0x50] sm:$0xff]  }
0x1190   :  { %v2936_v45 = vpop.xlane.xlu1 %2935  ;;  %9884 = vmatpush3.bf16.msra.mxu1 %v10729_v49 }
0x1191   :  { %v2938_v0 = vmul.f32 0.015625, %v2936_v45  ;;  %v2941_v6 = vmul.f32 %v2939_v56, %v2939_v56  ;;  %9885 = vmatprep.subr.bf16.mxu1 %v11134_v1 }
0x1193   :  { %v2940_v7 = vsub.f32 %v2930_v50, %v2938_v0  ;;  %v2943_v9 = vsel %vm232_vm1, %v2941_v6, 0.0  ;;  %v2982_v50 = vrot.slane %v11855_v26, %v11558_v63 }
0x1194   :  { %2944 = vadd.xlane.f32.xlu0 %v2943_v9  ;;  %9886 = vmatpush3.bf16.msra.mxu1 %v10730_v29 }
0x1195   :  { %v2942_v8 = vmul.f32 %v2940_v7, %v2940_v7  ;;  %9887 = vmatprep.subr.bf16.mxu1 %v11134_v1 }
0x1197   :  { %v2946_v12 = vsel %vm232_vm1, %v2942_v8, 0.0 }
0x1198   :  { %2947 = vadd.xlane.f32.xlu0 %v2946_v12  ;;  %9888 = vmatpush3.bf16.msra.mxu1 %v10731_v48 }
0x1199   :  { %3525 = vmatprep.subr.bf16.mxu1 %v10739_v61 }
0x121d   :  { %v2945_v24 = vpop.xlane.xlu0 %2944 }
0x121e   :  { %v2949_v27 = vmul.f32 0.015625, %v2945_v24 }
0x1220   :  { %v2951_v54 = vadd.f32 1e-05, %v2949_v27 }
0x1221   :  { %v2948_v25 = vpop.xlane.xlu0 %2947 }
0x1222   :  { %10893 = vrsqrt.f32 %v2951_v54  ;;  %v2950_v38 = vmul.f32 0.015625, %v2948_v25 }
0x1224   :  { %v2952_v5 = vadd.f32 1e-05, %v2950_v38 }
0x1226   :  { %10895 = vrsqrt.f32 %v2952_v5 }
0x122f   :  { %v10894_v30 = vpop.eup %10893 }
0x1230   :  { %v2955_v17 = vmul.f32 %v10894_v30, %v2939_v56 }
0x1232   :  { %v2961_v39 = vmul.f32 %v2960_v32, %v2955_v17 }
0x1233   :  { %v10896_v22 = vpop.eup %10895 }
0x1234   :  { %v2956_v41 = vmul.f32 %v10896_v22, %v2940_v7  ;;  %v11823_v42 = vadd.f32 %v2966_v36, %v2961_v39  ;;  %v10740_v39 = vld [vmem:[#allocation4 + $0xa0] ss:$8 sps:$4 sm:$0xff]  }
0x1236   :  { %v2962_v40 = vmul.f32 %v2960_v32, %v2956_v41  ;;  %v10742_v41 = vld [vmem:[#allocation4 + $0xa4] ss:$8 sps:$4 sm:$0xff]  }
0x1238   :  { %v11825_v46 = vadd.f32 %v2966_v36, %v2962_v40  ;;  %v10745_v40 = vld [vmem:[#allocation4 + $0x94] ss:$8 sps:$4 sm:$0xff]  }
0x123a   :  { %v2978_v34 = vpack.c.bf16 %v11825_v46, %v11823_v42 }
0x123c   :  { %9870 = vmatmul.mubr.msk.bf16.vlgmr.msra.gmra.mxu0 %vm232_vm1, %v2978_v34  ;;  %v10748_v34 = vld [vmem:[#allocation4 + $0x84] ss:$8 sps:$4 sm:$0xff]  }
0x123d   :  { %9894 = vmatpush3.msra.mxu0 %v3205_v16  ;;  %9897 = vmatprep.mubr.msk.f32.mxu0 %vm517_vm5, %v3215_v55  ;;  %v10736_v16 = vld [vmem:[%s13001_s6 + $0x40] sm:$0xff]  }
0x123e   :  { %9895 = vmatprep.subr.mxu0 %v3204_v47  ;;  %v10746_v55 = vld [vmem:[#allocation4 + $0x80] ss:$8 sps:$4 sm:$0xff]  }
0x123f   :  { %9896 = vmatpush3.msra.mxu0 %v3204_v47  ;;  %v3371_v47 = vrot.slane %v11055_v20, %v11574_v58 }
0x1240   :  { %9900 = vmatprep.subr.bf16.mxu0 %v11134_v1 }
0x1244   :  { %9898 = vmatmul.mubr.msk.f32.vlgmr.msra.gmra.mxu0 %vm517_vm5, %v3216_v43 }
0x1245   :  { %9902 = vmatprep.mubr.msk.bf16.mxu0 %vm11135_vm0, %v11134_v1  ;;  %9901 = vmatpush3.bf16.msra.mxu0 %v10732_v37 }
0x1246   :  { %9906 = vmatprep.subr.bf16.mxu0 %v11134_v1 }
0x12fc   :  { %v3044_v53 = vpop.f32.mrf.mxu0 }
0x12fd   :  { %v3045_v60 = vadd.f32 %v3044_v53, %v2982_v50  ;;  %v3442_v53 = vld [vmem:[%s12998_s3 + $0x20] sm:$0xff] }
0x12fe   :  { %v9871_v59 = vpop.f32.mrf.mxu0 }
0x12ff   :  { %v3051_v6 = vmax.f32 %v3045_v60, 0.0 }
0x1300   :  { %v3047_v56 = vpop.f32.mrf.mxu0 }
0x1301   :  { %v3048_v45 = vadd.f32 %v3047_v56, %v2982_v50 }
0x1302   :  { %v9872_v0 = vpop.f32.mrf.mxu0 }
0x1303   :  { %v3052_v7 = vmax.f32 %v3048_v45, 0.0 }
0x1304   :  { %v9899_v9 = vpop.f32.mrf.mxu0 }
0x1305   :  { %v3070_v8 = vpack.c.bf16 %v3052_v7, %v3051_v6  ;;  %v3469_v6 = vrot.slane %v11813_v28, %v11294_v57 }
0x1306   :  { %v3289_v12 = vpop.f32.mrf.mxu0 }
0x1307   :  { %v3301_v11 = vpack.c.bf16 %v9899_v9, %v3289_v12  ;;  %9890 = vmatmul.mubr.bf16.vlgmr.msra.gmra.mxu1 %v3070_v8  ;;  %v79_v9 = vld [vmem:[#allocation2 + $0x28] sm:$0xff] }
0x1308   :  { %3549 = vmatprep.mubr.bf16.mxu1 %v11136_v31  ;;  %3526 = vmatpush1.bf16.msra.mxu1 %v10737_v18 }
0x1309   :  { %9903 = vmatmul.mubr.msk.bf16.vlgmr.msra.gmra.mxu0 %vm517_vm5, %v3301_v11  ;;  %3527 = vmatprep.subr.bf16.mxu1 %v10742_v41 }
0x130a   :  { %9907 = vmatpush3.bf16.msra.mxu0 %v10733_v35  ;;  %9914 = vmatprep.mubr.msk.bf16.mxu0 %vm11135_vm0, %v11134_v1  ;;  %v3473_v35 = vrot.slane %v79_v9, %v11294_v57 }
0x130b   :  { %9908 = vmatprep.subr.bf16.mxu0 %v11134_v1 }
0x130c   :  { %3528 = vmatpush1.bf16.msra.mxu1 %v10740_v39 }
0x130d   :  { %3529 = vmatprep.subr.bf16.mxu1 %v10745_v40 }
0x130e   :  { %9909 = vmatpush3.bf16.msra.mxu0 %v10734_v13 }
0x130f   :  { %9910 = vmatprep.subr.bf16.mxu0 %v11134_v1 }
0x1310   :  { %3530 = vmatpush1.bf16.msra.mxu1 %v10743_v44 }
0x1311   :  { %3531 = vmatprep.subr.bf16.mxu1 %v10748_v34 }
0x1312   :  { %9911 = vmatpush3.bf16.msra.mxu0 %v10735_v51 }
0x1313   :  { %9912 = vmatprep.subr.bf16.mxu0 %v11134_v1 }
0x1314   :  { %3532 = vmatpush1.bf16.msra.mxu1 %v10746_v55 }
0x1315   :  { %9930 = vmatprep.subr.bf16.mxu1 %v11134_v1 }
0x1316   :  { %9913 = vmatpush3.bf16.msra.mxu0 %v10736_v16 }
0x1317   :  { %9918 = vmatprep.subr.bf16.mxu0 %v11134_v1 }
0x13c7   :  { %v11879_v10 = vpop.f32.mrf.mxu1 }
0x13c9   :  { %v9891_v24 = vpop.f32.mrf.mxu1  ;;  %v3349_v27 = vpop.f32.mrf.mxu0 }
0x13ca   :  { %v3350_v38 = vadd.f32 %v3349_v27, %v3305_v23 }
0x13cb   :  { %v11882_v54 = vpop.f32.mrf.mxu1  ;;  %v9904_v25 = vpop.f32.mrf.mxu0 }
0x13cc   :  { %v3356_v33 = vmax.f32 %v3350_v38, 0.0 }
0x13cd   :  { %v9892_v5 = vpop.f32.mrf.mxu1  ;;  %v3352_v30 = vpop.f32.mrf.mxu0 }
0x13ce   :  { %v3353_v17 = vadd.f32 %v3352_v30, %v3305_v23 }
0x13cf   :  { %v9905_v32 = vpop.f32.mrf.mxu0 }
0x13d0   :  { %v3357_v22 = vmax.f32 %v3353_v17, 0.0 }
0x13d2   :  { %v3367_v36 = vpack.c.bf16 %v3357_v22, %v3356_v33 }
0x13d4   :  { %9915 = vmatmul.mubr.msk.bf16.vlgmr.msra.gmra.mxu0 %vm232_vm1, %v3367_v36 }
0x13d5   :  { %9920 = vmatprep.mubr.msk.bf16.mxu0 %vm11135_vm0, %v11134_v1 }
0x1494   :  { %v3433_v43 = vpop.f32.mrf.mxu0 }
0x1495   :  { %v3434_v49 = vadd.f32 %v3433_v43, %v3371_v47 }
0x1496   :  { %v9916_v29 = vpop.f32.mrf.mxu0 }
0x1497   :  { %v3440_v37 = vmax.f32 %v3434_v49, 0.0 }
0x1498   :  { %v3436_v48 = vpop.f32.mrf.mxu0 }
0x1499   :  { %v3437_v50 = vadd.f32 %v3436_v48, %v3371_v47  ;;  %v11892_v56 = vadd.f32 %v3442_v53, %v3440_v37 }
0x149a   :  { %v9917_v59 = vpop.f32.mrf.mxu0 }
0x149b   :  { %v3441_v60 = vmax.f32 %v3437_v50, 0.0 }
0x149d   :  { %v11894_v45 = vadd.f32 %v3442_v53, %v3441_v60 }
0x149f   :  { %v3465_v0 = vpack.c.bf16 %v11894_v45, %v11892_v56 }
0x14a1   :  { %9040 = vmatmul.mubr.msk.bf16.vlgmr.msra.gmra.mxu1 %vm232_vm1, %v3465_v0 }
0x14a2   :  { %9932 = vmatprep.mubr.msk.bf16.mxu1 %vm11135_vm0, %v11134_v1 }
0x1561   :  { %v3551_v7 = vpop.f32.mrf.mxu1 }
0x1562   :  { %v3552_v8 = vadd.f32 %v3551_v7, %v3469_v6 }
0x1563   :  { %v3553_v12 = vpop.f32.mrf.mxu1 }
0x1564   :  { %3562 = vrot.lane.b32.xlu1 %v3552_v8, %s11139_s28  ;;  %v11905_v16 = vadd.f32 %v3553_v12, %v3473_v35  ;;  %v3616_v61 = vpack.c.bf16 %v3552_v8, %v3552_v8  ;;  %v3600_v40 = vmul.f32 0.25, %v3552_v8 }
0x1565   :  { %v3555_v11 = vpop.f32.mrf.mxu1 }
0x1566   :  { %v3556_v13 = vadd.f32 %v3555_v11, %v3469_v6  ;;  %v3608_v34 = vpack.c.bf16 %v3600_v40, %v3600_v40 }
0x1567   :  { %v3557_v51 = vpop.f32.mrf.mxu1 }
0x1568   :  { %v11907_v18 = vadd.f32 %v3557_v51, %v3473_v35  ;;  %3564 = vrot.lane.b32.xlu0 %v3556_v13, %s11139_s28  ;;  %3568 = vrot.lane.b32.xlu1 %v3552_v8, %s11138_s27  ;;  %v3617_v20 = vpack.c.bf16 %v3556_v13, %v3556_v13  ;;  %v3601_v47 = vmul.f32 0.25, %v3556_v13 }
0x156a   :  { %v11913_v28 = vpack.i.bf16 %v11907_v18, %v11905_v16  ;;  %v3609_v43 = vpack.c.bf16 %v3601_v47, %v3601_v47 }
0x156c   :  { %3574 = vrot.lane.b32.xlu0 %v3552_v8, %s11140_s4  ;;  %3570 = vrot.lane.b32.xlu1 %v3556_v13, %s11138_s27 }
0x1570   :  { %3576 = vrot.lane.b32.xlu1 %v3556_v13, %s11140_s4  ;;  %3625 = vrot.lane.b32.xlu0 %v3616_v61, %s11132_s25 }
0x1574   :  { %3674 = vrot.lane.b32.xlu1 %v3617_v20, %s11132_s25 }
0x15d6   :  { %v3563_v23 = vpop.permute.xlu1 %3562 }
0x15d7   :  { %v3618_v24 = vpack.c.bf16 %v3563_v23, %v3563_v23  ;;  %v3602_v48 = vmul.f32 0.25, %v3563_v23 }
0x15d9   :  { %3723 = vrot.lane.b32.xlu0 %v3618_v24, %s11132_s25  ;;  %v3610_v59 = vpack.c.bf16 %v3602_v48, %v3602_v48  ;;  %v4120_v24 = vpack.c.bf16 %v11905_v16, %v11905_v16 }
0x15da   :  { %v3565_v27 = vpop.permute.xlu0 %3564  ;;  %v3569_v25 = vpop.permute.xlu1 %3568 }
0x15db   :  { %v3619_v38 = vpack.c.bf16 %v3565_v27, %v3565_v27  ;;  %v3620_v5 = vpack.c.bf16 %v3569_v25, %v3569_v25  ;;  %v3603_v60 = vmul.f32 0.25, %v3565_v27  ;;  %v3604_v9 = vmul.f32 0.25, %v3569_v25 }
0x15dd   :  { %3772 = vrot.lane.b32.xlu1 %v3619_v38, %s11132_s25  ;;  %3821 = vrot.lane.b32.xlu0 %v3620_v5, %s11132_s25  ;;  %v3611_v7 = vpack.c.bf16 %v3603_v60, %v3603_v60  ;;  %v3612_v35 = vpack.c.bf16 %v3604_v9, %v3604_v9  ;;  %v4132_v38 = vsel %vm1033_vm6, %v4120_v24, 0  ;;  %v4121_v5 = vpack.c.bf16 %v11907_v18, %v11907_v18 }
0x15de   :  { %v3575_v30 = vpop.permute.xlu0 %3574  ;;  %v3571_v17 = vpop.permute.xlu1 %3570  ;;  %v11977_v18 = vsel %vm3445_vm15, -1e+09, %v11134_v1 }
0x15df   :  { %v3622_v32 = vpack.c.bf16 %v3575_v30, %v3575_v30  ;;  %v3621_v33 = vpack.c.bf16 %v3571_v17, %v3571_v17  ;;  %v3605_v11 = vmul.f32 0.25, %v3571_v17  ;;  %v3606_v61 = vmul.f32 0.25, %v3575_v30 }
0x15e0   :  { %v4178_v30 = vsel %vm1033_vm6, %v4121_v5, 0 }
0x15e1   :  { %3870 = vrot.lane.b32.xlu1 %v3621_v33, %s11132_s25  ;;  %3919 = vrot.lane.b32.xlu0 %v3622_v32, %s11132_s25  ;;  %v3613_v20 = vpack.c.bf16 %v3605_v11, %v3605_v11  ;;  %v3614_v27 = vpack.c.bf16 %v3606_v61, %v3606_v61 }
0x15e2   :  { %v3577_v22 = vpop.permute.xlu1 %3576  ;;  %v3626_v36 = vpop.permute.xlu0 %3625 }
0x15e3   :  { %v3623_v41 = vpack.c.bf16 %v3577_v22, %v3577_v22  ;;  %v3631_v39 = vsel %vm517_vm5, %v3626_v36, 0  ;;  %v3607_v25 = vmul.f32 0.25, %v3577_v22 }
0x15e4   :  { %9919 = vmatpush3.bf16.xpose.msra.mxu0 %v3631_v39 }
0x15e5   :  { %3968 = vrot.lane.b32.xlu1 %v3623_v41, %s11132_s25  ;;  %9924 = vmatprep.subr.bf16.mxu0 %v11134_v1  ;;  %v3615_v16 = vpack.c.bf16 %v3607_v25, %v3607_v25 }
0x15e6   :  { %v3675_v44 = vpop.permute.xlu1 %3674 }
0x15e7   :  { %v3680_v55 = vsel %vm517_vm5, %v3675_v44, 0 }
0x15eb   :  { %9921 = vmatmul.mubr.msk.bf16.vlgmr.msra.gmra.mxu0 %vm517_vm5, %v3608_v34 }
0x15ec   :  { %9925 = vmatpush3.bf16.xpose.msra.mxu0 %v3680_v55  ;;  %9926 = vmatprep.mubr.msk.bf16.mxu0 %vm11135_vm0, %v11134_v1 }
0x15ed   :  { %9936 = vmatprep.subr.bf16.mxu0 %v11134_v1 }
0x15f3   :  { %9927 = vmatmul.mubr.msk.bf16.vlgmr.msra.gmra.mxu0 %vm517_vm5, %v3609_v43 }
0x15f4   :  { %9938 = vmatprep.mubr.msk.bf16.mxu0 %vm11135_vm0, %v11134_v1 }
0x164b   :  { %v3724_v49 = vpop.permute.xlu0 %3723 }
0x164c   :  { %v3729_v29 = vsel %vm517_vm5, %v3724_v49, 0 }
0x164d   :  { %9931 = vmatpush3.bf16.xpose.msra.mxu1 %v3729_v29 }
0x164e   :  { %9942 = vmatprep.subr.bf16.mxu1 %v11134_v1 }
0x164f   :  { %v3773_v37 = vpop.permute.xlu1 %3772  ;;  %v3822_v53 = vpop.permute.xlu0 %3821 }
0x1650   :  { %v3778_v50 = vsel %vm517_vm5, %v3773_v37, 0  ;;  %v3827_v0 = vsel %vm517_vm5, %v3822_v53, 0 }
0x1651   :  { %9937 = vmatpush3.bf16.xpose.msra.mxu0 %v3778_v50 }
0x1652   :  { %9948 = vmatprep.subr.bf16.mxu0 %v11134_v1 }
0x1653   :  { %v3871_v6 = vpop.permute.xlu1 %3870  ;;  %v3920_v12 = vpop.permute.xlu0 %3919 }
0x1654   :  { %9933 = vmatmul.mubr.msk.bf16.vlgmr.msra.gmra.mxu1 %vm517_vm5, %v3610_v59  ;;  %v3876_v8 = vsel %vm517_vm5, %v3871_v6, 0  ;;  %v3925_v13 = vsel %vm517_vm5, %v3920_v12, 0 }
0x1655   :  { %9943 = vmatpush3.bf16.xpose.msra.mxu1 %v3827_v0  ;;  %9944 = vmatprep.mubr.msk.bf16.mxu1 %vm11135_vm0, %v11134_v1 }
0x1656   :  { %9954 = vmatprep.subr.bf16.mxu1 %v11134_v1 }
0x1657   :  { %v3969_v51 = vpop.permute.xlu1 %3968 }
0x1658   :  { %9939 = vmatmul.mubr.msk.bf16.vlgmr.msra.gmra.mxu0 %vm517_vm5, %v3611_v7  ;;  %v3974_v23 = vsel %vm517_vm5, %v3969_v51, 0 }
0x1659   :  { %9949 = vmatpush3.bf16.xpose.msra.mxu0 %v3876_v8  ;;  %9950 = vmatprep.mubr.msk.bf16.mxu0 %vm11135_vm0, %v11134_v1 }
0x165a   :  { %9960 = vmatprep.subr.bf16.mxu0 %v11134_v1 }
0x165c   :  { %9945 = vmatmul.mubr.msk.bf16.vlgmr.msra.gmra.mxu1 %vm517_vm5, %v3612_v35 }
0x165d   :  { %9955 = vmatpush3.bf16.xpose.msra.mxu1 %v3925_v13  ;;  %9956 = vmatprep.mubr.msk.bf16.mxu1 %vm11135_vm0, %v11134_v1 }
0x165e   :  { %9966 = vmatprep.subr.bf16.mxu1 %v11134_v1 }
0x1660   :  { %9951 = vmatmul.mubr.msk.bf16.vlgmr.msra.gmra.mxu0 %vm517_vm5, %v3613_v20 }
0x1661   :  { %9961 = vmatpush3.bf16.xpose.msra.mxu0 %v3974_v23  ;;  %9962 = vmatprep.mubr.msk.bf16.mxu0 %vm11135_vm0, %v11134_v1 }
0x1662   :  { %9972 = vmatprep.subr.bf16.mxu0 %v11134_v1 }
0x1664   :  { %9957 = vmatmul.mubr.msk.bf16.vlgmr.msra.gmra.mxu1 %vm517_vm5, %v3614_v27 }
0x1665   :  { %9967 = vmatpush3.bf16.msra.mxu1 %v4132_v38  ;;  %9968 = vmatprep.mubr.msk.bf16.mxu1 %vm11135_vm0, %v11134_v1 }
0x1666   :  { %9978 = vmatprep.subr.bf16.mxu1 %v11134_v1 }
0x1668   :  { %9963 = vmatmul.mubr.msk.bf16.vlgmr.msra.gmra.mxu0 %vm517_vm5, %v3615_v16 }
0x1669   :  { %9973 = vmatpush3.bf16.msra.mxu0 %v4178_v30  ;;  %9974 = vmatprep.mubr.msk.bf16.mxu0 %vm11135_vm0, %v11134_v1 }
0x166a   :  { %9984 = vmatprep.subr.bf16.mxu0 %v11134_v1 }
0x16ab   :  { %v3667_v17 = vpop.f32.mrf.mxu0 }
0x16ac   :  { %v4016_v32 = vadd.f32 %v3667_v17, %v11977_v18 }
0x16ad   :  { %v9922_v33 = vpop.f32.mrf.mxu0 }
0x16ae   :  { %v4024_v22 = vsel %vm925_vm8, %v4016_v32, -inf }
0x16af   :  { %4025 = vmax.xlane.f32.xlu0 %v4024_v22  ;;  %v3670_v36 = vpop.f32.mrf.mxu0 }
0x16b1   :  { %v9923_v41 = vpop.f32.mrf.mxu0 }
0x16b3   :  { %v3716_v39 = vpop.f32.mrf.mxu0 }
0x16b4   :  { %v4017_v40 = vadd.f32 %v3716_v39, %v11977_v18 }
0x16b5   :  { %v9928_v44 = vpop.f32.mrf.mxu0 }
0x16b6   :  { %v4027_v34 = vsel %vm925_vm8, %v4017_v40, -inf }
0x16b7   :  { %4028 = vmax.xlane.f32.xlu1 %v4027_v34  ;;  %v3719_v2 = vpop.f32.mrf.mxu0 }
0x16b9   :  { %v9929_v19 = vpop.f32.mrf.mxu0 }
0x1714   :  { %v3765_v55 = vpop.f32.mrf.mxu1 }
0x1715   :  { %v4018_v47 = vadd.f32 %v3765_v55, %v11977_v18 }
0x1716   :  { %v9934_v43 = vpop.f32.mrf.mxu1 }
0x1717   :  { %v4030_v49 = vsel %vm925_vm8, %v4018_v47, -inf }
0x1718   :  { %v3768_v29 = vpop.f32.mrf.mxu1  ;;  %4031 = vmax.xlane.f32.xlu0 %v4030_v49  ;;  %v3814_v48 = vpop.f32.mrf.mxu0 }
0x1719   :  { %v4019_v37 = vadd.f32 %v3814_v48, %v11977_v18 }
0x171a   :  { %v9935_v50 = vpop.f32.mrf.mxu1  ;;  %v9940_v53 = vpop.f32.mrf.mxu0 }
0x171b   :  { %v4033_v59 = vsel %vm925_vm8, %v4019_v37, -inf }
0x171c   :  { %v3863_v60 = vpop.f32.mrf.mxu1  ;;  %4034 = vmax.xlane.f32.xlu0 %v4033_v59  ;;  %v3817_v0 = vpop.f32.mrf.mxu0 }
0x171d   :  { %v4020_v6 = vadd.f32 %v3863_v60, %v11977_v18 }
0x171e   :  { %v9941_v7 = vpop.f32.mrf.mxu0  ;;  %v9946_v9 = vpop.f32.mrf.mxu1 }
0x171f   :  { %v4036_v8 = vsel %vm925_vm8, %v4020_v6, -inf }
0x1720   :  { %v3866_v12 = vpop.f32.mrf.mxu1  ;;  %4037 = vmax.xlane.f32.xlu1 %v4036_v8  ;;  %v3912_v35 = vpop.f32.mrf.mxu0 }
0x1721   :  { %v4021_v11 = vadd.f32 %v3912_v35, %v11977_v18 }
0x1722   :  { %v9947_v13 = vpop.f32.mrf.mxu1  ;;  %v9952_v51 = vpop.f32.mrf.mxu0 }
0x1723   :  { %v4039_v61 = vsel %vm925_vm8, %v4021_v11, -inf }
0x1724   :  { %v3961_v20 = vpop.f32.mrf.mxu1  ;;  %4040 = vmax.xlane.f32.xlu0 %v4039_v61  ;;  %v3915_v23 = vpop.f32.mrf.mxu0 }
0x1725   :  { %v4022_v24 = vadd.f32 %v3961_v20, %v11977_v18 }
0x1726   :  { %v9953_v27 = vpop.f32.mrf.mxu0  ;;  %v9958_v25 = vpop.f32.mrf.mxu1 }
0x1727   :  { %v4042_v38 = vsel %vm925_vm8, %v4022_v24, -inf }
0x1728   :  { %v3964_v5 = vpop.f32.mrf.mxu1  ;;  %4043 = vmax.xlane.f32.xlu1 %v4042_v38  ;;  %v4010_v16 = vpop.f32.mrf.mxu0 }
0x1729   :  { %v4023_v30 = vadd.f32 %v4010_v16, %v11977_v18 }
0x172a   :  { %v9959_v17 = vpop.f32.mrf.mxu1  ;;  %v9964_v33 = vpop.f32.mrf.mxu0 }
0x172b   :  { %v4045_v22 = vsel %vm925_vm8, %v4023_v30, -inf }
0x172c   :  { %4046 = vmax.xlane.f32.xlu0 %v4045_v22  ;;  %v4013_v36 = vpop.f32.mrf.mxu0 }
0x172e   :  { %v9965_v41 = vpop.f32.mrf.mxu0 }
0x1738   :  { %v4026_v44 = vpop.xlane.xlu0 %4025 }
0x1739   :  { %10553 = vrot.lane.b32.xlu1 %v11913_v28, %s11139_s28  ;;  %v4048_v19 = vsub.f32 %v4016_v32, %v4026_v44 }
0x173b   :  { %v4056_v55 = vmul.f32 1.442695, %v4048_v19 }
0x1740   :  { %v4029_v39 = vpop.xlane.xlu1 %4028 }
0x1741   :  { %v4049_v34 = vsub.f32 %v4017_v40, %v4029_v39 }
0x1743   :  { %v4058_v2 = vmul.f32 1.442695, %v4049_v34 }
0x1745   :  { %10897 = vpow2.f32 %v4058_v2 }
0x1746   :  { %10899 = vpow2.f32 %v4056_v55 }
0x1752   :  { %v10898_v43 = vpop.eup %10897 }
0x1753   :  { %v4075_v49 = vsel %vm925_vm8, %v10898_v43, 0.0  ;;  %v11998_v29 = vpop.eup %10899 }
0x1754   :  { %4076 = vadd.xlane.f32.xlu0 %v4075_v49  ;;  %v4072_v48 = vsel %vm925_vm8, %v11998_v29, 0.0 }
0x175d   :  { %4073 = vadd.xlane.f32.xlu1 %v4072_v48 }
0x17a1   :  { %v4032_v50 = vpop.xlane.xlu0 %4031 }
0x17a2   :  { %v4050_v53 = vsub.f32 %v4018_v47, %v4032_v50 }
0x17a4   :  { %v4060_v59 = vmul.f32 1.442695, %v4050_v53 }
0x17a5   :  { %v4035_v60 = vpop.xlane.xlu0 %4034 }
0x17a6   :  { %10901 = vpow2.f32 %v4060_v59  ;;  %v4051_v40 = vsub.f32 %v4019_v37, %v4035_v60 }
0x17a8   :  { %v4062_v32 = vmul.f32 1.442695, %v4051_v40 }
0x17a9   :  { %v4038_v0 = vpop.xlane.xlu1 %4037 }
0x17aa   :  { %10903 = vpow2.f32 %v4062_v32  ;;  %v4052_v7 = vsub.f32 %v4020_v6, %v4038_v0 }
0x17ac   :  { %v4064_v9 = vmul.f32 1.442695, %v4052_v7 }
0x17ad   :  { %v4041_v8 = vpop.xlane.xlu0 %4040 }
0x17ae   :  { %10905 = vpow2.f32 %v4064_v9  ;;  %v4053_v12 = vsub.f32 %v4021_v11, %v4041_v8 }
0x17b0   :  { %v4066_v35 = vmul.f32 1.442695, %v4053_v12 }
0x17b1   :  { %v4044_v13 = vpop.xlane.xlu1 %4043 }
0x17b2   :  { %10907 = vpow2.f32 %v4066_v35  ;;  %v4054_v51 = vsub.f32 %v4022_v24, %v4044_v13 }
0x17b3   :  { %v10902_v61 = vpop.eup %10901 }
0x17b4   :  { %v4068_v20 = vmul.f32 1.442695, %v4054_v51  ;;  %v4078_v47 = vsel %vm925_vm8, %v10902_v61, 0.0 }
0x17b5   :  { %4079 = vadd.xlane.f32.xlu1 %v4078_v47  ;;  %v4047_v23 = vpop.xlane.xlu0 %4046  ;;  %v10554_v36 = vpop.permute.xlu1 %10553 }
0x17b6   :  { %10909 = vpow2.f32 %v4068_v20  ;;  %v4055_v37 = vsub.f32 %v4023_v30, %v4047_v23  ;;  %v10556_v39 = vunpack.i.h.bf16 %v10554_v36  ;;  %v10555_v49 = vunpack.i.l.bf16 %v10554_v36 }
0x17b7   :  { %v10904_v27 = vpop.eup %10903 }
0x17b8   :  { %v4070_v25 = vmul.f32 1.442695, %v4055_v37  ;;  %v4081_v6 = vsel %vm925_vm8, %v10904_v27, 0.0  ;;  %v4123_v34 = vpack.c.bf16 %v10556_v39, %v10556_v39  ;;  %v4122_v48 = vpack.c.bf16 %v10555_v49, %v10555_v49 }
0x17b9   :  { %4082 = vadd.xlane.f32.xlu0 %v4081_v6 }
0x17ba   :  { %10911 = vpow2.f32 %v4070_v25  ;;  %v4270_v55 = vsel %vm1033_vm6, %v4123_v34, 0 }
0x17bb   :  { %v12004_v38 = vpop.eup %10905 }
0x17bc   :  { %v4084_v11 = vsel %vm925_vm8, %v12004_v38, 0.0 }
0x17bd   :  { %4085 = vadd.xlane.f32.xlu1 %v4084_v11 }
0x17bf   :  { %v12008_v24 = vpop.eup %10907 }
0x17c0   :  { %v4087_v5 = vsel %vm925_vm8, %v12008_v24, 0.0 }
0x17c1   :  { %4088 = vadd.xlane.f32.xlu0 %v4087_v5 }
0x17c3   :  { %v12012_v16 = vpop.eup %10909 }
0x17c4   :  { %v4090_v30 = vsel %vm925_vm8, %v12012_v16, 0.0 }
0x17c5   :  { %4091 = vadd.xlane.f32.xlu1 %v4090_v30 }
0x17c7   :  { %v12016_v17 = vpop.eup %10911 }
0x17c8   :  { %v4093_v33 = vsel %vm925_vm8, %v12016_v17, 0.0 }
0x17c9   :  { %4094 = vadd.xlane.f32.xlu0 %v4093_v33 }
0x17d6   :  { %10563 = vrot.lane.b32.xlu1 %v11913_v28, %s11140_s4 }
0x17dd   :  { %v4077_v22 = vpop.xlane.xlu0 %4076 }
0x17de   :  { %10913 = vrcp.f32 %v4077_v22 }
0x17df   :  { %10558 = vrot.lane.b32.xlu0 %v11913_v28, %s11138_s27 }
0x17e6   :  { %v4074_v41 = vpop.xlane.xlu1 %4073 }
0x17e7   :  { %10915 = vrcp.f32 %v4074_v41 }
0x17eb   :  { %v10914_v44 = vpop.eup %10913 }
0x17ec   :  { %v4105_v2 = vmul.f32 %v10914_v44, %v10898_v43  ;;  %v4224_v43 = vsel %vm1033_vm6, %v4122_v48, 0 }
0x17ee   :  { %v4113_v19 = vpack.c.bf16 %v4105_v2, %v4105_v2 }
0x17f0   :  { %9975 = vmatmul.mubr.msk.bf16.vlgmr.msra.gmra.mxu0 %vm925_vm8, %v4113_v19 }
0x17f1   :  { %9985 = vmatpush3.bf16.msra.mxu0 %v4270_v55  ;;  %9986 = vmatprep.mubr.msk.bf16.mxu0 %vm11135_vm0, %v11134_v1 }
0x17f2   :  { %9996 = vmatprep.subr.bf16.mxu0 %v11134_v1 }
0x17f4   :  { %v10916_v28 = vpop.eup %10915 }
0x17f5   :  { %v4104_v50 = vmul.f32 %v10916_v28, %v11998_v29 }
0x17f7   :  { %v4112_v53 = vpack.c.bf16 %v4104_v50, %v4104_v50 }
0x17f9   :  { %9969 = vmatmul.mubr.msk.bf16.vlgmr.msra.gmra.mxu1 %vm925_vm8, %v4112_v53 }
0x17fa   :  { %9979 = vmatpush3.bf16.msra.mxu1 %v4224_v43  ;;  %9980 = vmatprep.mubr.msk.bf16.mxu1 %vm11135_vm0, %v11134_v1 }
0x17fb   :  { %9990 = vmatprep.subr.bf16.mxu1 %v11134_v1 }
0x183e   :  { %v4080_v59 = vpop.xlane.xlu1 %4079 }
0x183f   :  { %10917 = vrcp.f32 %v4080_v59 }
0x1842   :  { %v4083_v60 = vpop.xlane.xlu0 %4082 }
0x1843   :  { %10919 = vrcp.f32 %v4083_v60 }
0x1846   :  { %v4086_v40 = vpop.xlane.xlu1 %4085 }
0x1847   :  { %10921 = vrcp.f32 %v4086_v40  ;;  %v10749_v40 = vld [vmem:[%s13001_s6 + $0xd8] sm:$0xff]  }
0x184a   :  { %v4089_v32 = vpop.xlane.xlu0 %4088 }
0x184b   :  { %10923 = vrcp.f32 %v4089_v32 }
0x184c   :  { %v10918_v29 = vpop.eup %10917 }
0x184d   :  { %v4106_v0 = vmul.f32 %v10918_v29, %v10902_v61 }
0x184e   :  { %v4092_v7 = vpop.xlane.xlu1 %4091 }
0x184f   :  { %v4114_v9 = vpack.c.bf16 %v4106_v0, %v4106_v0  ;;  %10925 = vrcp.f32 %v4092_v7 }
0x1850   :  { %v10920_v8 = vpop.eup %10919 }
0x1851   :  { %v4107_v12 = vmul.f32 %v10920_v8, %v10904_v27  ;;  %9981 = vmatmul.mubr.msk.bf16.vlgmr.msra.gmra.mxu1 %vm925_vm8, %v4114_v9  ;;  %v10750_v8 = vld [vmem:[%s13001_s6 + $0xd0] sm:$0xff]  }
0x1852   :  { %v4095_v35 = vpop.xlane.xlu0 %4094  ;;  %9992 = vmatprep.mubr.msk.bf16.mxu1 %vm11135_vm0, %v11134_v1  ;;  %v10564_v51 = vpop.permute.xlu1 %10563 }
0x1853   :  { %v4115_v13 = vpack.c.bf16 %v4107_v12, %v4107_v12  ;;  %10927 = vrcp.f32 %v4095_v35  ;;  %v10566_v61 = vunpack.i.h.bf16 %v10564_v51  ;;  %v10565_v23 = vunpack.i.l.bf16 %v10564_v51 }
0x1854   :  { %v10922_v20 = vpop.eup %10921 }
0x1855   :  { %9987 = vmatmul.mubr.msk.bf16.vlgmr.msra.gmra.mxu0 %vm925_vm8, %v4115_v13  ;;  %v4108_v30 = vmul.f32 %v10922_v20, %v12004_v38  ;;  %v4127_v33 = vpack.c.bf16 %v10566_v61, %v10566_v61  ;;  %v4126_v22 = vpack.c.bf16 %v10565_v23, %v10565_v23  ;;  %v10751_v13 = vld [vmem:[%s13001_s6 + $0xc8] sm:$0xff]  }
0x1856   :  { %v10559_v47 = vpop.permute.xlu0 %10558  ;;  %9998 = vmatprep.mubr.msk.bf16.mxu0 %vm11135_vm0, %v11134_v1 }
0x1857   :  { %v10561_v37 = vunpack.i.h.bf16 %v10559_v47  ;;  %v10560_v27 = vunpack.i.l.bf16 %v10559_v47  ;;  %v4116_v44 = vpack.c.bf16 %v4108_v30, %v4108_v30  ;;  %v4408_v38 = vsel %vm1033_vm6, %v4126_v22, 0  ;;  %v10752_v47 = vld [vmem:[%s13001_s6 + $0xc0] sm:$0xff]  }
0x1858   :  { %v10924_v25 = vpop.eup %10923 }
0x1859   :  { %v4109_v6 = vmul.f32 %v10924_v25, %v12008_v24  ;;  %v4125_v11 = vpack.c.bf16 %v10561_v37, %v10561_v37  ;;  %v4124_v5 = vpack.c.bf16 %v10560_v27, %v10560_v27  ;;  %v4454_v24 = vsel %vm1033_vm6, %v4127_v33, 0 }
0x185b   :  { %v4316_v36 = vsel %vm1033_vm6, %v4124_v5, 0  ;;  %v4362_v41 = vsel %vm1033_vm6, %v4125_v11, 0  ;;  %v4117_v39 = vpack.c.bf16 %v4109_v6, %v4109_v6 }
0x185c   :  { %9991 = vmatpush3.bf16.msra.mxu1 %v4316_v36  ;;  %9997 = vmatpush3.bf16.msra.mxu0 %v4362_v41  ;;  %v10926_v34 = vpop.eup %10925 }
0x185d   :  { %10002 = vmatprep.subr.bf16.mxu1 %v11134_v1  ;;  %10008 = vmatprep.subr.bf16.mxu0 %v11134_v1  ;;  %v4110_v55 = vmul.f32 %v10926_v34, %v12012_v16 }
0x185f   :  { %9993 = vmatmul.mubr.msk.bf16.vlgmr.msra.gmra.mxu1 %vm925_vm8, %v4116_v44  ;;  %9999 = vmatmul.mubr.msk.bf16.vlgmr.msra.gmra.mxu0 %vm925_vm8, %v4117_v39  ;;  %v4118_v28 = vpack.c.bf16 %v4110_v55, %v4110_v55 }
0x1860   :  { %v10928_v2 = vpop.eup %10927  ;;  %10003 = vmatpush3.bf16.msra.mxu1 %v4408_v38  ;;  %10009 = vmatpush3.bf16.msra.mxu0 %v4454_v24 }
0x1861   :  { %v4111_v19 = vmul.f32 %v10928_v2, %v12016_v17  ;;  %10004 = vmatprep.mubr.msk.bf16.mxu1 %vm11135_vm0, %v11134_v1  ;;  %10010 = vmatprep.mubr.msk.bf16.mxu0 %vm11135_vm0, %v11134_v1  ;;  %v3074_v2 = vrot.slane %v11855_v26, %v11565_v15 }
0x1862   :  { %10014 = vmatprep.subr.bf16.mxu1 %v11134_v1  ;;  %10026 = vmatprep.subr.bf16.mxu0 %v11134_v1 }
0x1863   :  { %v4119_v49 = vpack.c.bf16 %v4111_v19, %v4111_v19  ;;  %v3158_v19 = vadd.f32 %v11879_v10, %v3074_v2 }
0x1865   :  { %v3164_v55 = vadd.f32 %v3158_v19, %v11823_v42 }
0x1867   :  { %10005 = vmatmul.mubr.msk.bf16.vlgmr.msra.gmra.mxu1 %vm925_vm8, %v4118_v28  ;;  %10011 = vmatmul.mubr.msk.bf16.vlgmr.msra.gmra.mxu0 %vm925_vm8, %v4119_v49  ;;  %v3166_v49 = vsel %vm232_vm1, %v3164_v55, 0.0  ;;  %v3161_v28 = vadd.f32 %v11882_v54, %v3074_v2 }
0x1868   :  { %10022 = vmatprep.mubr.msk.bf16.mxu1 %vm11135_vm0, %v11134_v1  ;;  %10034 = vmatprep.mubr.msk.bf16.mxu0 %vm11135_vm0, %v11134_v1 }
0x1869   :  { %10015 = vmatpush3.bf16.msra.mxu1 %v10749_v40 }
0x186a   :  { %10016 = vmatprep.subr.bf16.mxu1 %v11134_v1 }
0x186d   :  { %10017 = vmatpush3.bf16.msra.mxu1 %v10750_v8 }
0x186e   :  { %10018 = vmatprep.subr.bf16.mxu1 %v11134_v1 }
0x1871   :  { %10019 = vmatpush3.bf16.msra.mxu1 %v10751_v13 }
0x1872   :  { %10020 = vmatprep.subr.bf16.mxu1 %v11134_v1 }
0x1875   :  { %10021 = vmatpush3.bf16.msra.mxu1 %v10752_v47 }
0x1876   :  { %10038 = vmatprep.subr.bf16.mxu1 %v11134_v1 }
0x18b0   :  { %v12065_v17 = vpop.f32.mrf.mxu0 }
0x18b2   :  { %v9976_v48 = vpop.f32.mrf.mxu0 }
0x18b3   :  { %v3165_v48 = vadd.f32 %v3161_v28, %v11825_v46 }
0x18b4   :  { %v4217_v16 = vpop.f32.mrf.mxu0 }
0x18b5   :  { %v3169_v16 = vsel %vm232_vm1, %v3165_v48, 0.0 }
0x18b6   :  { %v9977_v50 = vpop.f32.mrf.mxu0 }
0x18b9   :  { %v12067_v53 = vpop.f32.mrf.mxu1 }
0x18bb   :  { %v9970_v43 = vpop.f32.mrf.mxu1 }
0x18bd   :  { %v4171_v59 = vpop.f32.mrf.mxu1 }
0x18bf   :  { %v9971_v60 = vpop.f32.mrf.mxu1 }
0x1911   :  { %v4260_v32 = vpop.f32.mrf.mxu1 }
0x1913   :  { %v9982_v29 = vpop.f32.mrf.mxu1 }
0x1915   :  { %v4263_v0 = vpop.f32.mrf.mxu1  ;;  %v4306_v7 = vpop.f32.mrf.mxu0 }
0x1916   :  { %v10567_v9 = vpack.i.bf16 %v4306_v7, %v4260_v32 }
0x1917   :  { %v9983_v12 = vpop.f32.mrf.mxu1  ;;  %v9988_v35 = vpop.f32.mrf.mxu0 }
0x1918   :  { %10568 = vrot.lane.b32.xlu1 %v10567_v9, %s11130_s20 }
0x1919   :  { %v4309_v51 = vpop.f32.mrf.mxu0 }
0x191a   :  { %v12108_v51 = vld [vmem:[#allocation2 + $0x20] sm:$0xff] }
0x191b   :  { %v9989_v20 = vpop.f32.mrf.mxu0 }
0x191c   :  { %v4530_v20 = vrot.slane %v12108_v51, %v11504_v62 }
0x191f   :  { %v4352_v61 = vpop.f32.mrf.mxu1  ;;  %v4398_v23 = vpop.f32.mrf.mxu0 }
0x1920   :  { %v10572_v37 = vpack.i.bf16 %v4398_v23, %v4352_v61 }
0x1921   :  { %v9994_v27 = vpop.f32.mrf.mxu1  ;;  %v10000_v25 = vpop.f32.mrf.mxu0 }
0x1922   :  { %10573 = vrot.lane.b32.xlu0 %v10572_v37, %s11141_s14 }
0x1923   :  { %v4355_v6 = vpop.f32.mrf.mxu1  ;;  %v4401_v11 = vpop.f32.mrf.mxu0 }
0x1925   :  { %v9995_v5 = vpop.f32.mrf.mxu1  ;;  %v10001_v30 = vpop.f32.mrf.mxu0 }
0x1927   :  { %v4444_v33 = vpop.f32.mrf.mxu1  ;;  %v4490_v22 = vpop.f32.mrf.mxu0 }
0x1928   :  { %v10577_v36 = vpack.i.bf16 %v4490_v22, %v4444_v33 }
0x1929   :  { %v10006_v41 = vpop.f32.mrf.mxu1  ;;  %v10012_v39 = vpop.f32.mrf.mxu0 }
0x192a   :  { %10578 = vrot.lane.b32.xlu1 %v10577_v36, %s11142_s15 }
0x192b   :  { %v4447_v44 = vpop.f32.mrf.mxu1  ;;  %v4493_v34 = vpop.f32.mrf.mxu0 }
0x192c   :  { %v10753_v44 = vld [vmem:[#allocation6 + $0x98] sm:$0xff]   ;;  %v10755_v34 = vld [vmem:[#allocation6 + $0x88] sm:$0xff]  }
0x192d   :  { %v10007_v38 = vpop.f32.mrf.mxu1  ;;  %v10013_v24 = vpop.f32.mrf.mxu0  ;;  %10027 = vmatpush3.bf16.msra.mxu0 %v10753_v44 }
0x192e   :  { %10028 = vmatprep.subr.bf16.mxu0 %v11134_v1  ;;  %v10756_v38 = vld [vmem:[#allocation6 + $0x80] sm:$0xff]  }
0x1941   :  { %3167 = vadd.xlane.f32.xlu0 %v3166_v49 }
0x194e   :  { %3170 = vadd.xlane.f32.xlu1 %v3169_v16 }
0x198a   :  { %v10569_v50 = vpop.permute.xlu1 %10568 }
0x198b   :  { %v10571_v59 = vunpack.i.h.bf16 %v10569_v50  ;;  %v10570_v60 = vunpack.i.l.bf16 %v10569_v50 }
0x198d   :  { %v4521_v42 = vsel %vm517_vm5, %v12065_v17, %v10571_v59  ;;  %v4520_v10 = vsel %vm517_vm5, %v12067_v53, %v10570_v60 }
0x1994   :  { %v10574_v43 = vpop.permute.xlu0 %10573 }
0x1995   :  { %v10576_v40 = vunpack.i.h.bf16 %v10574_v43  ;;  %v10575_v26 = vunpack.i.l.bf16 %v10574_v43 }
0x1997   :  { %v4523_v46 = vsel %vm111_vm2, %v4521_v42, %v10576_v40  ;;  %v4522_v0 = vsel %vm111_vm2, %v4520_v10, %v10575_v26  ;;  %v3195_v10 = vrot.slane %v12108_v51, %v11574_v58 }
0x199c   :  { %v10579_v32 = vpop.permute.xlu1 %10578 }
0x199d   :  { %v10581_v29 = vunpack.i.h.bf16 %v10579_v32  ;;  %v10580_v54 = vunpack.i.l.bf16 %v10579_v32 }
0x199f   :  { %v4525_v7 = vsel %vm1427_vm9, %v4523_v46, %v10581_v29  ;;  %v4524_v9 = vsel %vm1427_vm9, %v4522_v0, %v10580_v54 }
0x19a0   :  { %v4526_v8 = vpack.c.bf16 %v4525_v7, %v4524_v9  ;;  %v3201_v7 = vrot.slane %v12108_v51, %v11579_v52 }
0x19a2   :  { %10023 = vmatmul.mubr.msk.bf16.vlgmr.msra.gmra.mxu1 %vm232_vm1, %v4526_v8 }
0x19a3   :  { %10046 = vmatprep.mubr.msk.bf16.mxu1 %vm11135_vm0, %v11134_v1 }
0x19ca   :  { %v3168_v17 = vpop.xlane.xlu0 %3167 }
0x19cb   :  { %v3172_v12 = vmul.f32 0.015625, %v3168_v17 }
0x19cd   :  { %v3174_v35 = vsub.f32 %v3164_v55, %v3172_v12  ;;  %v10757_v12 = vld [vmem:[%s13001_s6 + $0x118] sm:$0xff]  }
0x19ce   :  { %10039 = vmatpush3.bf16.msra.mxu1 %v10757_v12 }
0x19cf   :  { %v3176_v53 = vmul.f32 %v3174_v35, %v3174_v35  ;;  %10040 = vmatprep.subr.bf16.mxu1 %v11134_v1 }
0x19d1   :  { %v3178_v13 = vsel %vm232_vm1, %v3176_v53, 0.0 }
0x19d2   :  { %3179 = vadd.xlane.f32.xlu1 %v3178_v13  ;;  %v10759_v13 = vld [vmem:[%s13001_s6 + $0x108] sm:$0xff]  }
0x19d7   :  { %v3171_v47 = vpop.xlane.xlu1 %3170 }
0x19d8   :  { %v3173_v23 = vmul.f32 0.015625, %v3171_v47 }
0x19da   :  { %v3175_v11 = vsub.f32 %v3165_v48, %v3173_v23 }
0x19dc   :  { %v3177_v41 = vmul.f32 %v3175_v11, %v3175_v11 }
0x19de   :  { %v3181_v39 = vsel %vm232_vm1, %v3177_v41, 0.0 }
0x1a62   :  { %v4592_v61 = vpop.f32.mrf.mxu1 }
0x1a63   :  { %v4593_v37 = vadd.f32 %v4592_v61, %v4530_v20 }
0x1a64   :  { %v10024_v27 = vpop.f32.mrf.mxu1 }
0x1a65   :  { %v4599_v25 = vadd.f32 %v4593_v37, %v11892_v56  ;;  %v10754_v56 = vld [vmem:[#allocation6 + $0x90] sm:$0xff]  }
0x1a66   :  { %v4595_v6 = vpop.f32.mrf.mxu1  ;;  %10029 = vmatpush3.bf16.msra.mxu0 %v10754_v56 }
0x1a67   :  { %v4596_v5 = vadd.f32 %v4595_v6, %v4530_v20  ;;  %v4601_v30 = vsel %vm232_vm1, %v4599_v25, 0.0  ;;  %10030 = vmatprep.subr.bf16.mxu0 %v11134_v1  ;;  %v10760_v20 = vld [vmem:[%s13001_s6 + $0x100] sm:$0xff]   ;;  %v12149_v6 = vld [vmem:[#allocation2 + $0x30] sm:$0xff] }
0x1a68   :  { %4602 = vadd.xlane.f32.xlu0 %v4601_v30  ;;  %v10025_v33 = vpop.f32.mrf.mxu1  ;;  %v4636_v41 = vrot.slane %v12149_v6, %v11294_v57 }
0x1a69   :  { %v4600_v22 = vadd.f32 %v4596_v5, %v11894_v45  ;;  %v3180_v45 = vpop.xlane.xlu1 %3179  ;;  %v4630_v5 = vrot.slane %v12149_v6, %v11579_v52 }
0x1a6a   :  { %10031 = vmatpush3.bf16.msra.mxu0 %v10755_v34  ;;  %v3184_v24 = vmul.f32 0.015625, %v3180_v45 }
0x1a6b   :  { %v4604_v36 = vsel %vm232_vm1, %v4600_v22, 0.0  ;;  %10032 = vmatprep.subr.bf16.mxu0 %v11134_v1 }
0x1a6c   :  { %4605 = vadd.xlane.f32.xlu0 %v4604_v36  ;;  %v3186_v55 = vadd.f32 1e-05, %v3184_v24 }
0x1a6e   :  { %10033 = vmatpush3.bf16.msra.mxu0 %v10756_v38  ;;  %10929 = vrsqrt.f32 %v3186_v55  ;;  %v4652_v38 = vrot.slane %v12108_v51, %v11565_v15 }
0x1a6f   :  { %10050 = vmatprep.subr.bf16.mxu0 %v11134_v1 }
0x1a70   :  { %3182 = vadd.xlane.f32.xlu0 %v3181_v39 }
0x1a7b   :  { %v10930_v42 = vpop.eup %10929 }
0x1a7c   :  { %v3190_v29 = vmul.f32 %v10930_v42, %v3174_v35  ;;  %v10758_v35 = vld [vmem:[%s13001_s6 + $0x110] sm:$0xff]  }
0x1a7d   :  { %10041 = vmatpush3.bf16.msra.mxu1 %v10758_v35 }
0x1a7e   :  { %v3196_v46 = vmul.f32 %v3195_v10, %v3190_v29  ;;  %10042 = vmatprep.subr.bf16.mxu1 %v11134_v1 }
0x1a80   :  { %v3202_v8 = vadd.f32 %v3201_v7, %v3196_v46 }
0x1a81   :  { %10043 = vmatpush3.bf16.msra.mxu1 %v10759_v13 }
0x1a82   :  { %10044 = vmatprep.subr.bf16.mxu1 %v11134_v1 }
0x1a85   :  { %10045 = vmatpush3.bf16.msra.mxu1 %v10760_v20 }
0x1a86   :  { %10062 = vmatprep.subr.bf16.mxu1 %v11134_v1 }
0x1af1   :  { %v4603_v2 = vpop.xlane.xlu0 %4602 }
0x1af2   :  { %v4607_v19 = vmul.f32 0.015625, %v4603_v2 }
0x1af4   :  { %v4609_v49 = vsub.f32 %v4599_v25, %v4607_v19 }
0x1af5   :  { %v4606_v28 = vpop.xlane.xlu0 %4605 }
0x1af6   :  { %v4608_v48 = vmul.f32 0.015625, %v4606_v28  ;;  %v4611_v16 = vmul.f32 %v4609_v49, %v4609_v49 }
0x1af8   :  { %v4610_v50 = vsub.f32 %v4600_v22, %v4608_v48  ;;  %v4613_v43 = vsel %vm232_vm1, %v4611_v16, 0.0 }
0x1af9   :  { %4614 = vadd.xlane.f32.xlu1 %v4613_v43  ;;  %v3183_v59 = vpop.xlane.xlu0 %3182 }
0x1afa   :  { %v3185_v60 = vmul.f32 0.015625, %v3183_v59  ;;  %v4612_v40 = vmul.f32 %v4610_v50, %v4610_v50 }
0x1afc   :  { %v3187_v26 = vadd.f32 1e-05, %v3185_v60  ;;  %v4616_v32 = vsel %vm232_vm1, %v4612_v40, 0.0  ;;  %v4754_v40 = vrot.slane %v12108_v51, %v11558_v63 }
0x1afd   :  { %4617 = vadd.xlane.f32.xlu0 %v4616_v32 }
0x1afe   :  { %10931 = vrsqrt.f32 %v3187_v26 }
0x1b0b   :  { %v10932_v54 = vpop.eup %10931 }
0x1b0c   :  { %v3191_v0 = vmul.f32 %v10932_v54, %v3175_v11 }
0x1b0e   :  { %v3197_v9 = vmul.f32 %v3195_v10, %v3191_v0 }
0x1b10   :  { %v3203_v17 = vadd.f32 %v3201_v7, %v3197_v9 }
0x1b12   :  { %v12130_v53 = vpack.c.bf16 %v3203_v17, %v3202_v8 }
0x1b14   :  { %10035 = vmatmul.mubr.msk.bf16.vlgmr.msra.gmra.mxu0 %vm232_vm1, %v12130_v53 }
0x1b15   :  { %10052 = vmatprep.mubr.msk.bf16.mxu0 %vm11135_vm0, %v11134_v1 }
0x1b82   :  { %v4615_v47 = vpop.xlane.xlu1 %4614 }
0x1b83   :  { %v4619_v61 = vmul.f32 0.015625, %v4615_v47 }
0x1b85   :  { %v4621_v23 = vadd.f32 1e-05, %v4619_v61 }
0x1b86   :  { %v4618_v37 = vpop.xlane.xlu0 %4617 }
0x1b87   :  { %10933 = vrsqrt.f32 %v4621_v23  ;;  %v4620_v27 = vmul.f32 0.015625, %v4618_v37 }
0x1b89   :  { %v4622_v25 = vadd.f32 1e-05, %v4620_v27 }
0x1b8b   :  { %10935 = vrsqrt.f32 %v4622_v25 }
0x1b94   :  { %v10934_v11 = vpop.eup %10933 }
0x1b95   :  { %v4625_v30 = vmul.f32 %v10934_v11, %v4609_v49 }
0x1b97   :  { %v4631_v22 = vmul.f32 %v4630_v5, %v4625_v30 }
0x1b98   :  { %v10936_v33 = vpop.eup %10935 }
0x1b99   :  { %v4626_v36 = vmul.f32 %v10936_v33, %v4610_v50  ;;  %v12155_v44 = vadd.f32 %v4636_v41, %v4631_v22 }
0x1b9b   :  { %v4632_v39 = vmul.f32 %v4630_v5, %v4626_v36 }
0x1b9d   :  { %v12157_v56 = vadd.f32 %v4636_v41, %v4632_v39 }
0x1b9f   :  { %v4750_v34 = vpack.c.bf16 %v12157_v56, %v12155_v44 }
0x1ba1   :  { %10047 = vmatmul.mubr.msk.bf16.vlgmr.msra.gmra.mxu1 %vm232_vm1, %v4750_v34 }
0x1ba2   :  { %10064 = vmatprep.mubr.msk.bf16.mxu1 %vm11135_vm0, %v11134_v1 }
0x1bd4   :  { %v4714_v45 = vpop.f32.mrf.mxu0 }
0x1bd5   :  { %v4715_v24 = vadd.f32 %v4714_v45, %v4652_v38 }
0x1bd6   :  { %v10036_v2 = vpop.f32.mrf.mxu0 }
0x1bd7   :  { %v4859_v19 = vpack.c.bf16 %v4715_v24, %v4715_v24 }
0x1bd8   :  { %v4717_v55 = vpop.f32.mrf.mxu0 }
0x1bd9   :  { %v4718_v49 = vadd.f32 %v4717_v55, %v4652_v38  ;;  %v4871_v28 = vsel %vm517_vm5, %v4859_v19, 0 }
0x1bda   :  { %v10037_v48 = vpop.f32.mrf.mxu0  ;;  %10051 = vmatpush3.bf16.xpose.msra.mxu0 %v4871_v28 }
0x1bdb   :  { %v10582_v16 = vpack.i.bf16 %v4718_v49, %v4715_v24  ;;  %10056 = vmatprep.subr.bf16.mxu0 %v11134_v1  ;;  %v4860_v29 = vpack.c.bf16 %v4718_v49, %v4718_v49 }
0x1bdd   :  { %10583 = vrot.lane.b32.xlu1 %v10582_v16, %s11139_s28  ;;  %v4917_v8 = vsel %vm517_vm5, %v4860_v29, 0 }
0x1c4f   :  { %v10584_v50 = vpop.permute.xlu1 %10583 }
0x1c50   :  { %v10585_v43 = vunpack.i.l.bf16 %v10584_v50  ;;  %v10586_v9 = vunpack.i.h.bf16 %v10584_v50 }
0x1c52   :  { %v12169_v59 = vpack.c.bf16 %v10585_v43, %v10585_v43  ;;  %v12184_v17 = vpack.c.bf16 %v10586_v9, %v10586_v9 }
0x1c54   :  { %v4963_v60 = vsel %vm517_vm5, %v12169_v59, 0  ;;  %v5009_v35 = vsel %vm517_vm5, %v12184_v17, 0 }
0x1c55   :  { %10063 = vmatpush3.bf16.xpose.msra.mxu1 %v4963_v60 }
0x1c56   :  { %10074 = vmatprep.subr.bf16.mxu1 %v11134_v1 }
0x1c61   :  { %v4816_v26 = vpop.f32.mrf.mxu1 }
0x1c62   :  { %v4817_v32 = vadd.f32 %v4816_v26, %v4754_v40 }
0x1c63   :  { %v10048_v42 = vpop.f32.mrf.mxu1 }
0x1c64   :  { %v4843_v10 = vmul.f32 0.25, %v4817_v32  ;;  %4825 = vrot.lane.b32.xlu0 %v4817_v32, %s11139_s28 }
0x1c65   :  { %v4819_v54 = vpop.f32.mrf.mxu1 }
0x1c66   :  { %v4851_v46 = vpack.c.bf16 %v4843_v10, %v4843_v10  ;;  %v4820_v0 = vadd.f32 %v4819_v54, %v4754_v40 }
0x1c67   :  { %v10049_v7 = vpop.f32.mrf.mxu1 }
0x1c68   :  { %4831 = vrot.lane.b32.xlu0 %v4817_v32, %s11138_s27  ;;  %10053 = vmatmul.mubr.msk.bf16.vlgmr.msra.gmra.mxu0 %vm517_vm5, %v4851_v46  ;;  %v4844_v51 = vmul.f32 0.25, %v4820_v0 }
0x1c69   :  { %4827 = vrot.lane.b32.xlu1 %v4820_v0, %s11139_s28  ;;  %10057 = vmatpush3.bf16.xpose.msra.mxu0 %v4917_v8 }
0x1c6a   :  { %10058 = vmatprep.mubr.msk.bf16.mxu0 %vm11135_vm0, %v11134_v1  ;;  %10068 = vmatprep.subr.bf16.mxu0 %v11134_v1  ;;  %v4852_v12 = vpack.c.bf16 %v4844_v51, %v4844_v51 }
0x1c6c   :  { %10593 = vrot.lane.b32.xlu0 %v10582_v16, %s11140_s4 }
0x1c6d   :  { %10588 = vrot.lane.b32.xlu1 %v10582_v16, %s11138_s27 }
0x1c70   :  { %4839 = vrot.lane.b32.xlu0 %v4820_v0, %s11140_s4  ;;  %10059 = vmatmul.mubr.msk.bf16.vlgmr.msra.gmra.mxu0 %vm517_vm5, %v4852_v12 }
0x1c71   :  { %4833 = vrot.lane.b32.xlu1 %v4820_v0, %s11138_s27  ;;  %10069 = vmatpush3.bf16.xpose.msra.mxu0 %v5009_v35 }
0x1c72   :  { %10070 = vmatprep.mubr.msk.bf16.mxu0 %vm11135_vm0, %v11134_v1  ;;  %10080 = vmatprep.subr.bf16.mxu0 %v11134_v1 }
0x1c74   :  { %5340 = vrot.lane.b32.xlu0 %v4859_v19, %s11132_s25 }
0x1c75   :  { %4837 = vrot.lane.b32.xlu1 %v4817_v32, %s11140_s4 }
0x1c79   :  { %5389 = vrot.lane.b32.xlu1 %v4860_v29, %s11132_s25 }
0x1cd6   :  { %v4826_v13 = vpop.permute.xlu0 %4825 }
0x1cd7   :  { %v4845_v20 = vmul.f32 0.25, %v4826_v13 }
0x1cd9   :  { %v4853_v47 = vpack.c.bf16 %v4845_v20, %v4845_v20 }
0x1cda   :  { %v4832_v61 = vpop.permute.xlu0 %4831 }
0x1cdb   :  { %v4828_v23 = vpop.permute.xlu1 %4827  ;;  %10065 = vmatmul.mubr.msk.bf16.vlgmr.msra.gmra.mxu1 %vm517_vm5, %v4853_v47  ;;  %v4847_v45 = vmul.f32 0.25, %v4832_v61 }
0x1cdc   :  { %v4846_v37 = vmul.f32 0.25, %v4828_v23  ;;  %10076 = vmatprep.mubr.msk.bf16.mxu1 %vm11135_vm0, %v11134_v1 }
0x1cdd   :  { %v4855_v55 = vpack.c.bf16 %v4847_v45, %v4847_v45 }
0x1cde   :  { %v4854_v27 = vpack.c.bf16 %v4846_v37, %v4846_v37  ;;  %v10594_v30 = vpop.permute.xlu0 %10593 }
0x1cdf   :  { %v10589_v25 = vpop.permute.xlu1 %10588  ;;  %v10596_v41 = vunpack.i.h.bf16 %v10594_v30  ;;  %v10595_v39 = vunpack.i.l.bf16 %v10594_v30 }
0x1ce0   :  { %v10591_v11 = vunpack.i.h.bf16 %v10589_v25  ;;  %v10590_v5 = vunpack.i.l.bf16 %v10589_v25  ;;  %10071 = vmatmul.mubr.msk.bf16.vlgmr.msra.gmra.mxu0 %vm517_vm5, %v4854_v27 }
0x1ce1   :  { %10082 = vmatprep.mubr.msk.bf16.mxu0 %vm11135_vm0, %v11134_v1  ;;  %v12215_v2 = vpack.c.bf16 %v10596_v41, %v10596_v41  ;;  %v12217_v19 = vpack.c.bf16 %v10595_v39, %v10595_v39 }
0x1ce2   :  { %v12205_v33 = vpack.c.bf16 %v10591_v11, %v10591_v11  ;;  %v12207_v22 = vpack.c.bf16 %v10590_v5, %v10590_v5  ;;  %v4840_v28 = vpop.permute.xlu0 %4839 }
0x1ce3   :  { %v4834_v36 = vpop.permute.xlu1 %4833  ;;  %v5147_v16 = vsel %vm517_vm5, %v12217_v19, 0  ;;  %v5193_v50 = vsel %vm517_vm5, %v12215_v2, 0  ;;  %v4850_v43 = vmul.f32 0.25, %v4840_v28 }
0x1ce4   :  { %v5055_v34 = vsel %vm517_vm5, %v12207_v22, 0  ;;  %v5101_v38 = vsel %vm517_vm5, %v12205_v33, 0  ;;  %v4848_v24 = vmul.f32 0.25, %v4834_v36 }
0x1ce5   :  { %10075 = vmatpush3.bf16.xpose.msra.mxu1 %v5055_v34  ;;  %10081 = vmatpush3.bf16.xpose.msra.mxu0 %v5101_v38  ;;  %v4858_v32 = vpack.c.bf16 %v4850_v43, %v4850_v43 }
0x1ce6   :  { %10086 = vmatprep.subr.bf16.mxu1 %v11134_v1  ;;  %10092 = vmatprep.subr.bf16.mxu0 %v11134_v1  ;;  %v4856_v49 = vpack.c.bf16 %v4848_v24, %v4848_v24  ;;  %v5341_v40 = vpop.permute.xlu0 %5340 }
0x1ce7   :  { %v4838_v48 = vpop.permute.xlu1 %4837  ;;  %v5346_v10 = vsel %vm1033_vm6, %v5341_v40, 0 }
0x1ce8   :  { %v4849_v60 = vmul.f32 0.25, %v4838_v48 }
0x1cea   :  { %v4857_v42 = vpack.c.bf16 %v4849_v60, %v4849_v60 }
0x1ceb   :  { %v5390_v26 = vpop.permute.xlu1 %5389 }
0x1cec   :  { %10077 = vmatmul.mubr.msk.bf16.vlgmr.msra.gmra.mxu1 %vm517_vm5, %v4855_v55  ;;  %10083 = vmatmul.mubr.msk.bf16.vlgmr.msra.gmra.mxu0 %vm517_vm5, %v4856_v49  ;;  %v5395_v29 = vsel %vm1033_vm6, %v5390_v26, 0 }
0x1ced   :  { %10087 = vmatpush3.bf16.xpose.msra.mxu1 %v5147_v16  ;;  %10093 = vmatpush3.bf16.xpose.msra.mxu0 %v5193_v50 }
0x1cee   :  { %10088 = vmatprep.mubr.msk.bf16.mxu1 %vm11135_vm0, %v11134_v1  ;;  %10094 = vmatprep.mubr.msk.bf16.mxu0 %vm11135_vm0, %v11134_v1 }
0x1cef   :  { %10098 = vmatprep.subr.bf16.mxu1 %v11134_v1  ;;  %10104 = vmatprep.subr.bf16.mxu0 %v11134_v1 }
0x1cf4   :  { %10089 = vmatmul.mubr.msk.bf16.vlgmr.msra.gmra.mxu1 %vm517_vm5, %v4857_v42  ;;  %10095 = vmatmul.mubr.msk.bf16.vlgmr.msra.gmra.mxu0 %vm517_vm5, %v4858_v32 }
0x1cf5   :  { %10099 = vmatpush3.bf16.msra.mxu1 %v5346_v10  ;;  %10105 = vmatpush3.bf16.msra.mxu0 %v5395_v29 }
0x1cf6   :  { %10100 = vmatprep.mubr.msk.bf16.mxu1 %vm11135_vm0, %v11134_v1  ;;  %10106 = vmatprep.mubr.msk.bf16.mxu0 %vm11135_vm0, %v11134_v1 }
0x1cf7   :  { %10110 = vmatprep.subr.bf16.mxu1 %v11134_v1  ;;  %10116 = vmatprep.subr.bf16.mxu0 %v11134_v1 }
0x1d28   :  { %v4907_v54 = vpop.f32.mrf.mxu0 }
0x1d29   :  { %v5235_v46 = vadd.f32 %v4907_v54, %v11379_v14 }
0x1d2a   :  { %v10054_v0 = vpop.f32.mrf.mxu0 }
0x1d2b   :  { %v5243_v7 = vsel %vm925_vm8, %v5235_v46, -inf }
0x1d2c   :  { %5244 = vmax.xlane.f32.xlu1 %v5243_v7  ;;  %v4910_v9 = vpop.f32.mrf.mxu0 }
0x1d2e   :  { %v10055_v8 = vpop.f32.mrf.mxu0 }
0x1d30   :  { %v4953_v51 = vpop.f32.mrf.mxu0 }
0x1d31   :  { %v5236_v12 = vadd.f32 %v4953_v51, %v11388_v21 }
0x1d32   :  { %v10060_v35 = vpop.f32.mrf.mxu0 }
0x1d33   :  { %v5246_v13 = vsel %vm925_vm8, %v5236_v12, -inf }
0x1d34   :  { %5247 = vmax.xlane.f32.xlu0 %v5246_v13  ;;  %v4956_v20 = vpop.f32.mrf.mxu0 }
0x1d36   :  { %v10061_v47 = vpop.f32.mrf.mxu0 }
0x1d9b   :  { %v4999_v61 = vpop.f32.mrf.mxu1 }
0x1d9c   :  { %v5237_v23 = vadd.f32 %v4999_v61, %v11379_v14 }
0x1d9d   :  { %v10066_v37 = vpop.f32.mrf.mxu1 }
0x1d9e   :  { %v5249_v27 = vsel %vm925_vm8, %v5237_v23, -inf }
0x1d9f   :  { %v5002_v25 = vpop.f32.mrf.mxu1  ;;  %5250 = vmax.xlane.f32.xlu0 %v5249_v27 }
0x1da0   :  { %v5045_v11 = vpop.f32.mrf.mxu0 }
0x1da1   :  { %v5238_v5 = vadd.f32 %v5045_v11, %v11388_v21  ;;  %v10067_v30 = vpop.f32.mrf.mxu1 }
0x1da2   :  { %v10072_v36 = vpop.f32.mrf.mxu0 }
0x1da3   :  { %v5252_v41 = vsel %vm925_vm8, %v5238_v5, -inf }
0x1da4   :  { %5253 = vmax.xlane.f32.xlu1 %v5252_v41  ;;  %v5048_v39 = vpop.f32.mrf.mxu0 }
0x1da6   :  { %v10073_v34 = vpop.f32.mrf.mxu0 }
0x1dac   :  { %v5091_v38 = vpop.f32.mrf.mxu1  ;;  %v5137_v45 = vpop.f32.mrf.mxu0 }
0x1dad   :  { %v12250_v24 = vadd.f32 %v5091_v38, %v11379_v14  ;;  %v5240_v55 = vadd.f32 %v5137_v45, %v11388_v21 }
0x1dae   :  { %v10078_v49 = vpop.f32.mrf.mxu1  ;;  %v10084_v28 = vpop.f32.mrf.mxu0 }
0x1daf   :  { %v5255_v48 = vsel %vm925_vm8, %v12250_v24, -inf  ;;  %v5258_v16 = vsel %vm925_vm8, %v5240_v55, -inf }
0x1db0   :  { %v5094_v50 = vpop.f32.mrf.mxu1  ;;  %5256 = vmax.xlane.f32.xlu0 %v5255_v48  ;;  %5259 = vmax.xlane.f32.xlu1 %v5258_v16  ;;  %v5140_v43 = vpop.f32.mrf.mxu0 }
0x1db2   :  { %v10079_v60 = vpop.f32.mrf.mxu1  ;;  %v10085_v40 = vpop.f32.mrf.mxu0 }
0x1db4   :  { %v5183_v26 = vpop.f32.mrf.mxu1  ;;  %v5229_v32 = vpop.f32.mrf.mxu0 }
0x1db5   :  { %v12257_v42 = vadd.f32 %v5183_v26, %v11379_v14  ;;  %v5242_v10 = vadd.f32 %v5229_v32, %v11388_v21  ;;  %v5245_v13 = vpop.xlane.xlu1 %5244 }
0x1db6   :  { %v10090_v29 = vpop.f32.mrf.mxu1  ;;  %v10096_v54 = vpop.f32.mrf.mxu0  ;;  %v5267_v47 = vsub.f32 %v5235_v46, %v5245_v13 }
0x1db7   :  { %v5261_v0 = vsel %vm925_vm8, %v12257_v42, -inf  ;;  %v5264_v7 = vsel %vm925_vm8, %v5242_v10, -inf }
0x1db8   :  { %v5186_v9 = vpop.f32.mrf.mxu1  ;;  %5262 = vmax.xlane.f32.xlu0 %v5261_v0  ;;  %5265 = vmax.xlane.f32.xlu1 %v5264_v7  ;;  %v5232_v8 = vpop.f32.mrf.mxu0  ;;  %v5275_v37 = vmul.f32 1.442695, %v5267_v47 }
0x1dba   :  { %v10091_v51 = vpop.f32.mrf.mxu1  ;;  %v10097_v35 = vpop.f32.mrf.mxu0  ;;  %10937 = vpow2.f32 %v5275_v37 }
0x1dbd   :  { %v5248_v20 = vpop.xlane.xlu0 %5247 }
0x1dbe   :  { %v5268_v61 = vsub.f32 %v5236_v12, %v5248_v20 }
0x1dc0   :  { %v5277_v27 = vmul.f32 1.442695, %v5268_v61 }
0x1dc2   :  { %10939 = vpow2.f32 %v5277_v27 }
0x1dc7   :  { %v10938_v25 = vpop.eup %10937 }
0x1dc8   :  { %v5291_v30 = vsel %vm925_vm8, %v10938_v25, 0.0 }
0x1dc9   :  { %5438 = vrot.lane.b32.xlu1 %v12169_v59, %s11132_s25 }
0x1dce   :  { %5487 = vrot.lane.b32.xlu0 %v12184_v17, %s11132_s25 }
0x1dcf   :  { %v10940_v11 = vpop.eup %10939 }
0x1dd0   :  { %v5294_v36 = vsel %vm925_vm8, %v10940_v11, 0.0 }
0x1ded   :  { %5292 = vadd.xlane.f32.xlu0 %v5291_v30  ;;  %5295 = vadd.xlane.f32.xlu1 %v5294_v36 }
0x1dfe   :  { %5536 = vrot.lane.b32.xlu1 %v12207_v22, %s11132_s25 }
0x1e28   :  { %v5251_v59 = vpop.xlane.xlu0 %5250 }
0x1e29   :  { %v5269_v17 = vsub.f32 %v5237_v23, %v5251_v59 }
0x1e2b   :  { %v5279_v41 = vmul.f32 1.442695, %v5269_v17 }
0x1e2d   :  { %10941 = vpow2.f32 %v5279_v41  ;;  %v5254_v46 = vpop.xlane.xlu1 %5253 }
0x1e2e   :  { %v5270_v12 = vsub.f32 %v5238_v5, %v5254_v46 }
0x1e30   :  { %v5281_v39 = vmul.f32 1.442695, %v5270_v12 }
0x1e32   :  { %10943 = vpow2.f32 %v5281_v39 }
0x1e39   :  { %v5260_v34 = vpop.xlane.xlu1 %5259  ;;  %v5257_v60 = vpop.xlane.xlu0 %5256 }
0x1e3a   :  { %v12271_v38 = vpop.eup %10941  ;;  %v5272_v45 = vsub.f32 %v5240_v55, %v5260_v34  ;;  %v5271_v26 = vsub.f32 %v12250_v24, %v5257_v60 }
0x1e3b   :  { %v5297_v49 = vsel %vm925_vm8, %v12271_v38, 0.0 }
0x1e3c   :  { %v5285_v28 = vmul.f32 1.442695, %v5272_v45  ;;  %5298 = vadd.xlane.f32.xlu0 %v5297_v49 }
0x1e3e   :  { %10945 = vpow2.f32 %v5285_v28 }
0x1e3f   :  { %v12275_v48 = vpop.eup %10943 }
0x1e40   :  { %v5300_v22 = vsel %vm925_vm8, %v12275_v48, 0.0 }
0x1e41   :  { %5301 = vadd.xlane.f32.xlu1 %v5300_v22  ;;  %v5266_v23 = vpop.xlane.xlu1 %5265  ;;  %v5263_v32 = vpop.xlane.xlu0 %5262 }
0x1e42   :  { %v5274_v5 = vsub.f32 %v5242_v10, %v5266_v23  ;;  %v5283_v10 = vmul.f32 1.442695, %v5271_v26  ;;  %v5273_v29 = vsub.f32 %v12257_v42, %v5263_v32 }
0x1e44   :  { %v5289_v16 = vmul.f32 1.442695, %v5274_v5  ;;  %v5287_v54 = vmul.f32 1.442695, %v5273_v29 }
0x1e45   :  { %v5488_v9 = vpop.permute.xlu0 %5487  ;;  %v5439_v24 = vpop.permute.xlu1 %5438 }
0x1e46   :  { %10947 = vpow2.f32 %v5289_v16  ;;  %v5444_v37 = vsel %vm1033_vm6, %v5439_v24, 0  ;;  %v5493_v27 = vsel %vm1033_vm6, %v5488_v9, 0 }
0x1e47   :  { %10949 = vpow2.f32 %v5283_v10 }
0x1e48   :  { %10951 = vpow2.f32 %v5287_v54 }
0x1e4b   :  { %v12279_v50 = vpop.eup %10945 }
0x1e4c   :  { %v5306_v55 = vsel %vm925_vm8, %v12279_v50, 0.0 }
0x1e4d   :  { %5307 = vadd.xlane.f32.xlu1 %v5306_v55 }
0x1e52   :  { %5585 = vrot.lane.b32.xlu0 %v12205_v33, %s11132_s25 }
0x1e53   :  { %v12285_v43 = vpop.eup %10947 }
0x1e54   :  { %v5312_v40 = vsel %vm925_vm8, %v12285_v43, 0.0  ;;  %v12293_v33 = vpop.eup %10949 }
0x1e55   :  { %5313 = vadd.xlane.f32.xlu1 %v5312_v40  ;;  %v5303_v0 = vsel %vm925_vm8, %v12293_v33, 0.0  ;;  %v12297_v7 = vpop.eup %10951 }
0x1e56   :  { %v5309_v8 = vsel %vm925_vm8, %v12297_v7, 0.0 }
0x1e66   :  { %5634 = vrot.lane.b32.xlu1 %v12217_v19, %s11132_s25 }
0x1e71   :  { %5304 = vadd.xlane.f32.xlu0 %v5303_v0 }
0x1e75   :  { %5310 = vadd.xlane.f32.xlu0 %v5309_v8 }
0x1e76   :  { %v5293_v42 = vpop.xlane.xlu0 %5292  ;;  %v5296_v51 = vpop.xlane.xlu1 %5295 }
0x1e77   :  { %10953 = vrcp.f32 %v5293_v42 }
0x1e78   :  { %10955 = vrcp.f32 %v5296_v51 }
0x1e84   :  { %v10954_v35 = vpop.eup %10953 }
0x1e85   :  { %v10956_v19 = vpop.eup %10955  ;;  %v5323_v13 = vmul.f32 %v10954_v35, %v10938_v25 }
0x1e86   :  { %v5324_v20 = vmul.f32 %v10956_v19, %v10940_v11  ;;  %v5537_v11 = vpop.permute.xlu1 %5536 }
0x1e87   :  { %v5331_v47 = vpack.c.bf16 %v5323_v13, %v5323_v13  ;;  %v5542_v46 = vsel %vm1033_vm6, %v5537_v11, 0 }
0x1e88   :  { %v5332_v61 = vpack.c.bf16 %v5324_v20, %v5324_v20 }
0x1e89   :  { %10101 = vmatmul.mubr.msk.bf16.vlgmr.msra.gmra.mxu1 %vm925_vm8, %v5331_v47 }
0x1e8a   :  { %10107 = vmatmul.mubr.msk.bf16.vlgmr.msra.gmra.mxu0 %vm925_vm8, %v5332_v61  ;;  %10111 = vmatpush3.bf16.msra.mxu1 %v5444_v37 }
0x1e8b   :  { %10117 = vmatpush3.bf16.msra.mxu0 %v5493_v27  ;;  %5683 = vrot.lane.b32.xlu0 %v12215_v2, %s11132_s25 }
0x1e8c   :  { %10112 = vmatprep.mubr.msk.bf16.mxu1 %vm11135_vm0, %v11134_v1  ;;  %10122 = vmatprep.subr.bf16.mxu1 %v11134_v1 }
0x1e8d   :  { %10118 = vmatprep.mubr.msk.bf16.mxu0 %vm11135_vm0, %v11134_v1  ;;  %10128 = vmatprep.subr.bf16.mxu0 %v11134_v1 }
0x1ec5   :  { %v5299_v25 = vpop.xlane.xlu0 %5298 }
0x1ec6   :  { %10957 = vrcp.f32 %v5299_v25 }
0x1ec9   :  { %v5586_v39 = vpop.permute.xlu0 %5585 }
0x1eca   :  { %v5302_v30 = vpop.xlane.xlu1 %5301 }
0x1ecb   :  { %10959 = vrcp.f32 %v5302_v30 }
0x1ed3   :  { %v10958_v36 = vpop.eup %10957 }
0x1ed4   :  { %v5325_v59 = vmul.f32 %v10958_v36, %v12271_v38  ;;  %v5591_v38 = vsel %vm1033_vm6, %v5586_v39, 0 }
0x1ed6   :  { %v5333_v17 = vpack.c.bf16 %v5325_v59, %v5325_v59  ;;  %v5308_v2 = vpop.xlane.xlu1 %5307 }
0x1ed7   :  { %10961 = vrcp.f32 %v5308_v2 }
0x1ed8   :  { %v10960_v41 = vpop.eup %10959  ;;  %10113 = vmatmul.mubr.msk.bf16.vlgmr.msra.gmra.mxu1 %vm925_vm8, %v5333_v17 }
0x1ed9   :  { %v5326_v12 = vmul.f32 %v10960_v41, %v12275_v48  ;;  %10123 = vmatpush3.bf16.msra.mxu1 %v5542_v46  ;;  %10124 = vmatprep.mubr.msk.bf16.mxu1 %vm11135_vm0, %v11134_v1  ;;  %v10762_v41 = vld [vmem:[%s13001_s6 + $0x150] sm:$0xff]  }
0x1eda   :  { %10134 = vmatprep.subr.bf16.mxu1 %v11134_v1 }
0x1edb   :  { %v5334_v34 = vpack.c.bf16 %v5326_v12, %v5326_v12  ;;  %v10763_v12 = vld [vmem:[%s13001_s6 + $0x148] sm:$0xff]  }
0x1edd   :  { %10119 = vmatmul.mubr.msk.bf16.vlgmr.msra.gmra.mxu0 %vm925_vm8, %v5334_v34 }
0x1ede   :  { %10129 = vmatpush3.bf16.msra.mxu0 %v5591_v38  ;;  %10130 = vmatprep.mubr.msk.bf16.mxu0 %vm11135_vm0, %v11134_v1  ;;  %v5314_v48 = vpop.xlane.xlu1 %5313 }
0x1edf   :  { %10140 = vmatprep.subr.bf16.mxu0 %v11134_v1  ;;  %10963 = vrcp.f32 %v5314_v48 }
0x1ee2   :  { %v5635_v32 = vpop.permute.xlu1 %5634 }
0x1ee4   :  { %v10962_v45 = vpop.eup %10961 }
0x1ee5   :  { %v5328_v49 = vmul.f32 %v10962_v45, %v12279_v50 }
0x1ee7   :  { %v5336_v28 = vpack.c.bf16 %v5328_v49, %v5328_v49 }
0x1ee9   :  { %10131 = vmatmul.mubr.msk.bf16.vlgmr.msra.gmra.mxu0 %vm925_vm8, %v5336_v28  ;;  %v10764_v28 = vld [vmem:[%s13001_s6 + $0x140] sm:$0xff]  }
0x1eea   :  { %10142 = vmatprep.mubr.msk.bf16.mxu0 %vm11135_vm0, %v11134_v1 }
0x1eec   :  { %v10964_v23 = vpop.eup %10963 }
0x1eed   :  { %v5330_v16 = vmul.f32 %v10964_v23, %v12285_v43  ;;  %v5640_v43 = vsel %vm1033_vm6, %v5635_v32, 0 }
0x1eef   :  { %v5338_v50 = vpack.c.bf16 %v5330_v16, %v5330_v16 }
0x1efa   :  { %v5305_v22 = vpop.xlane.xlu0 %5304 }
0x1efb   :  { %10965 = vrcp.f32 %v5305_v22 }
0x1efe   :  { %v5311_v5 = vpop.xlane.xlu0 %5310 }
0x1eff   :  { %10967 = vrcp.f32 %v5311_v5 }
0x1f02   :  { %v5684_v55 = vpop.permute.xlu0 %5683 }
0x1f03   :  { %v5689_v60 = vsel %vm1033_vm6, %v5684_v55, 0 }
0x1f04   :  { %10141 = vmatpush3.bf16.msra.mxu0 %v5689_v60 }
0x1f05   :  { %10158 = vmatprep.subr.bf16.mxu0 %v11134_v1 }
0x1f07   :  { %10143 = vmatmul.mubr.msk.bf16.vlgmr.msra.gmra.mxu0 %vm925_vm8, %v5338_v50 }
0x1f08   :  { %v10966_v40 = vpop.eup %10965  ;;  %10166 = vmatprep.mubr.msk.bf16.mxu0 %vm11135_vm0, %v11134_v1 }
0x1f09   :  { %v5327_v26 = vmul.f32 %v10966_v40, %v12293_v33 }
0x1f0b   :  { %v5335_v10 = vpack.c.bf16 %v5327_v26, %v5327_v26 }
0x1f0c   :  { %v10968_v29 = vpop.eup %10967 }
0x1f0d   :  { %10125 = vmatmul.mubr.msk.bf16.vlgmr.msra.gmra.mxu1 %vm925_vm8, %v5335_v10  ;;  %v5329_v54 = vmul.f32 %v10968_v29, %v12297_v7  ;;  %v10761_v7 = vld [vmem:[%s13001_s6 + $0x158] sm:$0xff]  }
0x1f0e   :  { %10135 = vmatpush3.bf16.msra.mxu1 %v5640_v43  ;;  %10136 = vmatprep.mubr.msk.bf16.mxu1 %vm11135_vm0, %v11134_v1 }
0x1f0f   :  { %10146 = vmatprep.subr.bf16.mxu1 %v11134_v1  ;;  %v5337_v0 = vpack.c.bf16 %v5329_v54, %v5329_v54 }
0x1f15   :  { %10137 = vmatmul.mubr.msk.bf16.vlgmr.msra.gmra.mxu1 %vm925_vm8, %v5337_v0 }
0x1f16   :  { %10154 = vmatprep.mubr.msk.bf16.mxu1 %vm11135_vm0, %v11134_v1  ;;  %10147 = vmatpush3.bf16.msra.mxu1 %v10761_v7 }
0x1f17   :  { %10148 = vmatprep.subr.bf16.mxu1 %v11134_v1 }
0x1f1a   :  { %10149 = vmatpush3.bf16.msra.mxu1 %v10762_v41 }
0x1f1b   :  { %10150 = vmatprep.subr.bf16.mxu1 %v11134_v1 }
0x1f1e   :  { %10151 = vmatpush3.bf16.msra.mxu1 %v10763_v12 }
0x1f1f   :  { %10152 = vmatprep.subr.bf16.mxu1 %v11134_v1 }
0x1f22   :  { %10153 = vmatpush3.bf16.msra.mxu1 %v10764_v28  ;;  %v10768_v28 = vld [vmem:[#allocation6 + $0x40] sm:$0xff]  }
0x1f23   :  { %10170 = vmatprep.subr.bf16.mxu1 %v11134_v1 }
0x1f49   :  { %v5382_v33 = vpop.f32.mrf.mxu1 }
0x1f4a   :  { %v5431_v9 = vpop.f32.mrf.mxu0 }
0x1f4b   :  { %v10102_v24 = vpop.f32.mrf.mxu1 }
0x1f4c   :  { %v10108_v8 = vpop.f32.mrf.mxu0 }
0x1f4d   :  { %v5385_v42 = vpop.f32.mrf.mxu1 }
0x1f4e   :  { %v5434_v51 = vpop.f32.mrf.mxu0 }
0x1f4f   :  { %v10103_v35 = vpop.f32.mrf.mxu1 }
0x1f50   :  { %v10109_v19 = vpop.f32.mrf.mxu0 }
0x1f98   :  { %v5480_v13 = vpop.f32.mrf.mxu1 }
0x1f9a   :  { %v10114_v20 = vpop.f32.mrf.mxu1 }
0x1f9c   :  { %v5483_v47 = vpop.f32.mrf.mxu1 }
0x1f9d   :  { %v5529_v61 = vpop.f32.mrf.mxu0 }
0x1f9e   :  { %v10597_v37 = vpack.i.bf16 %v5529_v61, %v5480_v13  ;;  %v10115_v27 = vpop.f32.mrf.mxu1 }
0x1f9f   :  { %v10120_v25 = vpop.f32.mrf.mxu0 }
0x1fa0   :  { %10598 = vrot.lane.b32.xlu1 %v10597_v37, %s11130_s20 }
0x1fa1   :  { %v5532_v11 = vpop.f32.mrf.mxu0 }
0x1fa3   :  { %v10121_v30 = vpop.f32.mrf.mxu0 }
0x1fa9   :  { %v5627_v36 = vpop.f32.mrf.mxu0 }
0x1fab   :  { %v10132_v59 = vpop.f32.mrf.mxu0 }
0x1fad   :  { %v5630_v17 = vpop.f32.mrf.mxu0 }
0x1faf   :  { %v10133_v2 = vpop.f32.mrf.mxu0 }
0x1fc7   :  { %v5725_v46 = vpop.f32.mrf.mxu0 }
0x1fc9   :  { %v10144_v39 = vpop.f32.mrf.mxu0 }
0x1fcb   :  { %v5728_v34 = vpop.f32.mrf.mxu0 }
0x1fcd   :  { %v5578_v38 = vpop.f32.mrf.mxu1  ;;  %v10145_v45 = vpop.f32.mrf.mxu0 }
0x1fce   :  { %v10602_v49 = vpack.i.bf16 %v5627_v36, %v5578_v38  ;;  %v10765_v45 = vld [vmem:[#allocation6 + $0x58] sm:$0xff]  }
0x1fcf   :  { %v10126_v48 = vpop.f32.mrf.mxu1  ;;  %10159 = vmatpush3.bf16.msra.mxu0 %v10765_v45 }
0x1fd0   :  { %10603 = vrot.lane.b32.xlu0 %v10602_v49, %s11141_s14  ;;  %10160 = vmatprep.subr.bf16.mxu0 %v11134_v1  ;;  %v10767_v49 = vld [vmem:[#allocation6 + $0x48] sm:$0xff]   ;;  %v10769_v48 = vld [vmem:[%s13003_s8 + $0xb8] sm:$0xff]  }
0x1fd1   :  { %v5581_v22 = vpop.f32.mrf.mxu1 }
0x1fd2   :  { %v10770_v22 = vld [vmem:[%s13003_s8 + $0xb0] sm:$0xff]  }
0x1fd3   :  { %v10127_v23 = vpop.f32.mrf.mxu1 }
0x1fd4   :  { %v10771_v23 = vld [vmem:[%s13003_s8 + $0xa8] sm:$0xff]  }
0x1fd5   :  { %v5676_v5 = vpop.f32.mrf.mxu1 }
0x1fd6   :  { %v10607_v16 = vpack.i.bf16 %v5725_v46, %v5676_v5  ;;  %v10772_v5 = vld [vmem:[%s13003_s8 + $0xa0] sm:$0xff]  }
0x1fd7   :  { %v10138_v55 = vpop.f32.mrf.mxu1 }
0x1fd8   :  { %10608 = vrot.lane.b32.xlu1 %v10607_v16, %s11142_s15  ;;  %v10773_v16 = vld [vmem:[%s13003_s8 + $0x98] sm:$0xff]  }
0x1fd9   :  { %v5679_v60 = vpop.f32.mrf.mxu1 }
0x1fdb   :  { %v10139_v50 = vpop.f32.mrf.mxu1 }
0x2012   :  { %v10599_v40 = vpop.permute.xlu1 %10598 }
0x2013   :  { %v10601_v32 = vunpack.i.h.bf16 %v10599_v40  ;;  %v10600_v10 = vunpack.i.l.bf16 %v10599_v40 }
0x2015   :  { %v5756_v0 = vsel %vm517_vm5, %v5431_v9, %v10601_v32  ;;  %v5755_v24 = vsel %vm517_vm5, %v5382_v33, %v10600_v10  ;;  %v5774_v9 = vrot.slane %v12149_v6, %v11211_v3 }
0x2042   :  { %v10604_v26 = vpop.permute.xlu0 %10603 }
0x2043   :  { %v10606_v29 = vunpack.i.h.bf16 %v10604_v26  ;;  %v10605_v43 = vunpack.i.l.bf16 %v10604_v26 }
0x2045   :  { %v5758_v51 = vsel %vm111_vm2, %v5756_v0, %v10606_v29  ;;  %v5757_v35 = vsel %vm111_vm2, %v5755_v24, %v10605_v43  ;;  %v5874_v29 = vrot.slane %v12149_v6, %v11504_v62 }
0x204a   :  { %v10609_v54 = vpop.permute.xlu1 %10608 }
0x204b   :  { %v10611_v8 = vunpack.i.h.bf16 %v10609_v54  ;;  %v10610_v42 = vunpack.i.l.bf16 %v10609_v54 }
0x204d   :  { %v5760_v19 = vsel %vm1427_vm9, %v5758_v51, %v10611_v8  ;;  %v5759_v7 = vsel %vm1427_vm9, %v5757_v35, %v10610_v42  ;;  %v5880_v8 = vrot.slane %v12149_v6, %v11558_v63 }
0x204e   :  { %v5770_v13 = vpack.c.bf16 %v5760_v19, %v5759_v7  ;;  %v10774_v7 = vld [vmem:[%s13003_s8 + $0x90] sm:$0xff]  }
0x2050   :  { %10155 = vmatmul.mubr.msk.bf16.vlgmr.msra.gmra.mxu1 %vm232_vm1, %v5770_v13  ;;  %v10775_v13 = vld [vmem:[%s13003_s8 + $0x88] sm:$0xff]  }
0x2051   :  { %10186 = vmatprep.mubr.msk.bf16.mxu1 %vm11135_vm0, %v11134_v1  ;;  %10171 = vmatpush3.bf16.msra.mxu1 %v10769_v48 }
0x2052   :  { %10172 = vmatprep.subr.bf16.mxu1 %v11134_v1 }
0x2055   :  { %10173 = vmatpush3.bf16.msra.mxu1 %v10770_v22 }
0x2056   :  { %10174 = vmatprep.subr.bf16.mxu1 %v11134_v1 }
0x2059   :  { %10175 = vmatpush3.bf16.msra.mxu1 %v10771_v23 }
0x205a   :  { %10176 = vmatprep.subr.bf16.mxu1 %v11134_v1 }
0x205d   :  { %10177 = vmatpush3.bf16.msra.mxu1 %v10772_v5 }
0x205e   :  { %10178 = vmatprep.subr.bf16.mxu1 %v11134_v1 }
0x2061   :  { %10179 = vmatpush3.bf16.msra.mxu1 %v10773_v16 }
0x2062   :  { %10180 = vmatprep.subr.bf16.mxu1 %v11134_v1 }
0x2065   :  { %10181 = vmatpush3.bf16.msra.mxu1 %v10774_v7 }
0x2066   :  { %10182 = vmatprep.subr.bf16.mxu1 %v11134_v1 }
0x2069   :  { %10183 = vmatpush3.bf16.msra.mxu1 %v10775_v13  ;;  %v12434_v13 = vld [vmem:[#allocation2 + $0x40] sm:$0xff] }
0x206a   :  { %10184 = vmatprep.subr.bf16.mxu1 %v11134_v1 }
0x2110   :  { %v5836_v33 = vpop.f32.mrf.mxu1 }
0x2111   :  { %v5837_v20 = vadd.f32 %v5836_v33, %v5774_v9 }
0x2112   :  { %v10156_v47 = vpop.f32.mrf.mxu1 }
0x2113   :  { %v5843_v61 = vadd.f32 %v5837_v20, %v12155_v44 }
0x2114   :  { %v5839_v37 = vpop.f32.mrf.mxu1 }
0x2115   :  { %v5840_v27 = vadd.f32 %v5839_v37, %v5774_v9  ;;  %v5845_v25 = vsel %vm232_vm1, %v5843_v61, 0.0  ;;  %v10776_v9 = vld [vmem:[%s13003_s8 + $0x80] sm:$0xff]  }
0x2116   :  { %5846 = vadd.xlane.f32.xlu0 %v5845_v25  ;;  %v10157_v11 = vpop.f32.mrf.mxu1  ;;  %10185 = vmatpush3.bf16.msra.mxu1 %v10776_v9 }
0x2117   :  { %v5844_v30 = vadd.f32 %v5840_v27, %v12157_v56  ;;  %v10766_v56 = vld [vmem:[#allocation6 + $0x50] sm:$0xff]   ;;  %10202 = vmatprep.subr.bf16.mxu1 %v11134_v1 }
0x2118   :  { %10161 = vmatpush3.bf16.msra.mxu0 %v10766_v56 }
0x2119   :  { %v5848_v36 = vsel %vm232_vm1, %v5844_v30, 0.0  ;;  %10162 = vmatprep.subr.bf16.mxu0 %v11134_v1 }
0x211a   :  { %5849 = vadd.xlane.f32.xlu1 %v5848_v36  ;;  %v5988_v36 = vrot.slane %v12149_v6, %v11574_v58 }
0x211c   :  { %10163 = vmatpush3.bf16.msra.mxu0 %v10767_v49 }
0x211d   :  { %10164 = vmatprep.subr.bf16.mxu0 %v11134_v1 }
0x2120   :  { %10165 = vmatpush3.bf16.msra.mxu0 %v10768_v28 }
0x219f   :  { %v5847_v59 = vpop.xlane.xlu0 %5846 }
0x21a0   :  { %v5851_v17 = vmul.f32 0.015625, %v5847_v59 }
0x21a2   :  { %v5853_v2 = vsub.f32 %v5843_v61, %v5851_v17 }
0x21a3   :  { %v5850_v41 = vpop.xlane.xlu1 %5849 }
0x21a4   :  { %v5852_v46 = vmul.f32 0.015625, %v5850_v41  ;;  %v5855_v12 = vmul.f32 %v5853_v2, %v5853_v2 }
0x21a6   :  { %v5854_v39 = vsub.f32 %v5844_v30, %v5852_v46  ;;  %v5857_v44 = vsel %vm232_vm1, %v5855_v12, 0.0 }
0x21a7   :  { %5858 = vadd.xlane.f32.xlu0 %v5857_v44 }
0x21a8   :  { %v5856_v34 = vmul.f32 %v5854_v39, %v5854_v39 }
0x21aa   :  { %v5860_v38 = vsel %vm232_vm1, %v5856_v34, 0.0 }
0x21ab   :  { %5861 = vadd.xlane.f32.xlu0 %v5860_v38 }
0x2230   :  { %v5859_v55 = vpop.xlane.xlu0 %5858 }
0x2231   :  { %v5863_v60 = vmul.f32 0.015625, %v5859_v55  ;;  %v10779_v55 = vld [vmem:[#allocation4 + $0xf4] ss:$8 sps:$4 sm:$0xff]  }
0x2232   :  { %6196 = vmatprep.subr.bf16.mxu0 %v10779_v55 }
0x2233   :  { %v5865_v50 = vadd.f32 1e-05, %v5863_v60  ;;  %v10777_v60 = vld [vmem:[#allocation4 + $0xf0] ss:$8 sps:$4 sm:$0xff]  }
0x2234   :  { %v5862_v40 = vpop.xlane.xlu0 %5861 }
0x2235   :  { %10969 = vrsqrt.f32 %v5865_v50  ;;  %v5864_v26 = vmul.f32 0.015625, %v5862_v40  ;;  %v10782_v50 = vld [vmem:[#allocation4 + $0xe4] ss:$8 sps:$4 sm:$0xff]   ;;  %v10780_v40 = vld [vmem:[#allocation4 + $0xe0] ss:$8 sps:$4 sm:$0xff]  }
0x2237   :  { %v5866_v32 = vadd.f32 1e-05, %v5864_v26  ;;  %v10785_v26 = vld [vmem:[#allocation4 + $0xd4] ss:$8 sps:$4 sm:$0xff]  }
0x2239   :  { %10971 = vrsqrt.f32 %v5866_v32  ;;  %v10783_v32 = vld [vmem:[#allocation4 + $0xd0] ss:$8 sps:$4 sm:$0xff]  }
0x2242   :  { %v10970_v10 = vpop.eup %10969 }
0x2243   :  { %v5869_v43 = vmul.f32 %v10970_v10, %v5853_v2  ;;  %v10788_v10 = vld [vmem:[#allocation4 + $0xc4] ss:$8 sps:$4 sm:$0xff]  }
0x2245   :  { %v5875_v0 = vmul.f32 %v5874_v29, %v5869_v43 }
0x2246   :  { %v10972_v54 = vpop.eup %10971 }
0x2247   :  { %v5870_v24 = vmul.f32 %v10972_v54, %v5854_v39  ;;  %v5881_v51 = vadd.f32 %v5880_v8, %v5875_v0 }
0x2249   :  { %v5876_v42 = vmul.f32 %v5874_v29, %v5870_v24  ;;  %v10786_v29 = vld [vmem:[#allocation4 + $0xc0] ss:$8 sps:$4 sm:$0xff]  }
0x224b   :  { %v5882_v35 = vadd.f32 %v5880_v8, %v5876_v42 }
0x224d   :  { %v5892_v19 = vpack.c.bf16 %v5882_v35, %v5881_v51 }
0x224f   :  { %10167 = vmatmul.mubr.msk.bf16.vlgmr.msra.gmra.mxu0 %vm232_vm1, %v5892_v19 }
0x2250   :  { %6220 = vmatprep.mubr.bf16.mxu0 %v11136_v31  ;;  %v5896_v31 = vrot.slane %v12149_v6, %v11214_v4  ;;  %6197 = vmatpush1.bf16.msra.mxu0 %v10777_v60 }
0x2251   :  { %6198 = vmatprep.subr.bf16.mxu0 %v10782_v50 }
0x2254   :  { %6199 = vmatpush1.bf16.msra.mxu0 %v10780_v40 }
0x2255   :  { %6200 = vmatprep.subr.bf16.mxu0 %v10785_v26 }
0x2258   :  { %6201 = vmatpush1.bf16.msra.mxu0 %v10783_v32 }
0x2259   :  { %6202 = vmatprep.subr.bf16.mxu0 %v10788_v10 }
0x225c   :  { %6203 = vmatpush1.bf16.msra.mxu0 %v10786_v29 }
0x225d   :  { %10190 = vmatprep.subr.bf16.mxu0 %v11134_v1 }
0x230f   :  { %v5958_v33 = vpop.f32.mrf.mxu0 }
0x2310   :  { %v5959_v47 = vadd.f32 %v5958_v33, %v5896_v31 }
0x2311   :  { %v10168_v20 = vpop.f32.mrf.mxu0 }
0x2312   :  { %v5965_v25 = vmax.f32 %v5959_v47, 0.0  ;;  %v6115_v20 = vrot.slane %v12434_v13, %v11211_v3 }
0x2313   :  { %v5961_v61 = vpop.f32.mrf.mxu0 }
0x2314   :  { %v5962_v37 = vadd.f32 %v5961_v61, %v5896_v31 }
0x2315   :  { %v10169_v27 = vpop.f32.mrf.mxu0 }
0x2316   :  { %v5966_v11 = vmax.f32 %v5962_v37, 0.0 }
0x2318   :  { %v5984_v30 = vpack.c.bf16 %v5966_v11, %v5965_v25  ;;  %v6140_v25 = vrot.slane %v12434_v13, %v11214_v4 }
0x231a   :  { %10187 = vmatmul.mubr.bf16.vlgmr.msra.gmra.mxu1 %v5984_v30  ;;  %v82_v30 = vld [vmem:[#allocation2 + $0x48] sm:$0xff] }
0x231b   :  { %10204 = vmatprep.mubr.msk.bf16.mxu1 %vm11135_vm0, %v11134_v1 }
0x23da   :  { %v6071_v59 = vpop.f32.mrf.mxu1 }
0x23db   :  { %v6072_v17 = vadd.f32 %v6071_v59, %v5988_v36 }
0x23dc   :  { %v10188_v2 = vpop.f32.mrf.mxu1 }
0x23dd   :  { %v6078_v41 = vadd.f32 %v6072_v17, %v5881_v51  ;;  %v6144_v17 = vrot.slane %v82_v30, %v11214_v4 }
0x23de   :  { %v6074_v46 = vpop.f32.mrf.mxu1 }
0x23df   :  { %v6075_v12 = vadd.f32 %v6074_v46, %v5988_v36  ;;  %v6080_v39 = vsel %vm232_vm1, %v6078_v41, 0.0 }
0x23e0   :  { %6081 = vadd.xlane.f32.xlu1 %v6080_v39  ;;  %v10189_v44 = vpop.f32.mrf.mxu1 }
0x23e1   :  { %v6079_v34 = vadd.f32 %v6075_v12, %v5882_v35  ;;  %v11057_v35 = vld [vmem:[#allocation2 + $0x30] sm:$0xff] }
0x23e2   :  { %v6109_v19 = vrot.slane %v11057_v35, %v11565_v15 }
0x23e3   :  { %v6083_v38 = vsel %vm232_vm1, %v6079_v34, 0.0 }
0x23e4   :  { %6084 = vadd.xlane.f32.xlu0 %v6083_v38 }
0x2469   :  { %v6082_v45 = vpop.xlane.xlu1 %6081 }
0x246a   :  { %v6086_v56 = vmul.f32 0.015625, %v6082_v45 }
0x246c   :  { %v6088_v49 = vsub.f32 %v6078_v41, %v6086_v56 }
0x246d   :  { %v6085_v28 = vpop.xlane.xlu0 %6084 }
0x246e   :  { %v6087_v48 = vmul.f32 0.015625, %v6085_v28  ;;  %v6090_v6 = vmul.f32 %v6088_v49, %v6088_v49 }
0x2470   :  { %v6089_v22 = vsub.f32 %v6079_v34, %v6087_v48  ;;  %v6092_v23 = vsel %vm232_vm1, %v6090_v6, 0.0 }
0x2471   :  { %6093 = vadd.xlane.f32.xlu1 %v6092_v23 }
0x2472   :  { %v6091_v5 = vmul.f32 %v6089_v22, %v6089_v22 }
0x2474   :  { %v6095_v16 = vsel %vm232_vm1, %v6091_v5, 0.0 }
0x2475   :  { %6096 = vadd.xlane.f32.xlu0 %v6095_v16 }
0x24fa   :  { %v6094_v43 = vpop.xlane.xlu1 %6093 }
0x24fb   :  { %v6098_v54 = vmul.f32 0.015625, %v6094_v43 }
0x24fd   :  { %v6100_v0 = vadd.f32 1e-05, %v6098_v54 }
0x24fe   :  { %v6097_v24 = vpop.xlane.xlu0 %6096 }
0x24ff   :  { %10973 = vrsqrt.f32 %v6100_v0  ;;  %v6099_v8 = vmul.f32 0.015625, %v6097_v24 }
0x2501   :  { %v6101_v42 = vadd.f32 1e-05, %v6099_v8 }
0x2503   :  { %10975 = vrsqrt.f32 %v6101_v42 }
0x250c   :  { %v10974_v51 = vpop.eup %10973 }
0x250d   :  { %v6104_v7 = vmul.f32 %v10974_v51, %v6088_v49 }
0x250f   :  { %v6110_v31 = vmul.f32 %v6109_v19, %v6104_v7 }
0x2510   :  { %v10976_v9 = vpop.eup %10975 }
0x2511   :  { %v6105_v33 = vmul.f32 %v10976_v9, %v6089_v22  ;;  %v12438_v61 = vadd.f32 %v6115_v20, %v6110_v31 }
0x2513   :  { %v6111_v47 = vmul.f32 %v6109_v19, %v6105_v33 }
0x2515   :  { %v12440_v37 = vadd.f32 %v6115_v20, %v6111_v47 }
0x2517   :  { %v6136_v27 = vpack.c.bf16 %v12440_v37, %v12438_v61 }
0x2519   :  { %9154 = vmatmul.mubr.msk.bf16.vlgmr.msra.gmra.mxu0 %vm232_vm1, %v6136_v27 }
0x251a   :  { %10192 = vmatprep.mubr.msk.bf16.mxu0 %vm11135_vm0, %v11134_v1 }
0x25d9   :  { %v6222_v11 = vpop.f32.mrf.mxu0 }
0x25da   :  { %v6223_v36 = vadd.f32 %v6222_v11, %v6140_v25 }
0x25db   :  { %v6224_v59 = vpop.f32.mrf.mxu0 }
0x25dc   :  { %6233 = vrot.lane.b32.xlu1 %v6223_v36, %s11139_s28  ;;  %v12451_v12 = vadd.f32 %v6224_v59, %v6144_v17  ;;  %v6287_v34 = vpack.c.bf16 %v6223_v36, %v6223_v36  ;;  %v6271_v26 = vmul.f32 0.25, %v6223_v36 }
0x25dd   :  { %v6226_v2 = vpop.f32.mrf.mxu0 }
0x25de   :  { %v6227_v41 = vadd.f32 %v6226_v2, %v6140_v25  ;;  %v6279_v10 = vpack.c.bf16 %v6271_v26, %v6271_v26 }
0x25df   :  { %v6228_v46 = vpop.f32.mrf.mxu0 }
0x25e0   :  { %v12453_v39 = vadd.f32 %v6228_v46, %v6144_v17  ;;  %6235 = vrot.lane.b32.xlu0 %v6227_v41, %s11139_s28  ;;  %6239 = vrot.lane.b32.xlu1 %v6223_v36, %s11138_s27  ;;  %v6288_v38 = vpack.c.bf16 %v6227_v41, %v6227_v41  ;;  %v6272_v43 = vmul.f32 0.25, %v6227_v41 }
0x25e2   :  { %v12459_v44 = vpack.i.bf16 %v12453_v39, %v12451_v12  ;;  %v6280_v54 = vpack.c.bf16 %v6272_v43, %v6272_v43 }
0x25e4   :  { %6245 = vrot.lane.b32.xlu0 %v6223_v36, %s11140_s4  ;;  %6241 = vrot.lane.b32.xlu1 %v6227_v41, %s11138_s27 }
0x25e8   :  { %6247 = vrot.lane.b32.xlu1 %v6227_v41, %s11140_s4  ;;  %6296 = vrot.lane.b32.xlu0 %v6287_v34, %s11132_s25  ;;  %v6791_v41 = vpack.c.bf16 %v12451_v12, %v12451_v12 }
0x25ec   :  { %6345 = vrot.lane.b32.xlu1 %v6288_v38, %s11132_s25  ;;  %v6803_v38 = vsel %vm1033_vm6, %v6791_v41, 0 }
0x264e   :  { %v6234_v45 = vpop.permute.xlu1 %6233 }
0x264f   :  { %v6289_v56 = vpack.c.bf16 %v6234_v45, %v6234_v45  ;;  %v6273_v8 = vmul.f32 0.25, %v6234_v45  ;;  %v6792_v45 = vpack.c.bf16 %v12453_v39, %v12453_v39 }
0x2651   :  { %6394 = vrot.lane.b32.xlu0 %v6289_v56, %s11132_s25  ;;  %v6281_v19 = vpack.c.bf16 %v6273_v8, %v6273_v8  ;;  %v6849_v56 = vsel %vm1033_vm6, %v6792_v45, 0 }
0x2652   :  { %v6236_v49 = vpop.permute.xlu0 %6235  ;;  %v6240_v28 = vpop.permute.xlu1 %6239 }
0x2653   :  { %v6290_v48 = vpack.c.bf16 %v6236_v49, %v6236_v49  ;;  %v6291_v6 = vpack.c.bf16 %v6240_v28, %v6240_v28  ;;  %v6274_v7 = vmul.f32 0.25, %v6236_v49  ;;  %v6275_v20 = vmul.f32 0.25, %v6240_v28 }
0x2655   :  { %6443 = vrot.lane.b32.xlu1 %v6290_v48, %s11132_s25  ;;  %6492 = vrot.lane.b32.xlu0 %v6291_v6, %s11132_s25  ;;  %v6282_v33 = vpack.c.bf16 %v6274_v7, %v6274_v7  ;;  %v6283_v25 = vpack.c.bf16 %v6275_v20, %v6275_v20 }
0x2656   :  { %v6246_v22 = vpop.permute.xlu0 %6245  ;;  %v6242_v23 = vpop.permute.xlu1 %6241 }
0x2657   :  { %v6293_v5 = vpack.c.bf16 %v6246_v22, %v6246_v22  ;;  %v6292_v16 = vpack.c.bf16 %v6242_v23, %v6242_v23  ;;  %v6276_v11 = vmul.f32 0.25, %v6242_v23  ;;  %v6277_v59 = vmul.f32 0.25, %v6246_v22 }
0x2659   :  { %6541 = vrot.lane.b32.xlu1 %v6292_v16, %s11132_s25  ;;  %6590 = vrot.lane.b32.xlu0 %v6293_v5, %s11132_s25  ;;  %v6284_v17 = vpack.c.bf16 %v6276_v11, %v6276_v11  ;;  %v6285_v46 = vpack.c.bf16 %v6277_v59, %v6277_v59 }
0x265a   :  { %v6248_v55 = vpop.permute.xlu1 %6247  ;;  %v6297_v60 = vpop.permute.xlu0 %6296 }
0x265b   :  { %v6294_v50 = vpack.c.bf16 %v6248_v55, %v6248_v55  ;;  %v6302_v40 = vsel %vm517_vm5, %v6297_v60, 0  ;;  %v6278_v34 = vmul.f32 0.25, %v6248_v55 }
0x265c   :  { %10191 = vmatpush3.bf16.xpose.msra.mxu0 %v6302_v40 }
0x265d   :  { %6639 = vrot.lane.b32.xlu1 %v6294_v50, %s11132_s25  ;;  %10196 = vmatprep.subr.bf16.mxu0 %v11134_v1  ;;  %v6286_v12 = vpack.c.bf16 %v6278_v34, %v6278_v34 }
0x265e   :  { %v6346_v32 = vpop.permute.xlu1 %6345 }
0x265f   :  { %v6351_v29 = vsel %vm517_vm5, %v6346_v32, 0 }
0x2663   :  { %10193 = vmatmul.mubr.msk.bf16.vlgmr.msra.gmra.mxu0 %vm517_vm5, %v6279_v10 }
0x2664   :  { %10197 = vmatpush3.bf16.xpose.msra.mxu0 %v6351_v29  ;;  %10198 = vmatprep.mubr.msk.bf16.mxu0 %vm11135_vm0, %v11134_v1 }
0x2665   :  { %10208 = vmatprep.subr.bf16.mxu0 %v11134_v1 }
0x266b   :  { %10199 = vmatmul.mubr.msk.bf16.vlgmr.msra.gmra.mxu0 %vm517_vm5, %v6280_v54 }
0x266c   :  { %10210 = vmatprep.mubr.msk.bf16.mxu0 %vm11135_vm0, %v11134_v1 }
0x26c3   :  { %v6395_v0 = vpop.permute.xlu0 %6394 }
0x26c4   :  { %v6400_v24 = vsel %vm517_vm5, %v6395_v0, 0 }
0x26c5   :  { %10203 = vmatpush3.bf16.xpose.msra.mxu1 %v6400_v24 }
0x26c6   :  { %10214 = vmatprep.subr.bf16.mxu1 %v11134_v1 }
0x26c7   :  { %v6444_v42 = vpop.permute.xlu1 %6443  ;;  %v6493_v35 = vpop.permute.xlu0 %6492 }
0x26c8   :  { %v6449_v51 = vsel %vm517_vm5, %v6444_v42, 0  ;;  %v6498_v9 = vsel %vm517_vm5, %v6493_v35, 0 }
0x26c9   :  { %10209 = vmatpush3.bf16.xpose.msra.mxu0 %v6449_v51 }
0x26ca   :  { %10220 = vmatprep.subr.bf16.mxu0 %v11134_v1 }
0x26cb   :  { %v6542_v31 = vpop.permute.xlu1 %6541  ;;  %v6591_v27 = vpop.permute.xlu0 %6590 }
0x26cc   :  { %10205 = vmatmul.mubr.msk.bf16.vlgmr.msra.gmra.mxu1 %vm517_vm5, %v6281_v19  ;;  %v6547_v47 = vsel %vm517_vm5, %v6542_v31, 0  ;;  %v6596_v30 = vsel %vm517_vm5, %v6591_v27, 0 }
0x26cd   :  { %10215 = vmatpush3.bf16.xpose.msra.mxu1 %v6498_v9  ;;  %10216 = vmatprep.mubr.msk.bf16.mxu1 %vm11135_vm0, %v11134_v1 }
0x26ce   :  { %10226 = vmatprep.subr.bf16.mxu1 %v11134_v1 }
0x26cf   :  { %v6640_v36 = vpop.permute.xlu1 %6639 }
0x26d0   :  { %10211 = vmatmul.mubr.msk.bf16.vlgmr.msra.gmra.mxu0 %vm517_vm5, %v6282_v33  ;;  %v6645_v2 = vsel %vm517_vm5, %v6640_v36, 0 }
0x26d1   :  { %10221 = vmatpush3.bf16.xpose.msra.mxu0 %v6547_v47  ;;  %10222 = vmatprep.mubr.msk.bf16.mxu0 %vm11135_vm0, %v11134_v1 }
0x26d2   :  { %10232 = vmatprep.subr.bf16.mxu0 %v11134_v1 }
0x26d4   :  { %10217 = vmatmul.mubr.msk.bf16.vlgmr.msra.gmra.mxu1 %vm517_vm5, %v6283_v25 }
0x26d5   :  { %10227 = vmatpush3.bf16.xpose.msra.mxu1 %v6596_v30  ;;  %10228 = vmatprep.mubr.msk.bf16.mxu1 %vm11135_vm0, %v11134_v1 }
0x26d6   :  { %10238 = vmatprep.subr.bf16.mxu1 %v11134_v1 }
0x26d8   :  { %10223 = vmatmul.mubr.msk.bf16.vlgmr.msra.gmra.mxu0 %vm517_vm5, %v6284_v17 }
0x26d9   :  { %10233 = vmatpush3.bf16.xpose.msra.mxu0 %v6645_v2  ;;  %10234 = vmatprep.mubr.msk.bf16.mxu0 %vm11135_vm0, %v11134_v1 }
0x26da   :  { %10244 = vmatprep.subr.bf16.mxu0 %v11134_v1 }
0x26dc   :  { %10229 = vmatmul.mubr.msk.bf16.vlgmr.msra.gmra.mxu1 %vm517_vm5, %v6285_v46 }
0x26dd   :  { %10239 = vmatpush3.bf16.msra.mxu1 %v6803_v38  ;;  %10240 = vmatprep.mubr.msk.bf16.mxu1 %vm11135_vm0, %v11134_v1 }
0x26de   :  { %10250 = vmatprep.subr.bf16.mxu1 %v11134_v1 }
0x26e0   :  { %10235 = vmatmul.mubr.msk.bf16.vlgmr.msra.gmra.mxu0 %vm517_vm5, %v6286_v12 }
0x26e1   :  { %10245 = vmatpush3.bf16.msra.mxu0 %v6849_v56  ;;  %10246 = vmatprep.mubr.msk.bf16.mxu0 %vm11135_vm0, %v11134_v1 }
0x26e2   :  { %10256 = vmatprep.subr.bf16.mxu0 %v11134_v1 }
0x2723   :  { %v6338_v49 = vpop.f32.mrf.mxu0 }
0x2724   :  { %v6687_v39 = vadd.f32 %v6338_v49, %v11977_v18 }
0x2725   :  { %v10194_v28 = vpop.f32.mrf.mxu0 }
0x2726   :  { %v6695_v48 = vsel %vm925_vm8, %v6687_v39, -inf }
0x2727   :  { %6696 = vmax.xlane.f32.xlu0 %v6695_v48  ;;  %v6341_v6 = vpop.f32.mrf.mxu0 }
0x2729   :  { %v10195_v22 = vpop.f32.mrf.mxu0 }
0x272b   :  { %v6387_v23 = vpop.f32.mrf.mxu0 }
0x272c   :  { %v6688_v5 = vadd.f32 %v6387_v23, %v11977_v18 }
0x272d   :  { %v10200_v16 = vpop.f32.mrf.mxu0 }
0x272e   :  { %v6698_v55 = vsel %vm925_vm8, %v6688_v5, -inf }
0x272f   :  { %6699 = vmax.xlane.f32.xlu1 %v6698_v55  ;;  %v6390_v60 = vpop.f32.mrf.mxu0 }
0x2731   :  { %v10201_v50 = vpop.f32.mrf.mxu0 }
0x278c   :  { %v6436_v40 = vpop.f32.mrf.mxu1 }
0x278d   :  { %v6689_v26 = vadd.f32 %v6436_v40, %v11977_v18 }
0x278e   :  { %v10206_v32 = vpop.f32.mrf.mxu1 }
0x278f   :  { %v6701_v10 = vsel %vm925_vm8, %v6689_v26, -inf }
0x2790   :  { %v6439_v29 = vpop.f32.mrf.mxu1  ;;  %6702 = vmax.xlane.f32.xlu0 %v6701_v10  ;;  %v6485_v43 = vpop.f32.mrf.mxu0 }
0x2791   :  { %v6690_v54 = vadd.f32 %v6485_v43, %v11977_v18 }
0x2792   :  { %v10207_v0 = vpop.f32.mrf.mxu1  ;;  %v10212_v24 = vpop.f32.mrf.mxu0 }
0x2793   :  { %v6704_v8 = vsel %vm925_vm8, %v6690_v54, -inf }
0x2794   :  { %v6534_v42 = vpop.f32.mrf.mxu1  ;;  %6705 = vmax.xlane.f32.xlu0 %v6704_v8  ;;  %v6488_v51 = vpop.f32.mrf.mxu0 }
0x2795   :  { %v6691_v35 = vadd.f32 %v6534_v42, %v11977_v18 }
0x2796   :  { %v10213_v19 = vpop.f32.mrf.mxu0  ;;  %v10218_v7 = vpop.f32.mrf.mxu1 }
0x2797   :  { %v6707_v9 = vsel %vm925_vm8, %v6691_v35, -inf }
0x2798   :  { %v6537_v31 = vpop.f32.mrf.mxu1  ;;  %6708 = vmax.xlane.f32.xlu1 %v6707_v9  ;;  %v6583_v33 = vpop.f32.mrf.mxu0 }
0x2799   :  { %v6692_v20 = vadd.f32 %v6583_v33, %v11977_v18 }
0x279a   :  { %v10219_v47 = vpop.f32.mrf.mxu1  ;;  %v10224_v27 = vpop.f32.mrf.mxu0 }
0x279b   :  { %v6710_v25 = vsel %vm925_vm8, %v6692_v20, -inf }
0x279c   :  { %v6632_v11 = vpop.f32.mrf.mxu1  ;;  %6711 = vmax.xlane.f32.xlu0 %v6710_v25  ;;  %v6586_v30 = vpop.f32.mrf.mxu0 }
0x279d   :  { %v6693_v36 = vadd.f32 %v6632_v11, %v11977_v18 }
0x279e   :  { %v10225_v59 = vpop.f32.mrf.mxu0  ;;  %v10230_v17 = vpop.f32.mrf.mxu1 }
0x279f   :  { %v6713_v2 = vsel %vm925_vm8, %v6693_v36, -inf }
0x27a0   :  { %v6635_v41 = vpop.f32.mrf.mxu1  ;;  %6714 = vmax.xlane.f32.xlu1 %v6713_v2  ;;  %v6681_v46 = vpop.f32.mrf.mxu0 }
0x27a1   :  { %v6694_v34 = vadd.f32 %v6681_v46, %v11977_v18 }
0x27a2   :  { %v10231_v38 = vpop.f32.mrf.mxu1  ;;  %v10236_v45 = vpop.f32.mrf.mxu0 }
0x27a3   :  { %v6716_v12 = vsel %vm925_vm8, %v6694_v34, -inf }
0x27a4   :  { %6717 = vmax.xlane.f32.xlu0 %v6716_v12  ;;  %v6684_v56 = vpop.f32.mrf.mxu0 }
0x27a6   :  { %v10237_v49 = vpop.f32.mrf.mxu0 }
0x27b0   :  { %v6697_v48 = vpop.xlane.xlu0 %6696 }
0x27b1   :  { %10613 = vrot.lane.b32.xlu1 %v12459_v44, %s11139_s28  ;;  %v6719_v23 = vsub.f32 %v6687_v39, %v6697_v48 }
0x27b3   :  { %v6727_v16 = vmul.f32 1.442695, %v6719_v23 }
0x27b8   :  { %v6700_v28 = vpop.xlane.xlu1 %6699 }
0x27b9   :  { %v6720_v6 = vsub.f32 %v6688_v5, %v6700_v28 }
0x27bb   :  { %v6729_v22 = vmul.f32 1.442695, %v6720_v6 }
0x27bd   :  { %10977 = vpow2.f32 %v6729_v22 }
0x27be   :  { %10979 = vpow2.f32 %v6727_v16 }
0x27ca   :  { %v10978_v55 = vpop.eup %10977 }
0x27cb   :  { %v6746_v18 = vsel %vm925_vm8, %v10978_v55, 0.0  ;;  %v12539_v60 = vpop.eup %10979 }
0x27cc   :  { %6747 = vadd.xlane.f32.xlu0 %v6746_v18  ;;  %v6743_v50 = vsel %vm925_vm8, %v12539_v60, 0.0 }
0x27d5   :  { %6744 = vadd.xlane.f32.xlu1 %v6743_v50 }
0x2819   :  { %v6703_v40 = vpop.xlane.xlu0 %6702 }
0x281a   :  { %v6721_v32 = vsub.f32 %v6689_v26, %v6703_v40 }
0x281c   :  { %v6731_v10 = vmul.f32 1.442695, %v6721_v32 }
0x281d   :  { %v6706_v29 = vpop.xlane.xlu0 %6705 }
0x281e   :  { %10981 = vpow2.f32 %v6731_v10  ;;  %v6722_v5 = vsub.f32 %v6690_v54, %v6706_v29 }
0x2820   :  { %v6733_v39 = vmul.f32 1.442695, %v6722_v5 }
0x2821   :  { %v6709_v43 = vpop.xlane.xlu1 %6708 }
0x2822   :  { %10983 = vpow2.f32 %v6733_v39  ;;  %v6723_v0 = vsub.f32 %v6691_v35, %v6709_v43 }
0x2824   :  { %v6735_v24 = vmul.f32 1.442695, %v6723_v0 }
0x2825   :  { %v6712_v8 = vpop.xlane.xlu0 %6711 }
0x2826   :  { %10985 = vpow2.f32 %v6735_v24  ;;  %v6724_v42 = vsub.f32 %v6692_v20, %v6712_v8 }
0x2828   :  { %v6737_v51 = vmul.f32 1.442695, %v6724_v42 }
0x2829   :  { %v6715_v19 = vpop.xlane.xlu1 %6714 }
0x282a   :  { %10987 = vpow2.f32 %v6737_v51  ;;  %v6725_v7 = vsub.f32 %v6693_v36, %v6715_v19 }
0x282b   :  { %v10982_v9 = vpop.eup %10981 }
0x282c   :  { %v6739_v31 = vmul.f32 1.442695, %v6725_v7  ;;  %v6749_v26 = vsel %vm925_vm8, %v10982_v9, 0.0 }
0x282d   :  { %6750 = vadd.xlane.f32.xlu1 %v6749_v26  ;;  %v6718_v33 = vpop.xlane.xlu0 %6717  ;;  %v10614_v46 = vpop.permute.xlu1 %10613 }
0x282e   :  { %10989 = vpow2.f32 %v6739_v31  ;;  %v6726_v54 = vsub.f32 %v6694_v34, %v6718_v33  ;;  %v10616_v38 = vunpack.i.h.bf16 %v10614_v46  ;;  %v10615_v48 = vunpack.i.l.bf16 %v10614_v46 }
0x282f   :  { %v10984_v47 = vpop.eup %10983 }
0x2830   :  { %v6741_v27 = vmul.f32 1.442695, %v6726_v54  ;;  %v6752_v35 = vsel %vm925_vm8, %v10984_v47, 0.0  ;;  %v6794_v12 = vpack.c.bf16 %v10616_v38, %v10616_v38  ;;  %v6793_v6 = vpack.c.bf16 %v10615_v48, %v10615_v48 }
0x2831   :  { %6753 = vadd.xlane.f32.xlu0 %v6752_v35 }
0x2832   :  { %10991 = vpow2.f32 %v6741_v27  ;;  %v6941_v28 = vsel %vm1033_vm6, %v6794_v12, 0  ;;  %v6895_v16 = vsel %vm1033_vm6, %v6793_v6, 0 }
0x2833   :  { %v12545_v25 = vpop.eup %10985 }
0x2834   :  { %v6755_v20 = vsel %vm925_vm8, %v12545_v25, 0.0 }
0x2835   :  { %6756 = vadd.xlane.f32.xlu1 %v6755_v20 }
0x2837   :  { %v12549_v11 = vpop.eup %10987 }
0x2838   :  { %v6758_v30 = vsel %vm925_vm8, %v12549_v11, 0.0 }
0x2839   :  { %6759 = vadd.xlane.f32.xlu0 %v6758_v30 }
0x283b   :  { %v12553_v36 = vpop.eup %10989 }
0x283c   :  { %v6761_v59 = vsel %vm925_vm8, %v12553_v36, 0.0 }
0x283d   :  { %6762 = vadd.xlane.f32.xlu1 %v6761_v59 }
0x283f   :  { %v12557_v17 = vpop.eup %10991 }
0x2840   :  { %v6764_v2 = vsel %vm925_vm8, %v12557_v17, 0.0 }
0x2841   :  { %6765 = vadd.xlane.f32.xlu0 %v6764_v2 }
0x284e   :  { %10623 = vrot.lane.b32.xlu1 %v12459_v44, %s11140_s4 }
0x2855   :  { %v6748_v41 = vpop.xlane.xlu0 %6747 }
0x2856   :  { %10993 = vrcp.f32 %v6748_v41 }
0x2857   :  { %10618 = vrot.lane.b32.xlu0 %v12459_v44, %s11138_s27 }
0x285e   :  { %v6745_v34 = vpop.xlane.xlu1 %6744 }
0x285f   :  { %10995 = vrcp.f32 %v6745_v34 }
0x2863   :  { %v10994_v45 = vpop.eup %10993 }
0x2864   :  { %v6776_v56 = vmul.f32 %v10994_v45, %v10978_v55  ;;  %v10789_v45 = vld [vmem:[#allocation6 + $0xb8] sm:$0xff]  }
0x2866   :  { %v6784_v49 = vpack.c.bf16 %v6776_v56, %v6776_v56 }
0x2868   :  { %10247 = vmatmul.mubr.msk.bf16.vlgmr.msra.gmra.mxu0 %vm925_vm8, %v6784_v49  ;;  %v10792_v49 = vld [vmem:[#allocation6 + $0xa0] sm:$0xff]  }
0x2869   :  { %10257 = vmatpush3.bf16.msra.mxu0 %v6941_v28  ;;  %10258 = vmatprep.mubr.msk.bf16.mxu0 %vm11135_vm0, %v11134_v1 }
0x286a   :  { %10268 = vmatprep.subr.bf16.mxu0 %v11134_v1 }
0x286c   :  { %v10996_v44 = vpop.eup %10995 }
0x286d   :  { %v6775_v22 = vmul.f32 %v10996_v44, %v12539_v60 }
0x286f   :  { %v6783_v23 = vpack.c.bf16 %v6775_v22, %v6775_v22 }
0x2871   :  { %10241 = vmatmul.mubr.msk.bf16.vlgmr.msra.gmra.mxu1 %vm925_vm8, %v6783_v23 }
0x2872   :  { %10251 = vmatpush3.bf16.msra.mxu1 %v6895_v16  ;;  %10252 = vmatprep.mubr.msk.bf16.mxu1 %vm11135_vm0, %v11134_v1 }
0x2873   :  { %10262 = vmatprep.subr.bf16.mxu1 %v11134_v1 }
0x28b6   :  { %v6751_v55 = vpop.xlane.xlu1 %6750 }
0x28b7   :  { %10997 = vrcp.f32 %v6751_v55 }
0x28ba   :  { %v6754_v18 = vpop.xlane.xlu0 %6753 }
0x28bb   :  { %10999 = vrcp.f32 %v6754_v18  ;;  %v10793_v18 = vld [vmem:[%s13001_s6 + $0xf8] sm:$0xff]  }
0x28be   :  { %v6757_v50 = vpop.xlane.xlu1 %6756 }
0x28bf   :  { %11001 = vrcp.f32 %v6757_v50 }
0x28c2   :  { %v6760_v40 = vpop.xlane.xlu0 %6759 }
0x28c3   :  { %11003 = vrcp.f32 %v6760_v40 }
0x28c4   :  { %v10998_v60 = vpop.eup %10997 }
0x28c5   :  { %v6777_v32 = vmul.f32 %v10998_v60, %v10982_v9 }
0x28c6   :  { %v6763_v10 = vpop.xlane.xlu1 %6762 }
0x28c7   :  { %v6785_v29 = vpack.c.bf16 %v6777_v32, %v6777_v32  ;;  %11005 = vrcp.f32 %v6763_v10 }
0x28c8   :  { %v11000_v5 = vpop.eup %10999 }
0x28c9   :  { %v6778_v39 = vmul.f32 %v11000_v5, %v10984_v47  ;;  %10253 = vmatmul.mubr.msk.bf16.vlgmr.msra.gmra.mxu1 %vm925_vm8, %v6785_v29  ;;  %v10794_v5 = vld [vmem:[%s13001_s6 + $0xf0] sm:$0xff]  }
0x28ca   :  { %v6766_v43 = vpop.xlane.xlu0 %6765  ;;  %10264 = vmatprep.mubr.msk.bf16.mxu1 %vm11135_vm0, %v11134_v1  ;;  %v10624_v24 = vpop.permute.xlu1 %10623 }
0x28cb   :  { %v6786_v0 = vpack.c.bf16 %v6778_v39, %v6778_v39  ;;  %11007 = vrcp.f32 %v6766_v43  ;;  %v10626_v51 = vunpack.i.h.bf16 %v10624_v24  ;;  %v10625_v19 = vunpack.i.l.bf16 %v10624_v24  ;;  %v10795_v43 = vld [vmem:[%s13001_s6 + $0xe8] sm:$0xff]  }
0x28cc   :  { %v11002_v8 = vpop.eup %11001 }
0x28cd   :  { %10259 = vmatmul.mubr.msk.bf16.vlgmr.msra.gmra.mxu0 %vm925_vm8, %v6786_v0  ;;  %v6779_v26 = vmul.f32 %v11002_v8, %v12545_v25  ;;  %v6798_v27 = vpack.c.bf16 %v10626_v51, %v10626_v51  ;;  %v6797_v35 = vpack.c.bf16 %v10625_v19, %v10625_v19  ;;  %v10796_v51 = vld [vmem:[%s13001_s6 + $0xe0] sm:$0xff]  }
0x28ce   :  { %v10619_v42 = vpop.permute.xlu0 %10618  ;;  %10270 = vmatprep.mubr.msk.bf16.mxu0 %vm11135_vm0, %v11134_v1 }
0x28cf   :  { %v10621_v7 = vunpack.i.h.bf16 %v10619_v42  ;;  %v10620_v9 = vunpack.i.l.bf16 %v10619_v42  ;;  %v6787_v59 = vpack.c.bf16 %v6779_v26, %v6779_v26  ;;  %v7079_v25 = vsel %vm1033_vm6, %v6797_v35, 0 }
0x28d0   :  { %v11004_v31 = vpop.eup %11003 }
0x28d1   :  { %v6780_v33 = vmul.f32 %v11004_v31, %v12549_v11  ;;  %v6796_v54 = vpack.c.bf16 %v10621_v7, %v10621_v7  ;;  %v6795_v47 = vpack.c.bf16 %v10620_v9, %v10620_v9  ;;  %v7125_v11 = vsel %vm1033_vm6, %v6798_v27, 0 }
0x28d3   :  { %v6987_v20 = vsel %vm1033_vm6, %v6795_v47, 0  ;;  %v7033_v30 = vsel %vm1033_vm6, %v6796_v54, 0  ;;  %v6788_v2 = vpack.c.bf16 %v6780_v33, %v6780_v33 }
0x28d4   :  { %10263 = vmatpush3.bf16.msra.mxu1 %v6987_v20  ;;  %10269 = vmatpush3.bf16.msra.mxu0 %v7033_v30  ;;  %v11006_v41 = vpop.eup %11005 }
0x28d5   :  { %10274 = vmatprep.subr.bf16.mxu1 %v11134_v1  ;;  %10280 = vmatprep.subr.bf16.mxu0 %v11134_v1  ;;  %v6781_v34 = vmul.f32 %v11006_v41, %v12553_v36  ;;  %v10790_v36 = vld [vmem:[#allocation6 + $0xb0] sm:$0xff]  }
0x28d7   :  { %10265 = vmatmul.mubr.msk.bf16.vlgmr.msra.gmra.mxu1 %vm925_vm8, %v6787_v59  ;;  %10271 = vmatmul.mubr.msk.bf16.vlgmr.msra.gmra.mxu0 %vm925_vm8, %v6788_v2  ;;  %v6789_v12 = vpack.c.bf16 %v6781_v34, %v6781_v34 }
0x28d8   :  { %v11008_v46 = vpop.eup %11007  ;;  %10275 = vmatpush3.bf16.msra.mxu1 %v7079_v25  ;;  %10281 = vmatpush3.bf16.msra.mxu0 %v7125_v11  ;;  %v7322_v25 = vrot.slane %v12434_v13, %v11294_v57 }
0x28d9   :  { %v6782_v38 = vmul.f32 %v11008_v46, %v12557_v17  ;;  %10276 = vmatprep.mubr.msk.bf16.mxu1 %vm11135_vm0, %v11134_v1  ;;  %10282 = vmatprep.mubr.msk.bf16.mxu0 %vm11135_vm0, %v11134_v1  ;;  %v10791_v17 = vld [vmem:[#allocation6 + $0xa8] sm:$0xff]  }
0x28da   :  { %10298 = vmatprep.subr.bf16.mxu0 %v11134_v1  ;;  %10286 = vmatprep.subr.bf16.mxu1 %v11134_v1 }
0x28db   :  { %v6790_v56 = vpack.c.bf16 %v6782_v38, %v6782_v38 }
0x28df   :  { %10277 = vmatmul.mubr.msk.bf16.vlgmr.msra.gmra.mxu1 %vm925_vm8, %v6789_v12  ;;  %10283 = vmatmul.mubr.msk.bf16.vlgmr.msra.gmra.mxu0 %vm925_vm8, %v6790_v56 }
0x28e0   :  { %10299 = vmatpush3.bf16.msra.mxu0 %v10789_v45  ;;  %10306 = vmatprep.mubr.msk.bf16.mxu0 %vm11135_vm0, %v11134_v1 }
0x28e1   :  { %10300 = vmatprep.subr.bf16.mxu0 %v11134_v1  ;;  %10294 = vmatprep.mubr.msk.bf16.mxu1 %vm11135_vm0, %v11134_v1 }
0x28e2   :  { %10287 = vmatpush3.bf16.msra.mxu1 %v10793_v18 }
0x28e3   :  { %10288 = vmatprep.subr.bf16.mxu1 %v11134_v1 }
0x28e4   :  { %10301 = vmatpush3.bf16.msra.mxu0 %v10790_v36 }
0x28e5   :  { %10302 = vmatprep.subr.bf16.mxu0 %v11134_v1 }
0x28e6   :  { %10289 = vmatpush3.bf16.msra.mxu1 %v10794_v5 }
0x28e7   :  { %10290 = vmatprep.subr.bf16.mxu1 %v11134_v1 }
0x28e8   :  { %10303 = vmatpush3.bf16.msra.mxu0 %v10791_v17 }
0x28e9   :  { %10304 = vmatprep.subr.bf16.mxu0 %v11134_v1 }
0x28ea   :  { %10291 = vmatpush3.bf16.msra.mxu1 %v10795_v43 }
0x28eb   :  { %10292 = vmatprep.subr.bf16.mxu1 %v11134_v1 }
0x28ec   :  { %10305 = vmatpush3.bf16.msra.mxu0 %v10792_v49 }
0x28ed   :  { %10322 = vmatprep.subr.bf16.mxu0 %v11134_v1 }
0x28ee   :  { %10293 = vmatpush3.bf16.msra.mxu1 %v10796_v51 }
0x28ef   :  { %10307 = vmatmul.mubr.msk.bf16.vlgmr.msra.gmra.mxu0 %vm232_vm1, %v12130_v53  ;;  %10310 = vmatprep.subr.bf16.mxu1 %v11134_v1 }
0x28f0   :  { %10324 = vmatprep.mubr.msk.bf16.mxu0 %vm11135_vm0, %v11134_v1 }
0x2928   :  { %v12614_v28 = vpop.f32.mrf.mxu0 }
0x292a   :  { %v10248_v48 = vpop.f32.mrf.mxu0 }
0x292c   :  { %v6888_v44 = vpop.f32.mrf.mxu0 }
0x292e   :  { %v10249_v6 = vpop.f32.mrf.mxu0 }
0x2931   :  { %v12616_v22 = vpop.f32.mrf.mxu1 }
0x2933   :  { %v10242_v23 = vpop.f32.mrf.mxu1 }
0x2935   :  { %v6842_v16 = vpop.f32.mrf.mxu1 }
0x2937   :  { %v10243_v55 = vpop.f32.mrf.mxu1 }
0x2989   :  { %v6931_v53 = vpop.f32.mrf.mxu1 }
0x298b   :  { %v10254_v50 = vpop.f32.mrf.mxu1 }
0x298d   :  { %v6934_v40 = vpop.f32.mrf.mxu1  ;;  %v6977_v60 = vpop.f32.mrf.mxu0 }
0x298e   :  { %v10627_v32 = vpack.i.bf16 %v6977_v60, %v6931_v53 }
0x298f   :  { %v10255_v10 = vpop.f32.mrf.mxu1  ;;  %v10260_v29 = vpop.f32.mrf.mxu0 }
0x2990   :  { %10628 = vrot.lane.b32.xlu1 %v10627_v32, %s11130_s20 }
0x2991   :  { %v6980_v39 = vpop.f32.mrf.mxu0 }
0x2993   :  { %v10261_v0 = vpop.f32.mrf.mxu0 }
0x2997   :  { %v7023_v24 = vpop.f32.mrf.mxu1  ;;  %v7069_v8 = vpop.f32.mrf.mxu0 }
0x2998   :  { %v10632_v42 = vpack.i.bf16 %v7069_v8, %v7023_v24 }
0x2999   :  { %v10266_v19 = vpop.f32.mrf.mxu1  ;;  %v10272_v7 = vpop.f32.mrf.mxu0 }
0x299a   :  { %10633 = vrot.lane.b32.xlu0 %v10632_v42, %s11141_s14 }
0x299b   :  { %v7026_v9 = vpop.f32.mrf.mxu1  ;;  %v7072_v31 = vpop.f32.mrf.mxu0 }
0x299d   :  { %v10267_v26 = vpop.f32.mrf.mxu1  ;;  %v10273_v33 = vpop.f32.mrf.mxu0 }
0x299f   :  { %v7115_v54 = vpop.f32.mrf.mxu1  ;;  %v7161_v47 = vpop.f32.mrf.mxu0 }
0x29a0   :  { %v10637_v27 = vpack.i.bf16 %v7161_v47, %v7115_v54 }
0x29a1   :  { %v10278_v35 = vpop.f32.mrf.mxu1  ;;  %v10284_v20 = vpop.f32.mrf.mxu0 }
0x29a2   :  { %10638 = vrot.lane.b32.xlu1 %v10637_v27, %s11142_s15 }
0x29a3   :  { %v7118_v30 = vpop.f32.mrf.mxu1  ;;  %v7164_v59 = vpop.f32.mrf.mxu0 }
0x29a4   :  { %v10798_v30 = vld [vmem:[%s13001_s6 + $0x130] sm:$0xff]   ;;  %v10799_v59 = vld [vmem:[%s13001_s6 + $0x128] sm:$0xff]  }
0x29a5   :  { %v10279_v2 = vpop.f32.mrf.mxu1  ;;  %v10285_v41 = vpop.f32.mrf.mxu0 }
0x29a6   :  { %v10800_v2 = vld [vmem:[%s13001_s6 + $0x120] sm:$0xff]  }
0x29af   :  { %v7381_v11 = vpop.f32.mrf.mxu0 }
0x29b0   :  { %v7382_v46 = vadd.f32 %v7381_v11, %v7322_v25 }
0x29b1   :  { %v10308_v34 = vpop.f32.mrf.mxu0 }
0x29b2   :  { %v12639_v38 = vpack.c.bf16 %v7382_v46, %v7382_v46 }
0x29b3   :  { %v7384_v45 = vpop.f32.mrf.mxu0 }
0x29b4   :  { %v12641_v12 = vadd.f32 %v7384_v45, %v7322_v25  ;;  %v7538_v56 = vsel %vm517_vm5, %v12639_v38, 0 }
0x29b5   :  { %v10309_v36 = vpop.f32.mrf.mxu0  ;;  %10323 = vmatpush3.bf16.xpose.msra.mxu0 %v7538_v56  ;;  %v12686_v56 = vld [vmem:[#allocation2 + $0x50] sm:$0x3f] }
0x29b6   :  { %v12646_v17 = vpack.i.bf16 %v12641_v12, %v7382_v46  ;;  %10328 = vmatprep.subr.bf16.mxu0 %v11134_v1 }
0x2a02   :  { %v10629_v49 = vpop.permute.xlu1 %10628 }
0x2a03   :  { %v10631_v44 = vunpack.i.h.bf16 %v10629_v49  ;;  %v10630_v6 = vunpack.i.l.bf16 %v10629_v49  ;;  %v7301_v49 = vrot.slane %v12686_v56, %v11211_v3 }
0x2a05   :  { %v7192_v18 = vsel %vm517_vm5, %v12614_v28, %v10631_v44  ;;  %v7191_v53 = vsel %vm517_vm5, %v12616_v22, %v10630_v6  ;;  %v7201_v28 = vrot.slane %v12434_v13, %v11574_v58 }
0x2a0c   :  { %v10634_v48 = vpop.permute.xlu0 %10633 }
0x2a0d   :  { %v10636_v23 = vunpack.i.h.bf16 %v10634_v48  ;;  %v10635_v16 = vunpack.i.l.bf16 %v10634_v48 }
0x2a0f   :  { %v7194_v60 = vsel %vm111_vm2, %v7192_v18, %v10636_v23  ;;  %v7193_v32 = vsel %vm111_vm2, %v7191_v53, %v10635_v16  ;;  %v7307_v18 = vrot.slane %v12686_v56, %v11214_v4  ;;  %v7421_v4 = vrot.slane %v12434_v13, %v11579_v52 }
0x2a14   :  { %v10639_v55 = vpop.permute.xlu1 %10638 }
0x2a15   :  { %v10641_v50 = vunpack.i.h.bf16 %v10639_v55  ;;  %v10640_v40 = vunpack.i.l.bf16 %v10639_v55 }
0x2a17   :  { %v7196_v10 = vsel %vm1427_vm9, %v7194_v60, %v10641_v50  ;;  %v7195_v29 = vsel %vm1427_vm9, %v7193_v32, %v10640_v40 }
0x2a18   :  { %v7197_v5 = vpack.c.bf16 %v7196_v10, %v7195_v29 }
0x2a1a   :  { %10295 = vmatmul.mubr.msk.bf16.vlgmr.msra.gmra.mxu1 %vm232_vm1, %v7197_v5 }
0x2a1b   :  { %10318 = vmatprep.mubr.msk.bf16.mxu1 %vm11135_vm0, %v11134_v1 }
0x2ada   :  { %v7263_v22 = vpop.f32.mrf.mxu1 }
0x2adb   :  { %v7264_v39 = vadd.f32 %v7263_v22, %v7201_v28  ;;  %v7527_v22 = vpack.c.bf16 %v12641_v12, %v12641_v12 }
0x2adc   :  { %v10296_v43 = vpop.f32.mrf.mxu1 }
0x2add   :  { %v7270_v0 = vadd.f32 %v7264_v39, %v12438_v61  ;;  %v7584_v13 = vsel %vm517_vm5, %v7527_v22, 0 }
0x2ade   :  { %v7266_v24 = vpop.f32.mrf.mxu1 }
0x2adf   :  { %v7267_v8 = vadd.f32 %v7266_v24, %v7201_v28  ;;  %v7272_v42 = vsel %vm232_vm1, %v7270_v0, 0.0 }
0x2ae0   :  { %7273 = vadd.xlane.f32.xlu0 %v7272_v42  ;;  %v10297_v51 = vpop.f32.mrf.mxu1 }
0x2ae1   :  { %v7271_v19 = vadd.f32 %v7267_v8, %v12440_v37  ;;  %v10797_v37 = vld [vmem:[%s13001_s6 + $0x138] sm:$0xff]  }
0x2ae2   :  { %10311 = vmatpush3.bf16.msra.mxu1 %v10797_v37 }
0x2ae3   :  { %v7275_v7 = vsel %vm232_vm1, %v7271_v19, 0.0  ;;  %10312 = vmatprep.subr.bf16.mxu1 %v11134_v1 }
0x2ae4   :  { %7276 = vadd.xlane.f32.xlu1 %v7275_v7 }
0x2ae6   :  { %10313 = vmatpush3.bf16.msra.mxu1 %v10798_v30 }
0x2ae7   :  { %10314 = vmatprep.subr.bf16.mxu1 %v11134_v1 }
0x2aea   :  { %10315 = vmatpush3.bf16.msra.mxu1 %v10799_v59 }
0x2aeb   :  { %10316 = vmatprep.subr.bf16.mxu1 %v11134_v1 }
0x2aee   :  { %10317 = vmatpush3.bf16.msra.mxu1 %v10800_v2 }
0x2aef   :  { %10334 = vmatprep.subr.bf16.mxu1 %v11134_v1 }
0x2af5   :  { %10643 = vrot.lane.b32.xlu1 %v12646_v17, %s11139_s28 }
0x2b69   :  { %v7274_v9 = vpop.xlane.xlu0 %7273 }
0x2b6a   :  { %v7278_v31 = vmul.f32 0.015625, %v7274_v9 }
0x2b6c   :  { %v7280_v26 = vsub.f32 %v7270_v0, %v7278_v31 }
0x2b6d   :  { %v7277_v33 = vpop.xlane.xlu1 %7276 }
0x2b6e   :  { %v7279_v54 = vmul.f32 0.015625, %v7277_v33  ;;  %v7282_v61 = vmul.f32 %v7280_v26, %v7280_v26 }
0x2b70   :  { %v7281_v47 = vsub.f32 %v7271_v19, %v7279_v54  ;;  %v7284_v27 = vsel %vm232_vm1, %v7282_v61, 0.0 }
0x2b71   :  { %7285 = vadd.xlane.f32.xlu0 %v7284_v27  ;;  %v10644_v44 = vpop.permute.xlu1 %10643 }
0x2b72   :  { %v7283_v35 = vmul.f32 %v7281_v47, %v7281_v47  ;;  %v10645_v23 = vunpack.i.l.bf16 %v10644_v44  ;;  %v10646_v8 = vunpack.i.h.bf16 %v10644_v44 }
0x2b74   :  { %v7287_v20 = vsel %vm232_vm1, %v7283_v35, 0.0  ;;  %v12692_v50 = vpack.c.bf16 %v10645_v23, %v10645_v23  ;;  %v12718_v12 = vpack.c.bf16 %v10646_v8, %v10646_v8 }
0x2b75   :  { %7288 = vadd.xlane.f32.xlu0 %v7287_v20 }
0x2b76   :  { %v7630_v3 = vsel %vm517_vm5, %v12692_v50, 0  ;;  %v7676_v19 = vsel %vm517_vm5, %v12718_v12, 0 }
0x2bfa   :  { %v7286_v41 = vpop.xlane.xlu0 %7285 }
0x2bfb   :  { %v7290_v25 = vmul.f32 0.015625, %v7286_v41 }
0x2bfd   :  { %v7292_v11 = vadd.f32 1e-05, %v7290_v25 }
0x2bfe   :  { %v7289_v46 = vpop.xlane.xlu0 %7288 }
0x2bff   :  { %11009 = vrsqrt.f32 %v7292_v11  ;;  %v7291_v34 = vmul.f32 0.015625, %v7289_v46 }
0x2c01   :  { %v7293_v45 = vadd.f32 1e-05, %v7291_v34 }
0x2c03   :  { %11011 = vrsqrt.f32 %v7293_v45 }
0x2c0c   :  { %v11010_v36 = vpop.eup %11009 }
0x2c0d   :  { %v7296_v48 = vmul.f32 %v11010_v36, %v7280_v26 }
0x2c0f   :  { %v7302_v16 = vmul.f32 %v7301_v49, %v7296_v48 }
0x2c10   :  { %v11012_v6 = vpop.eup %11011 }
0x2c11   :  { %v7297_v55 = vmul.f32 %v11012_v6, %v7281_v47  ;;  %v12694_v40 = vadd.f32 %v7307_v18, %v7302_v16 }
0x2c13   :  { %v7303_v53 = vmul.f32 %v7301_v49, %v7297_v55 }
0x2c15   :  { %v12696_v60 = vadd.f32 %v7307_v18, %v7303_v53 }
0x2c17   :  { %v7417_v32 = vpack.c.bf16 %v12696_v60, %v12694_v40 }
0x2c19   :  { %10319 = vmatmul.mubr.msk.bf16.vlgmr.msra.gmra.mxu1 %vm232_vm1, %v7417_v32 }
0x2c1a   :  { %10335 = vmatpush3.bf16.xpose.msra.mxu1 %v7630_v3  ;;  %10336 = vmatprep.mubr.msk.bf16.mxu1 %vm11135_vm0, %v11134_v1 }
0x2c1b   :  { %10346 = vmatprep.subr.bf16.mxu1 %v11134_v1 }
0x2cd9   :  { %v7483_v10 = vpop.f32.mrf.mxu1 }
0x2cda   :  { %v7484_v29 = vadd.f32 %v7483_v10, %v7421_v4 }
0x2cdb   :  { %v10320_v5 = vpop.f32.mrf.mxu1 }
0x2cdc   :  { %v7510_v28 = vmul.f32 0.25, %v7484_v29  ;;  %7492 = vrot.lane.b32.xlu0 %v7484_v29, %s11139_s28 }
0x2cdd   :  { %v7486_v39 = vpop.f32.mrf.mxu1 }
0x2cde   :  { %v7518_v43 = vpack.c.bf16 %v7510_v28, %v7510_v28  ;;  %v7487_v0 = vadd.f32 %v7486_v39, %v7421_v4 }
0x2cdf   :  { %v10321_v24 = vpop.f32.mrf.mxu1 }
0x2ce0   :  { %7498 = vrot.lane.b32.xlu0 %v7484_v29, %s11138_s27  ;;  %10325 = vmatmul.mubr.msk.bf16.vlgmr.msra.gmra.mxu0 %vm517_vm5, %v7518_v43  ;;  %v7511_v42 = vmul.f32 0.25, %v7487_v0 }
0x2ce1   :  { %7494 = vrot.lane.b32.xlu1 %v7487_v0, %s11139_s28  ;;  %10329 = vmatpush3.bf16.xpose.msra.mxu0 %v7584_v13 }
0x2ce2   :  { %10330 = vmatprep.mubr.msk.bf16.mxu0 %vm11135_vm0, %v11134_v1  ;;  %10340 = vmatprep.subr.bf16.mxu0 %v11134_v1  ;;  %v7519_v51 = vpack.c.bf16 %v7511_v42, %v7511_v42 }
0x2ce4   :  { %10653 = vrot.lane.b32.xlu0 %v12646_v17, %s11140_s4 }
0x2ce5   :  { %10648 = vrot.lane.b32.xlu1 %v12646_v17, %s11138_s27 }
0x2ce8   :  { %7506 = vrot.lane.b32.xlu0 %v7487_v0, %s11140_s4  ;;  %10331 = vmatmul.mubr.msk.bf16.vlgmr.msra.gmra.mxu0 %vm517_vm5, %v7519_v51 }
0x2ce9   :  { %7500 = vrot.lane.b32.xlu1 %v7487_v0, %s11138_s27  ;;  %10341 = vmatpush3.bf16.xpose.msra.mxu0 %v7676_v19 }
0x2cea   :  { %10342 = vmatprep.mubr.msk.bf16.mxu0 %vm11135_vm0, %v11134_v1  ;;  %10352 = vmatprep.subr.bf16.mxu0 %v11134_v1 }
0x2cec   :  { %8007 = vrot.lane.b32.xlu0 %v12639_v38, %s11132_s25 }
0x2ced   :  { %7504 = vrot.lane.b32.xlu1 %v7484_v29, %s11140_s4 }
0x2cf1   :  { %8056 = vrot.lane.b32.xlu1 %v7527_v22, %s11132_s25 }
0x2d4e   :  { %v7493_v17 = vpop.permute.xlu0 %7492 }
0x2d4f   :  { %v7512_v7 = vmul.f32 0.25, %v7493_v17 }
0x2d51   :  { %v7520_v9 = vpack.c.bf16 %v7512_v7, %v7512_v7 }
0x2d52   :  { %v7499_v31 = vpop.permute.xlu0 %7498 }
0x2d53   :  { %v7495_v26 = vpop.permute.xlu1 %7494  ;;  %10337 = vmatmul.mubr.msk.bf16.vlgmr.msra.gmra.mxu1 %vm517_vm5, %v7520_v9  ;;  %v7514_v25 = vmul.f32 0.25, %v7499_v31 }
0x2d54   :  { %v7513_v33 = vmul.f32 0.25, %v7495_v26  ;;  %10348 = vmatprep.mubr.msk.bf16.mxu1 %vm11135_vm0, %v11134_v1 }
0x2d55   :  { %v7522_v45 = vpack.c.bf16 %v7514_v25, %v7514_v25 }
0x2d56   :  { %v7521_v54 = vpack.c.bf16 %v7513_v33, %v7513_v33  ;;  %v10654_v38 = vpop.permute.xlu0 %10653 }
0x2d57   :  { %v10649_v61 = vpop.permute.xlu1 %10648  ;;  %v10656_v30 = vunpack.i.h.bf16 %v10654_v38  ;;  %v10655_v59 = vunpack.i.l.bf16 %v10654_v38 }
0x2d58   :  { %v10651_v47 = vunpack.i.h.bf16 %v10649_v61  ;;  %v10650_v27 = vunpack.i.l.bf16 %v10649_v61  ;;  %10343 = vmatmul.mubr.msk.bf16.vlgmr.msra.gmra.mxu0 %vm517_vm5, %v7521_v54 }
0x2d59   :  { %10354 = vmatprep.mubr.msk.bf16.mxu0 %vm11135_vm0, %v11134_v1  ;;  %v12752_v46 = vpack.c.bf16 %v10656_v30, %v10656_v30  ;;  %v12754_v34 = vpack.c.bf16 %v10655_v59, %v10655_v59 }
0x2d5a   :  { %v12742_v35 = vpack.c.bf16 %v10651_v47, %v10651_v47  ;;  %v12744_v20 = vpack.c.bf16 %v10650_v27, %v10650_v27  ;;  %v7507_v49 = vpop.permute.xlu0 %7506 }
0x2d5b   :  { %v7501_v37 = vpop.permute.xlu1 %7500  ;;  %v7814_v44 = vsel %vm517_vm5, %v12754_v34, 0  ;;  %v7860_v6 = vsel %vm517_vm5, %v12752_v46, 0  ;;  %v7517_v23 = vmul.f32 0.25, %v7507_v49 }
0x2d5c   :  { %v7722_v2 = vsel %vm517_vm5, %v12744_v20, 0  ;;  %v7768_v41 = vsel %vm517_vm5, %v12742_v35, 0  ;;  %v7515_v11 = vmul.f32 0.25, %v7501_v37 }
0x2d5d   :  { %10347 = vmatpush3.bf16.xpose.msra.mxu1 %v7722_v2  ;;  %10353 = vmatpush3.bf16.xpose.msra.mxu0 %v7768_v41  ;;  %v7525_v53 = vpack.c.bf16 %v7517_v23, %v7517_v23 }
0x2d5e   :  { %10358 = vmatprep.subr.bf16.mxu1 %v11134_v1  ;;  %10364 = vmatprep.subr.bf16.mxu0 %v11134_v1  ;;  %v7523_v36 = vpack.c.bf16 %v7515_v11, %v7515_v11  ;;  %v8008_v55 = vpop.permute.xlu0 %8007 }
0x2d5f   :  { %v7505_v48 = vpop.permute.xlu1 %7504  ;;  %v8013_v3 = vsel %vm1033_vm6, %v8008_v55, 0 }
0x2d60   :  { %v7516_v16 = vmul.f32 0.25, %v7505_v48 }
0x2d62   :  { %v7524_v32 = vpack.c.bf16 %v7516_v16, %v7516_v16 }
0x2d63   :  { %v8057_v18 = vpop.permute.xlu1 %8056 }
0x2d64   :  { %10349 = vmatmul.mubr.msk.bf16.vlgmr.msra.gmra.mxu1 %vm517_vm5, %v7522_v45  ;;  %10355 = vmatmul.mubr.msk.bf16.vlgmr.msra.gmra.mxu0 %vm517_vm5, %v7523_v36  ;;  %v8062_v4 = vsel %vm1033_vm6, %v8057_v18, 0 }
0x2d65   :  { %10359 = vmatpush3.bf16.xpose.msra.mxu1 %v7814_v44  ;;  %10365 = vmatpush3.bf16.xpose.msra.mxu0 %v7860_v6 }
0x2d66   :  { %10360 = vmatprep.mubr.msk.bf16.mxu1 %vm11135_vm0, %v11134_v1  ;;  %10366 = vmatprep.mubr.msk.bf16.mxu0 %vm11135_vm0, %v11134_v1 }
0x2d67   :  { %10370 = vmatprep.subr.bf16.mxu1 %v11134_v1  ;;  %10376 = vmatprep.subr.bf16.mxu0 %v11134_v1 }
0x2d6c   :  { %10361 = vmatmul.mubr.msk.bf16.vlgmr.msra.gmra.mxu1 %vm517_vm5, %v7524_v32  ;;  %10367 = vmatmul.mubr.msk.bf16.vlgmr.msra.gmra.mxu0 %vm517_vm5, %v7525_v53 }
0x2d6d   :  { %10371 = vmatpush3.bf16.msra.mxu1 %v8013_v3  ;;  %10377 = vmatpush3.bf16.msra.mxu0 %v8062_v4 }
0x2d6e   :  { %10372 = vmatprep.mubr.msk.bf16.mxu1 %vm11135_vm0, %v11134_v1  ;;  %10378 = vmatprep.mubr.msk.bf16.mxu0 %vm11135_vm0, %v11134_v1 }
0x2d6f   :  { %10382 = vmatprep.subr.bf16.mxu1 %v11134_v1  ;;  %10388 = vmatprep.subr.bf16.mxu0 %v11134_v1 }
0x2da0   :  { %v7574_v10 = vpop.f32.mrf.mxu0 }
0x2da1   :  { %v7902_v29 = vadd.f32 %v7574_v10, %v11379_v14 }
0x2da2   :  { %v10326_v5 = vpop.f32.mrf.mxu0 }
0x2da3   :  { %v7910_v28 = vsel %vm925_vm8, %v7902_v29, -inf }
0x2da4   :  { %7911 = vmax.xlane.f32.xlu1 %v7910_v28  ;;  %v7577_v22 = vpop.f32.mrf.mxu0 }
0x2da6   :  { %v10327_v39 = vpop.f32.mrf.mxu0 }
0x2da8   :  { %v7620_v43 = vpop.f32.mrf.mxu0 }
0x2da9   :  { %v7903_v0 = vadd.f32 %v7620_v43, %v11388_v21 }
0x2daa   :  { %v10332_v24 = vpop.f32.mrf.mxu0 }
0x2dab   :  { %v7913_v8 = vsel %vm925_vm8, %v7903_v0, -inf }
0x2dac   :  { %7914 = vmax.xlane.f32.xlu0 %v7913_v8  ;;  %v7623_v13 = vpop.f32.mrf.mxu0 }
0x2dae   :  { %v10333_v42 = vpop.f32.mrf.mxu0 }
0x2e13   :  { %v7666_v51 = vpop.f32.mrf.mxu1 }
0x2e14   :  { %v7904_v19 = vadd.f32 %v7666_v51, %v11379_v14 }
0x2e15   :  { %v10338_v17 = vpop.f32.mrf.mxu1 }
0x2e16   :  { %v7916_v7 = vsel %vm925_vm8, %v7904_v19, -inf }
0x2e17   :  { %v7669_v9 = vpop.f32.mrf.mxu1  ;;  %7917 = vmax.xlane.f32.xlu0 %v7916_v7 }
0x2e18   :  { %v7712_v31 = vpop.f32.mrf.mxu0 }
0x2e19   :  { %v7905_v26 = vadd.f32 %v7712_v31, %v11388_v21  ;;  %v10339_v33 = vpop.f32.mrf.mxu1 }
0x2e1a   :  { %v10344_v54 = vpop.f32.mrf.mxu0 }
0x2e1b   :  { %v7919_v61 = vsel %vm925_vm8, %v7905_v26, -inf }
0x2e1c   :  { %7920 = vmax.xlane.f32.xlu1 %v7919_v61  ;;  %v7715_v47 = vpop.f32.mrf.mxu0 }
0x2e1e   :  { %v10345_v27 = vpop.f32.mrf.mxu0 }
0x2e24   :  { %v7758_v38 = vpop.f32.mrf.mxu1  ;;  %v7804_v37 = vpop.f32.mrf.mxu0 }
0x2e25   :  { %v12787_v30 = vadd.f32 %v7758_v38, %v11379_v14  ;;  %v7907_v59 = vadd.f32 %v7804_v37, %v11388_v21 }
0x2e26   :  { %v10350_v2 = vpop.f32.mrf.mxu1  ;;  %v10356_v41 = vpop.f32.mrf.mxu0 }
0x2e27   :  { %v7922_v25 = vsel %vm925_vm8, %v12787_v30, -inf  ;;  %v7925_v11 = vsel %vm925_vm8, %v7907_v59, -inf }
0x2e28   :  { %v7761_v45 = vpop.f32.mrf.mxu1  ;;  %7923 = vmax.xlane.f32.xlu0 %v7922_v25  ;;  %7926 = vmax.xlane.f32.xlu1 %v7925_v11  ;;  %v7807_v36 = vpop.f32.mrf.mxu0 }
0x2e2a   :  { %v10351_v49 = vpop.f32.mrf.mxu1  ;;  %v10357_v48 = vpop.f32.mrf.mxu0 }
0x2e2c   :  { %v7850_v44 = vpop.f32.mrf.mxu1  ;;  %v7896_v6 = vpop.f32.mrf.mxu0 }
0x2e2d   :  { %v12794_v23 = vadd.f32 %v7850_v44, %v11379_v14  ;;  %v7909_v16 = vadd.f32 %v7896_v6, %v11388_v21  ;;  %v7912_v14 = vpop.xlane.xlu1 %7911 }
0x2e2e   :  { %v10362_v55 = vpop.f32.mrf.mxu1  ;;  %v10368_v18 = vpop.f32.mrf.mxu0  ;;  %v7934_v28 = vsub.f32 %v7902_v29, %v7912_v14 }
0x2e2f   :  { %v7928_v53 = vsel %vm925_vm8, %v12794_v23, -inf  ;;  %v7931_v32 = vsel %vm925_vm8, %v7909_v16, -inf }
0x2e30   :  { %v7853_v3 = vpop.f32.mrf.mxu1  ;;  %7929 = vmax.xlane.f32.xlu0 %v7928_v53  ;;  %7932 = vmax.xlane.f32.xlu1 %v7931_v32  ;;  %v7899_v4 = vpop.f32.mrf.mxu0  ;;  %v7942_v39 = vmul.f32 1.442695, %v7934_v28 }
0x2e32   :  { %v10363_v10 = vpop.f32.mrf.mxu1  ;;  %v10369_v5 = vpop.f32.mrf.mxu0  ;;  %11013 = vpow2.f32 %v7942_v39 }
0x2e35   :  { %v7915_v21 = vpop.xlane.xlu0 %7914 }
0x2e36   :  { %v7935_v22 = vsub.f32 %v7903_v0, %v7915_v21 }
0x2e38   :  { %v7944_v43 = vmul.f32 1.442695, %v7935_v22 }
0x2e3a   :  { %11015 = vpow2.f32 %v7944_v43 }
0x2e3f   :  { %v11014_v24 = vpop.eup %11013 }
0x2e40   :  { %v7958_v13 = vsel %vm925_vm8, %v11014_v24, 0.0 }
0x2e41   :  { %8105 = vrot.lane.b32.xlu1 %v12692_v50, %s11132_s25 }
0x2e46   :  { %8154 = vrot.lane.b32.xlu0 %v12718_v12, %s11132_s25 }
0x2e47   :  { %v11016_v8 = vpop.eup %11015 }
0x2e48   :  { %v7961_v42 = vsel %vm925_vm8, %v11016_v8, 0.0 }
0x2e65   :  { %7959 = vadd.xlane.f32.xlu0 %v7958_v13  ;;  %7962 = vadd.xlane.f32.xlu1 %v7961_v42 }
0x2e76   :  { %8203 = vrot.lane.b32.xlu1 %v12744_v20, %s11132_s25 }
0x2ea0   :  { %v7918_v50 = vpop.xlane.xlu0 %7917 }
0x2ea1   :  { %v7936_v12 = vsub.f32 %v7904_v19, %v7918_v50 }
0x2ea3   :  { %v7946_v51 = vmul.f32 1.442695, %v7936_v12 }
0x2ea5   :  { %11017 = vpow2.f32 %v7946_v51  ;;  %v7921_v29 = vpop.xlane.xlu1 %7920 }
0x2ea6   :  { %v7937_v0 = vsub.f32 %v7905_v26, %v7921_v29 }
0x2ea8   :  { %v7948_v17 = vmul.f32 1.442695, %v7937_v0 }
0x2eaa   :  { %11019 = vpow2.f32 %v7948_v17 }
0x2eb1   :  { %v7927_v7 = vpop.xlane.xlu1 %7926 }
0x2eb2   :  { %v12808_v9 = vpop.eup %11017  ;;  %v7939_v31 = vsub.f32 %v7907_v59, %v7927_v7  ;;  %v7924_v59 = vpop.xlane.xlu0 %7923 }
0x2eb3   :  { %v7964_v33 = vsel %vm925_vm8, %v12808_v9, 0.0  ;;  %v7938_v41 = vsub.f32 %v12787_v30, %v7924_v59 }
0x2eb4   :  { %v7952_v54 = vmul.f32 1.442695, %v7939_v31  ;;  %7965 = vadd.xlane.f32.xlu0 %v7964_v33 }
0x2eb5   :  { %v7950_v11 = vmul.f32 1.442695, %v7938_v41 }
0x2eb6   :  { %11021 = vpow2.f32 %v7952_v54 }
0x2eb7   :  { %v12812_v61 = vpop.eup %11019 }
0x2eb8   :  { %v7967_v20 = vsel %vm925_vm8, %v12812_v61, 0.0 }
0x2eb9   :  { %7968 = vadd.xlane.f32.xlu1 %v7967_v20  ;;  %v7933_v19 = vpop.xlane.xlu1 %7932  ;;  %v7930_v25 = vpop.xlane.xlu0 %7929 }
0x2eba   :  { %v7941_v26 = vsub.f32 %v7909_v16, %v7933_v19  ;;  %v7940_v45 = vsub.f32 %v12794_v23, %v7930_v25 }
0x2ebc   :  { %v7956_v47 = vmul.f32 1.442695, %v7941_v26  ;;  %v7954_v36 = vmul.f32 1.442695, %v7940_v45 }
0x2ebd   :  { %v8155_v44 = vpop.permute.xlu0 %8154  ;;  %v8106_v30 = vpop.permute.xlu1 %8105 }
0x2ebe   :  { %11023 = vpow2.f32 %v7956_v47  ;;  %v8111_v4 = vsel %vm1033_vm6, %v8106_v30, 0  ;;  %v8160_v10 = vsel %vm1033_vm6, %v8155_v44, 0 }
0x2ebf   :  { %11025 = vpow2.f32 %v7950_v11 }
0x2ec0   :  { %11027 = vpow2.f32 %v7954_v36 }
0x2ec3   :  { %v12816_v27 = vpop.eup %11021 }
0x2ec4   :  { %v7973_v38 = vsel %vm925_vm8, %v12816_v27, 0.0 }
0x2ec5   :  { %7974 = vadd.xlane.f32.xlu1 %v7973_v38 }
0x2eca   :  { %8252 = vrot.lane.b32.xlu0 %v12742_v35, %s11132_s25 }
0x2ecb   :  { %v12822_v37 = vpop.eup %11023 }
0x2ecc   :  { %v7979_v2 = vsel %vm925_vm8, %v12822_v37, 0.0  ;;  %v12830_v35 = vpop.eup %11025 }
0x2ecd   :  { %7980 = vadd.xlane.f32.xlu1 %v7979_v2  ;;  %v7970_v49 = vsel %vm925_vm8, %v12830_v35, 0.0  ;;  %v12834_v48 = vpop.eup %11027 }
0x2ece   :  { %v7976_v6 = vsel %vm925_vm8, %v12834_v48, 0.0 }
0x2ede   :  { %8301 = vrot.lane.b32.xlu1 %v12754_v34, %s11132_s25 }
0x2ee9   :  { %7971 = vadd.xlane.f32.xlu0 %v7970_v49 }
0x2eed   :  { %7977 = vadd.xlane.f32.xlu0 %v7976_v6 }
0x2eee   :  { %v7960_v23 = vpop.xlane.xlu0 %7959  ;;  %v7963_v16 = vpop.xlane.xlu1 %7962 }
0x2eef   :  { %11029 = vrcp.f32 %v7960_v23 }
0x2ef0   :  { %11031 = vrcp.f32 %v7963_v16 }
0x2ef2   :  { %v8204_v14 = vpop.permute.xlu1 %8203 }
0x2efc   :  { %v11030_v55 = vpop.eup %11029 }
0x2efd   :  { %v11032_v34 = vpop.eup %11031  ;;  %v7990_v18 = vmul.f32 %v11030_v55, %v11014_v24  ;;  %v8209_v24 = vsel %vm1033_vm6, %v8204_v14, 0 }
0x2efe   :  { %v7991_v53 = vmul.f32 %v11032_v34, %v11016_v8 }
0x2eff   :  { %v7998_v32 = vpack.c.bf16 %v7990_v18, %v7990_v18 }
0x2f00   :  { %v7999_v3 = vpack.c.bf16 %v7991_v53, %v7991_v53 }
0x2f01   :  { %10373 = vmatmul.mubr.msk.bf16.vlgmr.msra.gmra.mxu1 %vm925_vm8, %v7998_v32 }
0x2f02   :  { %10379 = vmatmul.mubr.msk.bf16.vlgmr.msra.gmra.mxu0 %vm925_vm8, %v7999_v3  ;;  %10383 = vmatpush3.bf16.msra.mxu1 %v8111_v4 }
0x2f03   :  { %10389 = vmatpush3.bf16.msra.mxu0 %v8160_v10  ;;  %8350 = vrot.lane.b32.xlu0 %v12752_v46, %s11132_s25 }
0x2f04   :  { %10384 = vmatprep.mubr.msk.bf16.mxu1 %vm11135_vm0, %v11134_v1  ;;  %10394 = vmatprep.subr.bf16.mxu1 %v11134_v1 }
0x2f05   :  { %10390 = vmatprep.mubr.msk.bf16.mxu0 %vm11135_vm0, %v11134_v1  ;;  %10400 = vmatprep.subr.bf16.mxu0 %v11134_v1 }
0x2f3d   :  { %v7966_v5 = vpop.xlane.xlu0 %7965 }
0x2f3e   :  { %11033 = vrcp.f32 %v7966_v5  ;;  %v10802_v5 = vld [vmem:[%s13001_s6 + $0x170] sm:$0xff]  }
0x2f41   :  { %v8253_v13 = vpop.permute.xlu0 %8252 }
0x2f42   :  { %v7969_v21 = vpop.xlane.xlu1 %7968  ;;  %v8258_v50 = vsel %vm1033_vm6, %v8253_v13, 0 }
0x2f43   :  { %11035 = vrcp.f32 %v7969_v21  ;;  %v10803_v21 = vld [vmem:[%s13001_s6 + $0x168] sm:$0xff]  }
0x2f4b   :  { %v11034_v28 = vpop.eup %11033 }
0x2f4c   :  { %v7992_v22 = vmul.f32 %v11034_v28, %v12808_v9 }
0x2f4e   :  { %v8000_v39 = vpack.c.bf16 %v7992_v22, %v7992_v22  ;;  %v7975_v46 = vpop.xlane.xlu1 %7974 }
0x2f4f   :  { %11037 = vrcp.f32 %v7975_v46 }
0x2f50   :  { %v11036_v43 = vpop.eup %11035  ;;  %10385 = vmatmul.mubr.msk.bf16.vlgmr.msra.gmra.mxu1 %vm925_vm8, %v8000_v39 }
0x2f51   :  { %v7993_v8 = vmul.f32 %v11036_v43, %v12812_v61  ;;  %10395 = vmatpush3.bf16.msra.mxu1 %v8209_v24  ;;  %10396 = vmatprep.mubr.msk.bf16.mxu1 %vm11135_vm0, %v11134_v1  ;;  %v10804_v24 = vld [vmem:[%s13001_s6 + $0x160] sm:$0xff]  }
0x2f52   :  { %10406 = vmatprep.subr.bf16.mxu1 %v11134_v1 }
0x2f53   :  { %v8001_v42 = vpack.c.bf16 %v7993_v8, %v7993_v8 }
0x2f55   :  { %10391 = vmatmul.mubr.msk.bf16.vlgmr.msra.gmra.mxu0 %vm925_vm8, %v8001_v42 }
0x2f56   :  { %10401 = vmatpush3.bf16.msra.mxu0 %v8258_v50  ;;  %10402 = vmatprep.mubr.msk.bf16.mxu0 %vm11135_vm0, %v11134_v1  ;;  %v7981_v0 = vpop.xlane.xlu1 %7980 }
0x2f57   :  { %10412 = vmatprep.subr.bf16.mxu0 %v11134_v1  ;;  %11039 = vrcp.f32 %v7981_v0 }
0x2f5a   :  { %v8302_v26 = vpop.permute.xlu1 %8301 }
0x2f5b   :  { %v8307_v38 = vsel %vm1033_vm6, %v8302_v26, 0 }
0x2f5c   :  { %v11038_v12 = vpop.eup %11037 }
0x2f5d   :  { %v7995_v51 = vmul.f32 %v11038_v12, %v12816_v27 }
0x2f5f   :  { %v8003_v29 = vpack.c.bf16 %v7995_v51, %v7995_v51 }
0x2f61   :  { %10403 = vmatmul.mubr.msk.bf16.vlgmr.msra.gmra.mxu0 %vm925_vm8, %v8003_v29 }
0x2f62   :  { %10414 = vmatprep.mubr.msk.bf16.mxu0 %vm11135_vm0, %v11134_v1 }
0x2f64   :  { %v11040_v7 = vpop.eup %11039 }
0x2f65   :  { %v7997_v31 = vmul.f32 %v11040_v7, %v12822_v37 }
0x2f67   :  { %v8005_v61 = vpack.c.bf16 %v7997_v31, %v7997_v31 }
0x2f72   :  { %v7972_v17 = vpop.xlane.xlu0 %7971 }
0x2f73   :  { %11041 = vrcp.f32 %v7972_v17 }
0x2f76   :  { %v7978_v9 = vpop.xlane.xlu0 %7977 }
0x2f77   :  { %11043 = vrcp.f32 %v7978_v9 }
0x2f7a   :  { %v8351_v33 = vpop.permute.xlu0 %8350 }
0x2f7b   :  { %v8356_v54 = vsel %vm1033_vm6, %v8351_v33, 0 }
0x2f7c   :  { %10413 = vmatpush3.bf16.msra.mxu0 %v8356_v54 }
0x2f7d   :  { %10430 = vmatprep.subr.bf16.mxu0 %v11134_v1 }
0x2f7f   :  { %10415 = vmatmul.mubr.msk.bf16.vlgmr.msra.gmra.mxu0 %vm925_vm8, %v8005_v61 }
0x2f80   :  { %v11042_v20 = vpop.eup %11041  ;;  %10438 = vmatprep.mubr.msk.bf16.mxu0 %vm11135_vm0, %v11134_v1 }
0x2f81   :  { %v7994_v19 = vmul.f32 %v11042_v20, %v12830_v35 }
0x2f83   :  { %v8002_v47 = vpack.c.bf16 %v7994_v19, %v7994_v19 }
0x2f84   :  { %v11044_v27 = vpop.eup %11043 }
0x2f85   :  { %10397 = vmatmul.mubr.msk.bf16.vlgmr.msra.gmra.mxu1 %vm925_vm8, %v8002_v47  ;;  %v7996_v37 = vmul.f32 %v11044_v27, %v12834_v48  ;;  %v10801_v48 = vld [vmem:[%s13001_s6 + $0x178] sm:$0xff]  }
0x2f86   :  { %10407 = vmatpush3.bf16.msra.mxu1 %v8307_v38  ;;  %10408 = vmatprep.mubr.msk.bf16.mxu1 %vm11135_vm0, %v11134_v1 }
0x2f87   :  { %10418 = vmatprep.subr.bf16.mxu1 %v11134_v1  ;;  %v8004_v59 = vpack.c.bf16 %v7996_v37, %v7996_v37 }
0x2f8d   :  { %10409 = vmatmul.mubr.msk.bf16.vlgmr.msra.gmra.mxu1 %vm925_vm8, %v8004_v59 }
0x2f8e   :  { %10426 = vmatprep.mubr.msk.bf16.mxu1 %vm11135_vm0, %v11134_v1  ;;  %10419 = vmatpush3.bf16.msra.mxu1 %v10801_v48 }
0x2f8f   :  { %10420 = vmatprep.subr.bf16.mxu1 %v11134_v1 }
0x2f92   :  { %10421 = vmatpush3.bf16.msra.mxu1 %v10802_v5  ;;  %v10805_v5 = vld [vmem:[#allocation6 + $0x78] sm:$0xff]  }
0x2f93   :  { %10422 = vmatprep.subr.bf16.mxu1 %v11134_v1  ;;  %10431 = vmatpush3.bf16.msra.mxu0 %v10805_v5  ;;  %v10817_v5 = vld [vmem:[%s13001_s6 + $0x78] sm:$0xff]  }
0x2f94   :  { %10432 = vmatprep.subr.bf16.mxu0 %v11134_v1 }
0x2f96   :  { %10423 = vmatpush3.bf16.msra.mxu1 %v10803_v21  ;;  %v10808_v21 = vld [vmem:[#allocation6 + $0x60] sm:$0xff]  }
0x2f97   :  { %10424 = vmatprep.subr.bf16.mxu1 %v11134_v1 }
0x2f9a   :  { %10425 = vmatpush3.bf16.msra.mxu1 %v10804_v24 }
0x2f9b   :  { %10442 = vmatprep.subr.bf16.mxu1 %v11134_v1 }
0x2fc1   :  { %v8049_v2 = vpop.f32.mrf.mxu1 }
0x2fc2   :  { %v8098_v41 = vpop.f32.mrf.mxu0 }
0x2fc3   :  { %v10374_v25 = vpop.f32.mrf.mxu1 }
0x2fc4   :  { %v10380_v11 = vpop.f32.mrf.mxu0 }
0x2fc5   :  { %v8052_v45 = vpop.f32.mrf.mxu1  ;;  %v12910_v11 = vld [vmem:[#allocation2 + $0x40] sm:$0xff] }
0x2fc6   :  { %v8101_v36 = vpop.f32.mrf.mxu0 }
0x2fc7   :  { %v10375_v35 = vpop.f32.mrf.mxu1 }
0x2fc8   :  { %v10381_v49 = vpop.f32.mrf.mxu0 }
0x3010   :  { %v8147_v44 = vpop.f32.mrf.mxu1 }
0x3012   :  { %v10386_v30 = vpop.f32.mrf.mxu1 }
0x3014   :  { %v8150_v6 = vpop.f32.mrf.mxu1 }
0x3015   :  { %v8196_v23 = vpop.f32.mrf.mxu0 }
0x3016   :  { %v10657_v16 = vpack.i.bf16 %v8196_v23, %v8147_v44  ;;  %v10387_v55 = vpop.f32.mrf.mxu1 }
0x3017   :  { %v10392_v34 = vpop.f32.mrf.mxu0 }
0x3018   :  { %10658 = vrot.lane.b32.xlu1 %v10657_v16, %s11130_s20 }
0x3019   :  { %v8199_v18 = vpop.f32.mrf.mxu0 }
0x301b   :  { %v10393_v53 = vpop.f32.mrf.mxu0 }
0x3021   :  { %v8294_v32 = vpop.f32.mrf.mxu0 }
0x3023   :  { %v10404_v3 = vpop.f32.mrf.mxu0 }
0x3025   :  { %v8297_v4 = vpop.f32.mrf.mxu0 }
0x3027   :  { %v10405_v10 = vpop.f32.mrf.mxu0 }
0x303f   :  { %v8392_v14 = vpop.f32.mrf.mxu0 }
0x3041   :  { %v10416_v28 = vpop.f32.mrf.mxu0 }
0x3042   :  { %v10809_v28 = vld [vmem:[%s13003_s8 + $0xf8] sm:$0xff]  }
0x3043   :  { %v8395_v22 = vpop.f32.mrf.mxu0 }
0x3044   :  { %v10810_v22 = vld [vmem:[%s13003_s8 + $0xf0] sm:$0xff]  }
0x3045   :  { %v8245_v39 = vpop.f32.mrf.mxu1  ;;  %v10417_v46 = vpop.f32.mrf.mxu0 }
0x3046   :  { %v10662_v43 = vpack.i.bf16 %v8294_v32, %v8245_v39  ;;  %v10811_v39 = vld [vmem:[%s13003_s8 + $0xe8] sm:$0xff]   ;;  %v10812_v46 = vld [vmem:[%s13003_s8 + $0xe0] sm:$0xff]  }
0x3047   :  { %v10398_v8 = vpop.f32.mrf.mxu1 }
0x3048   :  { %10663 = vrot.lane.b32.xlu0 %v10662_v43, %s11141_s14  ;;  %v10813_v43 = vld [vmem:[%s13003_s8 + $0xd8] sm:$0xff]  }
0x3049   :  { %v8248_v13 = vpop.f32.mrf.mxu1 }
0x304b   :  { %v10399_v42 = vpop.f32.mrf.mxu1 }
0x304d   :  { %v8343_v50 = vpop.f32.mrf.mxu1 }
0x304e   :  { %v10667_v12 = vpack.i.bf16 %v8392_v14, %v8343_v50  ;;  %v10807_v14 = vld [vmem:[#allocation6 + $0x68] sm:$0xff]  }
0x304f   :  { %v10410_v51 = vpop.f32.mrf.mxu1 }
0x3050   :  { %10668 = vrot.lane.b32.xlu1 %v10667_v12, %s11142_s15 }
0x3051   :  { %v8346_v29 = vpop.f32.mrf.mxu1 }
0x3052   :  { %v8541_v29 = vrot.slane %v12686_v56, %v11574_v58  ;;  %v10814_v58 = vld [vmem:[%s13003_s8 + $0xd0] sm:$0xff]  }
0x3053   :  { %v10411_v0 = vpop.f32.mrf.mxu1 }
0x308a   :  { %v10659_v17 = vpop.permute.xlu1 %10658 }
0x308b   :  { %v10661_v9 = vunpack.i.h.bf16 %v10659_v17  ;;  %v10660_v31 = vunpack.i.l.bf16 %v10659_v17 }
0x308d   :  { %v8423_v20 = vsel %vm517_vm5, %v8098_v41, %v10661_v9  ;;  %v8422_v19 = vsel %vm517_vm5, %v8049_v2, %v10660_v31  ;;  %v8441_v2 = vrot.slane %v12910_v11, %v11504_v62  ;;  %v8547_v31 = vrot.slane %v12686_v56, %v11579_v52  ;;  %v10815_v56 = vld [vmem:[%s13003_s8 + $0xc8] sm:$0xff]  }
0x30ba   :  { %v10664_v7 = vpop.permute.xlu0 %10663 }
0x30bb   :  { %v10666_v33 = vunpack.i.h.bf16 %v10664_v7  ;;  %v10665_v54 = vunpack.i.l.bf16 %v10664_v7 }
0x30bd   :  { %v8425_v27 = vsel %vm111_vm2, %v8423_v20, %v10666_v33  ;;  %v8424_v38 = vsel %vm111_vm2, %v8422_v19, %v10665_v54  ;;  %v10816_v19 = vld [vmem:[%s13003_s8 + $0xc0] sm:$0xff]  }
0x30c2   :  { %v10669_v61 = vpop.permute.xlu1 %10668 }
0x30c3   :  { %v10671_v26 = vunpack.i.h.bf16 %v10669_v61  ;;  %v10670_v47 = vunpack.i.l.bf16 %v10669_v61 }
0x30c5   :  { %v8427_v37 = vsel %vm1427_vm9, %v8425_v27, %v10671_v26  ;;  %v8426_v59 = vsel %vm1427_vm9, %v8424_v38, %v10670_v47  ;;  %v8563_v26 = vrot.slane %v12910_v11, %v11558_v63 }
0x30c6   :  { %v8437_v25 = vpack.c.bf16 %v8427_v37, %v8426_v59 }
0x30c8   :  { %10427 = vmatmul.mubr.msk.bf16.vlgmr.msra.gmra.mxu1 %vm232_vm1, %v8437_v25 }
0x30c9   :  { %10458 = vmatprep.mubr.msk.bf16.mxu1 %vm11135_vm0, %v11134_v1  ;;  %10443 = vmatpush3.bf16.msra.mxu1 %v10809_v28 }
0x30ca   :  { %10444 = vmatprep.subr.bf16.mxu1 %v11134_v1 }
0x30cd   :  { %10445 = vmatpush3.bf16.msra.mxu1 %v10810_v22 }
0x30ce   :  { %10446 = vmatprep.subr.bf16.mxu1 %v11134_v1 }
0x30d1   :  { %10447 = vmatpush3.bf16.msra.mxu1 %v10811_v39 }
0x30d2   :  { %10448 = vmatprep.subr.bf16.mxu1 %v11134_v1 }
0x30d5   :  { %10449 = vmatpush3.bf16.msra.mxu1 %v10812_v46 }
0x30d6   :  { %10450 = vmatprep.subr.bf16.mxu1 %v11134_v1 }
0x30d9   :  { %10451 = vmatpush3.bf16.msra.mxu1 %v10813_v43 }
0x30da   :  { %10452 = vmatprep.subr.bf16.mxu1 %v11134_v1 }
0x30dd   :  { %10453 = vmatpush3.bf16.msra.mxu1 %v10814_v58 }
0x30de   :  { %10454 = vmatprep.subr.bf16.mxu1 %v11134_v1 }
0x30e1   :  { %10455 = vmatpush3.bf16.msra.mxu1 %v10815_v56 }
0x30e2   :  { %10456 = vmatprep.subr.bf16.mxu1 %v11134_v1 }
0x30e5   :  { %10457 = vmatpush3.bf16.msra.mxu1 %v10816_v19 }
0x3188   :  { %v8503_v41 = vpop.f32.mrf.mxu1 }
0x3189   :  { %v8504_v45 = vadd.f32 %v8503_v41, %v8441_v2 }
0x318a   :  { %v10428_v36 = vpop.f32.mrf.mxu1 }
0x318b   :  { %v8510_v35 = vadd.f32 %v8504_v45, %v12694_v40  ;;  %v8655_v36 = vrot.slane %v12910_v11, %v11565_v15 }
0x318c   :  { %v8506_v49 = vpop.f32.mrf.mxu1 }
0x318d   :  { %v8507_v48 = vadd.f32 %v8506_v49, %v8441_v2  ;;  %v8512_v44 = vsel %vm232_vm1, %v8510_v35, 0.0 }
0x318e   :  { %8513 = vadd.xlane.f32.xlu0 %v8512_v44  ;;  %v10429_v30 = vpop.f32.mrf.mxu1 }
0x318f   :  { %v8511_v6 = vadd.f32 %v8507_v48, %v12696_v60  ;;  %v10806_v60 = vld [vmem:[#allocation6 + $0x70] sm:$0xff]  }
0x3190   :  { %10433 = vmatpush3.bf16.msra.mxu0 %v10806_v60  ;;  %v10818_v60 = vld [vmem:[%s13001_s6 + $0x70] sm:$0xff]  }
0x3191   :  { %v8515_v23 = vsel %vm232_vm1, %v8511_v6, 0.0  ;;  %10434 = vmatprep.subr.bf16.mxu0 %v11134_v1 }
0x3192   :  { %8516 = vadd.xlane.f32.xlu1 %v8515_v23 }
0x3194   :  { %10435 = vmatpush3.bf16.msra.mxu0 %v10807_v14  ;;  %v10819_v14 = vld [vmem:[%s13001_s6 + $0x68] sm:$0xff]  }
0x3195   :  { %10436 = vmatprep.subr.bf16.mxu0 %v11134_v1 }
0x3198   :  { %10437 = vmatpush3.bf16.msra.mxu0 %v10808_v21  ;;  %v10820_v21 = vld [vmem:[%s13001_s6 + $0x60] sm:$0xff]  }
0x3199   :  { %10462 = vmatprep.subr.bf16.mxu0 %v11134_v1 }
0x3217   :  { %v8514_v16 = vpop.xlane.xlu0 %8513 }
0x3218   :  { %v8518_v55 = vmul.f32 0.015625, %v8514_v16 }
0x321a   :  { %v8520_v34 = vsub.f32 %v8510_v35, %v8518_v55 }
0x321b   :  { %v8517_v18 = vpop.xlane.xlu1 %8516 }
0x321c   :  { %v8519_v53 = vmul.f32 0.015625, %v8517_v18  ;;  %v8522_v32 = vmul.f32 %v8520_v34, %v8520_v34 }
0x321e   :  { %v8521_v3 = vsub.f32 %v8511_v6, %v8519_v53  ;;  %v8524_v40 = vsel %vm232_vm1, %v8522_v32, 0.0 }
0x321f   :  { %8525 = vadd.xlane.f32.xlu0 %v8524_v40 }
0x3220   :  { %v8523_v4 = vmul.f32 %v8521_v3, %v8521_v3 }
0x3222   :  { %v8527_v10 = vsel %vm232_vm1, %v8523_v4, 0.0 }
0x3223   :  { %8528 = vadd.xlane.f32.xlu0 %v8527_v10 }
0x32a8   :  { %v8526_v24 = vpop.xlane.xlu0 %8525 }
0x32a9   :  { %v8530_v8 = vmul.f32 0.015625, %v8526_v24 }
0x32ab   :  { %v8532_v13 = vadd.f32 1e-05, %v8530_v8 }
0x32ac   :  { %v8529_v42 = vpop.xlane.xlu0 %8528 }
0x32ad   :  { %11045 = vrsqrt.f32 %v8532_v13  ;;  %v8531_v50 = vmul.f32 0.015625, %v8529_v42  ;;  %v11059_v13 = vld [vmem:[#allocation2 + $0x50] sm:$0x3f] }
0x32ae   :  { %v8776_v42 = vrot.slane %v11059_v13, %v11294_v57 }
0x32af   :  { %v8533_v12 = vadd.f32 1e-05, %v8531_v50 }
0x32b1   :  { %11047 = vrsqrt.f32 %v8533_v12 }
0x32ba   :  { %v11046_v51 = vpop.eup %11045 }
0x32bb   :  { %v8536_v0 = vmul.f32 %v11046_v51, %v8520_v34  ;;  %v8782_v51 = vrot.slane %v11059_v13, %v11504_v62 }
0x32bd   :  { %v8542_v7 = vmul.f32 %v8541_v29, %v8536_v0 }
0x32be   :  { %v11048_v17 = vpop.eup %11047 }
0x32bf   :  { %v8537_v9 = vmul.f32 %v11048_v17, %v8521_v3  ;;  %v8548_v54 = vadd.f32 %v8547_v31, %v8542_v7 }
0x32c1   :  { %v8543_v33 = vmul.f32 %v8541_v29, %v8537_v9 }
0x32c3   :  { %v8549_v61 = vadd.f32 %v8547_v31, %v8543_v33  ;;  %v11060_v31 = vld [vmem:[#allocation2] sm:$0xff] }
0x32c4   :  { %v8866_v33 = vrot.slane %v11060_v31, %v11579_v52 }
0x32c5   :  { %v8559_v20 = vpack.c.bf16 %v8549_v61, %v8548_v54 }
0x32c7   :  { %10439 = vmatmul.mubr.msk.bf16.vlgmr.msra.gmra.mxu0 %vm232_vm1, %v8559_v20 }
0x32c8   :  { %10470 = vmatprep.mubr.msk.bf16.mxu0 %vm11135_vm0, %v11134_v1  ;;  %10463 = vmatpush3.bf16.msra.mxu0 %v10817_v5  ;;  %vm8869_vm0 = vcmask 138240  }
0x32c9   :  { %10464 = vmatprep.subr.bf16.mxu0 %v11134_v1 }
0x32cc   :  { %10465 = vmatpush3.bf16.msra.mxu0 %v10818_v60 }
0x32cd   :  { %10466 = vmatprep.subr.bf16.mxu0 %v11134_v1 }
0x32d0   :  { %10467 = vmatpush3.bf16.msra.mxu0 %v10819_v14 }
0x32d1   :  { %10468 = vmatprep.subr.bf16.mxu0 %v11134_v1 }
0x32d4   :  { %10469 = vmatpush3.bf16.msra.mxu0 %v10820_v21 }
0x3387   :  { %v8625_v47 = vpop.f32.mrf.mxu0 }
0x3388   :  { %v8626_v38 = vadd.f32 %v8625_v47, %v8563_v26 }
0x3389   :  { %v10440_v27 = vpop.f32.mrf.mxu0 }
0x338a   :  { %v8632_v2 = vmax.f32 %v8626_v38, 0.0 }
0x338b   :  { %v8628_v37 = vpop.f32.mrf.mxu0 }
0x338c   :  { %v8629_v59 = vadd.f32 %v8628_v37, %v8563_v26 }
0x338d   :  { %v10441_v25 = vpop.f32.mrf.mxu0 }
0x338e   :  { %v8633_v41 = vmax.f32 %v8629_v59, 0.0 }
0x3390   :  { %v8651_v45 = vpack.c.bf16 %v8633_v41, %v8632_v2 }
0x3392   :  { %10459 = vmatmul.mubr.bf16.vlgmr.msra.gmra.mxu1 %v8651_v45 }
0x3452   :  { %v8738_v35 = vpop.f32.mrf.mxu1 }
0x3453   :  { %v8739_v49 = vadd.f32 %v8738_v35, %v8655_v36 }
0x3454   :  { %v10460_v48 = vpop.f32.mrf.mxu1 }
0x3455   :  { %v8745_v44 = vadd.f32 %v8739_v49, %v8548_v54 }
0x3456   :  { %v8741_v30 = vpop.f32.mrf.mxu1 }
0x3457   :  { %v8742_v6 = vadd.f32 %v8741_v30, %v8655_v36  ;;  %v8747_v63 = vsel %vm232_vm1, %v8745_v44, 0.0 }
0x3458   :  { %8748 = vadd.xlane.f32.xlu1 %v8747_v63  ;;  %v10461_v23 = vpop.f32.mrf.mxu1 }
0x3459   :  { %v8746_v16 = vadd.f32 %v8742_v6, %v8549_v61 }
0x345b   :  { %v8750_v55 = vsel %vm232_vm1, %v8746_v16, 0.0 }
0x345c   :  { %8751 = vadd.xlane.f32.xlu0 %v8750_v55 }
0x34e1   :  { %v8749_v34 = vpop.xlane.xlu1 %8748 }
0x34e2   :  { %v8753_v18 = vmul.f32 0.015625, %v8749_v34 }
0x34e4   :  { %v8755_v53 = vsub.f32 %v8745_v44, %v8753_v18 }
0x34e5   :  { %v8752_v32 = vpop.xlane.xlu0 %8751 }
0x34e6   :  { %v8754_v3 = vmul.f32 0.015625, %v8752_v32  ;;  %v8757_v15 = vmul.f32 %v8755_v53, %v8755_v53 }
0x34e8   :  { %v8756_v11 = vsub.f32 %v8746_v16, %v8754_v3  ;;  %v8759_v40 = vsel %vm232_vm1, %v8757_v15, 0.0 }
0x34e9   :  { %8760 = vadd.xlane.f32.xlu1 %v8759_v40 }
0x34ea   :  { %v8758_v4 = vmul.f32 %v8756_v11, %v8756_v11 }
0x34ec   :  { %v8762_v10 = vsel %vm232_vm1, %v8758_v4, 0.0 }
0x34ed   :  { %8763 = vadd.xlane.f32.xlu0 %v8762_v10 }
0x3572   :  { %v8761_v28 = vpop.xlane.xlu1 %8760 }
0x3573   :  { %v8765_v22 = vmul.f32 0.015625, %v8761_v28 }
0x3575   :  { %v8767_v39 = vadd.f32 1e-05, %v8765_v22 }
0x3576   :  { %v8764_v46 = vpop.xlane.xlu0 %8763 }
0x3577   :  { %11049 = vrsqrt.f32 %v8767_v39  ;;  %v8766_v43 = vmul.f32 0.015625, %v8764_v46 }
0x3579   :  { %v8768_v24 = vadd.f32 1e-05, %v8766_v43 }
0x357b   :  { %11051 = vrsqrt.f32 %v8768_v24 }
0x3584   :  { %v11050_v8 = vpop.eup %11049 }
0x3585   :  { %v8771_v50 = vmul.f32 %v11050_v8, %v8755_v53 }
0x3587   :  { %v8777_v29 = vmul.f32 %v8776_v42, %v8771_v50 }
0x3588   :  { %v11052_v12 = vpop.eup %11051 }
0x3589   :  { %v8772_v0 = vmul.f32 %v11052_v12, %v8756_v11  ;;  %v8783_v17 = vadd.f32 %v8782_v51, %v8777_v29 }
0x358b   :  { %v8778_v1 = vmul.f32 %v8776_v42, %v8772_v0 }
0x358d   :  { %v8784_v7 = vadd.f32 %v8782_v51, %v8778_v1 }
0x358f   :  { %v8785_v9 = vpack.c.bf16 %v8784_v7, %v8783_v17 }
0x3591   :  { %10471 = vmatmul.mubr.msk.bf16.vlgmr.msra.gmra.mxu0 %vm232_vm1, %v8785_v9 }
0x3651   :  { %v8856_v54 = vpop.f32.mrf.mxu0 }
0x3652   :  { %v8867_v61 = vadd.f32 %v8866_v33, %v8856_v54 }
0x3653   :  { %v10472_v20 = vpop.f32.mrf.mxu0 }
0x3654   :  { %8870 = vst.msk [vmem:[%s13004_s9] sm:$0xff] %vm8869_vm0, %v8867_v61 }
0x3655   :  { %v8859_v57 = vpop.f32.mrf.mxu0 }
0x3656   :  { %v8868_v62 = vadd.f32 %v8866_v33, %v8859_v57 }
0x3657   :  { %v10473_v58 = vpop.f32.mrf.mxu0 }
0x3658   :  { %8871 = vst.msk [vmem:[%s13004_s9 + $0x8] sm:$0xff] %vm8869_vm0, %v8868_v62 }
0x3659   :  { %8876 = vsyncpa [#allocation3], 1 }
0x365a   :  { %8877 = vsyncpa [#allocation5], 1 }

</bundles_post_ra>
